<compile_context>
chip_gen: v6e
topology: v6e:2x2x1
jax: 0.10.0
libtpu: 0.0.40
codegen_flags: <defaults>
</compile_context>

<pallas_src>
import functools
import math

import jax
import jax.numpy as jnp
from jax.experimental import pallas as pl
from jax.experimental.pallas import tpu as pltpu


# ---------------------------------------------------------------------------
# Fused transformer-block kernel (one grid step = one (batch, q-row-tile))
# ---------------------------------------------------------------------------
def _transformer_block_kernel(
    q_ref, kT_ref, v_ref,
    wq_ref, wk_ref, bk_ref, wv_ref, bv_ref, wo_ref,
    kmask_ref, vmask_ref, misc_ref, w1_ref, b1_ref, w2_ref,
    o_ref,
    kbd_scr, vwo_scr,
    *, heads, head_dim, q_dim, v_dim, tq, v_len, eps):
  f32 = jnp.float32
  E = heads * head_dim
  lk = v_len * v_dim            # flattened key/value "token" count per head
  hlk = heads * lk
  d_out = q_dim * E

  # -------------------------------------------------------------------
  # Per-batch stage (t == 0 only): K/V projections emitted directly in the
  # head-block-diagonal layouts consumed by the attention matmuls, plus the
  # V_bd @ Wo_x fold.  Cached in VMEM scratch across all query tiles.
  # -------------------------------------------------------------------
  @pl.when(pl.program_id(1) == 0)
  def _precompute_kv():
    kT_in = kT_ref[...]                       # (Dv, vLen)  key, pre-transposed
    v_in = v_ref[...]                         # (vLen, Dv)
    kt_blocks, vt_blocks = [], []
    for y in range(v_dim):
      # K^T block for value-dim y: rows (h, d), cols k.    (E, vLen)
      kt_blocks.append(
          jnp.dot(wk_ref[y], kT_in, preferred_element_type=f32)
          + bk_ref[:, y:y + 1])
      # V block for value-dim y: rows k, cols (h, d).      (vLen, E)
      vt_blocks.append(
          jnp.dot(v_in, wv_ref[y], preferred_element_type=f32)
          + bv_ref[y:y + 1, :])
    kt_full = jnp.concatenate(kt_blocks, axis=1)           # (E, lk)
    vt_full = jnp.concatenate(vt_blocks, axis=0)           # (lk, E)

    # Head-block-diagonal K^T: (E, H*lk).  A single (tq,E)@(E,H*lk) matmul
    # then yields all heads' scores at once (off-head blocks are zero).
    kbd_scr[...] = jnp.concatenate([kt_full] * heads, axis=1) * kmask_ref[...]

    # Head-block-diagonal V folded with the per-query-dim output projection:
    # vwo[x] = V_bd @ Wo_x, so attention-output + out-projection become one
    # full-depth (tq,H*lk)@(H*lk,d_out) matmul per query dim.
    vbd = jnp.concatenate([vt_full] * heads, axis=0) * vmask_ref[...]
    for x in range(q_dim):
      vwo_scr[x] = jnp.dot(vbd, wo_ref[x], preferred_element_type=f32)

  # -------------------------------------------------------------------
  # Per-tile stage
  # -------------------------------------------------------------------
  q_in = q_ref[...]                                        # (tq, d_out) resid.
  # Q projection, one full-width matmul; 1/sqrt(E) folded into weights/bias.
  q_proj = (jnp.dot(q_in, wq_ref[...], preferred_element_type=f32)
            + misc_ref[0:1, :])

  kbd = kbd_scr[...]
  acc = jnp.zeros((tq, d_out), f32)
  for x in range(q_dim):                                   # short static loop
    q_x = q_proj[:, x * E:(x + 1) * E]                     # (tq, E)
    s = jnp.dot(q_x, kbd, preferred_element_type=f32)      # (tq, H*lk)
    p_segs = []
    for h in range(heads):                                 # per-head softmax
      seg = s[:, h * lk:(h + 1) * lk]
      m = jnp.max(seg, axis=-1, keepdims=True)
      e = jnp.exp(seg - m)
      p_segs.append(e * (1.0 / jnp.sum(e, axis=-1, keepdims=True)))
    p = jnp.concatenate(p_segs, axis=-1)                   # (tq, H*lk)
    acc = acc + jnp.dot(p, vwo_scr[x], preferred_element_type=f32)
  attn = acc + misc_ref[1:2, :]                            # + bo

  g1, be1 = misc_ref[2:3, :], misc_ref[3:4, :]
  g2, be2 = misc_ref[4:5, :], misc_ref[5:6, :]
  b2 = misc_ref[6:7, :]

  def seg_layernorm(y, g, b):
    # layerNorm2D: independent LayerNorm(E) per query-dim segment (VPU/XLU).
    segs = []
    for x in range(q_dim):
      seg = y[:, x * E:(x + 1) * E]
      mu = jnp.mean(seg, axis=-1, keepdims=True)
      d = seg - mu
      var = jnp.mean(d * d, axis=-1, keepdims=True)
      segs.append(d * jax.lax.rsqrt(var + eps))
    return jnp.concatenate(segs, axis=-1) * g + b

  x1 = seg_layernorm(attn + q_in, g1, be1)

  # feedForward: Linear -> LeakyReLU(0.05) -> Linear
  h1 = jnp.dot(x1, w1_ref[...], preferred_element_type=f32) + b1_ref[...]
  h1 = jnp.where(h1 >= 0, h1, 0.05 * h1)
  f2 = jnp.dot(h1, w2_ref[...], preferred_element_type=f32) + b2

  # residual + norm2 (dropout == identity in eval mode)
  o_ref[...] = seg_layernorm(f2 + x1, g2, be2).astype(o_ref.dtype)


# ---------------------------------------------------------------------------
# Wrapper: one-time weight preprocessing + a single fused pallas_call
# ---------------------------------------------------------------------------
def transformer_block_forward(params, query, key, value, cfg):
  N, qLen, qDim, E = query.shape
  _, vLen, vDim, _ = value.shape
  H, Dh = cfg["heads"], cfg["headDim"]
  assert H * Dh == E
  Dq, Dv = qDim * E, vDim * E
  F = params["w1"].shape[0]
  lk = vLen * vDim
  hlk = H * lk
  scale = 1.0 / math.sqrt(E)
  f32 = jnp.float32

  # ---- one-time weight preprocessing (plain XLA, outside the kernel) ------
  wq_t = (params["wq"] * scale).T.astype(f32)                   # (Dq, Dq)
  wk3 = params["wk"].reshape(vDim, E, Dv).astype(f32)           # [y]->(E, Dv)
  bk2 = params["bk"].reshape(vDim, E).T.astype(f32)             # (E, vDim)
  wv3 = jnp.transpose(params["wv"].reshape(vDim, E, Dv),
                      (0, 2, 1)).astype(f32)                    # [y]->(Dv, E)
  bv2 = params["bv"].reshape(vDim, E).astype(f32)               # (vDim, E)
  wo3 = params["wo"].T.reshape(qDim, E, Dq).astype(f32)         # [x]->(E, Dq)
  w1_t = params["w1"].T.astype(f32)                             # (Dq, F)
  b1 = params["b1"].reshape(1, F).astype(f32)
  w2_t = params["w2"].T.astype(f32)                             # (F, Dq)
  # tiny biases / gains packed into one lane-dense slab
  misc = jnp.stack([params["bq"].reshape(-1) * scale,
                    params["bo"].reshape(-1),
                    params["g1"].reshape(-1),
                    params["be1"].reshape(-1),
                    params["g2"].reshape(-1),
                    params["be2"].reshape(-1),
                    params["b2"].reshape(-1)], axis=0).astype(f32)   # (7, Dq)
  # head-block-diagonal masks (constants)
  head_row = jnp.arange(E) // Dh
  head_col = jnp.arange(hlk) // lk
  kmask = (head_row[:, None] == head_col[None, :]).astype(f32)  # (E, hlk)
  vmask = kmask.T                                               # (hlk, E)

  # ---- activations: lane-dense slabs; key pre-transposed for K^T blocks ---
  q2 = query.reshape(N, qLen, Dq).astype(f32)
  kT = jnp.transpose(key.reshape(N, vLen, Dv), (0, 2, 1)).astype(f32)
  v2 = value.reshape(N, vLen, Dv).astype(f32)

  # ---- query tiling with padded tail (no qLen % TQ restriction) -----------
  if qLen <= 256:
    TQ = ((qLen + 7) // 8) * 8
  else:
    TQ = 128          # keep per-tile VMEM modest (v7x: 64 MiB per TC)
  qLen_pad = ((qLen + TQ - 1) // TQ) * TQ
  if qLen_pad != qLen:
    q2 = jnp.pad(q2, ((0, 0), (0, qLen_pad - qLen), (0, 0)))
  grid = (N, qLen_pad // TQ)

  kernel = functools.partial(
      _transformer_block_kernel, heads=H, head_dim=Dh, q_dim=qDim,
      v_dim=vDim, tq=TQ, v_len=vLen, eps=1e-5)

  operands = (q2, kT, v2, wq_t, wk3, bk2, wv3, bv2, wo3,
              kmask, vmask, misc, w1_t, b1, w2_t)

  def run(single_buffer_weights):
    def const_spec(a):
      kw = {}
      if single_buffer_weights:
        # grid-invariant inputs: no need for double buffering (halves VMEM)
        kw["pipeline_mode"] = pl.Buffered(1)
      return pl.BlockSpec(a.shape, lambda n, t, _nd=a.ndim: (0,) * _nd, **kw)

    in_specs = [
        pl.BlockSpec((pl.Squeezed(), TQ, Dq), lambda n, t: (n, t, 0)),
        pl.BlockSpec((pl.Squeezed(), Dv, vLen), lambda n, t: (n, 0, 0)),
        pl.BlockSpec((pl.Squeezed(), vLen, Dv), lambda n, t: (n, 0, 0)),
    ] + [const_spec(a) for a in operands[3:]]

    return pl.pallas_call(
        kernel,
        out_shape=jax.ShapeDtypeStruct((N, qLen_pad, Dq), jnp.float32),
        grid=grid,
        in_specs=in_specs,
        out_specs=pl.BlockSpec((pl.Squeezed(), TQ, Dq), lambda n, t: (n, t, 0)),
        scratch_shapes=[
            pltpu.VMEM((E, hlk), jnp.float32),          # block-diag K^T
            pltpu.VMEM((qDim, hlk, Dq), jnp.float32),   # block-diag V @ Wo_x
        ],
        compiler_params=pltpu.CompilerParams(
            dimension_semantics=("parallel", "arbitrary"),
            vmem_limit_bytes=48 * 1024 * 1024),
    )(*operands)

  try:
    out = run(True)
  except Exception:     # pl.Buffered(1) unsupported -> default double buffering
    out = run(False)

  return out[:, :qLen, :].reshape(N, qLen, qDim, E)


# ---------------------------------------------------------------------------
# Pure-JAX reference (mirrors the PyTorch forward exactly) for validation
# ---------------------------------------------------------------------------
def reference_forward(params, query, key, value, cfg):
  N, qLen, qDim, E = query.shape
  _, vLen, vDim, _ = value.shape
  H, Dh = cfg["heads"], cfg["headDim"]

  def lin(x, w, b):
    return x @ w.T + b[0]

  v = lin(value.reshape(N, vLen, vDim * E), params["wv"], params["bv"])
  k = lin(key.reshape(N, vLen, vDim * E), params["wk"], params["bk"])
  q = lin(query.reshape(N, qLen, qDim * E), params["wq"], params["bq"])
  v = v.reshape(N, vLen, vDim, H, Dh)
  k = k.reshape(N, vLen, vDim, H, Dh)
  q = q.reshape(N, qLen, qDim, H, Dh)
  energy = jnp.einsum("nqxhd,nkyhd->nhqxky", q, k)
  energy = energy.reshape(N, H, qLen, qDim, -1)
  att = jax.nn.softmax(energy / math.sqrt(E), axis=4)
  att = att.reshape(N, H, qLen, qDim, vLen, vDim)
  out = jnp.einsum("nhqxvy,nvyhd->nqxhd", att, v).reshape(N, qLen, qDim * H * Dh)
  out = lin(out, params["wo"], params["bo"]).reshape(N, qLen, qDim, E)

  def ln(x, g, b):
    mean = x.mean(-1, keepdims=True)
    var = ((x - mean) ** 2).mean(-1, keepdims=True)
    return (x - mean) / jnp.sqrt(var + 1e-5) * g + b

  x = ln(out + query, params["g1"], params["be1"])
  h = lin(x.reshape(N, qLen, -1), params["w1"], params["b1"])
  h = jnp.where(h >= 0, h, 0.05 * h)
  f = lin(h, params["w2"], params["b2"]).reshape(N, qLen, qDim, E)
  return ln(f + x, params["g2"], params["be2"])


# ---------------------------------------------------------------------------
# Deterministic parameter init + driver
# ---------------------------------------------------------------------------
def init_params(key, qDim, vDim, E, fwd_exp):
  D_q = qDim * E
  D_v = vDim * E
  D_h = fwd_exp * qDim * E
  ks = jax.random.split(key, 12)

  def w(k, shape):
    return jax.random.normal(k, shape, jnp.float32) * 0.05

  return {
      "wq": w(ks[0], (D_q, D_q)), "bq": w(ks[1], (1, D_q)),
      "wk": w(ks[2], (D_v, D_v)), "bk": w(ks[3], (1, D_v)),
      "wv": w(ks[4], (D_v, D_v)), "bv": w(ks[5], (1, D_v)),
      "wo": w(ks[6], (D_q, D_q)), "bo": w(ks[7], (1, D_q)),
      "w1": w(ks[8], (D_h, D_q)), "b1": w(ks[9], (1, D_h)),
      "w2": w(ks[10], (D_q, D_h)), "b2": w(ks[11], (1, D_q)),
      # layerNorm2D params: one (embedSize,) LayerNorm per queryDim index
      "g1": jnp.ones((qDim, E), jnp.float32),
      "be1": jnp.zeros((qDim, E), jnp.float32),
      "g2": jnp.ones((qDim, E), jnp.float32),
      "be2": jnp.zeros((qDim, E), jnp.float32),
  }


if __name__ == "__main__":
  cfg = {"embedSize": 32, "heads": 4, "headDim": 8, "forwardExpansion": 2}
  N, qLen, vLen, qDim, vDim = 2, 8, 8, 4, 4
  E = cfg["embedSize"]

  root = jax.random.PRNGKey(0)
  k_p, k_q, k_k, k_v = jax.random.split(root, 4)
  params = init_params(k_p, qDim, vDim, E, cfg["forwardExpansion"])

  query = jax.random.normal(k_q, (N, qLen, qDim, E), jnp.float32)
  key = jax.random.normal(k_k, (N, vLen, vDim, E), jnp.float32)
  value = jax.random.normal(k_v, (N, vLen, vDim, E), jnp.float32)

  out = transformer_block_forward(params, query, key, value, cfg)
  out = jax.block_until_ready(out)

  ref = reference_forward(params, query, key, value, cfg)
  assert out.shape == (N, qLen, qDim, E)
  assert jnp.allclose(out, ref, atol=2e-3, rtol=2e-3), float(
      jnp.max(jnp.abs(out - ref)))

  print("KERNEL_OK")
</pallas_src>

<mosaic_0001>
module attributes {stable_mosaic.version = 11 : i64} {
  func.func @_transformer_block_kernel(%arg0: i32, %arg1: i32, %arg2: memref<1x8x128xf32, #tpu.memory_space<vmem>>, %arg3: memref<1x128x8xf32, #tpu.memory_space<vmem>>, %arg4: memref<1x8x128xf32, #tpu.memory_space<vmem>>, %arg5: memref<128x128xf32, #tpu.memory_space<vmem>>, %arg6: memref<4x32x128xf32, #tpu.memory_space<vmem>>, %arg7: memref<32x4xf32, #tpu.memory_space<vmem>>, %arg8: memref<4x128x32xf32, #tpu.memory_space<vmem>>, %arg9: memref<4x32xf32, #tpu.memory_space<vmem>>, %arg10: memref<4x32x128xf32, #tpu.memory_space<vmem>>, %arg11: memref<32x128xf32, #tpu.memory_space<vmem>>, %arg12: memref<128x32xf32, #tpu.memory_space<vmem>>, %arg13: memref<7x128xf32, #tpu.memory_space<vmem>>, %arg14: memref<128x256xf32, #tpu.memory_space<vmem>>, %arg15: memref<1x256xf32, #tpu.memory_space<vmem>>, %arg16: memref<256x128xf32, #tpu.memory_space<vmem>>, %arg17: memref<1x8x128xf32, #tpu.memory_space<vmem>>, %arg18: memref<32x128xf32, #tpu.memory_space<vmem>>, %arg19: memref<4x128x128xf32, #tpu.memory_space<vmem>>) attributes {dimension_semantics = [#tpu.dimension_semantics<parallel>, #tpu.dimension_semantics<arbitrary>], iteration_bounds = array<i64: 2, 1>, scalar_prefetch = 0 : i64, scratch_operands = 2 : i64, tpu.core_type = #tpu.core_type<tc>, window_params = [{transform_indices = @transform_0, window_bounds = array<i64: 1, 8, 128>}, {transform_indices = @transform_1, window_bounds = array<i64: 1, 128, 8>}, {transform_indices = @transform_2, window_bounds = array<i64: 1, 8, 128>}, {pipeline_mode = #tpu.pipeline_mode<synchronous>, transform_indices = @transform_3, window_bounds = array<i64: 128, 128>}, {pipeline_mode = #tpu.pipeline_mode<synchronous>, transform_indices = @transform_4, window_bounds = array<i64: 4, 32, 128>}, {pipeline_mode = #tpu.pipeline_mode<synchronous>, transform_indices = @transform_5, window_bounds = array<i64: 32, 4>}, {pipeline_mode = #tpu.pipeline_mode<synchronous>, transform_indices = @transform_6, window_bounds = array<i64: 4, 128, 32>}, {pipeline_mode = #tpu.pipeline_mode<synchronous>, transform_indices = @transform_7, window_bounds = array<i64: 4, 32>}, {pipeline_mode = #tpu.pipeline_mode<synchronous>, transform_indices = @transform_8, window_bounds = array<i64: 4, 32, 128>}, {pipeline_mode = #tpu.pipeline_mode<synchronous>, transform_indices = @transform_9, window_bounds = array<i64: 32, 128>}, {pipeline_mode = #tpu.pipeline_mode<synchronous>, transform_indices = @transform_10, window_bounds = array<i64: 128, 32>}, {pipeline_mode = #tpu.pipeline_mode<synchronous>, transform_indices = @transform_11, window_bounds = array<i64: 7, 128>}, {pipeline_mode = #tpu.pipeline_mode<synchronous>, transform_indices = @transform_12, window_bounds = array<i64: 128, 256>}, {pipeline_mode = #tpu.pipeline_mode<synchronous>, transform_indices = @transform_13, window_bounds = array<i64: 1, 256>}, {pipeline_mode = #tpu.pipeline_mode<synchronous>, transform_indices = @transform_14, window_bounds = array<i64: 256, 128>}, {transform_indices = @transform_15, window_bounds = array<i64: 1, 8, 128>}]} {
    %c0_i32 = arith.constant 0 : i32
    %0 = arith.cmpi eq, %arg1, %c0_i32 : i32
    %1 = arith.extui %0 : i1 to i32
    %c0_i32_0 = arith.constant 0 : i32
    %2 = arith.cmpi ne, %1, %c0_i32_0 : i32
    scf.if %2 {
      %c0_137 = arith.constant 0 : index
      %c0_138 = arith.constant 0 : index
      %c0_139 = arith.constant 0 : index
      %405 = vector.load %arg3[%c0_137, %c0_138, %c0_139] : memref<1x128x8xf32, #tpu.memory_space<vmem>>, vector<1x128x8xf32>
      %406 = vector.shape_cast %405 : vector<1x128x8xf32> to vector<128x8xf32>
      %c0_140 = arith.constant 0 : index
      %c0_141 = arith.constant 0 : index
      %c0_142 = arith.constant 0 : index
      %407 = vector.load %arg4[%c0_140, %c0_141, %c0_142] : memref<1x8x128xf32, #tpu.memory_space<vmem>>, vector<1x8x128xf32>
      %408 = vector.shape_cast %407 : vector<1x8x128xf32> to vector<8x128xf32>
      %c0_143 = arith.constant 0 : index
      %c0_144 = arith.constant 0 : index
      %c0_145 = arith.constant 0 : index
      %409 = vector.load %arg6[%c0_143, %c0_144, %c0_145] : memref<4x32x128xf32, #tpu.memory_space<vmem>>, vector<1x32x128xf32>
      %410 = vector.shape_cast %409 : vector<1x32x128xf32> to vector<32x128xf32>
      %cst_146 = arith.constant dense<0.000000e+00> : vector<32x8xf32>
      %411 = tpu.matmul %410, %406, %cst_146 {dimension_numbers = #tpu.dot_dimension_numbers<[1], [0], [0], [1], [0, 0, 1, 1], [], []>} : vector<32x128xf32>, vector<128x8xf32>, vector<32x8xf32> -> vector<32x8xf32>
      %c0_147 = arith.constant 0 : index
      %c0_148 = arith.constant 0 : index
      %412 = vector.load %arg7[%c0_147, %c0_148] : memref<32x4xf32, #tpu.memory_space<vmem>>, vector<32x1xf32>
      %413 = vector.broadcast %412 : vector<32x1xf32> to vector<32x8xf32>
      %414 = arith.addf %411, %413 : vector<32x8xf32>
      %c0_149 = arith.constant 0 : index
      %c0_150 = arith.constant 0 : index
      %c0_151 = arith.constant 0 : index
      %415 = vector.load %arg8[%c0_149, %c0_150, %c0_151] : memref<4x128x32xf32, #tpu.memory_space<vmem>>, vector<1x128x32xf32>
      %416 = vector.shape_cast %415 : vector<1x128x32xf32> to vector<128x32xf32>
      %cst_152 = arith.constant dense<0.000000e+00> : vector<8x32xf32>
      %417 = tpu.matmul %408, %416, %cst_152 {dimension_numbers = #tpu.dot_dimension_numbers<[1], [0], [0], [1], [0, 0, 1, 1], [], []>} : vector<8x128xf32>, vector<128x32xf32>, vector<8x32xf32> -> vector<8x32xf32>
      %c0_153 = arith.constant 0 : index
      %c0_154 = arith.constant 0 : index
      %418 = vector.load %arg9[%c0_153, %c0_154] : memref<4x32xf32, #tpu.memory_space<vmem>>, vector<1x32xf32>
      %419 = vector.broadcast %418 : vector<1x32xf32> to vector<8x32xf32>
      %420 = arith.addf %417, %419 : vector<8x32xf32>
      %c1_155 = arith.constant 1 : index
      %c0_156 = arith.constant 0 : index
      %c0_157 = arith.constant 0 : index
      %421 = vector.load %arg6[%c1_155, %c0_156, %c0_157] : memref<4x32x128xf32, #tpu.memory_space<vmem>>, vector<1x32x128xf32>
      %422 = vector.shape_cast %421 : vector<1x32x128xf32> to vector<32x128xf32>
      %cst_158 = arith.constant dense<0.000000e+00> : vector<32x8xf32>
      %423 = tpu.matmul %422, %406, %cst_158 {dimension_numbers = #tpu.dot_dimension_numbers<[1], [0], [0], [1], [0, 0, 1, 1], [], []>} : vector<32x128xf32>, vector<128x8xf32>, vector<32x8xf32> -> vector<32x8xf32>
      %c0_159 = arith.constant 0 : index
      %c1_160 = arith.constant 1 : index
      %424 = vector.load %arg7[%c0_159, %c1_160] : memref<32x4xf32, #tpu.memory_space<vmem>>, vector<32x1xf32>
      %425 = vector.broadcast %424 : vector<32x1xf32> to vector<32x8xf32>
      %426 = arith.addf %423, %425 : vector<32x8xf32>
      %c1_161 = arith.constant 1 : index
      %c0_162 = arith.constant 0 : index
      %c0_163 = arith.constant 0 : index
      %427 = vector.load %arg8[%c1_161, %c0_162, %c0_163] : memref<4x128x32xf32, #tpu.memory_space<vmem>>, vector<1x128x32xf32>
      %428 = vector.shape_cast %427 : vector<1x128x32xf32> to vector<128x32xf32>
      %cst_164 = arith.constant dense<0.000000e+00> : vector<8x32xf32>
      %429 = tpu.matmul %408, %428, %cst_164 {dimension_numbers = #tpu.dot_dimension_numbers<[1], [0], [0], [1], [0, 0, 1, 1], [], []>} : vector<8x128xf32>, vector<128x32xf32>, vector<8x32xf32> -> vector<8x32xf32>
      %c1_165 = arith.constant 1 : index
      %c0_166 = arith.constant 0 : index
      %430 = vector.load %arg9[%c1_165, %c0_166] : memref<4x32xf32, #tpu.memory_space<vmem>>, vector<1x32xf32>
      %431 = vector.broadcast %430 : vector<1x32xf32> to vector<8x32xf32>
      %432 = arith.addf %429, %431 : vector<8x32xf32>
      %c2_167 = arith.constant 2 : index
      %c0_168 = arith.constant 0 : index
      %c0_169 = arith.constant 0 : index
      %433 = vector.load %arg6[%c2_167, %c0_168, %c0_169] : memref<4x32x128xf32, #tpu.memory_space<vmem>>, vector<1x32x128xf32>
      %434 = vector.shape_cast %433 : vector<1x32x128xf32> to vector<32x128xf32>
      %cst_170 = arith.constant dense<0.000000e+00> : vector<32x8xf32>
      %435 = tpu.matmul %434, %406, %cst_170 {dimension_numbers = #tpu.dot_dimension_numbers<[1], [0], [0], [1], [0, 0, 1, 1], [], []>} : vector<32x128xf32>, vector<128x8xf32>, vector<32x8xf32> -> vector<32x8xf32>
      %c0_171 = arith.constant 0 : index
      %c2_172 = arith.constant 2 : index
      %436 = vector.load %arg7[%c0_171, %c2_172] : memref<32x4xf32, #tpu.memory_space<vmem>>, vector<32x1xf32>
      %437 = vector.broadcast %436 : vector<32x1xf32> to vector<32x8xf32>
      %438 = arith.addf %435, %437 : vector<32x8xf32>
      %c2_173 = arith.constant 2 : index
      %c0_174 = arith.constant 0 : index
      %c0_175 = arith.constant 0 : index
      %439 = vector.load %arg8[%c2_173, %c0_174, %c0_175] : memref<4x128x32xf32, #tpu.memory_space<vmem>>, vector<1x128x32xf32>
      %440 = vector.shape_cast %439 : vector<1x128x32xf32> to vector<128x32xf32>
      %cst_176 = arith.constant dense<0.000000e+00> : vector<8x32xf32>
      %441 = tpu.matmul %408, %440, %cst_176 {dimension_numbers = #tpu.dot_dimension_numbers<[1], [0], [0], [1], [0, 0, 1, 1], [], []>} : vector<8x128xf32>, vector<128x32xf32>, vector<8x32xf32> -> vector<8x32xf32>
      %c2_177 = arith.constant 2 : index
      %c0_178 = arith.constant 0 : index
      %442 = vector.load %arg9[%c2_177, %c0_178] : memref<4x32xf32, #tpu.memory_space<vmem>>, vector<1x32xf32>
      %443 = vector.broadcast %442 : vector<1x32xf32> to vector<8x32xf32>
      %444 = arith.addf %441, %443 : vector<8x32xf32>
      %c3_179 = arith.constant 3 : index
      %c0_180 = arith.constant 0 : index
      %c0_181 = arith.constant 0 : index
      %445 = vector.load %arg6[%c3_179, %c0_180, %c0_181] : memref<4x32x128xf32, #tpu.memory_space<vmem>>, vector<1x32x128xf32>
      %446 = vector.shape_cast %445 : vector<1x32x128xf32> to vector<32x128xf32>
      %cst_182 = arith.constant dense<0.000000e+00> : vector<32x8xf32>
      %447 = tpu.matmul %446, %406, %cst_182 {dimension_numbers = #tpu.dot_dimension_numbers<[1], [0], [0], [1], [0, 0, 1, 1], [], []>} : vector<32x128xf32>, vector<128x8xf32>, vector<32x8xf32> -> vector<32x8xf32>
      %c0_183 = arith.constant 0 : index
      %c3_184 = arith.constant 3 : index
      %448 = vector.load %arg7[%c0_183, %c3_184] : memref<32x4xf32, #tpu.memory_space<vmem>>, vector<32x1xf32>
      %449 = vector.broadcast %448 : vector<32x1xf32> to vector<32x8xf32>
      %450 = arith.addf %447, %449 : vector<32x8xf32>
      %c3_185 = arith.constant 3 : index
      %c0_186 = arith.constant 0 : index
      %c0_187 = arith.constant 0 : index
      %451 = vector.load %arg8[%c3_185, %c0_186, %c0_187] : memref<4x128x32xf32, #tpu.memory_space<vmem>>, vector<1x128x32xf32>
      %452 = vector.shape_cast %451 : vector<1x128x32xf32> to vector<128x32xf32>
      %cst_188 = arith.constant dense<0.000000e+00> : vector<8x32xf32>
      %453 = tpu.matmul %408, %452, %cst_188 {dimension_numbers = #tpu.dot_dimension_numbers<[1], [0], [0], [1], [0, 0, 1, 1], [], []>} : vector<8x128xf32>, vector<128x32xf32>, vector<8x32xf32> -> vector<8x32xf32>
      %c3_189 = arith.constant 3 : index
      %c0_190 = arith.constant 0 : index
      %454 = vector.load %arg9[%c3_189, %c0_190] : memref<4x32xf32, #tpu.memory_space<vmem>>, vector<1x32xf32>
      %455 = vector.broadcast %454 : vector<1x32xf32> to vector<8x32xf32>
      %456 = arith.addf %453, %455 : vector<8x32xf32>
      %457 = tpu.concatenate %414, %426, %438, %450 in 1 : vector<32x8xf32>, vector<32x8xf32>, vector<32x8xf32>, vector<32x8xf32> -> vector<32x32xf32>
      %458 = tpu.concatenate %420, %432, %444, %456 in 0 : vector<8x32xf32>, vector<8x32xf32>, vector<8x32xf32>, vector<8x32xf32> -> vector<32x32xf32>
      %459 = tpu.concatenate %457, %457, %457, %457 in 1 : vector<32x32xf32>, vector<32x32xf32>, vector<32x32xf32>, vector<32x32xf32> -> vector<32x128xf32>
      %c0_191 = arith.constant 0 : index
      %c0_192 = arith.constant 0 : index
      %460 = vector.load %arg11[%c0_191, %c0_192] : memref<32x128xf32, #tpu.memory_space<vmem>>, vector<32x128xf32>
      %461 = arith.mulf %459, %460 : vector<32x128xf32>
      %c0_193 = arith.constant 0 : index
      %c0_194 = arith.constant 0 : index
      %462 = vector.load %arg18[%c0_193, %c0_194] : memref<32x128xf32, #tpu.memory_space<vmem>>, vector<32x128xf32>
      tpu.vector_store %arg18[%c0_193, %c0_194], %461 {strides = array<i32>} : memref<32x128xf32, #tpu.memory_space<vmem>>, vector<32x128xf32>,
      %463 = tpu.concatenate %458, %458, %458, %458 in 0 : vector<32x32xf32>, vector<32x32xf32>, vector<32x32xf32>, vector<32x32xf32> -> vector<128x32xf32>
      %c0_195 = arith.constant 0 : index
      %c0_196 = arith.constant 0 : index
      %464 = vector.load %arg12[%c0_195, %c0_196] : memref<128x32xf32, #tpu.memory_space<vmem>>, vector<128x32xf32>
      %465 = arith.mulf %463, %464 : vector<128x32xf32>
      %c0_197 = arith.constant 0 : index
      %c0_198 = arith.constant 0 : index
      %c0_199 = arith.constant 0 : index
      %466 = vector.load %arg10[%c0_197, %c0_198, %c0_199] : memref<4x32x128xf32, #tpu.memory_space<vmem>>, vector<1x32x128xf32>
      %467 = vector.shape_cast %466 : vector<1x32x128xf32> to vector<32x128xf32>
      %cst_200 = arith.constant dense<0.000000e+00> : vector<128x128xf32>
      %468 = tpu.matmul %465, %467, %cst_200 {dimension_numbers = #tpu.dot_dimension_numbers<[1], [0], [0], [1], [0, 0, 1, 1], [], []>} : vector<128x32xf32>, vector<32x128xf32>, vector<128x128xf32> -> vector<128x128xf32>
      %c0_201 = arith.constant 0 : index
      %c0_202 = arith.constant 0 : index
      %c0_203 = arith.constant 0 : index
      %469 = vector.load %arg19[%c0_201, %c0_202, %c0_203] : memref<4x128x128xf32, #tpu.memory_space<vmem>>, vector<1x128x128xf32>
      %470 = vector.shape_cast %469 : vector<1x128x128xf32> to vector<128x128xf32>
      %471 = vector.shape_cast %468 : vector<128x128xf32> to vector<1x128x128xf32>
      tpu.vector_store %arg19[%c0_201, %c0_202, %c0_203], %471 {strides = array<i32>} : memref<4x128x128xf32, #tpu.memory_space<vmem>>, vector<1x128x128xf32>,
      %c1_204 = arith.constant 1 : index
      %c0_205 = arith.constant 0 : index
      %c0_206 = arith.constant 0 : index
      %472 = vector.load %arg10[%c1_204, %c0_205, %c0_206] : memref<4x32x128xf32, #tpu.memory_space<vmem>>, vector<1x32x128xf32>
      %473 = vector.shape_cast %472 : vector<1x32x128xf32> to vector<32x128xf32>
      %cst_207 = arith.constant dense<0.000000e+00> : vector<128x128xf32>
      %474 = tpu.matmul %465, %473, %cst_207 {dimension_numbers = #tpu.dot_dimension_numbers<[1], [0], [0], [1], [0, 0, 1, 1], [], []>} : vector<128x32xf32>, vector<32x128xf32>, vector<128x128xf32> -> vector<128x128xf32>
      %c1_208 = arith.constant 1 : index
      %c0_209 = arith.constant 0 : index
      %c0_210 = arith.constant 0 : index
      %475 = vector.load %arg19[%c1_208, %c0_209, %c0_210] : memref<4x128x128xf32, #tpu.memory_space<vmem>>, vector<1x128x128xf32>
      %476 = vector.shape_cast %475 : vector<1x128x128xf32> to vector<128x128xf32>
      %477 = vector.shape_cast %474 : vector<128x128xf32> to vector<1x128x128xf32>
      tpu.vector_store %arg19[%c1_208, %c0_209, %c0_210], %477 {strides = array<i32>} : memref<4x128x128xf32, #tpu.memory_space<vmem>>, vector<1x128x128xf32>,
      %c2_211 = arith.constant 2 : index
      %c0_212 = arith.constant 0 : index
      %c0_213 = arith.constant 0 : index
      %478 = vector.load %arg10[%c2_211, %c0_212, %c0_213] : memref<4x32x128xf32, #tpu.memory_space<vmem>>, vector<1x32x128xf32>
      %479 = vector.shape_cast %478 : vector<1x32x128xf32> to vector<32x128xf32>
      %cst_214 = arith.constant dense<0.000000e+00> : vector<128x128xf32>
      %480 = tpu.matmul %465, %479, %cst_214 {dimension_numbers = #tpu.dot_dimension_numbers<[1], [0], [0], [1], [0, 0, 1, 1], [], []>} : vector<128x32xf32>, vector<32x128xf32>, vector<128x128xf32> -> vector<128x128xf32>
      %c2_215 = arith.constant 2 : index
      %c0_216 = arith.constant 0 : index
      %c0_217 = arith.constant 0 : index
      %481 = vector.load %arg19[%c2_215, %c0_216, %c0_217] : memref<4x128x128xf32, #tpu.memory_space<vmem>>, vector<1x128x128xf32>
      %482 = vector.shape_cast %481 : vector<1x128x128xf32> to vector<128x128xf32>
      %483 = vector.shape_cast %480 : vector<128x128xf32> to vector<1x128x128xf32>
      tpu.vector_store %arg19[%c2_215, %c0_216, %c0_217], %483 {strides = array<i32>} : memref<4x128x128xf32, #tpu.memory_space<vmem>>, vector<1x128x128xf32>,
      %c3_218 = arith.constant 3 : index
      %c0_219 = arith.constant 0 : index
      %c0_220 = arith.constant 0 : index
      %484 = vector.load %arg10[%c3_218, %c0_219, %c0_220] : memref<4x32x128xf32, #tpu.memory_space<vmem>>, vector<1x32x128xf32>
      %485 = vector.shape_cast %484 : vector<1x32x128xf32> to vector<32x128xf32>
      %cst_221 = arith.constant dense<0.000000e+00> : vector<128x128xf32>
      %486 = tpu.matmul %465, %485, %cst_221 {dimension_numbers = #tpu.dot_dimension_numbers<[1], [0], [0], [1], [0, 0, 1, 1], [], []>} : vector<128x32xf32>, vector<32x128xf32>, vector<128x128xf32> -> vector<128x128xf32>
      %c3_222 = arith.constant 3 : index
      %c0_223 = arith.constant 0 : index
      %c0_224 = arith.constant 0 : index
      %487 = vector.load %arg19[%c3_222, %c0_223, %c0_224] : memref<4x128x128xf32, #tpu.memory_space<vmem>>, vector<1x128x128xf32>
      %488 = vector.shape_cast %487 : vector<1x128x128xf32> to vector<128x128xf32>
      %489 = vector.shape_cast %486 : vector<128x128xf32> to vector<1x128x128xf32>
      tpu.vector_store %arg19[%c3_222, %c0_223, %c0_224], %489 {strides = array<i32>} : memref<4x128x128xf32, #tpu.memory_space<vmem>>, vector<1x128x128xf32>,
    } else {
    }
    %c0 = arith.constant 0 : index
    %c0_1 = arith.constant 0 : index
    %c0_2 = arith.constant 0 : index
    %3 = vector.load %arg2[%c0, %c0_1, %c0_2] : memref<1x8x128xf32, #tpu.memory_space<vmem>>, vector<1x8x128xf32>
    %4 = vector.shape_cast %3 : vector<1x8x128xf32> to vector<8x128xf32>
    %c0_3 = arith.constant 0 : index
    %c0_4 = arith.constant 0 : index
    %5 = vector.load %arg5[%c0_3, %c0_4] : memref<128x128xf32, #tpu.memory_space<vmem>>, vector<128x128xf32>
    %cst = arith.constant dense<0.000000e+00> : vector<8x128xf32>
    %6 = tpu.matmul %4, %5, %cst {dimension_numbers = #tpu.dot_dimension_numbers<[1], [0], [0], [1], [0, 0, 1, 1], [], []>} : vector<8x128xf32>, vector<128x128xf32>, vector<8x128xf32> -> vector<8x128xf32>
    %c0_5 = arith.constant 0 : index
    %c0_6 = arith.constant 0 : index
    %7 = vector.load %arg13[%c0_5, %c0_6] : memref<7x128xf32, #tpu.memory_space<vmem>>, vector<1x128xf32>
    %8 = vector.broadcast %7 : vector<1x128xf32> to vector<8x128xf32>
    %9 = arith.addf %6, %8 : vector<8x128xf32>
    %c0_7 = arith.constant 0 : index
    %c0_8 = arith.constant 0 : index
    %10 = vector.load %arg18[%c0_7, %c0_8] : memref<32x128xf32, #tpu.memory_space<vmem>>, vector<32x128xf32>
    %cst_9 = arith.constant 0.000000e+00 : f32
    %11 = vector.broadcast %cst_9 : f32 to vector<8x128xf32>
    %12 = vector.extract_strided_slice %9 {offsets = [0, 0], sizes = [8, 32], strides = [1, 1]} : vector<8x128xf32> to vector<8x32xf32>
    %cst_10 = arith.constant dense<0.000000e+00> : vector<8x128xf32>
    %13 = tpu.matmul %12, %10, %cst_10 {dimension_numbers = #tpu.dot_dimension_numbers<[1], [0], [0], [1], [0, 0, 1, 1], [], []>} : vector<8x32xf32>, vector<32x128xf32>, vector<8x128xf32> -> vector<8x128xf32>
    %14 = vector.extract_strided_slice %13 {offsets = [0, 0], sizes = [8, 32], strides = [1, 1]} : vector<8x128xf32> to vector<8x32xf32>
    %cst_11 = arith.constant dense<0xFF800000> : vector<8xf32>
    %15 = vector.multi_reduction <maximumf>, %14, %cst_11 [1] : vector<8x32xf32> to vector<8xf32>
    %16 = vector.shape_cast %15 : vector<8xf32> to vector<8x1xf32>
    %17 = vector.broadcast %16 : vector<8x1xf32> to vector<8x32xf32>
    %18 = arith.subf %14, %17 : vector<8x32xf32>
    %19 = math.exp %18 : vector<8x32xf32>
    %cst_12 = arith.constant dense<0.000000e+00> : vector<8xf32>
    %20 = vector.multi_reduction <add>, %19, %cst_12 [1] : vector<8x32xf32> to vector<8xf32>
    %21 = vector.shape_cast %20 : vector<8xf32> to vector<8x1xf32>
    %cst_13 = arith.constant 1.000000e+00 : f32
    %22 = vector.broadcast %cst_13 : f32 to vector<8x1xf32>
    %23 = arith.divf %22, %21 : vector<8x1xf32>
    %24 = vector.broadcast %23 : vector<8x1xf32> to vector<8x32xf32>
    %25 = arith.mulf %19, %24 : vector<8x32xf32>
    %26 = vector.extract_strided_slice %13 {offsets = [0, 32], sizes = [8, 32], strides = [1, 1]} : vector<8x128xf32> to vector<8x32xf32>
    %cst_14 = arith.constant dense<0xFF800000> : vector<8xf32>
    %27 = vector.multi_reduction <maximumf>, %26, %cst_14 [1] : vector<8x32xf32> to vector<8xf32>
    %28 = vector.shape_cast %27 : vector<8xf32> to vector<8x1xf32>
    %29 = vector.broadcast %28 : vector<8x1xf32> to vector<8x32xf32>
    %30 = arith.subf %26, %29 : vector<8x32xf32>
    %31 = math.exp %30 : vector<8x32xf32>
    %cst_15 = arith.constant dense<0.000000e+00> : vector<8xf32>
    %32 = vector.multi_reduction <add>, %31, %cst_15 [1] : vector<8x32xf32> to vector<8xf32>
    %33 = vector.shape_cast %32 : vector<8xf32> to vector<8x1xf32>
    %cst_16 = arith.constant 1.000000e+00 : f32
    %34 = vector.broadcast %cst_16 : f32 to vector<8x1xf32>
    %35 = arith.divf %34, %33 : vector<8x1xf32>
    %36 = vector.broadcast %35 : vector<8x1xf32> to vector<8x32xf32>
    %37 = arith.mulf %31, %36 : vector<8x32xf32>
    %38 = vector.extract_strided_slice %13 {offsets = [0, 64], sizes = [8, 32], strides = [1, 1]} : vector<8x128xf32> to vector<8x32xf32>
    %cst_17 = arith.constant dense<0xFF800000> : vector<8xf32>
    %39 = vector.multi_reduction <maximumf>, %38, %cst_17 [1] : vector<8x32xf32> to vector<8xf32>
    %40 = vector.shape_cast %39 : vector<8xf32> to vector<8x1xf32>
    %41 = vector.broadcast %40 : vector<8x1xf32> to vector<8x32xf32>
    %42 = arith.subf %38, %41 : vector<8x32xf32>
    %43 = math.exp %42 : vector<8x32xf32>
    %cst_18 = arith.constant dense<0.000000e+00> : vector<8xf32>
    %44 = vector.multi_reduction <add>, %43, %cst_18 [1] : vector<8x32xf32> to vector<8xf32>
    %45 = vector.shape_cast %44 : vector<8xf32> to vector<8x1xf32>
    %cst_19 = arith.constant 1.000000e+00 : f32
    %46 = vector.broadcast %cst_19 : f32 to vector<8x1xf32>
    %47 = arith.divf %46, %45 : vector<8x1xf32>
    %48 = vector.broadcast %47 : vector<8x1xf32> to vector<8x32xf32>
    %49 = arith.mulf %43, %48 : vector<8x32xf32>
    %50 = vector.extract_strided_slice %13 {offsets = [0, 96], sizes = [8, 32], strides = [1, 1]} : vector<8x128xf32> to vector<8x32xf32>
    %cst_20 = arith.constant dense<0xFF800000> : vector<8xf32>
    %51 = vector.multi_reduction <maximumf>, %50, %cst_20 [1] : vector<8x32xf32> to vector<8xf32>
    %52 = vector.shape_cast %51 : vector<8xf32> to vector<8x1xf32>
    %53 = vector.broadcast %52 : vector<8x1xf32> to vector<8x32xf32>
    %54 = arith.subf %50, %53 : vector<8x32xf32>
    %55 = math.exp %54 : vector<8x32xf32>
    %cst_21 = arith.constant dense<0.000000e+00> : vector<8xf32>
    %56 = vector.multi_reduction <add>, %55, %cst_21 [1] : vector<8x32xf32> to vector<8xf32>
    %57 = vector.shape_cast %56 : vector<8xf32> to vector<8x1xf32>
    %cst_22 = arith.constant 1.000000e+00 : f32
    %58 = vector.broadcast %cst_22 : f32 to vector<8x1xf32>
    %59 = arith.divf %58, %57 : vector<8x1xf32>
    %60 = vector.broadcast %59 : vector<8x1xf32> to vector<8x32xf32>
    %61 = arith.mulf %55, %60 : vector<8x32xf32>
    %62 = tpu.concatenate %25, %37, %49, %61 in 1 : vector<8x32xf32>, vector<8x32xf32>, vector<8x32xf32>, vector<8x32xf32> -> vector<8x128xf32>
    %c0_23 = arith.constant 0 : index
    %c0_24 = arith.constant 0 : index
    %c0_25 = arith.constant 0 : index
    %63 = vector.load %arg19[%c0_23, %c0_24, %c0_25] : memref<4x128x128xf32, #tpu.memory_space<vmem>>, vector<1x128x128xf32>
    %64 = vector.shape_cast %63 : vector<1x128x128xf32> to vector<128x128xf32>
    %cst_26 = arith.constant dense<0.000000e+00> : vector<8x128xf32>
    %65 = tpu.matmul %62, %64, %cst_26 {dimension_numbers = #tpu.dot_dimension_numbers<[1], [0], [0], [1], [0, 0, 1, 1], [], []>} : vector<8x128xf32>, vector<128x128xf32>, vector<8x128xf32> -> vector<8x128xf32>
    %66 = arith.addf %11, %65 : vector<8x128xf32>
    %67 = vector.extract_strided_slice %9 {offsets = [0, 32], sizes = [8, 32], strides = [1, 1]} : vector<8x128xf32> to vector<8x32xf32>
    %cst_27 = arith.constant dense<0.000000e+00> : vector<8x128xf32>
    %68 = tpu.matmul %67, %10, %cst_27 {dimension_numbers = #tpu.dot_dimension_numbers<[1], [0], [0], [1], [0, 0, 1, 1], [], []>} : vector<8x32xf32>, vector<32x128xf32>, vector<8x128xf32> -> vector<8x128xf32>
    %69 = vector.extract_strided_slice %68 {offsets = [0, 0], sizes = [8, 32], strides = [1, 1]} : vector<8x128xf32> to vector<8x32xf32>
    %cst_28 = arith.constant dense<0xFF800000> : vector<8xf32>
    %70 = vector.multi_reduction <maximumf>, %69, %cst_28 [1] : vector<8x32xf32> to vector<8xf32>
    %71 = vector.shape_cast %70 : vector<8xf32> to vector<8x1xf32>
    %72 = vector.broadcast %71 : vector<8x1xf32> to vector<8x32xf32>
    %73 = arith.subf %69, %72 : vector<8x32xf32>
    %74 = math.exp %73 : vector<8x32xf32>
    %cst_29 = arith.constant dense<0.000000e+00> : vector<8xf32>
    %75 = vector.multi_reduction <add>, %74, %cst_29 [1] : vector<8x32xf32> to vector<8xf32>
    %76 = vector.shape_cast %75 : vector<8xf32> to vector<8x1xf32>
    %cst_30 = arith.constant 1.000000e+00 : f32
    %77 = vector.broadcast %cst_30 : f32 to vector<8x1xf32>
    %78 = arith.divf %77, %76 : vector<8x1xf32>
    %79 = vector.broadcast %78 : vector<8x1xf32> to vector<8x32xf32>
    %80 = arith.mulf %74, %79 : vector<8x32xf32>
    %81 = vector.extract_strided_slice %68 {offsets = [0, 32], sizes = [8, 32], strides = [1, 1]} : vector<8x128xf32> to vector<8x32xf32>
    %cst_31 = arith.constant dense<0xFF800000> : vector<8xf32>
    %82 = vector.multi_reduction <maximumf>, %81, %cst_31 [1] : vector<8x32xf32> to vector<8xf32>
    %83 = vector.shape_cast %82 : vector<8xf32> to vector<8x1xf32>
    %84 = vector.broadcast %83 : vector<8x1xf32> to vector<8x32xf32>
    %85 = arith.subf %81, %84 : vector<8x32xf32>
    %86 = math.exp %85 : vector<8x32xf32>
    %cst_32 = arith.constant dense<0.000000e+00> : vector<8xf32>
    %87 = vector.multi_reduction <add>, %86, %cst_32 [1] : vector<8x32xf32> to vector<8xf32>
    %88 = vector.shape_cast %87 : vector<8xf32> to vector<8x1xf32>
    %cst_33 = arith.constant 1.000000e+00 : f32
    %89 = vector.broadcast %cst_33 : f32 to vector<8x1xf32>
    %90 = arith.divf %89, %88 : vector<8x1xf32>
    %91 = vector.broadcast %90 : vector<8x1xf32> to vector<8x32xf32>
    %92 = arith.mulf %86, %91 : vector<8x32xf32>
    %93 = vector.extract_strided_slice %68 {offsets = [0, 64], sizes = [8, 32], strides = [1, 1]} : vector<8x128xf32> to vector<8x32xf32>
    %cst_34 = arith.constant dense<0xFF800000> : vector<8xf32>
    %94 = vector.multi_reduction <maximumf>, %93, %cst_34 [1] : vector<8x32xf32> to vector<8xf32>
    %95 = vector.shape_cast %94 : vector<8xf32> to vector<8x1xf32>
    %96 = vector.broadcast %95 : vector<8x1xf32> to vector<8x32xf32>
    %97 = arith.subf %93, %96 : vector<8x32xf32>
    %98 = math.exp %97 : vector<8x32xf32>
    %cst_35 = arith.constant dense<0.000000e+00> : vector<8xf32>
    %99 = vector.multi_reduction <add>, %98, %cst_35 [1] : vector<8x32xf32> to vector<8xf32>
    %100 = vector.shape_cast %99 : vector<8xf32> to vector<8x1xf32>
    %cst_36 = arith.constant 1.000000e+00 : f32
    %101 = vector.broadcast %cst_36 : f32 to vector<8x1xf32>
    %102 = arith.divf %101, %100 : vector<8x1xf32>
    %103 = vector.broadcast %102 : vector<8x1xf32> to vector<8x32xf32>
    %104 = arith.mulf %98, %103 : vector<8x32xf32>
    %105 = vector.extract_strided_slice %68 {offsets = [0, 96], sizes = [8, 32], strides = [1, 1]} : vector<8x128xf32> to vector<8x32xf32>
    %cst_37 = arith.constant dense<0xFF800000> : vector<8xf32>
    %106 = vector.multi_reduction <maximumf>, %105, %cst_37 [1] : vector<8x32xf32> to vector<8xf32>
    %107 = vector.shape_cast %106 : vector<8xf32> to vector<8x1xf32>
    %108 = vector.broadcast %107 : vector<8x1xf32> to vector<8x32xf32>
    %109 = arith.subf %105, %108 : vector<8x32xf32>
    %110 = math.exp %109 : vector<8x32xf32>
    %cst_38 = arith.constant dense<0.000000e+00> : vector<8xf32>
    %111 = vector.multi_reduction <add>, %110, %cst_38 [1] : vector<8x32xf32> to vector<8xf32>
    %112 = vector.shape_cast %111 : vector<8xf32> to vector<8x1xf32>
    %cst_39 = arith.constant 1.000000e+00 : f32
    %113 = vector.broadcast %cst_39 : f32 to vector<8x1xf32>
    %114 = arith.divf %113, %112 : vector<8x1xf32>
    %115 = vector.broadcast %114 : vector<8x1xf32> to vector<8x32xf32>
    %116 = arith.mulf %110, %115 : vector<8x32xf32>
    %117 = tpu.concatenate %80, %92, %104, %116 in 1 : vector<8x32xf32>, vector<8x32xf32>, vector<8x32xf32>, vector<8x32xf32> -> vector<8x128xf32>
    %c1 = arith.constant 1 : index
    %c0_40 = arith.constant 0 : index
    %c0_41 = arith.constant 0 : index
    %118 = vector.load %arg19[%c1, %c0_40, %c0_41] : memref<4x128x128xf32, #tpu.memory_space<vmem>>, vector<1x128x128xf32>
    %119 = vector.shape_cast %118 : vector<1x128x128xf32> to vector<128x128xf32>
    %cst_42 = arith.constant dense<0.000000e+00> : vector<8x128xf32>
    %120 = tpu.matmul %117, %119, %cst_42 {dimension_numbers = #tpu.dot_dimension_numbers<[1], [0], [0], [1], [0, 0, 1, 1], [], []>} : vector<8x128xf32>, vector<128x128xf32>, vector<8x128xf32> -> vector<8x128xf32>
    %121 = arith.addf %66, %120 : vector<8x128xf32>
    %122 = vector.extract_strided_slice %9 {offsets = [0, 64], sizes = [8, 32], strides = [1, 1]} : vector<8x128xf32> to vector<8x32xf32>
    %cst_43 = arith.constant dense<0.000000e+00> : vector<8x128xf32>
    %123 = tpu.matmul %122, %10, %cst_43 {dimension_numbers = #tpu.dot_dimension_numbers<[1], [0], [0], [1], [0, 0, 1, 1], [], []>} : vector<8x32xf32>, vector<32x128xf32>, vector<8x128xf32> -> vector<8x128xf32>
    %124 = vector.extract_strided_slice %123 {offsets = [0, 0], sizes = [8, 32], strides = [1, 1]} : vector<8x128xf32> to vector<8x32xf32>
    %cst_44 = arith.constant dense<0xFF800000> : vector<8xf32>
    %125 = vector.multi_reduction <maximumf>, %124, %cst_44 [1] : vector<8x32xf32> to vector<8xf32>
    %126 = vector.shape_cast %125 : vector<8xf32> to vector<8x1xf32>
    %127 = vector.broadcast %126 : vector<8x1xf32> to vector<8x32xf32>
    %128 = arith.subf %124, %127 : vector<8x32xf32>
    %129 = math.exp %128 : vector<8x32xf32>
    %cst_45 = arith.constant dense<0.000000e+00> : vector<8xf32>
    %130 = vector.multi_reduction <add>, %129, %cst_45 [1] : vector<8x32xf32> to vector<8xf32>
    %131 = vector.shape_cast %130 : vector<8xf32> to vector<8x1xf32>
    %cst_46 = arith.constant 1.000000e+00 : f32
    %132 = vector.broadcast %cst_46 : f32 to vector<8x1xf32>
    %133 = arith.divf %132, %131 : vector<8x1xf32>
    %134 = vector.broadcast %133 : vector<8x1xf32> to vector<8x32xf32>
    %135 = arith.mulf %129, %134 : vector<8x32xf32>
    %136 = vector.extract_strided_slice %123 {offsets = [0, 32], sizes = [8, 32], strides = [1, 1]} : vector<8x128xf32> to vector<8x32xf32>
    %cst_47 = arith.constant dense<0xFF800000> : vector<8xf32>
    %137 = vector.multi_reduction <maximumf>, %136, %cst_47 [1] : vector<8x32xf32> to vector<8xf32>
    %138 = vector.shape_cast %137 : vector<8xf32> to vector<8x1xf32>
    %139 = vector.broadcast %138 : vector<8x1xf32> to vector<8x32xf32>
    %140 = arith.subf %136, %139 : vector<8x32xf32>
    %141 = math.exp %140 : vector<8x32xf32>
    %cst_48 = arith.constant dense<0.000000e+00> : vector<8xf32>
    %142 = vector.multi_reduction <add>, %141, %cst_48 [1] : vector<8x32xf32> to vector<8xf32>
    %143 = vector.shape_cast %142 : vector<8xf32> to vector<8x1xf32>
    %cst_49 = arith.constant 1.000000e+00 : f32
    %144 = vector.broadcast %cst_49 : f32 to vector<8x1xf32>
    %145 = arith.divf %144, %143 : vector<8x1xf32>
    %146 = vector.broadcast %145 : vector<8x1xf32> to vector<8x32xf32>
    %147 = arith.mulf %141, %146 : vector<8x32xf32>
    %148 = vector.extract_strided_slice %123 {offsets = [0, 64], sizes = [8, 32], strides = [1, 1]} : vector<8x128xf32> to vector<8x32xf32>
    %cst_50 = arith.constant dense<0xFF800000> : vector<8xf32>
    %149 = vector.multi_reduction <maximumf>, %148, %cst_50 [1] : vector<8x32xf32> to vector<8xf32>
    %150 = vector.shape_cast %149 : vector<8xf32> to vector<8x1xf32>
    %151 = vector.broadcast %150 : vector<8x1xf32> to vector<8x32xf32>
    %152 = arith.subf %148, %151 : vector<8x32xf32>
    %153 = math.exp %152 : vector<8x32xf32>
    %cst_51 = arith.constant dense<0.000000e+00> : vector<8xf32>
    %154 = vector.multi_reduction <add>, %153, %cst_51 [1] : vector<8x32xf32> to vector<8xf32>
    %155 = vector.shape_cast %154 : vector<8xf32> to vector<8x1xf32>
    %cst_52 = arith.constant 1.000000e+00 : f32
    %156 = vector.broadcast %cst_52 : f32 to vector<8x1xf32>
    %157 = arith.divf %156, %155 : vector<8x1xf32>
    %158 = vector.broadcast %157 : vector<8x1xf32> to vector<8x32xf32>
    %159 = arith.mulf %153, %158 : vector<8x32xf32>
    %160 = vector.extract_strided_slice %123 {offsets = [0, 96], sizes = [8, 32], strides = [1, 1]} : vector<8x128xf32> to vector<8x32xf32>
    %cst_53 = arith.constant dense<0xFF800000> : vector<8xf32>
    %161 = vector.multi_reduction <maximumf>, %160, %cst_53 [1] : vector<8x32xf32> to vector<8xf32>
    %162 = vector.shape_cast %161 : vector<8xf32> to vector<8x1xf32>
    %163 = vector.broadcast %162 : vector<8x1xf32> to vector<8x32xf32>
    %164 = arith.subf %160, %163 : vector<8x32xf32>
    %165 = math.exp %164 : vector<8x32xf32>
    %cst_54 = arith.constant dense<0.000000e+00> : vector<8xf32>
    %166 = vector.multi_reduction <add>, %165, %cst_54 [1] : vector<8x32xf32> to vector<8xf32>
    %167 = vector.shape_cast %166 : vector<8xf32> to vector<8x1xf32>
    %cst_55 = arith.constant 1.000000e+00 : f32
    %168 = vector.broadcast %cst_55 : f32 to vector<8x1xf32>
    %169 = arith.divf %168, %167 : vector<8x1xf32>
    %170 = vector.broadcast %169 : vector<8x1xf32> to vector<8x32xf32>
    %171 = arith.mulf %165, %170 : vector<8x32xf32>
    %172 = tpu.concatenate %135, %147, %159, %171 in 1 : vector<8x32xf32>, vector<8x32xf32>, vector<8x32xf32>, vector<8x32xf32> -> vector<8x128xf32>
    %c2 = arith.constant 2 : index
    %c0_56 = arith.constant 0 : index
    %c0_57 = arith.constant 0 : index
    %173 = vector.load %arg19[%c2, %c0_56, %c0_57] : memref<4x128x128xf32, #tpu.memory_space<vmem>>, vector<1x128x128xf32>
    %174 = vector.shape_cast %173 : vector<1x128x128xf32> to vector<128x128xf32>
    %cst_58 = arith.constant dense<0.000000e+00> : vector<8x128xf32>
    %175 = tpu.matmul %172, %174, %cst_58 {dimension_numbers = #tpu.dot_dimension_numbers<[1], [0], [0], [1], [0, 0, 1, 1], [], []>} : vector<8x128xf32>, vector<128x128xf32>, vector<8x128xf32> -> vector<8x128xf32>
    %176 = arith.addf %121, %175 : vector<8x128xf32>
    %177 = vector.extract_strided_slice %9 {offsets = [0, 96], sizes = [8, 32], strides = [1, 1]} : vector<8x128xf32> to vector<8x32xf32>
    %cst_59 = arith.constant dense<0.000000e+00> : vector<8x128xf32>
    %178 = tpu.matmul %177, %10, %cst_59 {dimension_numbers = #tpu.dot_dimension_numbers<[1], [0], [0], [1], [0, 0, 1, 1], [], []>} : vector<8x32xf32>, vector<32x128xf32>, vector<8x128xf32> -> vector<8x128xf32>
    %179 = vector.extract_strided_slice %178 {offsets = [0, 0], sizes = [8, 32], strides = [1, 1]} : vector<8x128xf32> to vector<8x32xf32>
    %cst_60 = arith.constant dense<0xFF800000> : vector<8xf32>
    %180 = vector.multi_reduction <maximumf>, %179, %cst_60 [1] : vector<8x32xf32> to vector<8xf32>
    %181 = vector.shape_cast %180 : vector<8xf32> to vector<8x1xf32>
    %182 = vector.broadcast %181 : vector<8x1xf32> to vector<8x32xf32>
    %183 = arith.subf %179, %182 : vector<8x32xf32>
    %184 = math.exp %183 : vector<8x32xf32>
    %cst_61 = arith.constant dense<0.000000e+00> : vector<8xf32>
    %185 = vector.multi_reduction <add>, %184, %cst_61 [1] : vector<8x32xf32> to vector<8xf32>
    %186 = vector.shape_cast %185 : vector<8xf32> to vector<8x1xf32>
    %cst_62 = arith.constant 1.000000e+00 : f32
    %187 = vector.broadcast %cst_62 : f32 to vector<8x1xf32>
    %188 = arith.divf %187, %186 : vector<8x1xf32>
    %189 = vector.broadcast %188 : vector<8x1xf32> to vector<8x32xf32>
    %190 = arith.mulf %184, %189 : vector<8x32xf32>
    %191 = vector.extract_strided_slice %178 {offsets = [0, 32], sizes = [8, 32], strides = [1, 1]} : vector<8x128xf32> to vector<8x32xf32>
    %cst_63 = arith.constant dense<0xFF800000> : vector<8xf32>
    %192 = vector.multi_reduction <maximumf>, %191, %cst_63 [1] : vector<8x32xf32> to vector<8xf32>
    %193 = vector.shape_cast %192 : vector<8xf32> to vector<8x1xf32>
    %194 = vector.broadcast %193 : vector<8x1xf32> to vector<8x32xf32>
    %195 = arith.subf %191, %194 : vector<8x32xf32>
    %196 = math.exp %195 : vector<8x32xf32>
    %cst_64 = arith.constant dense<0.000000e+00> : vector<8xf32>
    %197 = vector.multi_reduction <add>, %196, %cst_64 [1] : vector<8x32xf32> to vector<8xf32>
    %198 = vector.shape_cast %197 : vector<8xf32> to vector<8x1xf32>
    %cst_65 = arith.constant 1.000000e+00 : f32
    %199 = vector.broadcast %cst_65 : f32 to vector<8x1xf32>
    %200 = arith.divf %199, %198 : vector<8x1xf32>
    %201 = vector.broadcast %200 : vector<8x1xf32> to vector<8x32xf32>
    %202 = arith.mulf %196, %201 : vector<8x32xf32>
    %203 = vector.extract_strided_slice %178 {offsets = [0, 64], sizes = [8, 32], strides = [1, 1]} : vector<8x128xf32> to vector<8x32xf32>
    %cst_66 = arith.constant dense<0xFF800000> : vector<8xf32>
    %204 = vector.multi_reduction <maximumf>, %203, %cst_66 [1] : vector<8x32xf32> to vector<8xf32>
    %205 = vector.shape_cast %204 : vector<8xf32> to vector<8x1xf32>
    %206 = vector.broadcast %205 : vector<8x1xf32> to vector<8x32xf32>
    %207 = arith.subf %203, %206 : vector<8x32xf32>
    %208 = math.exp %207 : vector<8x32xf32>
    %cst_67 = arith.constant dense<0.000000e+00> : vector<8xf32>
    %209 = vector.multi_reduction <add>, %208, %cst_67 [1] : vector<8x32xf32> to vector<8xf32>
    %210 = vector.shape_cast %209 : vector<8xf32> to vector<8x1xf32>
    %cst_68 = arith.constant 1.000000e+00 : f32
    %211 = vector.broadcast %cst_68 : f32 to vector<8x1xf32>
    %212 = arith.divf %211, %210 : vector<8x1xf32>
    %213 = vector.broadcast %212 : vector<8x1xf32> to vector<8x32xf32>
    %214 = arith.mulf %208, %213 : vector<8x32xf32>
    %215 = vector.extract_strided_slice %178 {offsets = [0, 96], sizes = [8, 32], strides = [1, 1]} : vector<8x128xf32> to vector<8x32xf32>
    %cst_69 = arith.constant dense<0xFF800000> : vector<8xf32>
    %216 = vector.multi_reduction <maximumf>, %215, %cst_69 [1] : vector<8x32xf32> to vector<8xf32>
    %217 = vector.shape_cast %216 : vector<8xf32> to vector<8x1xf32>
    %218 = vector.broadcast %217 : vector<8x1xf32> to vector<8x32xf32>
    %219 = arith.subf %215, %218 : vector<8x32xf32>
    %220 = math.exp %219 : vector<8x32xf32>
    %cst_70 = arith.constant dense<0.000000e+00> : vector<8xf32>
    %221 = vector.multi_reduction <add>, %220, %cst_70 [1] : vector<8x32xf32> to vector<8xf32>
    %222 = vector.shape_cast %221 : vector<8xf32> to vector<8x1xf32>
    %cst_71 = arith.constant 1.000000e+00 : f32
    %223 = vector.broadcast %cst_71 : f32 to vector<8x1xf32>
    %224 = arith.divf %223, %222 : vector<8x1xf32>
    %225 = vector.broadcast %224 : vector<8x1xf32> to vector<8x32xf32>
    %226 = arith.mulf %220, %225 : vector<8x32xf32>
    %227 = tpu.concatenate %190, %202, %214, %226 in 1 : vector<8x32xf32>, vector<8x32xf32>, vector<8x32xf32>, vector<8x32xf32> -> vector<8x128xf32>
    %c3 = arith.constant 3 : index
    %c0_72 = arith.constant 0 : index
    %c0_73 = arith.constant 0 : index
    %228 = vector.load %arg19[%c3, %c0_72, %c0_73] : memref<4x128x128xf32, #tpu.memory_space<vmem>>, vector<1x128x128xf32>
    %229 = vector.shape_cast %228 : vector<1x128x128xf32> to vector<128x128xf32>
    %cst_74 = arith.constant dense<0.000000e+00> : vector<8x128xf32>
    %230 = tpu.matmul %227, %229, %cst_74 {dimension_numbers = #tpu.dot_dimension_numbers<[1], [0], [0], [1], [0, 0, 1, 1], [], []>} : vector<8x128xf32>, vector<128x128xf32>, vector<8x128xf32> -> vector<8x128xf32>
    %231 = arith.addf %176, %230 : vector<8x128xf32>
    %c1_75 = arith.constant 1 : index
    %c0_76 = arith.constant 0 : index
    %232 = vector.load %arg13[%c1_75, %c0_76] : memref<7x128xf32, #tpu.memory_space<vmem>>, vector<1x128xf32>
    %233 = vector.broadcast %232 : vector<1x128xf32> to vector<8x128xf32>
    %234 = arith.addf %231, %233 : vector<8x128xf32>
    %c2_77 = arith.constant 2 : index
    %c0_78 = arith.constant 0 : index
    %235 = vector.load %arg13[%c2_77, %c0_78] : memref<7x128xf32, #tpu.memory_space<vmem>>, vector<1x128xf32>
    %c3_79 = arith.constant 3 : index
    %c0_80 = arith.constant 0 : index
    %236 = vector.load %arg13[%c3_79, %c0_80] : memref<7x128xf32, #tpu.memory_space<vmem>>, vector<1x128xf32>
    %c4 = arith.constant 4 : index
    %c0_81 = arith.constant 0 : index
    %237 = vector.load %arg13[%c4, %c0_81] : memref<7x128xf32, #tpu.memory_space<vmem>>, vector<1x128xf32>
    %c5 = arith.constant 5 : index
    %c0_82 = arith.constant 0 : index
    %238 = vector.load %arg13[%c5, %c0_82] : memref<7x128xf32, #tpu.memory_space<vmem>>, vector<1x128xf32>
    %c6 = arith.constant 6 : index
    %c0_83 = arith.constant 0 : index
    %239 = vector.load %arg13[%c6, %c0_83] : memref<7x128xf32, #tpu.memory_space<vmem>>, vector<1x128xf32>
    %240 = arith.addf %234, %4 : vector<8x128xf32>
    %241 = vector.extract_strided_slice %240 {offsets = [0, 0], sizes = [8, 32], strides = [1, 1]} : vector<8x128xf32> to vector<8x32xf32>
    %cst_84 = arith.constant dense<0.000000e+00> : vector<8xf32>
    %242 = vector.multi_reduction <add>, %241, %cst_84 [1] : vector<8x32xf32> to vector<8xf32>
    %243 = vector.shape_cast %242 : vector<8xf32> to vector<8x1xf32>
    %cst_85 = arith.constant 3.200000e+01 : f32
    %244 = vector.broadcast %cst_85 : f32 to vector<8x1xf32>
    %245 = arith.divf %243, %244 : vector<8x1xf32>
    %246 = vector.broadcast %245 : vector<8x1xf32> to vector<8x32xf32>
    %247 = arith.subf %241, %246 : vector<8x32xf32>
    %248 = arith.mulf %247, %247 : vector<8x32xf32>
    %cst_86 = arith.constant dense<0.000000e+00> : vector<8xf32>
    %249 = vector.multi_reduction <add>, %248, %cst_86 [1] : vector<8x32xf32> to vector<8xf32>
    %250 = vector.shape_cast %249 : vector<8xf32> to vector<8x1xf32>
    %cst_87 = arith.constant 3.200000e+01 : f32
    %251 = vector.broadcast %cst_87 : f32 to vector<8x1xf32>
    %252 = arith.divf %250, %251 : vector<8x1xf32>
    %cst_88 = arith.constant 9.99999974E-6 : f32
    %253 = vector.broadcast %cst_88 : f32 to vector<8x1xf32>
    %254 = arith.addf %252, %253 : vector<8x1xf32>
    %255 = math.rsqrt %254 : vector<8x1xf32>
    %256 = vector.broadcast %255 : vector<8x1xf32> to vector<8x32xf32>
    %257 = arith.mulf %247, %256 : vector<8x32xf32>
    %258 = vector.extract_strided_slice %240 {offsets = [0, 32], sizes = [8, 32], strides = [1, 1]} : vector<8x128xf32> to vector<8x32xf32>
    %cst_89 = arith.constant dense<0.000000e+00> : vector<8xf32>
    %259 = vector.multi_reduction <add>, %258, %cst_89 [1] : vector<8x32xf32> to vector<8xf32>
    %260 = vector.shape_cast %259 : vector<8xf32> to vector<8x1xf32>
    %cst_90 = arith.constant 3.200000e+01 : f32
    %261 = vector.broadcast %cst_90 : f32 to vector<8x1xf32>
    %262 = arith.divf %260, %261 : vector<8x1xf32>
    %263 = vector.broadcast %262 : vector<8x1xf32> to vector<8x32xf32>
    %264 = arith.subf %258, %263 : vector<8x32xf32>
    %265 = arith.mulf %264, %264 : vector<8x32xf32>
    %cst_91 = arith.constant dense<0.000000e+00> : vector<8xf32>
    %266 = vector.multi_reduction <add>, %265, %cst_91 [1] : vector<8x32xf32> to vector<8xf32>
    %267 = vector.shape_cast %266 : vector<8xf32> to vector<8x1xf32>
    %cst_92 = arith.constant 3.200000e+01 : f32
    %268 = vector.broadcast %cst_92 : f32 to vector<8x1xf32>
    %269 = arith.divf %267, %268 : vector<8x1xf32>
    %cst_93 = arith.constant 9.99999974E-6 : f32
    %270 = vector.broadcast %cst_93 : f32 to vector<8x1xf32>
    %271 = arith.addf %269, %270 : vector<8x1xf32>
    %272 = math.rsqrt %271 : vector<8x1xf32>
    %273 = vector.broadcast %272 : vector<8x1xf32> to vector<8x32xf32>
    %274 = arith.mulf %264, %273 : vector<8x32xf32>
    %275 = vector.extract_strided_slice %240 {offsets = [0, 64], sizes = [8, 32], strides = [1, 1]} : vector<8x128xf32> to vector<8x32xf32>
    %cst_94 = arith.constant dense<0.000000e+00> : vector<8xf32>
    %276 = vector.multi_reduction <add>, %275, %cst_94 [1] : vector<8x32xf32> to vector<8xf32>
    %277 = vector.shape_cast %276 : vector<8xf32> to vector<8x1xf32>
    %cst_95 = arith.constant 3.200000e+01 : f32
    %278 = vector.broadcast %cst_95 : f32 to vector<8x1xf32>
    %279 = arith.divf %277, %278 : vector<8x1xf32>
    %280 = vector.broadcast %279 : vector<8x1xf32> to vector<8x32xf32>
    %281 = arith.subf %275, %280 : vector<8x32xf32>
    %282 = arith.mulf %281, %281 : vector<8x32xf32>
    %cst_96 = arith.constant dense<0.000000e+00> : vector<8xf32>
    %283 = vector.multi_reduction <add>, %282, %cst_96 [1] : vector<8x32xf32> to vector<8xf32>
    %284 = vector.shape_cast %283 : vector<8xf32> to vector<8x1xf32>
    %cst_97 = arith.constant 3.200000e+01 : f32
    %285 = vector.broadcast %cst_97 : f32 to vector<8x1xf32>
    %286 = arith.divf %284, %285 : vector<8x1xf32>
    %cst_98 = arith.constant 9.99999974E-6 : f32
    %287 = vector.broadcast %cst_98 : f32 to vector<8x1xf32>
    %288 = arith.addf %286, %287 : vector<8x1xf32>
    %289 = math.rsqrt %288 : vector<8x1xf32>
    %290 = vector.broadcast %289 : vector<8x1xf32> to vector<8x32xf32>
    %291 = arith.mulf %281, %290 : vector<8x32xf32>
    %292 = vector.extract_strided_slice %240 {offsets = [0, 96], sizes = [8, 32], strides = [1, 1]} : vector<8x128xf32> to vector<8x32xf32>
    %cst_99 = arith.constant dense<0.000000e+00> : vector<8xf32>
    %293 = vector.multi_reduction <add>, %292, %cst_99 [1] : vector<8x32xf32> to vector<8xf32>
    %294 = vector.shape_cast %293 : vector<8xf32> to vector<8x1xf32>
    %cst_100 = arith.constant 3.200000e+01 : f32
    %295 = vector.broadcast %cst_100 : f32 to vector<8x1xf32>
    %296 = arith.divf %294, %295 : vector<8x1xf32>
    %297 = vector.broadcast %296 : vector<8x1xf32> to vector<8x32xf32>
    %298 = arith.subf %292, %297 : vector<8x32xf32>
    %299 = arith.mulf %298, %298 : vector<8x32xf32>
    %cst_101 = arith.constant dense<0.000000e+00> : vector<8xf32>
    %300 = vector.multi_reduction <add>, %299, %cst_101 [1] : vector<8x32xf32> to vector<8xf32>
    %301 = vector.shape_cast %300 : vector<8xf32> to vector<8x1xf32>
    %cst_102 = arith.constant 3.200000e+01 : f32
    %302 = vector.broadcast %cst_102 : f32 to vector<8x1xf32>
    %303 = arith.divf %301, %302 : vector<8x1xf32>
    %cst_103 = arith.constant 9.99999974E-6 : f32
    %304 = vector.broadcast %cst_103 : f32 to vector<8x1xf32>
    %305 = arith.addf %303, %304 : vector<8x1xf32>
    %306 = math.rsqrt %305 : vector<8x1xf32>
    %307 = vector.broadcast %306 : vector<8x1xf32> to vector<8x32xf32>
    %308 = arith.mulf %298, %307 : vector<8x32xf32>
    %309 = tpu.concatenate %257, %274, %291, %308 in 1 : vector<8x32xf32>, vector<8x32xf32>, vector<8x32xf32>, vector<8x32xf32> -> vector<8x128xf32>
    %310 = vector.broadcast %235 : vector<1x128xf32> to vector<8x128xf32>
    %311 = arith.mulf %309, %310 : vector<8x128xf32>
    %312 = vector.broadcast %236 : vector<1x128xf32> to vector<8x128xf32>
    %313 = arith.addf %311, %312 : vector<8x128xf32>
    %c0_104 = arith.constant 0 : index
    %c0_105 = arith.constant 0 : index
    %314 = vector.load %arg14[%c0_104, %c0_105] : memref<128x256xf32, #tpu.memory_space<vmem>>, vector<128x256xf32>
    %cst_106 = arith.constant dense<0.000000e+00> : vector<8x256xf32>
    %315 = tpu.matmul %313, %314, %cst_106 {dimension_numbers = #tpu.dot_dimension_numbers<[1], [0], [0], [1], [0, 0, 1, 1], [], []>} : vector<8x128xf32>, vector<128x256xf32>, vector<8x256xf32> -> vector<8x256xf32>
    %c0_107 = arith.constant 0 : index
    %c0_108 = arith.constant 0 : index
    %316 = vector.load %arg15[%c0_107, %c0_108] : memref<1x256xf32, #tpu.memory_space<vmem>>, vector<1x256xf32>
    %317 = vector.broadcast %316 : vector<1x256xf32> to vector<8x256xf32>
    %318 = arith.addf %315, %317 : vector<8x256xf32>
    %cst_109 = arith.constant 0.000000e+00 : f32
    %319 = vector.broadcast %cst_109 : f32 to vector<8x256xf32>
    %320 = arith.cmpf oge, %318, %319 : vector<8x256xf32>
    %cst_110 = arith.constant 5.000000e-02 : f32
    %321 = vector.broadcast %cst_110 : f32 to vector<8x256xf32>
    %322 = arith.mulf %321, %318 : vector<8x256xf32>
    %323 = arith.select %320, %318, %322 : vector<8x256xi1>, vector<8x256xf32>
    %c0_111 = arith.constant 0 : index
    %c0_112 = arith.constant 0 : index
    %324 = vector.load %arg16[%c0_111, %c0_112] : memref<256x128xf32, #tpu.memory_space<vmem>>, vector<256x128xf32>
    %cst_113 = arith.constant dense<0.000000e+00> : vector<8x128xf32>
    %325 = tpu.matmul %323, %324, %cst_113 {dimension_numbers = #tpu.dot_dimension_numbers<[1], [0], [0], [1], [0, 0, 1, 1], [], []>} : vector<8x256xf32>, vector<256x128xf32>, vector<8x128xf32> -> vector<8x128xf32>
    %326 = vector.broadcast %239 : vector<1x128xf32> to vector<8x128xf32>
    %327 = arith.addf %325, %326 : vector<8x128xf32>
    %328 = arith.addf %327, %313 : vector<8x128xf32>
    %329 = vector.extract_strided_slice %328 {offsets = [0, 0], sizes = [8, 32], strides = [1, 1]} : vector<8x128xf32> to vector<8x32xf32>
    %cst_114 = arith.constant dense<0.000000e+00> : vector<8xf32>
    %330 = vector.multi_reduction <add>, %329, %cst_114 [1] : vector<8x32xf32> to vector<8xf32>
    %331 = vector.shape_cast %330 : vector<8xf32> to vector<8x1xf32>
    %cst_115 = arith.constant 3.200000e+01 : f32
    %332 = vector.broadcast %cst_115 : f32 to vector<8x1xf32>
    %333 = arith.divf %331, %332 : vector<8x1xf32>
    %334 = vector.broadcast %333 : vector<8x1xf32> to vector<8x32xf32>
    %335 = arith.subf %329, %334 : vector<8x32xf32>
    %336 = arith.mulf %335, %335 : vector<8x32xf32>
    %cst_116 = arith.constant dense<0.000000e+00> : vector<8xf32>
    %337 = vector.multi_reduction <add>, %336, %cst_116 [1] : vector<8x32xf32> to vector<8xf32>
    %338 = vector.shape_cast %337 : vector<8xf32> to vector<8x1xf32>
    %cst_117 = arith.constant 3.200000e+01 : f32
    %339 = vector.broadcast %cst_117 : f32 to vector<8x1xf32>
    %340 = arith.divf %338, %339 : vector<8x1xf32>
    %cst_118 = arith.constant 9.99999974E-6 : f32
    %341 = vector.broadcast %cst_118 : f32 to vector<8x1xf32>
    %342 = arith.addf %340, %341 : vector<8x1xf32>
    %343 = math.rsqrt %342 : vector<8x1xf32>
    %344 = vector.broadcast %343 : vector<8x1xf32> to vector<8x32xf32>
    %345 = arith.mulf %335, %344 : vector<8x32xf32>
    %346 = vector.extract_strided_slice %328 {offsets = [0, 32], sizes = [8, 32], strides = [1, 1]} : vector<8x128xf32> to vector<8x32xf32>
    %cst_119 = arith.constant dense<0.000000e+00> : vector<8xf32>
    %347 = vector.multi_reduction <add>, %346, %cst_119 [1] : vector<8x32xf32> to vector<8xf32>
    %348 = vector.shape_cast %347 : vector<8xf32> to vector<8x1xf32>
    %cst_120 = arith.constant 3.200000e+01 : f32
    %349 = vector.broadcast %cst_120 : f32 to vector<8x1xf32>
    %350 = arith.divf %348, %349 : vector<8x1xf32>
    %351 = vector.broadcast %350 : vector<8x1xf32> to vector<8x32xf32>
    %352 = arith.subf %346, %351 : vector<8x32xf32>
    %353 = arith.mulf %352, %352 : vector<8x32xf32>
    %cst_121 = arith.constant dense<0.000000e+00> : vector<8xf32>
    %354 = vector.multi_reduction <add>, %353, %cst_121 [1] : vector<8x32xf32> to vector<8xf32>
    %355 = vector.shape_cast %354 : vector<8xf32> to vector<8x1xf32>
    %cst_122 = arith.constant 3.200000e+01 : f32
    %356 = vector.broadcast %cst_122 : f32 to vector<8x1xf32>
    %357 = arith.divf %355, %356 : vector<8x1xf32>
    %cst_123 = arith.constant 9.99999974E-6 : f32
    %358 = vector.broadcast %cst_123 : f32 to vector<8x1xf32>
    %359 = arith.addf %357, %358 : vector<8x1xf32>
    %360 = math.rsqrt %359 : vector<8x1xf32>
    %361 = vector.broadcast %360 : vector<8x1xf32> to vector<8x32xf32>
    %362 = arith.mulf %352, %361 : vector<8x32xf32>
    %363 = vector.extract_strided_slice %328 {offsets = [0, 64], sizes = [8, 32], strides = [1, 1]} : vector<8x128xf32> to vector<8x32xf32>
    %cst_124 = arith.constant dense<0.000000e+00> : vector<8xf32>
    %364 = vector.multi_reduction <add>, %363, %cst_124 [1] : vector<8x32xf32> to vector<8xf32>
    %365 = vector.shape_cast %364 : vector<8xf32> to vector<8x1xf32>
    %cst_125 = arith.constant 3.200000e+01 : f32
    %366 = vector.broadcast %cst_125 : f32 to vector<8x1xf32>
    %367 = arith.divf %365, %366 : vector<8x1xf32>
    %368 = vector.broadcast %367 : vector<8x1xf32> to vector<8x32xf32>
    %369 = arith.subf %363, %368 : vector<8x32xf32>
    %370 = arith.mulf %369, %369 : vector<8x32xf32>
    %cst_126 = arith.constant dense<0.000000e+00> : vector<8xf32>
    %371 = vector.multi_reduction <add>, %370, %cst_126 [1] : vector<8x32xf32> to vector<8xf32>
    %372 = vector.shape_cast %371 : vector<8xf32> to vector<8x1xf32>
    %cst_127 = arith.constant 3.200000e+01 : f32
    %373 = vector.broadcast %cst_127 : f32 to vector<8x1xf32>
    %374 = arith.divf %372, %373 : vector<8x1xf32>
    %cst_128 = arith.constant 9.99999974E-6 : f32
    %375 = vector.broadcast %cst_128 : f32 to vector<8x1xf32>
    %376 = arith.addf %374, %375 : vector<8x1xf32>
    %377 = math.rsqrt %376 : vector<8x1xf32>
    %378 = vector.broadcast %377 : vector<8x1xf32> to vector<8x32xf32>
    %379 = arith.mulf %369, %378 : vector<8x32xf32>
    %380 = vector.extract_strided_slice %328 {offsets = [0, 96], sizes = [8, 32], strides = [1, 1]} : vector<8x128xf32> to vector<8x32xf32>
    %cst_129 = arith.constant dense<0.000000e+00> : vector<8xf32>
    %381 = vector.multi_reduction <add>, %380, %cst_129 [1] : vector<8x32xf32> to vector<8xf32>
    %382 = vector.shape_cast %381 : vector<8xf32> to vector<8x1xf32>
    %cst_130 = arith.constant 3.200000e+01 : f32
    %383 = vector.broadcast %cst_130 : f32 to vector<8x1xf32>
    %384 = arith.divf %382, %383 : vector<8x1xf32>
    %385 = vector.broadcast %384 : vector<8x1xf32> to vector<8x32xf32>
    %386 = arith.subf %380, %385 : vector<8x32xf32>
    %387 = arith.mulf %386, %386 : vector<8x32xf32>
    %cst_131 = arith.constant dense<0.000000e+00> : vector<8xf32>
    %388 = vector.multi_reduction <add>, %387, %cst_131 [1] : vector<8x32xf32> to vector<8xf32>
    %389 = vector.shape_cast %388 : vector<8xf32> to vector<8x1xf32>
    %cst_132 = arith.constant 3.200000e+01 : f32
    %390 = vector.broadcast %cst_132 : f32 to vector<8x1xf32>
    %391 = arith.divf %389, %390 : vector<8x1xf32>
    %cst_133 = arith.constant 9.99999974E-6 : f32
    %392 = vector.broadcast %cst_133 : f32 to vector<8x1xf32>
    %393 = arith.addf %391, %392 : vector<8x1xf32>
    %394 = math.rsqrt %393 : vector<8x1xf32>
    %395 = vector.broadcast %394 : vector<8x1xf32> to vector<8x32xf32>
    %396 = arith.mulf %386, %395 : vector<8x32xf32>
    %397 = tpu.concatenate %345, %362, %379, %396 in 1 : vector<8x32xf32>, vector<8x32xf32>, vector<8x32xf32>, vector<8x32xf32> -> vector<8x128xf32>
    %398 = vector.broadcast %237 : vector<1x128xf32> to vector<8x128xf32>
    %399 = arith.mulf %397, %398 : vector<8x128xf32>
    %400 = vector.broadcast %238 : vector<1x128xf32> to vector<8x128xf32>
    %401 = arith.addf %399, %400 : vector<8x128xf32>
    %c0_134 = arith.constant 0 : index
    %c0_135 = arith.constant 0 : index
    %c0_136 = arith.constant 0 : index
    %402 = vector.load %arg17[%c0_134, %c0_135, %c0_136] : memref<1x8x128xf32, #tpu.memory_space<vmem>>, vector<1x8x128xf32>
    %403 = vector.shape_cast %402 : vector<1x8x128xf32> to vector<8x128xf32>
    %404 = vector.shape_cast %401 : vector<8x128xf32> to vector<1x8x128xf32>
    tpu.vector_store %arg17[%c0_134, %c0_135, %c0_136], %404 {strides = array<i32>} : memref<1x8x128xf32, #tpu.memory_space<vmem>>, vector<1x8x128xf32>,
    return
  }
  func.func @transform_0(%arg0: i32, %arg1: i32) -> (i32, i32, i32) {
    %c0_i32 = arith.constant 0 : i32
    %c0_i32_0 = arith.constant 0 : i32
    return %arg0, %arg1, %c0_i32 : i32, i32, i32
  }
  func.func @transform_1(%arg0: i32, %arg1: i32) -> (i32, i32, i32) {
    %c0_i32 = arith.constant 0 : i32
    %c0_i32_0 = arith.constant 0 : i32
    %c0_i32_1 = arith.constant 0 : i32
    return %arg0, %c0_i32, %c0_i32_0 : i32, i32, i32
  }
  func.func @transform_2(%arg0: i32, %arg1: i32) -> (i32, i32, i32) {
    %c0_i32 = arith.constant 0 : i32
    %c0_i32_0 = arith.constant 0 : i32
    %c0_i32_1 = arith.constant 0 : i32
    return %arg0, %c0_i32, %c0_i32_0 : i32, i32, i32
  }
  func.func @transform_3(%arg0: i32, %arg1: i32) -> (i32, i32) {
    %c0_i32 = arith.constant 0 : i32
    %c0_i32_0 = arith.constant 0 : i32
    %c0_i32_1 = arith.constant 0 : i32
    return %c0_i32, %c0_i32_0 : i32, i32
  }
  func.func @transform_4(%arg0: i32, %arg1: i32) -> (i32, i32, i32) {
    %c0_i32 = arith.constant 0 : i32
    %c0_i32_0 = arith.constant 0 : i32
    %c0_i32_1 = arith.constant 0 : i32
    %c0_i32_2 = arith.constant 0 : i32
    return %c0_i32, %c0_i32_0, %c0_i32_1 : i32, i32, i32
  }
  func.func @transform_5(%arg0: i32, %arg1: i32) -> (i32, i32) {
    %c0_i32 = arith.constant 0 : i32
    %c0_i32_0 = arith.constant 0 : i32
    %c0_i32_1 = arith.constant 0 : i32
    return %c0_i32, %c0_i32_0 : i32, i32
  }
  func.func @transform_6(%arg0: i32, %arg1: i32) -> (i32, i32, i32) {
    %c0_i32 = arith.constant 0 : i32
    %c0_i32_0 = arith.constant 0 : i32
    %c0_i32_1 = arith.constant 0 : i32
    %c0_i32_2 = arith.constant 0 : i32
    return %c0_i32, %c0_i32_0, %c0_i32_1 : i32, i32, i32
  }
  func.func @transform_7(%arg0: i32, %arg1: i32) -> (i32, i32) {
    %c0_i32 = arith.constant 0 : i32
    %c0_i32_0 = arith.constant 0 : i32
    %c0_i32_1 = arith.constant 0 : i32
    return %c0_i32, %c0_i32_0 : i32, i32
  }
  func.func @transform_8(%arg0: i32, %arg1: i32) -> (i32, i32, i32) {
    %c0_i32 = arith.constant 0 : i32
    %c0_i32_0 = arith.constant 0 : i32
    %c0_i32_1 = arith.constant 0 : i32
    %c0_i32_2 = arith.constant 0 : i32
    return %c0_i32, %c0_i32_0, %c0_i32_1 : i32, i32, i32
  }
  func.func @transform_9(%arg0: i32, %arg1: i32) -> (i32, i32) {
    %c0_i32 = arith.constant 0 : i32
    %c0_i32_0 = arith.constant 0 : i32
    %c0_i32_1 = arith.constant 0 : i32
    return %c0_i32, %c0_i32_0 : i32, i32
  }
  func.func @transform_10(%arg0: i32, %arg1: i32) -> (i32, i32) {
    %c0_i32 = arith.constant 0 : i32
    %c0_i32_0 = arith.constant 0 : i32
    %c0_i32_1 = arith.constant 0 : i32
    return %c0_i32, %c0_i32_0 : i32, i32
  }
  func.func @transform_11(%arg0: i32, %arg1: i32) -> (i32, i32) {
    %c0_i32 = arith.constant 0 : i32
    %c0_i32_0 = arith.constant 0 : i32
    %c0_i32_1 = arith.constant 0 : i32
    return %c0_i32, %c0_i32_0 : i32, i32
  }
  func.func @transform_12(%arg0: i32, %arg1: i32) -> (i32, i32) {
    %c0_i32 = arith.constant 0 : i32
    %c0_i32_0 = arith.constant 0 : i32
    %c0_i32_1 = arith.constant 0 : i32
    return %c0_i32, %c0_i32_0 : i32, i32
  }
  func.func @transform_13(%arg0: i32, %arg1: i32) -> (i32, i32) {
    %c0_i32 = arith.constant 0 : i32
    %c0_i32_0 = arith.constant 0 : i32
    %c0_i32_1 = arith.constant 0 : i32
    return %c0_i32, %c0_i32_0 : i32, i32
  }
  func.func @transform_14(%arg0: i32, %arg1: i32) -> (i32, i32) {
    %c0_i32 = arith.constant 0 : i32
    %c0_i32_0 = arith.constant 0 : i32
    %c0_i32_1 = arith.constant 0 : i32
    return %c0_i32, %c0_i32_0 : i32, i32
  }
  func.func @transform_15(%arg0: i32, %arg1: i32) -> (i32, i32, i32) {
    %c0_i32 = arith.constant 0 : i32
    %c0_i32_0 = arith.constant 0 : i32
    return %arg0, %arg1, %c0_i32 : i32, i32, i32
  }
}

module attributes {stable_mosaic.version = 11 : i64} {
  func.func @_transformer_block_kernel(%arg0: i32, %arg1: i32, %arg2: memref<1x8x128xf32, #tpu.memory_space<vmem>>, %arg3: memref<1x128x8xf32, #tpu.memory_space<vmem>>, %arg4: memref<1x8x128xf32, #tpu.memory_space<vmem>>, %arg5: memref<128x128xf32, #tpu.memory_space<vmem>>, %arg6: memref<4x32x128xf32, #tpu.memory_space<vmem>>, %arg7: memref<32x4xf32, #tpu.memory_space<vmem>>, %arg8: memref<4x128x32xf32, #tpu.memory_space<vmem>>, %arg9: memref<4x32xf32, #tpu.memory_space<vmem>>, %arg10: memref<4x32x128xf32, #tpu.memory_space<vmem>>, %arg11: memref<32x128xf32, #tpu.memory_space<vmem>>, %arg12: memref<128x32xf32, #tpu.memory_space<vmem>>, %arg13: memref<7x128xf32, #tpu.memory_space<vmem>>, %arg14: memref<128x256xf32, #tpu.memory_space<vmem>>, %arg15: memref<1x256xf32, #tpu.memory_space<vmem>>, %arg16: memref<256x128xf32, #tpu.memory_space<vmem>>, %arg17: memref<1x8x128xf32, #tpu.memory_space<vmem>>, %arg18: memref<32x128xf32, #tpu.memory_space<vmem>>, %arg19: memref<4x128x128xf32, #tpu.memory_space<vmem>>) attributes {dimension_semantics = [#tpu.dimension_semantics<parallel>, #tpu.dimension_semantics<arbitrary>], iteration_bounds = array<i64: 2, 1>, scalar_prefetch = 0 : i64, scratch_operands = 2 : i64, tpu.core_type = #tpu.core_type<tc>, window_params = [{transform_indices = @transform_0, window_bounds = array<i64: 1, 8, 128>}, {transform_indices = @transform_1, window_bounds = array<i64: 1, 128, 8>}, {transform_indices = @transform_2, window_bounds = array<i64: 1, 8, 128>}, {pipeline_mode = #tpu.pipeline_mode<synchronous>, transform_indices = @transform_3, window_bounds = array<i64: 128, 128>}, {pipeline_mode = #tpu.pipeline_mode<synchronous>, transform_indices = @transform_4, window_bounds = array<i64: 4, 32, 128>}, {pipeline_mode = #tpu.pipeline_mode<synchronous>, transform_indices = @transform_5, window_bounds = array<i64: 32, 4>}, {pipeline_mode = #tpu.pipeline_mode<synchronous>, transform_indices = @transform_6, window_bounds = array<i64: 4, 128, 32>}, {pipeline_mode = #tpu.pipeline_mode<synchronous>, transform_indices = @transform_7, window_bounds = array<i64: 4, 32>}, {pipeline_mode = #tpu.pipeline_mode<synchronous>, transform_indices = @transform_8, window_bounds = array<i64: 4, 32, 128>}, {pipeline_mode = #tpu.pipeline_mode<synchronous>, transform_indices = @transform_9, window_bounds = array<i64: 32, 128>}, {pipeline_mode = #tpu.pipeline_mode<synchronous>, transform_indices = @transform_10, window_bounds = array<i64: 128, 32>}, {pipeline_mode = #tpu.pipeline_mode<synchronous>, transform_indices = @transform_11, window_bounds = array<i64: 7, 128>}, {pipeline_mode = #tpu.pipeline_mode<synchronous>, transform_indices = @transform_12, window_bounds = array<i64: 128, 256>}, {pipeline_mode = #tpu.pipeline_mode<synchronous>, transform_indices = @transform_13, window_bounds = array<i64: 1, 256>}, {pipeline_mode = #tpu.pipeline_mode<synchronous>, transform_indices = @transform_14, window_bounds = array<i64: 256, 128>}, {transform_indices = @transform_15, window_bounds = array<i64: 1, 8, 128>}]} {
    %c0_i32 = arith.constant 0 : i32
    %0 = arith.cmpi eq, %arg1, %c0_i32 : i32
    %1 = arith.extui %0 : i1 to i32
    %c0_i32_0 = arith.constant 0 : i32
    %2 = arith.cmpi ne, %1, %c0_i32_0 : i32
    scf.if %2 {
      %c0_137 = arith.constant 0 : index
      %c0_138 = arith.constant 0 : index
      %c0_139 = arith.constant 0 : index
      %405 = vector.load %arg3[%c0_137, %c0_138, %c0_139] : memref<1x128x8xf32, #tpu.memory_space<vmem>>, vector<1x128x8xf32>
      %406 = vector.shape_cast %405 : vector<1x128x8xf32> to vector<128x8xf32>
      %c0_140 = arith.constant 0 : index
      %c0_141 = arith.constant 0 : index
      %c0_142 = arith.constant 0 : index
      %407 = vector.load %arg4[%c0_140, %c0_141, %c0_142] : memref<1x8x128xf32, #tpu.memory_space<vmem>>, vector<1x8x128xf32>
      %408 = vector.shape_cast %407 : vector<1x8x128xf32> to vector<8x128xf32>
      %c0_143 = arith.constant 0 : index
      %c0_144 = arith.constant 0 : index
      %c0_145 = arith.constant 0 : index
      %409 = vector.load %arg6[%c0_143, %c0_144, %c0_145] : memref<4x32x128xf32, #tpu.memory_space<vmem>>, vector<1x32x128xf32>
      %410 = vector.shape_cast %409 : vector<1x32x128xf32> to vector<32x128xf32>
      %cst_146 = arith.constant dense<0.000000e+00> : vector<32x8xf32>
      %411 = tpu.matmul %410, %406, %cst_146 {dimension_numbers = #tpu.dot_dimension_numbers<[1], [0], [0], [1], [0, 0, 1, 1], [], []>} : vector<32x128xf32>, vector<128x8xf32>, vector<32x8xf32> -> vector<32x8xf32>
      %c0_147 = arith.constant 0 : index
      %c0_148 = arith.constant 0 : index
      %412 = vector.load %arg7[%c0_147, %c0_148] : memref<32x4xf32, #tpu.memory_space<vmem>>, vector<32x1xf32>
      %413 = vector.broadcast %412 : vector<32x1xf32> to vector<32x8xf32>
      %414 = arith.addf %411, %413 : vector<32x8xf32>
      %c0_149 = arith.constant 0 : index
      %c0_150 = arith.constant 0 : index
      %c0_151 = arith.constant 0 : index
      %415 = vector.load %arg8[%c0_149, %c0_150, %c0_151] : memref<4x128x32xf32, #tpu.memory_space<vmem>>, vector<1x128x32xf32>
      %416 = vector.shape_cast %415 : vector<1x128x32xf32> to vector<128x32xf32>
      %cst_152 = arith.constant dense<0.000000e+00> : vector<8x32xf32>
      %417 = tpu.matmul %408, %416, %cst_152 {dimension_numbers = #tpu.dot_dimension_numbers<[1], [0], [0], [1], [0, 0, 1, 1], [], []>} : vector<8x128xf32>, vector<128x32xf32>, vector<8x32xf32> -> vector<8x32xf32>
      %c0_153 = arith.constant 0 : index
      %c0_154 = arith.constant 0 : index
      %418 = vector.load %arg9[%c0_153, %c0_154] : memref<4x32xf32, #tpu.memory_space<vmem>>, vector<1x32xf32>
      %419 = vector.broadcast %418 : vector<1x32xf32> to vector<8x32xf32>
      %420 = arith.addf %417, %419 : vector<8x32xf32>
      %c1_155 = arith.constant 1 : index
      %c0_156 = arith.constant 0 : index
      %c0_157 = arith.constant 0 : index
      %421 = vector.load %arg6[%c1_155, %c0_156, %c0_157] : memref<4x32x128xf32, #tpu.memory_space<vmem>>, vector<1x32x128xf32>
      %422 = vector.shape_cast %421 : vector<1x32x128xf32> to vector<32x128xf32>
      %cst_158 = arith.constant dense<0.000000e+00> : vector<32x8xf32>
      %423 = tpu.matmul %422, %406, %cst_158 {dimension_numbers = #tpu.dot_dimension_numbers<[1], [0], [0], [1], [0, 0, 1, 1], [], []>} : vector<32x128xf32>, vector<128x8xf32>, vector<32x8xf32> -> vector<32x8xf32>
      %c0_159 = arith.constant 0 : index
      %c1_160 = arith.constant 1 : index
      %424 = vector.load %arg7[%c0_159, %c1_160] : memref<32x4xf32, #tpu.memory_space<vmem>>, vector<32x1xf32>
      %425 = vector.broadcast %424 : vector<32x1xf32> to vector<32x8xf32>
      %426 = arith.addf %423, %425 : vector<32x8xf32>
      %c1_161 = arith.constant 1 : index
      %c0_162 = arith.constant 0 : index
      %c0_163 = arith.constant 0 : index
      %427 = vector.load %arg8[%c1_161, %c0_162, %c0_163] : memref<4x128x32xf32, #tpu.memory_space<vmem>>, vector<1x128x32xf32>
      %428 = vector.shape_cast %427 : vector<1x128x32xf32> to vector<128x32xf32>
      %cst_164 = arith.constant dense<0.000000e+00> : vector<8x32xf32>
      %429 = tpu.matmul %408, %428, %cst_164 {dimension_numbers = #tpu.dot_dimension_numbers<[1], [0], [0], [1], [0, 0, 1, 1], [], []>} : vector<8x128xf32>, vector<128x32xf32>, vector<8x32xf32> -> vector<8x32xf32>
      %c1_165 = arith.constant 1 : index
      %c0_166 = arith.constant 0 : index
      %430 = vector.load %arg9[%c1_165, %c0_166] : memref<4x32xf32, #tpu.memory_space<vmem>>, vector<1x32xf32>
      %431 = vector.broadcast %430 : vector<1x32xf32> to vector<8x32xf32>
      %432 = arith.addf %429, %431 : vector<8x32xf32>
      %c2_167 = arith.constant 2 : index
      %c0_168 = arith.constant 0 : index
      %c0_169 = arith.constant 0 : index
      %433 = vector.load %arg6[%c2_167, %c0_168, %c0_169] : memref<4x32x128xf32, #tpu.memory_space<vmem>>, vector<1x32x128xf32>
      %434 = vector.shape_cast %433 : vector<1x32x128xf32> to vector<32x128xf32>
      %cst_170 = arith.constant dense<0.000000e+00> : vector<32x8xf32>
      %435 = tpu.matmul %434, %406, %cst_170 {dimension_numbers = #tpu.dot_dimension_numbers<[1], [0], [0], [1], [0, 0, 1, 1], [], []>} : vector<32x128xf32>, vector<128x8xf32>, vector<32x8xf32> -> vector<32x8xf32>
      %c0_171 = arith.constant 0 : index
      %c2_172 = arith.constant 2 : index
      %436 = vector.load %arg7[%c0_171, %c2_172] : memref<32x4xf32, #tpu.memory_space<vmem>>, vector<32x1xf32>
      %437 = vector.broadcast %436 : vector<32x1xf32> to vector<32x8xf32>
      %438 = arith.addf %435, %437 : vector<32x8xf32>
      %c2_173 = arith.constant 2 : index
      %c0_174 = arith.constant 0 : index
      %c0_175 = arith.constant 0 : index
      %439 = vector.load %arg8[%c2_173, %c0_174, %c0_175] : memref<4x128x32xf32, #tpu.memory_space<vmem>>, vector<1x128x32xf32>
      %440 = vector.shape_cast %439 : vector<1x128x32xf32> to vector<128x32xf32>
      %cst_176 = arith.constant dense<0.000000e+00> : vector<8x32xf32>
      %441 = tpu.matmul %408, %440, %cst_176 {dimension_numbers = #tpu.dot_dimension_numbers<[1], [0], [0], [1], [0, 0, 1, 1], [], []>} : vector<8x128xf32>, vector<128x32xf32>, vector<8x32xf32> -> vector<8x32xf32>
      %c2_177 = arith.constant 2 : index
      %c0_178 = arith.constant 0 : index
      %442 = vector.load %arg9[%c2_177, %c0_178] : memref<4x32xf32, #tpu.memory_space<vmem>>, vector<1x32xf32>
      %443 = vector.broadcast %442 : vector<1x32xf32> to vector<8x32xf32>
      %444 = arith.addf %441, %443 : vector<8x32xf32>
      %c3_179 = arith.constant 3 : index
      %c0_180 = arith.constant 0 : index
      %c0_181 = arith.constant 0 : index
      %445 = vector.load %arg6[%c3_179, %c0_180, %c0_181] : memref<4x32x128xf32, #tpu.memory_space<vmem>>, vector<1x32x128xf32>
      %446 = vector.shape_cast %445 : vector<1x32x128xf32> to vector<32x128xf32>
      %cst_182 = arith.constant dense<0.000000e+00> : vector<32x8xf32>
      %447 = tpu.matmul %446, %406, %cst_182 {dimension_numbers = #tpu.dot_dimension_numbers<[1], [0], [0], [1], [0, 0, 1, 1], [], []>} : vector<32x128xf32>, vector<128x8xf32>, vector<32x8xf32> -> vector<32x8xf32>
      %c0_183 = arith.constant 0 : index
      %c3_184 = arith.constant 3 : index
      %448 = vector.load %arg7[%c0_183, %c3_184] : memref<32x4xf32, #tpu.memory_space<vmem>>, vector<32x1xf32>
      %449 = vector.broadcast %448 : vector<32x1xf32> to vector<32x8xf32>
      %450 = arith.addf %447, %449 : vector<32x8xf32>
      %c3_185 = arith.constant 3 : index
      %c0_186 = arith.constant 0 : index
      %c0_187 = arith.constant 0 : index
      %451 = vector.load %arg8[%c3_185, %c0_186, %c0_187] : memref<4x128x32xf32, #tpu.memory_space<vmem>>, vector<1x128x32xf32>
      %452 = vector.shape_cast %451 : vector<1x128x32xf32> to vector<128x32xf32>
      %cst_188 = arith.constant dense<0.000000e+00> : vector<8x32xf32>
      %453 = tpu.matmul %408, %452, %cst_188 {dimension_numbers = #tpu.dot_dimension_numbers<[1], [0], [0], [1], [0, 0, 1, 1], [], []>} : vector<8x128xf32>, vector<128x32xf32>, vector<8x32xf32> -> vector<8x32xf32>
      %c3_189 = arith.constant 3 : index
      %c0_190 = arith.constant 0 : index
      %454 = vector.load %arg9[%c3_189, %c0_190] : memref<4x32xf32, #tpu.memory_space<vmem>>, vector<1x32xf32>
      %455 = vector.broadcast %454 : vector<1x32xf32> to vector<8x32xf32>
      %456 = arith.addf %453, %455 : vector<8x32xf32>
      %457 = tpu.concatenate %414, %426, %438, %450 in 1 : vector<32x8xf32>, vector<32x8xf32>, vector<32x8xf32>, vector<32x8xf32> -> vector<32x32xf32>
      %458 = tpu.concatenate %420, %432, %444, %456 in 0 : vector<8x32xf32>, vector<8x32xf32>, vector<8x32xf32>, vector<8x32xf32> -> vector<32x32xf32>
      %459 = tpu.concatenate %457, %457, %457, %457 in 1 : vector<32x32xf32>, vector<32x32xf32>, vector<32x32xf32>, vector<32x32xf32> -> vector<32x128xf32>
      %c0_191 = arith.constant 0 : index
      %c0_192 = arith.constant 0 : index
      %460 = vector.load %arg11[%c0_191, %c0_192] : memref<32x128xf32, #tpu.memory_space<vmem>>, vector<32x128xf32>
      %461 = arith.mulf %459, %460 : vector<32x128xf32>
      %c0_193 = arith.constant 0 : index
      %c0_194 = arith.constant 0 : index
      %462 = vector.load %arg18[%c0_193, %c0_194] : memref<32x128xf32, #tpu.memory_space<vmem>>, vector<32x128xf32>
      tpu.vector_store %arg18[%c0_193, %c0_194], %461 {strides = array<i32>} : memref<32x128xf32, #tpu.memory_space<vmem>>, vector<32x128xf32>,
      %463 = tpu.concatenate %458, %458, %458, %458 in 0 : vector<32x32xf32>, vector<32x32xf32>, vector<32x32xf32>, vector<32x32xf32> -> vector<128x32xf32>
      %c0_195 = arith.constant 0 : index
      %c0_196 = arith.constant 0 : index
      %464 = vector.load %arg12[%c0_195, %c0_196] : memref<128x32xf32, #tpu.memory_space<vmem>>, vector<128x32xf32>
      %465 = arith.mulf %463, %464 : vector<128x32xf32>
      %c0_197 = arith.constant 0 : index
      %c0_198 = arith.constant 0 : index
      %c0_199 = arith.constant 0 : index
      %466 = vector.load %arg10[%c0_197, %c0_198, %c0_199] : memref<4x32x128xf32, #tpu.memory_space<vmem>>, vector<1x32x128xf32>
      %467 = vector.shape_cast %466 : vector<1x32x128xf32> to vector<32x128xf32>
      %cst_200 = arith.constant dense<0.000000e+00> : vector<128x128xf32>
      %468 = tpu.matmul %465, %467, %cst_200 {dimension_numbers = #tpu.dot_dimension_numbers<[1], [0], [0], [1], [0, 0, 1, 1], [], []>} : vector<128x32xf32>, vector<32x128xf32>, vector<128x128xf32> -> vector<128x128xf32>
      %c0_201 = arith.constant 0 : index
      %c0_202 = arith.constant 0 : index
      %c0_203 = arith.constant 0 : index
      %469 = vector.load %arg19[%c0_201, %c0_202, %c0_203] : memref<4x128x128xf32, #tpu.memory_space<vmem>>, vector<1x128x128xf32>
      %470 = vector.shape_cast %469 : vector<1x128x128xf32> to vector<128x128xf32>
      %471 = vector.shape_cast %468 : vector<128x128xf32> to vector<1x128x128xf32>
      tpu.vector_store %arg19[%c0_201, %c0_202, %c0_203], %471 {strides = array<i32>} : memref<4x128x128xf32, #tpu.memory_space<vmem>>, vector<1x128x128xf32>,
      %c1_204 = arith.constant 1 : index
      %c0_205 = arith.constant 0 : index
      %c0_206 = arith.constant 0 : index
      %472 = vector.load %arg10[%c1_204, %c0_205, %c0_206] : memref<4x32x128xf32, #tpu.memory_space<vmem>>, vector<1x32x128xf32>
      %473 = vector.shape_cast %472 : vector<1x32x128xf32> to vector<32x128xf32>
      %cst_207 = arith.constant dense<0.000000e+00> : vector<128x128xf32>
      %474 = tpu.matmul %465, %473, %cst_207 {dimension_numbers = #tpu.dot_dimension_numbers<[1], [0], [0], [1], [0, 0, 1, 1], [], []>} : vector<128x32xf32>, vector<32x128xf32>, vector<128x128xf32> -> vector<128x128xf32>
      %c1_208 = arith.constant 1 : index
      %c0_209 = arith.constant 0 : index
      %c0_210 = arith.constant 0 : index
      %475 = vector.load %arg19[%c1_208, %c0_209, %c0_210] : memref<4x128x128xf32, #tpu.memory_space<vmem>>, vector<1x128x128xf32>
      %476 = vector.shape_cast %475 : vector<1x128x128xf32> to vector<128x128xf32>
      %477 = vector.shape_cast %474 : vector<128x128xf32> to vector<1x128x128xf32>
      tpu.vector_store %arg19[%c1_208, %c0_209, %c0_210], %477 {strides = array<i32>} : memref<4x128x128xf32, #tpu.memory_space<vmem>>, vector<1x128x128xf32>,
      %c2_211 = arith.constant 2 : index
      %c0_212 = arith.constant 0 : index
      %c0_213 = arith.constant 0 : index
      %478 = vector.load %arg10[%c2_211, %c0_212, %c0_213] : memref<4x32x128xf32, #tpu.memory_space<vmem>>, vector<1x32x128xf32>
      %479 = vector.shape_cast %478 : vector<1x32x128xf32> to vector<32x128xf32>
      %cst_214 = arith.constant dense<0.000000e+00> : vector<128x128xf32>
      %480 = tpu.matmul %465, %479, %cst_214 {dimension_numbers = #tpu.dot_dimension_numbers<[1], [0], [0], [1], [0, 0, 1, 1], [], []>} : vector<128x32xf32>, vector<32x128xf32>, vector<128x128xf32> -> vector<128x128xf32>
      %c2_215 = arith.constant 2 : index
      %c0_216 = arith.constant 0 : index
      %c0_217 = arith.constant 0 : index
      %481 = vector.load %arg19[%c2_215, %c0_216, %c0_217] : memref<4x128x128xf32, #tpu.memory_space<vmem>>, vector<1x128x128xf32>
      %482 = vector.shape_cast %481 : vector<1x128x128xf32> to vector<128x128xf32>
      %483 = vector.shape_cast %480 : vector<128x128xf32> to vector<1x128x128xf32>
      tpu.vector_store %arg19[%c2_215, %c0_216, %c0_217], %483 {strides = array<i32>} : memref<4x128x128xf32, #tpu.memory_space<vmem>>, vector<1x128x128xf32>,
      %c3_218 = arith.constant 3 : index
      %c0_219 = arith.constant 0 : index
      %c0_220 = arith.constant 0 : index
      %484 = vector.load %arg10[%c3_218, %c0_219, %c0_220] : memref<4x32x128xf32, #tpu.memory_space<vmem>>, vector<1x32x128xf32>
      %485 = vector.shape_cast %484 : vector<1x32x128xf32> to vector<32x128xf32>
      %cst_221 = arith.constant dense<0.000000e+00> : vector<128x128xf32>
      %486 = tpu.matmul %465, %485, %cst_221 {dimension_numbers = #tpu.dot_dimension_numbers<[1], [0], [0], [1], [0, 0, 1, 1], [], []>} : vector<128x32xf32>, vector<32x128xf32>, vector<128x128xf32> -> vector<128x128xf32>
      %c3_222 = arith.constant 3 : index
      %c0_223 = arith.constant 0 : index
      %c0_224 = arith.constant 0 : index
      %487 = vector.load %arg19[%c3_222, %c0_223, %c0_224] : memref<4x128x128xf32, #tpu.memory_space<vmem>>, vector<1x128x128xf32>
      %488 = vector.shape_cast %487 : vector<1x128x128xf32> to vector<128x128xf32>
      %489 = vector.shape_cast %486 : vector<128x128xf32> to vector<1x128x128xf32>
      tpu.vector_store %arg19[%c3_222, %c0_223, %c0_224], %489 {strides = array<i32>} : memref<4x128x128xf32, #tpu.memory_space<vmem>>, vector<1x128x128xf32>,
    } else {
    }
    %c0 = arith.constant 0 : index
    %c0_1 = arith.constant 0 : index
    %c0_2 = arith.constant 0 : index
    %3 = vector.load %arg2[%c0, %c0_1, %c0_2] : memref<1x8x128xf32, #tpu.memory_space<vmem>>, vector<1x8x128xf32>
    %4 = vector.shape_cast %3 : vector<1x8x128xf32> to vector<8x128xf32>
    %c0_3 = arith.constant 0 : index
    %c0_4 = arith.constant 0 : index
    %5 = vector.load %arg5[%c0_3, %c0_4] : memref<128x128xf32, #tpu.memory_space<vmem>>, vector<128x128xf32>
    %cst = arith.constant dense<0.000000e+00> : vector<8x128xf32>
    %6 = tpu.matmul %4, %5, %cst {dimension_numbers = #tpu.dot_dimension_numbers<[1], [0], [0], [1], [0, 0, 1, 1], [], []>} : vector<8x128xf32>, vector<128x128xf32>, vector<8x128xf32> -> vector<8x128xf32>
    %c0_5 = arith.constant 0 : index
    %c0_6 = arith.constant 0 : index
    %7 = vector.load %arg13[%c0_5, %c0_6] : memref<7x128xf32, #tpu.memory_space<vmem>>, vector<1x128xf32>
    %8 = vector.broadcast %7 : vector<1x128xf32> to vector<8x128xf32>
    %9 = arith.addf %6, %8 : vector<8x128xf32>
    %c0_7 = arith.constant 0 : index
    %c0_8 = arith.constant 0 : index
    %10 = vector.load %arg18[%c0_7, %c0_8] : memref<32x128xf32, #tpu.memory_space<vmem>>, vector<32x128xf32>
    %cst_9 = arith.constant 0.000000e+00 : f32
    %11 = vector.broadcast %cst_9 : f32 to vector<8x128xf32>
    %12 = vector.extract_strided_slice %9 {offsets = [0, 0], sizes = [8, 32], strides = [1, 1]} : vector<8x128xf32> to vector<8x32xf32>
    %cst_10 = arith.constant dense<0.000000e+00> : vector<8x128xf32>
    %13 = tpu.matmul %12, %10, %cst_10 {dimension_numbers = #tpu.dot_dimension_numbers<[1], [0], [0], [1], [0, 0, 1, 1], [], []>} : vector<8x32xf32>, vector<32x128xf32>, vector<8x128xf32> -> vector<8x128xf32>
    %14 = vector.extract_strided_slice %13 {offsets = [0, 0], sizes = [8, 32], strides = [1, 1]} : vector<8x128xf32> to vector<8x32xf32>
    %cst_11 = arith.constant dense<0xFF800000> : vector<8xf32>
    %15 = vector.multi_reduction <maximumf>, %14, %cst_11 [1] : vector<8x32xf32> to vector<8xf32>
    %16 = vector.shape_cast %15 : vector<8xf32> to vector<8x1xf32>
    %17 = vector.broadcast %16 : vector<8x1xf32> to vector<8x32xf32>
    %18 = arith.subf %14, %17 : vector<8x32xf32>
    %19 = math.exp %18 : vector<8x32xf32>
    %cst_12 = arith.constant dense<0.000000e+00> : vector<8xf32>
    %20 = vector.multi_reduction <add>, %19, %cst_12 [1] : vector<8x32xf32> to vector<8xf32>
    %21 = vector.shape_cast %20 : vector<8xf32> to vector<8x1xf32>
    %cst_13 = arith.constant 1.000000e+00 : f32
    %22 = vector.broadcast %cst_13 : f32 to vector<8x1xf32>
    %23 = arith.divf %22, %21 : vector<8x1xf32>
    %24 = vector.broadcast %23 : vector<8x1xf32> to vector<8x32xf32>
    %25 = arith.mulf %19, %24 : vector<8x32xf32>
    %26 = vector.extract_strided_slice %13 {offsets = [0, 32], sizes = [8, 32], strides = [1, 1]} : vector<8x128xf32> to vector<8x32xf32>
    %cst_14 = arith.constant dense<0xFF800000> : vector<8xf32>
    %27 = vector.multi_reduction <maximumf>, %26, %cst_14 [1] : vector<8x32xf32> to vector<8xf32>
    %28 = vector.shape_cast %27 : vector<8xf32> to vector<8x1xf32>
    %29 = vector.broadcast %28 : vector<8x1xf32> to vector<8x32xf32>
    %30 = arith.subf %26, %29 : vector<8x32xf32>
    %31 = math.exp %30 : vector<8x32xf32>
    %cst_15 = arith.constant dense<0.000000e+00> : vector<8xf32>
    %32 = vector.multi_reduction <add>, %31, %cst_15 [1] : vector<8x32xf32> to vector<8xf32>
    %33 = vector.shape_cast %32 : vector<8xf32> to vector<8x1xf32>
    %cst_16 = arith.constant 1.000000e+00 : f32
    %34 = vector.broadcast %cst_16 : f32 to vector<8x1xf32>
    %35 = arith.divf %34, %33 : vector<8x1xf32>
    %36 = vector.broadcast %35 : vector<8x1xf32> to vector<8x32xf32>
    %37 = arith.mulf %31, %36 : vector<8x32xf32>
    %38 = vector.extract_strided_slice %13 {offsets = [0, 64], sizes = [8, 32], strides = [1, 1]} : vector<8x128xf32> to vector<8x32xf32>
    %cst_17 = arith.constant dense<0xFF800000> : vector<8xf32>
    %39 = vector.multi_reduction <maximumf>, %38, %cst_17 [1] : vector<8x32xf32> to vector<8xf32>
    %40 = vector.shape_cast %39 : vector<8xf32> to vector<8x1xf32>
    %41 = vector.broadcast %40 : vector<8x1xf32> to vector<8x32xf32>
    %42 = arith.subf %38, %41 : vector<8x32xf32>
    %43 = math.exp %42 : vector<8x32xf32>
    %cst_18 = arith.constant dense<0.000000e+00> : vector<8xf32>
    %44 = vector.multi_reduction <add>, %43, %cst_18 [1] : vector<8x32xf32> to vector<8xf32>
    %45 = vector.shape_cast %44 : vector<8xf32> to vector<8x1xf32>
    %cst_19 = arith.constant 1.000000e+00 : f32
    %46 = vector.broadcast %cst_19 : f32 to vector<8x1xf32>
    %47 = arith.divf %46, %45 : vector<8x1xf32>
    %48 = vector.broadcast %47 : vector<8x1xf32> to vector<8x32xf32>
    %49 = arith.mulf %43, %48 : vector<8x32xf32>
    %50 = vector.extract_strided_slice %13 {offsets = [0, 96], sizes = [8, 32], strides = [1, 1]} : vector<8x128xf32> to vector<8x32xf32>
    %cst_20 = arith.constant dense<0xFF800000> : vector<8xf32>
    %51 = vector.multi_reduction <maximumf>, %50, %cst_20 [1] : vector<8x32xf32> to vector<8xf32>
    %52 = vector.shape_cast %51 : vector<8xf32> to vector<8x1xf32>
    %53 = vector.broadcast %52 : vector<8x1xf32> to vector<8x32xf32>
    %54 = arith.subf %50, %53 : vector<8x32xf32>
    %55 = math.exp %54 : vector<8x32xf32>
    %cst_21 = arith.constant dense<0.000000e+00> : vector<8xf32>
    %56 = vector.multi_reduction <add>, %55, %cst_21 [1] : vector<8x32xf32> to vector<8xf32>
    %57 = vector.shape_cast %56 : vector<8xf32> to vector<8x1xf32>
    %cst_22 = arith.constant 1.000000e+00 : f32
    %58 = vector.broadcast %cst_22 : f32 to vector<8x1xf32>
    %59 = arith.divf %58, %57 : vector<8x1xf32>
    %60 = vector.broadcast %59 : vector<8x1xf32> to vector<8x32xf32>
    %61 = arith.mulf %55, %60 : vector<8x32xf32>
    %62 = tpu.concatenate %25, %37, %49, %61 in 1 : vector<8x32xf32>, vector<8x32xf32>, vector<8x32xf32>, vector<8x32xf32> -> vector<8x128xf32>
    %c0_23 = arith.constant 0 : index
    %c0_24 = arith.constant 0 : index
    %c0_25 = arith.constant 0 : index
    %63 = vector.load %arg19[%c0_23, %c0_24, %c0_25] : memref<4x128x128xf32, #tpu.memory_space<vmem>>, vector<1x128x128xf32>
    %64 = vector.shape_cast %63 : vector<1x128x128xf32> to vector<128x128xf32>
    %cst_26 = arith.constant dense<0.000000e+00> : vector<8x128xf32>
    %65 = tpu.matmul %62, %64, %cst_26 {dimension_numbers = #tpu.dot_dimension_numbers<[1], [0], [0], [1], [0, 0, 1, 1], [], []>} : vector<8x128xf32>, vector<128x128xf32>, vector<8x128xf32> -> vector<8x128xf32>
    %66 = arith.addf %11, %65 : vector<8x128xf32>
    %67 = vector.extract_strided_slice %9 {offsets = [0, 32], sizes = [8, 32], strides = [1, 1]} : vector<8x128xf32> to vector<8x32xf32>
    %cst_27 = arith.constant dense<0.000000e+00> : vector<8x128xf32>
    %68 = tpu.matmul %67, %10, %cst_27 {dimension_numbers = #tpu.dot_dimension_numbers<[1], [0], [0], [1], [0, 0, 1, 1], [], []>} : vector<8x32xf32>, vector<32x128xf32>, vector<8x128xf32> -> vector<8x128xf32>
    %69 = vector.extract_strided_slice %68 {offsets = [0, 0], sizes = [8, 32], strides = [1, 1]} : vector<8x128xf32> to vector<8x32xf32>
    %cst_28 = arith.constant dense<0xFF800000> : vector<8xf32>
    %70 = vector.multi_reduction <maximumf>, %69, %cst_28 [1] : vector<8x32xf32> to vector<8xf32>
    %71 = vector.shape_cast %70 : vector<8xf32> to vector<8x1xf32>
    %72 = vector.broadcast %71 : vector<8x1xf32> to vector<8x32xf32>
    %73 = arith.subf %69, %72 : vector<8x32xf32>
    %74 = math.exp %73 : vector<8x32xf32>
    %cst_29 = arith.constant dense<0.000000e+00> : vector<8xf32>
    %75 = vector.multi_reduction <add>, %74, %cst_29 [1] : vector<8x32xf32> to vector<8xf32>
    %76 = vector.shape_cast %75 : vector<8xf32> to vector<8x1xf32>
    %cst_30 = arith.constant 1.000000e+00 : f32
    %77 = vector.broadcast %cst_30 : f32 to vector<8x1xf32>
    %78 = arith.divf %77, %76 : vector<8x1xf32>
    %79 = vector.broadcast %78 : vector<8x1xf32> to vector<8x32xf32>
    %80 = arith.mulf %74, %79 : vector<8x32xf32>
    %81 = vector.extract_strided_slice %68 {offsets = [0, 32], sizes = [8, 32], strides = [1, 1]} : vector<8x128xf32> to vector<8x32xf32>
    %cst_31 = arith.constant dense<0xFF800000> : vector<8xf32>
    %82 = vector.multi_reduction <maximumf>, %81, %cst_31 [1] : vector<8x32xf32> to vector<8xf32>
    %83 = vector.shape_cast %82 : vector<8xf32> to vector<8x1xf32>
    %84 = vector.broadcast %83 : vector<8x1xf32> to vector<8x32xf32>
    %85 = arith.subf %81, %84 : vector<8x32xf32>
    %86 = math.exp %85 : vector<8x32xf32>
    %cst_32 = arith.constant dense<0.000000e+00> : vector<8xf32>
    %87 = vector.multi_reduction <add>, %86, %cst_32 [1] : vector<8x32xf32> to vector<8xf32>
    %88 = vector.shape_cast %87 : vector<8xf32> to vector<8x1xf32>
    %cst_33 = arith.constant 1.000000e+00 : f32
    %89 = vector.broadcast %cst_33 : f32 to vector<8x1xf32>
    %90 = arith.divf %89, %88 : vector<8x1xf32>
    %91 = vector.broadcast %90 : vector<8x1xf32> to vector<8x32xf32>
    %92 = arith.mulf %86, %91 : vector<8x32xf32>
    %93 = vector.extract_strided_slice %68 {offsets = [0, 64], sizes = [8, 32], strides = [1, 1]} : vector<8x128xf32> to vector<8x32xf32>
    %cst_34 = arith.constant dense<0xFF800000> : vector<8xf32>
    %94 = vector.multi_reduction <maximumf>, %93, %cst_34 [1] : vector<8x32xf32> to vector<8xf32>
    %95 = vector.shape_cast %94 : vector<8xf32> to vector<8x1xf32>
    %96 = vector.broadcast %95 : vector<8x1xf32> to vector<8x32xf32>
    %97 = arith.subf %93, %96 : vector<8x32xf32>
    %98 = math.exp %97 : vector<8x32xf32>
    %cst_35 = arith.constant dense<0.000000e+00> : vector<8xf32>
    %99 = vector.multi_reduction <add>, %98, %cst_35 [1] : vector<8x32xf32> to vector<8xf32>
    %100 = vector.shape_cast %99 : vector<8xf32> to vector<8x1xf32>
    %cst_36 = arith.constant 1.000000e+00 : f32
    %101 = vector.broadcast %cst_36 : f32 to vector<8x1xf32>
    %102 = arith.divf %101, %100 : vector<8x1xf32>
    %103 = vector.broadcast %102 : vector<8x1xf32> to vector<8x32xf32>
    %104 = arith.mulf %98, %103 : vector<8x32xf32>
    %105 = vector.extract_strided_slice %68 {offsets = [0, 96], sizes = [8, 32], strides = [1, 1]} : vector<8x128xf32> to vector<8x32xf32>
    %cst_37 = arith.constant dense<0xFF800000> : vector<8xf32>
    %106 = vector.multi_reduction <maximumf>, %105, %cst_37 [1] : vector<8x32xf32> to vector<8xf32>
    %107 = vector.shape_cast %106 : vector<8xf32> to vector<8x1xf32>
    %108 = vector.broadcast %107 : vector<8x1xf32> to vector<8x32xf32>
    %109 = arith.subf %105, %108 : vector<8x32xf32>
    %110 = math.exp %109 : vector<8x32xf32>
    %cst_38 = arith.constant dense<0.000000e+00> : vector<8xf32>
    %111 = vector.multi_reduction <add>, %110, %cst_38 [1] : vector<8x32xf32> to vector<8xf32>
    %112 = vector.shape_cast %111 : vector<8xf32> to vector<8x1xf32>
    %cst_39 = arith.constant 1.000000e+00 : f32
    %113 = vector.broadcast %cst_39 : f32 to vector<8x1xf32>
    %114 = arith.divf %113, %112 : vector<8x1xf32>
    %115 = vector.broadcast %114 : vector<8x1xf32> to vector<8x32xf32>
    %116 = arith.mulf %110, %115 : vector<8x32xf32>
    %117 = tpu.concatenate %80, %92, %104, %116 in 1 : vector<8x32xf32>, vector<8x32xf32>, vector<8x32xf32>, vector<8x32xf32> -> vector<8x128xf32>
    %c1 = arith.constant 1 : index
    %c0_40 = arith.constant 0 : index
    %c0_41 = arith.constant 0 : index
    %118 = vector.load %arg19[%c1, %c0_40, %c0_41] : memref<4x128x128xf32, #tpu.memory_space<vmem>>, vector<1x128x128xf32>
    %119 = vector.shape_cast %118 : vector<1x128x128xf32> to vector<128x128xf32>
    %cst_42 = arith.constant dense<0.000000e+00> : vector<8x128xf32>
    %120 = tpu.matmul %117, %119, %cst_42 {dimension_numbers = #tpu.dot_dimension_numbers<[1], [0], [0], [1], [0, 0, 1, 1], [], []>} : vector<8x128xf32>, vector<128x128xf32>, vector<8x128xf32> -> vector<8x128xf32>
    %121 = arith.addf %66, %120 : vector<8x128xf32>
    %122 = vector.extract_strided_slice %9 {offsets = [0, 64], sizes = [8, 32], strides = [1, 1]} : vector<8x128xf32> to vector<8x32xf32>
    %cst_43 = arith.constant dense<0.000000e+00> : vector<8x128xf32>
    %123 = tpu.matmul %122, %10, %cst_43 {dimension_numbers = #tpu.dot_dimension_numbers<[1], [0], [0], [1], [0, 0, 1, 1], [], []>} : vector<8x32xf32>, vector<32x128xf32>, vector<8x128xf32> -> vector<8x128xf32>
    %124 = vector.extract_strided_slice %123 {offsets = [0, 0], sizes = [8, 32], strides = [1, 1]} : vector<8x128xf32> to vector<8x32xf32>
    %cst_44 = arith.constant dense<0xFF800000> : vector<8xf32>
    %125 = vector.multi_reduction <maximumf>, %124, %cst_44 [1] : vector<8x32xf32> to vector<8xf32>
    %126 = vector.shape_cast %125 : vector<8xf32> to vector<8x1xf32>
    %127 = vector.broadcast %126 : vector<8x1xf32> to vector<8x32xf32>
    %128 = arith.subf %124, %127 : vector<8x32xf32>
    %129 = math.exp %128 : vector<8x32xf32>
    %cst_45 = arith.constant dense<0.000000e+00> : vector<8xf32>
    %130 = vector.multi_reduction <add>, %129, %cst_45 [1] : vector<8x32xf32> to vector<8xf32>
    %131 = vector.shape_cast %130 : vector<8xf32> to vector<8x1xf32>
    %cst_46 = arith.constant 1.000000e+00 : f32
    %132 = vector.broadcast %cst_46 : f32 to vector<8x1xf32>
    %133 = arith.divf %132, %131 : vector<8x1xf32>
    %134 = vector.broadcast %133 : vector<8x1xf32> to vector<8x32xf32>
    %135 = arith.mulf %129, %134 : vector<8x32xf32>
    %136 = vector.extract_strided_slice %123 {offsets = [0, 32], sizes = [8, 32], strides = [1, 1]} : vector<8x128xf32> to vector<8x32xf32>
    %cst_47 = arith.constant dense<0xFF800000> : vector<8xf32>
    %137 = vector.multi_reduction <maximumf>, %136, %cst_47 [1] : vector<8x32xf32> to vector<8xf32>
    %138 = vector.shape_cast %137 : vector<8xf32> to vector<8x1xf32>
    %139 = vector.broadcast %138 : vector<8x1xf32> to vector<8x32xf32>
    %140 = arith.subf %136, %139 : vector<8x32xf32>
    %141 = math.exp %140 : vector<8x32xf32>
    %cst_48 = arith.constant dense<0.000000e+00> : vector<8xf32>
    %142 = vector.multi_reduction <add>, %141, %cst_48 [1] : vector<8x32xf32> to vector<8xf32>
    %143 = vector.shape_cast %142 : vector<8xf32> to vector<8x1xf32>
    %cst_49 = arith.constant 1.000000e+00 : f32
    %144 = vector.broadcast %cst_49 : f32 to vector<8x1xf32>
    %145 = arith.divf %144, %143 : vector<8x1xf32>
    %146 = vector.broadcast %145 : vector<8x1xf32> to vector<8x32xf32>
    %147 = arith.mulf %141, %146 : vector<8x32xf32>
    %148 = vector.extract_strided_slice %123 {offsets = [0, 64], sizes = [8, 32], strides = [1, 1]} : vector<8x128xf32> to vector<8x32xf32>
    %cst_50 = arith.constant dense<0xFF800000> : vector<8xf32>
    %149 = vector.multi_reduction <maximumf>, %148, %cst_50 [1] : vector<8x32xf32> to vector<8xf32>
    %150 = vector.shape_cast %149 : vector<8xf32> to vector<8x1xf32>
    %151 = vector.broadcast %150 : vector<8x1xf32> to vector<8x32xf32>
    %152 = arith.subf %148, %151 : vector<8x32xf32>
    %153 = math.exp %152 : vector<8x32xf32>
    %cst_51 = arith.constant dense<0.000000e+00> : vector<8xf32>
    %154 = vector.multi_reduction <add>, %153, %cst_51 [1] : vector<8x32xf32> to vector<8xf32>
    %155 = vector.shape_cast %154 : vector<8xf32> to vector<8x1xf32>
    %cst_52 = arith.constant 1.000000e+00 : f32
    %156 = vector.broadcast %cst_52 : f32 to vector<8x1xf32>
    %157 = arith.divf %156, %155 : vector<8x1xf32>
    %158 = vector.broadcast %157 : vector<8x1xf32> to vector<8x32xf32>
    %159 = arith.mulf %153, %158 : vector<8x32xf32>
    %160 = vector.extract_strided_slice %123 {offsets = [0, 96], sizes = [8, 32], strides = [1, 1]} : vector<8x128xf32> to vector<8x32xf32>
    %cst_53 = arith.constant dense<0xFF800000> : vector<8xf32>
    %161 = vector.multi_reduction <maximumf>, %160, %cst_53 [1] : vector<8x32xf32> to vector<8xf32>
    %162 = vector.shape_cast %161 : vector<8xf32> to vector<8x1xf32>
    %163 = vector.broadcast %162 : vector<8x1xf32> to vector<8x32xf32>
    %164 = arith.subf %160, %163 : vector<8x32xf32>
    %165 = math.exp %164 : vector<8x32xf32>
    %cst_54 = arith.constant dense<0.000000e+00> : vector<8xf32>
    %166 = vector.multi_reduction <add>, %165, %cst_54 [1] : vector<8x32xf32> to vector<8xf32>
    %167 = vector.shape_cast %166 : vector<8xf32> to vector<8x1xf32>
    %cst_55 = arith.constant 1.000000e+00 : f32
    %168 = vector.broadcast %cst_55 : f32 to vector<8x1xf32>
    %169 = arith.divf %168, %167 : vector<8x1xf32>
    %170 = vector.broadcast %169 : vector<8x1xf32> to vector<8x32xf32>
    %171 = arith.mulf %165, %170 : vector<8x32xf32>
    %172 = tpu.concatenate %135, %147, %159, %171 in 1 : vector<8x32xf32>, vector<8x32xf32>, vector<8x32xf32>, vector<8x32xf32> -> vector<8x128xf32>
    %c2 = arith.constant 2 : index
    %c0_56 = arith.constant 0 : index
    %c0_57 = arith.constant 0 : index
    %173 = vector.load %arg19[%c2, %c0_56, %c0_57] : memref<4x128x128xf32, #tpu.memory_space<vmem>>, vector<1x128x128xf32>
    %174 = vector.shape_cast %173 : vector<1x128x128xf32> to vector<128x128xf32>
    %cst_58 = arith.constant dense<0.000000e+00> : vector<8x128xf32>
    %175 = tpu.matmul %172, %174, %cst_58 {dimension_numbers = #tpu.dot_dimension_numbers<[1], [0], [0], [1], [0, 0, 1, 1], [], []>} : vector<8x128xf32>, vector<128x128xf32>, vector<8x128xf32> -> vector<8x128xf32>
    %176 = arith.addf %121, %175 : vector<8x128xf32>
    %177 = vector.extract_strided_slice %9 {offsets = [0, 96], sizes = [8, 32], strides = [1, 1]} : vector<8x128xf32> to vector<8x32xf32>
    %cst_59 = arith.constant dense<0.000000e+00> : vector<8x128xf32>
    %178 = tpu.matmul %177, %10, %cst_59 {dimension_numbers = #tpu.dot_dimension_numbers<[1], [0], [0], [1], [0, 0, 1, 1], [], []>} : vector<8x32xf32>, vector<32x128xf32>, vector<8x128xf32> -> vector<8x128xf32>
    %179 = vector.extract_strided_slice %178 {offsets = [0, 0], sizes = [8, 32], strides = [1, 1]} : vector<8x128xf32> to vector<8x32xf32>
    %cst_60 = arith.constant dense<0xFF800000> : vector<8xf32>
    %180 = vector.multi_reduction <maximumf>, %179, %cst_60 [1] : vector<8x32xf32> to vector<8xf32>
    %181 = vector.shape_cast %180 : vector<8xf32> to vector<8x1xf32>
    %182 = vector.broadcast %181 : vector<8x1xf32> to vector<8x32xf32>
    %183 = arith.subf %179, %182 : vector<8x32xf32>
    %184 = math.exp %183 : vector<8x32xf32>
    %cst_61 = arith.constant dense<0.000000e+00> : vector<8xf32>
    %185 = vector.multi_reduction <add>, %184, %cst_61 [1] : vector<8x32xf32> to vector<8xf32>
    %186 = vector.shape_cast %185 : vector<8xf32> to vector<8x1xf32>
    %cst_62 = arith.constant 1.000000e+00 : f32
    %187 = vector.broadcast %cst_62 : f32 to vector<8x1xf32>
    %188 = arith.divf %187, %186 : vector<8x1xf32>
    %189 = vector.broadcast %188 : vector<8x1xf32> to vector<8x32xf32>
    %190 = arith.mulf %184, %189 : vector<8x32xf32>
    %191 = vector.extract_strided_slice %178 {offsets = [0, 32], sizes = [8, 32], strides = [1, 1]} : vector<8x128xf32> to vector<8x32xf32>
    %cst_63 = arith.constant dense<0xFF800000> : vector<8xf32>
    %192 = vector.multi_reduction <maximumf>, %191, %cst_63 [1] : vector<8x32xf32> to vector<8xf32>
    %193 = vector.shape_cast %192 : vector<8xf32> to vector<8x1xf32>
    %194 = vector.broadcast %193 : vector<8x1xf32> to vector<8x32xf32>
    %195 = arith.subf %191, %194 : vector<8x32xf32>
    %196 = math.exp %195 : vector<8x32xf32>
    %cst_64 = arith.constant dense<0.000000e+00> : vector<8xf32>
    %197 = vector.multi_reduction <add>, %196, %cst_64 [1] : vector<8x32xf32> to vector<8xf32>
    %198 = vector.shape_cast %197 : vector<8xf32> to vector<8x1xf32>
    %cst_65 = arith.constant 1.000000e+00 : f32
    %199 = vector.broadcast %cst_65 : f32 to vector<8x1xf32>
    %200 = arith.divf %199, %198 : vector<8x1xf32>
    %201 = vector.broadcast %200 : vector<8x1xf32> to vector<8x32xf32>
    %202 = arith.mulf %196, %201 : vector<8x32xf32>
    %203 = vector.extract_strided_slice %178 {offsets = [0, 64], sizes = [8, 32], strides = [1, 1]} : vector<8x128xf32> to vector<8x32xf32>
    %cst_66 = arith.constant dense<0xFF800000> : vector<8xf32>
    %204 = vector.multi_reduction <maximumf>, %203, %cst_66 [1] : vector<8x32xf32> to vector<8xf32>
    %205 = vector.shape_cast %204 : vector<8xf32> to vector<8x1xf32>
    %206 = vector.broadcast %205 : vector<8x1xf32> to vector<8x32xf32>
    %207 = arith.subf %203, %206 : vector<8x32xf32>
    %208 = math.exp %207 : vector<8x32xf32>
    %cst_67 = arith.constant dense<0.000000e+00> : vector<8xf32>
    %209 = vector.multi_reduction <add>, %208, %cst_67 [1] : vector<8x32xf32> to vector<8xf32>
    %210 = vector.shape_cast %209 : vector<8xf32> to vector<8x1xf32>
    %cst_68 = arith.constant 1.000000e+00 : f32
    %211 = vector.broadcast %cst_68 : f32 to vector<8x1xf32>
    %212 = arith.divf %211, %210 : vector<8x1xf32>
    %213 = vector.broadcast %212 : vector<8x1xf32> to vector<8x32xf32>
    %214 = arith.mulf %208, %213 : vector<8x32xf32>
    %215 = vector.extract_strided_slice %178 {offsets = [0, 96], sizes = [8, 32], strides = [1, 1]} : vector<8x128xf32> to vector<8x32xf32>
    %cst_69 = arith.constant dense<0xFF800000> : vector<8xf32>
    %216 = vector.multi_reduction <maximumf>, %215, %cst_69 [1] : vector<8x32xf32> to vector<8xf32>
    %217 = vector.shape_cast %216 : vector<8xf32> to vector<8x1xf32>
    %218 = vector.broadcast %217 : vector<8x1xf32> to vector<8x32xf32>
    %219 = arith.subf %215, %218 : vector<8x32xf32>
    %220 = math.exp %219 : vector<8x32xf32>
    %cst_70 = arith.constant dense<0.000000e+00> : vector<8xf32>
    %221 = vector.multi_reduction <add>, %220, %cst_70 [1] : vector<8x32xf32> to vector<8xf32>
    %222 = vector.shape_cast %221 : vector<8xf32> to vector<8x1xf32>
    %cst_71 = arith.constant 1.000000e+00 : f32
    %223 = vector.broadcast %cst_71 : f32 to vector<8x1xf32>
    %224 = arith.divf %223, %222 : vector<8x1xf32>
    %225 = vector.broadcast %224 : vector<8x1xf32> to vector<8x32xf32>
    %226 = arith.mulf %220, %225 : vector<8x32xf32>
    %227 = tpu.concatenate %190, %202, %214, %226 in 1 : vector<8x32xf32>, vector<8x32xf32>, vector<8x32xf32>, vector<8x32xf32> -> vector<8x128xf32>
    %c3 = arith.constant 3 : index
    %c0_72 = arith.constant 0 : index
    %c0_73 = arith.constant 0 : index
    %228 = vector.load %arg19[%c3, %c0_72, %c0_73] : memref<4x128x128xf32, #tpu.memory_space<vmem>>, vector<1x128x128xf32>
    %229 = vector.shape_cast %228 : vector<1x128x128xf32> to vector<128x128xf32>
    %cst_74 = arith.constant dense<0.000000e+00> : vector<8x128xf32>
    %230 = tpu.matmul %227, %229, %cst_74 {dimension_numbers = #tpu.dot_dimension_numbers<[1], [0], [0], [1], [0, 0, 1, 1], [], []>} : vector<8x128xf32>, vector<128x128xf32>, vector<8x128xf32> -> vector<8x128xf32>
    %231 = arith.addf %176, %230 : vector<8x128xf32>
    %c1_75 = arith.constant 1 : index
    %c0_76 = arith.constant 0 : index
    %232 = vector.load %arg13[%c1_75, %c0_76] : memref<7x128xf32, #tpu.memory_space<vmem>>, vector<1x128xf32>
    %233 = vector.broadcast %232 : vector<1x128xf32> to vector<8x128xf32>
    %234 = arith.addf %231, %233 : vector<8x128xf32>
    %c2_77 = arith.constant 2 : index
    %c0_78 = arith.constant 0 : index
    %235 = vector.load %arg13[%c2_77, %c0_78] : memref<7x128xf32, #tpu.memory_space<vmem>>, vector<1x128xf32>
    %c3_79 = arith.constant 3 : index
    %c0_80 = arith.constant 0 : index
    %236 = vector.load %arg13[%c3_79, %c0_80] : memref<7x128xf32, #tpu.memory_space<vmem>>, vector<1x128xf32>
    %c4 = arith.constant 4 : index
    %c0_81 = arith.constant 0 : index
    %237 = vector.load %arg13[%c4, %c0_81] : memref<7x128xf32, #tpu.memory_space<vmem>>, vector<1x128xf32>
    %c5 = arith.constant 5 : index
    %c0_82 = arith.constant 0 : index
    %238 = vector.load %arg13[%c5, %c0_82] : memref<7x128xf32, #tpu.memory_space<vmem>>, vector<1x128xf32>
    %c6 = arith.constant 6 : index
    %c0_83 = arith.constant 0 : index
    %239 = vector.load %arg13[%c6, %c0_83] : memref<7x128xf32, #tpu.memory_space<vmem>>, vector<1x128xf32>
    %240 = arith.addf %234, %4 : vector<8x128xf32>
    %241 = vector.extract_strided_slice %240 {offsets = [0, 0], sizes = [8, 32], strides = [1, 1]} : vector<8x128xf32> to vector<8x32xf32>
    %cst_84 = arith.constant dense<0.000000e+00> : vector<8xf32>
    %242 = vector.multi_reduction <add>, %241, %cst_84 [1] : vector<8x32xf32> to vector<8xf32>
    %243 = vector.shape_cast %242 : vector<8xf32> to vector<8x1xf32>
    %cst_85 = arith.constant 3.200000e+01 : f32
    %244 = vector.broadcast %cst_85 : f32 to vector<8x1xf32>
    %245 = arith.divf %243, %244 : vector<8x1xf32>
    %246 = vector.broadcast %245 : vector<8x1xf32> to vector<8x32xf32>
    %247 = arith.subf %241, %246 : vector<8x32xf32>
    %248 = arith.mulf %247, %247 : vector<8x32xf32>
    %cst_86 = arith.constant dense<0.000000e+00> : vector<8xf32>
    %249 = vector.multi_reduction <add>, %248, %cst_86 [1] : vector<8x32xf32> to vector<8xf32>
    %250 = vector.shape_cast %249 : vector<8xf32> to vector<8x1xf32>
    %cst_87 = arith.constant 3.200000e+01 : f32
    %251 = vector.broadcast %cst_87 : f32 to vector<8x1xf32>
    %252 = arith.divf %250, %251 : vector<8x1xf32>
    %cst_88 = arith.constant 9.99999974E-6 : f32
    %253 = vector.broadcast %cst_88 : f32 to vector<8x1xf32>
    %254 = arith.addf %252, %253 : vector<8x1xf32>
    %255 = math.rsqrt %254 : vector<8x1xf32>
    %256 = vector.broadcast %255 : vector<8x1xf32> to vector<8x32xf32>
    %257 = arith.mulf %247, %256 : vector<8x32xf32>
    %258 = vector.extract_strided_slice %240 {offsets = [0, 32], sizes = [8, 32], strides = [1, 1]} : vector<8x128xf32> to vector<8x32xf32>
    %cst_89 = arith.constant dense<0.000000e+00> : vector<8xf32>
    %259 = vector.multi_reduction <add>, %258, %cst_89 [1] : vector<8x32xf32> to vector<8xf32>
    %260 = vector.shape_cast %259 : vector<8xf32> to vector<8x1xf32>
    %cst_90 = arith.constant 3.200000e+01 : f32
    %261 = vector.broadcast %cst_90 : f32 to vector<8x1xf32>
    %262 = arith.divf %260, %261 : vector<8x1xf32>
    %263 = vector.broadcast %262 : vector<8x1xf32> to vector<8x32xf32>
    %264 = arith.subf %258, %263 : vector<8x32xf32>
    %265 = arith.mulf %264, %264 : vector<8x32xf32>
    %cst_91 = arith.constant dense<0.000000e+00> : vector<8xf32>
    %266 = vector.multi_reduction <add>, %265, %cst_91 [1] : vector<8x32xf32> to vector<8xf32>
    %267 = vector.shape_cast %266 : vector<8xf32> to vector<8x1xf32>
    %cst_92 = arith.constant 3.200000e+01 : f32
    %268 = vector.broadcast %cst_92 : f32 to vector<8x1xf32>
    %269 = arith.divf %267, %268 : vector<8x1xf32>
    %cst_93 = arith.constant 9.99999974E-6 : f32
    %270 = vector.broadcast %cst_93 : f32 to vector<8x1xf32>
    %271 = arith.addf %269, %270 : vector<8x1xf32>
    %272 = math.rsqrt %271 : vector<8x1xf32>
    %273 = vector.broadcast %272 : vector<8x1xf32> to vector<8x32xf32>
    %274 = arith.mulf %264, %273 : vector<8x32xf32>
    %275 = vector.extract_strided_slice %240 {offsets = [0, 64], sizes = [8, 32], strides = [1, 1]} : vector<8x128xf32> to vector<8x32xf32>
    %cst_94 = arith.constant dense<0.000000e+00> : vector<8xf32>
    %276 = vector.multi_reduction <add>, %275, %cst_94 [1] : vector<8x32xf32> to vector<8xf32>
    %277 = vector.shape_cast %276 : vector<8xf32> to vector<8x1xf32>
    %cst_95 = arith.constant 3.200000e+01 : f32
    %278 = vector.broadcast %cst_95 : f32 to vector<8x1xf32>
    %279 = arith.divf %277, %278 : vector<8x1xf32>
    %280 = vector.broadcast %279 : vector<8x1xf32> to vector<8x32xf32>
    %281 = arith.subf %275, %280 : vector<8x32xf32>
    %282 = arith.mulf %281, %281 : vector<8x32xf32>
    %cst_96 = arith.constant dense<0.000000e+00> : vector<8xf32>
    %283 = vector.multi_reduction <add>, %282, %cst_96 [1] : vector<8x32xf32> to vector<8xf32>
    %284 = vector.shape_cast %283 : vector<8xf32> to vector<8x1xf32>
    %cst_97 = arith.constant 3.200000e+01 : f32
    %285 = vector.broadcast %cst_97 : f32 to vector<8x1xf32>
    %286 = arith.divf %284, %285 : vector<8x1xf32>
    %cst_98 = arith.constant 9.99999974E-6 : f32
    %287 = vector.broadcast %cst_98 : f32 to vector<8x1xf32>
    %288 = arith.addf %286, %287 : vector<8x1xf32>
    %289 = math.rsqrt %288 : vector<8x1xf32>
    %290 = vector.broadcast %289 : vector<8x1xf32> to vector<8x32xf32>
    %291 = arith.mulf %281, %290 : vector<8x32xf32>
    %292 = vector.extract_strided_slice %240 {offsets = [0, 96], sizes = [8, 32], strides = [1, 1]} : vector<8x128xf32> to vector<8x32xf32>
    %cst_99 = arith.constant dense<0.000000e+00> : vector<8xf32>
    %293 = vector.multi_reduction <add>, %292, %cst_99 [1] : vector<8x32xf32> to vector<8xf32>
    %294 = vector.shape_cast %293 : vector<8xf32> to vector<8x1xf32>
    %cst_100 = arith.constant 3.200000e+01 : f32
    %295 = vector.broadcast %cst_100 : f32 to vector<8x1xf32>
    %296 = arith.divf %294, %295 : vector<8x1xf32>
    %297 = vector.broadcast %296 : vector<8x1xf32> to vector<8x32xf32>
    %298 = arith.subf %292, %297 : vector<8x32xf32>
    %299 = arith.mulf %298, %298 : vector<8x32xf32>
    %cst_101 = arith.constant dense<0.000000e+00> : vector<8xf32>
    %300 = vector.multi_reduction <add>, %299, %cst_101 [1] : vector<8x32xf32> to vector<8xf32>
    %301 = vector.shape_cast %300 : vector<8xf32> to vector<8x1xf32>
    %cst_102 = arith.constant 3.200000e+01 : f32
    %302 = vector.broadcast %cst_102 : f32 to vector<8x1xf32>
    %303 = arith.divf %301, %302 : vector<8x1xf32>
    %cst_103 = arith.constant 9.99999974E-6 : f32
    %304 = vector.broadcast %cst_103 : f32 to vector<8x1xf32>
    %305 = arith.addf %303, %304 : vector<8x1xf32>
    %306 = math.rsqrt %305 : vector<8x1xf32>
    %307 = vector.broadcast %306 : vector<8x1xf32> to vector<8x32xf32>
    %308 = arith.mulf %298, %307 : vector<8x32xf32>
    %309 = tpu.concatenate %257, %274, %291, %308 in 1 : vector<8x32xf32>, vector<8x32xf32>, vector<8x32xf32>, vector<8x32xf32> -> vector<8x128xf32>
    %310 = vector.broadcast %235 : vector<1x128xf32> to vector<8x128xf32>
    %311 = arith.mulf %309, %310 : vector<8x128xf32>
    %312 = vector.broadcast %236 : vector<1x128xf32> to vector<8x128xf32>
    %313 = arith.addf %311, %312 : vector<8x128xf32>
    %c0_104 = arith.constant 0 : index
    %c0_105 = arith.constant 0 : index
    %314 = vector.load %arg14[%c0_104, %c0_105] : memref<128x256xf32, #tpu.memory_space<vmem>>, vector<128x256xf32>
    %cst_106 = arith.constant dense<0.000000e+00> : vector<8x256xf32>
    %315 = tpu.matmul %313, %314, %cst_106 {dimension_numbers = #tpu.dot_dimension_numbers<[1], [0], [0], [1], [0, 0, 1, 1], [], []>} : vector<8x128xf32>, vector<128x256xf32>, vector<8x256xf32> -> vector<8x256xf32>
    %c0_107 = arith.constant 0 : index
    %c0_108 = arith.constant 0 : index
    %316 = vector.load %arg15[%c0_107, %c0_108] : memref<1x256xf32, #tpu.memory_space<vmem>>, vector<1x256xf32>
    %317 = vector.broadcast %316 : vector<1x256xf32> to vector<8x256xf32>
    %318 = arith.addf %315, %317 : vector<8x256xf32>
    %cst_109 = arith.constant 0.000000e+00 : f32
    %319 = vector.broadcast %cst_109 : f32 to vector<8x256xf32>
    %320 = arith.cmpf oge, %318, %319 : vector<8x256xf32>
    %cst_110 = arith.constant 5.000000e-02 : f32
    %321 = vector.broadcast %cst_110 : f32 to vector<8x256xf32>
    %322 = arith.mulf %321, %318 : vector<8x256xf32>
    %323 = arith.select %320, %318, %322 : vector<8x256xi1>, vector<8x256xf32>
    %c0_111 = arith.constant 0 : index
    %c0_112 = arith.constant 0 : index
    %324 = vector.load %arg16[%c0_111, %c0_112] : memref<256x128xf32, #tpu.memory_space<vmem>>, vector<256x128xf32>
    %cst_113 = arith.constant dense<0.000000e+00> : vector<8x128xf32>
    %325 = tpu.matmul %323, %324, %cst_113 {dimension_numbers = #tpu.dot_dimension_numbers<[1], [0], [0], [1], [0, 0, 1, 1], [], []>} : vector<8x256xf32>, vector<256x128xf32>, vector<8x128xf32> -> vector<8x128xf32>
    %326 = vector.broadcast %239 : vector<1x128xf32> to vector<8x128xf32>
    %327 = arith.addf %325, %326 : vector<8x128xf32>
    %328 = arith.addf %327, %313 : vector<8x128xf32>
    %329 = vector.extract_strided_slice %328 {offsets = [0, 0], sizes = [8, 32], strides = [1, 1]} : vector<8x128xf32> to vector<8x32xf32>
    %cst_114 = arith.constant dense<0.000000e+00> : vector<8xf32>
    %330 = vector.multi_reduction <add>, %329, %cst_114 [1] : vector<8x32xf32> to vector<8xf32>
    %331 = vector.shape_cast %330 : vector<8xf32> to vector<8x1xf32>
    %cst_115 = arith.constant 3.200000e+01 : f32
    %332 = vector.broadcast %cst_115 : f32 to vector<8x1xf32>
    %333 = arith.divf %331, %332 : vector<8x1xf32>
    %334 = vector.broadcast %333 : vector<8x1xf32> to vector<8x32xf32>
    %335 = arith.subf %329, %334 : vector<8x32xf32>
    %336 = arith.mulf %335, %335 : vector<8x32xf32>
    %cst_116 = arith.constant dense<0.000000e+00> : vector<8xf32>
    %337 = vector.multi_reduction <add>, %336, %cst_116 [1] : vector<8x32xf32> to vector<8xf32>
    %338 = vector.shape_cast %337 : vector<8xf32> to vector<8x1xf32>
    %cst_117 = arith.constant 3.200000e+01 : f32
    %339 = vector.broadcast %cst_117 : f32 to vector<8x1xf32>
    %340 = arith.divf %338, %339 : vector<8x1xf32>
    %cst_118 = arith.constant 9.99999974E-6 : f32
    %341 = vector.broadcast %cst_118 : f32 to vector<8x1xf32>
    %342 = arith.addf %340, %341 : vector<8x1xf32>
    %343 = math.rsqrt %342 : vector<8x1xf32>
    %344 = vector.broadcast %343 : vector<8x1xf32> to vector<8x32xf32>
    %345 = arith.mulf %335, %344 : vector<8x32xf32>
    %346 = vector.extract_strided_slice %328 {offsets = [0, 32], sizes = [8, 32], strides = [1, 1]} : vector<8x128xf32> to vector<8x32xf32>
    %cst_119 = arith.constant dense<0.000000e+00> : vector<8xf32>
    %347 = vector.multi_reduction <add>, %346, %cst_119 [1] : vector<8x32xf32> to vector<8xf32>
    %348 = vector.shape_cast %347 : vector<8xf32> to vector<8x1xf32>
    %cst_120 = arith.constant 3.200000e+01 : f32
    %349 = vector.broadcast %cst_120 : f32 to vector<8x1xf32>
    %350 = arith.divf %348, %349 : vector<8x1xf32>
    %351 = vector.broadcast %350 : vector<8x1xf32> to vector<8x32xf32>
    %352 = arith.subf %346, %351 : vector<8x32xf32>
    %353 = arith.mulf %352, %352 : vector<8x32xf32>
    %cst_121 = arith.constant dense<0.000000e+00> : vector<8xf32>
    %354 = vector.multi_reduction <add>, %353, %cst_121 [1] : vector<8x32xf32> to vector<8xf32>
    %355 = vector.shape_cast %354 : vector<8xf32> to vector<8x1xf32>
    %cst_122 = arith.constant 3.200000e+01 : f32
    %356 = vector.broadcast %cst_122 : f32 to vector<8x1xf32>
    %357 = arith.divf %355, %356 : vector<8x1xf32>
    %cst_123 = arith.constant 9.99999974E-6 : f32
    %358 = vector.broadcast %cst_123 : f32 to vector<8x1xf32>
    %359 = arith.addf %357, %358 : vector<8x1xf32>
    %360 = math.rsqrt %359 : vector<8x1xf32>
    %361 = vector.broadcast %360 : vector<8x1xf32> to vector<8x32xf32>
    %362 = arith.mulf %352, %361 : vector<8x32xf32>
    %363 = vector.extract_strided_slice %328 {offsets = [0, 64], sizes = [8, 32], strides = [1, 1]} : vector<8x128xf32> to vector<8x32xf32>
    %cst_124 = arith.constant dense<0.000000e+00> : vector<8xf32>
    %364 = vector.multi_reduction <add>, %363, %cst_124 [1] : vector<8x32xf32> to vector<8xf32>
    %365 = vector.shape_cast %364 : vector<8xf32> to vector<8x1xf32>
    %cst_125 = arith.constant 3.200000e+01 : f32
    %366 = vector.broadcast %cst_125 : f32 to vector<8x1xf32>
    %367 = arith.divf %365, %366 : vector<8x1xf32>
    %368 = vector.broadcast %367 : vector<8x1xf32> to vector<8x32xf32>
    %369 = arith.subf %363, %368 : vector<8x32xf32>
    %370 = arith.mulf %369, %369 : vector<8x32xf32>
    %cst_126 = arith.constant dense<0.000000e+00> : vector<8xf32>
    %371 = vector.multi_reduction <add>, %370, %cst_126 [1] : vector<8x32xf32> to vector<8xf32>
    %372 = vector.shape_cast %371 : vector<8xf32> to vector<8x1xf32>
    %cst_127 = arith.constant 3.200000e+01 : f32
    %373 = vector.broadcast %cst_127 : f32 to vector<8x1xf32>
    %374 = arith.divf %372, %373 : vector<8x1xf32>
    %cst_128 = arith.constant 9.99999974E-6 : f32
    %375 = vector.broadcast %cst_128 : f32 to vector<8x1xf32>
    %376 = arith.addf %374, %375 : vector<8x1xf32>
    %377 = math.rsqrt %376 : vector<8x1xf32>
    %378 = vector.broadcast %377 : vector<8x1xf32> to vector<8x32xf32>
    %379 = arith.mulf %369, %378 : vector<8x32xf32>
    %380 = vector.extract_strided_slice %328 {offsets = [0, 96], sizes = [8, 32], strides = [1, 1]} : vector<8x128xf32> to vector<8x32xf32>
    %cst_129 = arith.constant dense<0.000000e+00> : vector<8xf32>
    %381 = vector.multi_reduction <add>, %380, %cst_129 [1] : vector<8x32xf32> to vector<8xf32>
    %382 = vector.shape_cast %381 : vector<8xf32> to vector<8x1xf32>
    %cst_130 = arith.constant 3.200000e+01 : f32
    %383 = vector.broadcast %cst_130 : f32 to vector<8x1xf32>
    %384 = arith.divf %382, %383 : vector<8x1xf32>
    %385 = vector.broadcast %384 : vector<8x1xf32> to vector<8x32xf32>
    %386 = arith.subf %380, %385 : vector<8x32xf32>
    %387 = arith.mulf %386, %386 : vector<8x32xf32>
    %cst_131 = arith.constant dense<0.000000e+00> : vector<8xf32>
    %388 = vector.multi_reduction <add>, %387, %cst_131 [1] : vector<8x32xf32> to vector<8xf32>
    %389 = vector.shape_cast %388 : vector<8xf32> to vector<8x1xf32>
    %cst_132 = arith.constant 3.200000e+01 : f32
    %390 = vector.broadcast %cst_132 : f32 to vector<8x1xf32>
    %391 = arith.divf %389, %390 : vector<8x1xf32>
    %cst_133 = arith.constant 9.99999974E-6 : f32
    %392 = vector.broadcast %cst_133 : f32 to vector<8x1xf32>
    %393 = arith.addf %391, %392 : vector<8x1xf32>
    %394 = math.rsqrt %393 : vector<8x1xf32>
    %395 = vector.broadcast %394 : vector<8x1xf32> to vector<8x32xf32>
    %396 = arith.mulf %386, %395 : vector<8x32xf32>
    %397 = tpu.concatenate %345, %362, %379, %396 in 1 : vector<8x32xf32>, vector<8x32xf32>, vector<8x32xf32>, vector<8x32xf32> -> vector<8x128xf32>
    %398 = vector.broadcast %237 : vector<1x128xf32> to vector<8x128xf32>
    %399 = arith.mulf %397, %398 : vector<8x128xf32>
    %400 = vector.broadcast %238 : vector<1x128xf32> to vector<8x128xf32>
    %401 = arith.addf %399, %400 : vector<8x128xf32>
    %c0_134 = arith.constant 0 : index
    %c0_135 = arith.constant 0 : index
    %c0_136 = arith.constant 0 : index
    %402 = vector.load %arg17[%c0_134, %c0_135, %c0_136] : memref<1x8x128xf32, #tpu.memory_space<vmem>>, vector<1x8x128xf32>
    %403 = vector.shape_cast %402 : vector<1x8x128xf32> to vector<8x128xf32>
    %404 = vector.shape_cast %401 : vector<8x128xf32> to vector<1x8x128xf32>
    tpu.vector_store %arg17[%c0_134, %c0_135, %c0_136], %404 {strides = array<i32>} : memref<1x8x128xf32, #tpu.memory_space<vmem>>, vector<1x8x128xf32>,
    return
  }
  func.func @transform_0(%arg0: i32, %arg1: i32) -> (i32, i32, i32) {
    %c0_i32 = arith.constant 0 : i32
    %c0_i32_0 = arith.constant 0 : i32
    return %arg0, %arg1, %c0_i32 : i32, i32, i32
  }
  func.func @transform_1(%arg0: i32, %arg1: i32) -> (i32, i32, i32) {
    %c0_i32 = arith.constant 0 : i32
    %c0_i32_0 = arith.constant 0 : i32
    %c0_i32_1 = arith.constant 0 : i32
    return %arg0, %c0_i32, %c0_i32_0 : i32, i32, i32
  }
  func.func @transform_2(%arg0: i32, %arg1: i32) -> (i32, i32, i32) {
    %c0_i32 = arith.constant 0 : i32
    %c0_i32_0 = arith.constant 0 : i32
    %c0_i32_1 = arith.constant 0 : i32
    return %arg0, %c0_i32, %c0_i32_0 : i32, i32, i32
  }
  func.func @transform_3(%arg0: i32, %arg1: i32) -> (i32, i32) {
    %c0_i32 = arith.constant 0 : i32
    %c0_i32_0 = arith.constant 0 : i32
    %c0_i32_1 = arith.constant 0 : i32
    return %c0_i32, %c0_i32_0 : i32, i32
  }
  func.func @transform_4(%arg0: i32, %arg1: i32) -> (i32, i32, i32) {
    %c0_i32 = arith.constant 0 : i32
    %c0_i32_0 = arith.constant 0 : i32
    %c0_i32_1 = arith.constant 0 : i32
    %c0_i32_2 = arith.constant 0 : i32
    return %c0_i32, %c0_i32_0, %c0_i32_1 : i32, i32, i32
  }
  func.func @transform_5(%arg0: i32, %arg1: i32) -> (i32, i32) {
    %c0_i32 = arith.constant 0 : i32
    %c0_i32_0 = arith.constant 0 : i32
    %c0_i32_1 = arith.constant 0 : i32
    return %c0_i32, %c0_i32_0 : i32, i32
  }
  func.func @transform_6(%arg0: i32, %arg1: i32) -> (i32, i32, i32) {
    %c0_i32 = arith.constant 0 : i32
    %c0_i32_0 = arith.constant 0 : i32
    %c0_i32_1 = arith.constant 0 : i32
    %c0_i32_2 = arith.constant 0 : i32
    return %c0_i32, %c0_i32_0, %c0_i32_1 : i32, i32, i32
  }
  func.func @transform_7(%arg0: i32, %arg1: i32) -> (i32, i32) {
    %c0_i32 = arith.constant 0 : i32
    %c0_i32_0 = arith.constant 0 : i32
    %c0_i32_1 = arith.constant 0 : i32
    return %c0_i32, %c0_i32_0 : i32, i32
  }
  func.func @transform_8(%arg0: i32, %arg1: i32) -> (i32, i32, i32) {
    %c0_i32 = arith.constant 0 : i32
    %c0_i32_0 = arith.constant 0 : i32
    %c0_i32_1 = arith.constant 0 : i32
    %c0_i32_2 = arith.constant 0 : i32
    return %c0_i32, %c0_i32_0, %c0_i32_1 : i32, i32, i32
  }
  func.func @transform_9(%arg0: i32, %arg1: i32) -> (i32, i32) {
    %c0_i32 = arith.constant 0 : i32
    %c0_i32_0 = arith.constant 0 : i32
    %c0_i32_1 = arith.constant 0 : i32
    return %c0_i32, %c0_i32_0 : i32, i32
  }
  func.func @transform_10(%arg0: i32, %arg1: i32) -> (i32, i32) {
    %c0_i32 = arith.constant 0 : i32
    %c0_i32_0 = arith.constant 0 : i32
    %c0_i32_1 = arith.constant 0 : i32
    return %c0_i32, %c0_i32_0 : i32, i32
  }
  func.func @transform_11(%arg0: i32, %arg1: i32) -> (i32, i32) {
    %c0_i32 = arith.constant 0 : i32
    %c0_i32_0 = arith.constant 0 : i32
    %c0_i32_1 = arith.constant 0 : i32
    return %c0_i32, %c0_i32_0 : i32, i32
  }
  func.func @transform_12(%arg0: i32, %arg1: i32) -> (i32, i32) {
    %c0_i32 = arith.constant 0 : i32
    %c0_i32_0 = arith.constant 0 : i32
    %c0_i32_1 = arith.constant 0 : i32
    return %c0_i32, %c0_i32_0 : i32, i32
  }
  func.func @transform_13(%arg0: i32, %arg1: i32) -> (i32, i32) {
    %c0_i32 = arith.constant 0 : i32
    %c0_i32_0 = arith.constant 0 : i32
    %c0_i32_1 = arith.constant 0 : i32
    return %c0_i32, %c0_i32_0 : i32, i32
  }
  func.func @transform_14(%arg0: i32, %arg1: i32) -> (i32, i32) {
    %c0_i32 = arith.constant 0 : i32
    %c0_i32_0 = arith.constant 0 : i32
    %c0_i32_1 = arith.constant 0 : i32
    return %c0_i32, %c0_i32_0 : i32, i32
  }
  func.func @transform_15(%arg0: i32, %arg1: i32) -> (i32, i32, i32) {
    %c0_i32 = arith.constant 0 : i32
    %c0_i32_0 = arith.constant 0 : i32
    return %arg0, %arg1, %c0_i32 : i32, i32, i32
  }
}

</mosaic_0001>

<bundles_post_ra>
// kernel: tpu_custom_call.1
= control target key start
LH: loop header
LB: loop body
LE: loop exit
PB: predicated region body
PF: predicated region fallthrough
CT: control target
= control target key end

     0   :  { %s7254_s0 = inlined_call_operand.vmem [shape: f32[2,8,128], index: 0, kind: input, shape index: {}]   ;;  %s7255_s1 = inlined_call_operand.vmem [shape: f32[2,128,8], index: 1, kind: input, shape index: {}]   ;;  %s7256_s2 = inlined_call_operand.hbm [shape: f32[2,8,128], index: 2, kind: input, shape index: {}]   ;;  %s7257_s3 = inlined_call_operand.vmem [shape: f32[128,128], index: 3, kind: input, shape index: {}]   ;;  %s7258_s4 = inlined_call_operand.vmem [shape: f32[4,32,128], index: 4, kind: input, shape index: {}]   ;;  %s7259_s5 = inlined_call_operand.vmem [shape: f32[32,4], index: 5, kind: input, shape index: {}]   ;;  %s7260_s6 = inlined_call_operand.vmem [shape: f32[4,128,32], index: 6, kind: input, shape index: {}]   ;;  %s7261_s7 = inlined_call_operand.vmem [shape: f32[4,32], index: 7, kind: input, shape index: {}]   ;;  %s7262_s8 = inlined_call_operand.vmem [shape: f32[4,32,128], index: 8, kind: input, shape index: {}]   ;;  %s7263_s9 = inlined_call_operand.vmem [shape: f32[32,128], index: 9, kind: input, shape index: {}]   ;;  %s7264_s10 = inlined_call_operand.vmem [shape: f32[128,32], index: 10, kind: input, shape index: {}]   ;;  %s7265_s11 = inlined_call_operand.hbm [shape: f32[7,128], index: 11, kind: input, shape index: {}]   ;;  %s7266_s12 = inlined_call_operand.vmem [shape: f32[128,256], index: 12, kind: input, shape index: {}]   ;;  %s7267_s13 = inlined_call_operand.vmem [shape: f32[1,256], index: 13, kind: input, shape index: {}]   ;;  %s7268_s14 = inlined_call_operand.vmem [shape: f32[256,128], index: 14, kind: input, shape index: {}]   ;;  %s7269_s15 = inlined_call_operand.hbm [shape: f32[2,8,128], index: 15, kind: output, shape index: {}]  }
   0x1   :  { %7284 = sst [smem:[#allocation19_spill]] %s7254_s0 }
   0x2   :  { %7285 = sst [smem:[#allocation20_spill]] %s7263_s9 }
   0x3   :  { %7286 = sst [smem:[#allocation21_spill]] %s7265_s11 }
   0x4   :  { %7287 = sst [smem:[#allocation22_spill]] %s7266_s12 }
   0x5   :  { %7288 = sst [smem:[#allocation23_spill]] %s7267_s13 }
   0x6   :  { %7289 = sst [smem:[#allocation24_spill]] %s7268_s14 }
   0x7   :  { %7290 = sst [smem:[#allocation25_spill]] %s7269_s15 }
   0x8   :  { %20 = vsyncpa [#allocation5], 0 }
   0x9   :  { %22 = vsyncpa [#allocation5 + $0x1], 0 }
   0xa   :  { %23 = vsyncpa [#allocation8], 0 }
   0xb   :  { %24 = vsyncpa [#allocation6], 0 }
   0xc   :  { %26 = vsyncpa [#allocation6 + $0x1], 0  ;;  %s5416_s18 = smov 0   ;;  %s5418_s19 = smov 0  }
   0xd   :  { %s5420_s20 = smov 0   ;;  %s5422_s21 = smov 0  }
   0xe   :  { %s5424_s22 = smov 0   ;;  %s5426_s23 = smov 0  }
   0xf LB: > { %7291 = sst [smem:[#allocation13_spill]] %s5299_s18  ;;  %s3825_s24 = sadd.s32 4294967295, %s5319_s23   ;;  %s5319_s23 = sphi %s5426_s23, %s32_s23   ;;  %s5315_s22 = sphi %s5424_s22, %s7324_s22   ;;  %s5311_s21 = sphi %s5422_s21, %s7323_s21   ;;  %s5307_s20 = sphi %s5420_s20, %s7327_s20   ;;  %s5303_s19 = sphi %s5418_s19, %s7326_s19   ;;  %s5299_s18 = sphi %s5416_s18, %s7325_s18  }
  0x10   : > { %7292 = sst [smem:[#allocation14_spill]] %s5315_s22  ;;  %s3826_s25 = sadd.s32 4294967294, %s5319_s23  }
  0x11   : > { %p118_p0 = scmp.ne.s32.totalorder %s5303_s19, %s5299_s18  ;;  %p5450_p1 = scmp.eq.s32.totalorder %s3825_s24, 0 }
  0x12   : > { %p5454_p2 = scmp.eq.s32.totalorder %s3825_s24, 1  ;;  %p402_p3 = scmp.eq.s32.totalorder %s3826_s25, 1 }
  0x13   : > { %p5460_p4 = por %p5450_p1, %p118_p0  ;;  %p3827_p5 = scmp.ge.s32.totalorder %s5319_s23, 1 }
  0x14   : > { %p5465_p6 = por %p402_p3, %p118_p0  ;;  %p409_p7 = scmp.lt.s32.totalorder %s5319_s23, 3 }
  0x15   : > { %s7295_s28 = scalar_select %p5460_p4, 1, 0 }
  0x16   : > { %s7296_s29 = scalar_select %p5465_p6, 1, 0 }
  0x17   : > { %p5470_p8 = pnand %p3827_p5, %p409_p7  ;;  %s5321_s16 = smov [#allocation7]  }
  0x18   : > { %7297 = sst [smem:[#allocation15_spill]] %s7296_s29  ;;  %s446_s17 = sshll.u32 %s5321_s16, 4  ;;  %s447_s17 = int_to_ptr.vmem [resolvable:$true] %s446_s17 }
  0x19   : > { %p5010_p10 = pneg %p5470_p8  ;;  %s44_s25 = sadd.s32 1, %s5315_s22 }
  0x1a   : > { %s105_s29 = sadd.s32 1, %s5307_s20  ;;  %p46_p12 = scmp.ge.s32.totalorder %s44_s25, 2 }
  0x1b   : > { %p5479_p11 = pnand %p5010_p10, %p5450_p1  ;;  %s5192_s18 = scalar_lea.vmem %s447_s17, 128 }
  0x1c   : > { %p5193_p0 = scmp.ne.s32.totalorder %s447_s17, %s5192_s18  ;;  %p5200_p7 = scmp.lt.s32.totalorder %s447_s17, %s447_s17 }
  0x1d   : > { %p5183_p13 = pneg %p5479_p11  ;;  %p5201_p6 = scmp.lt.s32.totalorder %s5192_s18, %s5192_s18 }
  0x1f   : > { %p5195_p3 = pnand %p5193_p0, %p5183_p13  ;;  %p5202_p9 = por %p5201_p6, %p5200_p7 }
  0x21   : > { %p5196_p5 = pneg %p5195_p3 }
  0x23   : > { %p5203_p4 = pnand %p5202_p9, %p5196_p5 }
  0x25   : > { %5206 = shalt.err (!%p5203_p4)
}
  0x26   : > { %s7300_s11 = sld [smem:[#allocation21_spill]]  ;;  %s7329_s25 = smov (%p46_p12, %s44_s25), 0 }
  0x27   : > { %7301 = sst [smem:[#allocation16_spill]] %s7329_s25  ;;  %p112_p6 = scmp.ne.s32.totalorder %s5307_s20, %s5303_s19 }
  0x28   : > { %p113_p4 = scmp.eq.s32.totalorder %s5319_s23, 0  ;;  %s102_s18 = ssub.s32 %s5315_s22, %s7329_s25 }
  0x29   : > { %p5023_p9 = scmp.lt.s32.totalorder %s5319_s23, 2  ;;  %p103_p10 = scmp.eq.s32.totalorder %s102_s18, 0 }
  0x2a   : > { %p114_p13 = por %p113_p4, %p112_p6  ;;  %p5502_p0 = por %p5454_p2, %p112_p6 }
  0x2b   : > { %s484_s24 = sand.u32 1, %s5307_s20   ;;  %s3831_s14 = sshll.u32 %s5315_s22, 7 }
  0x2c   : > { %5013 = dma.hbm_to_vmem [thread:$0]  (!%p5479_p11), %s7300_s11, 128, %s447_s17, [#allocation8]  }
  0x2d   : > { %s5508_s16 = scalar_select %p103_p10, %s5307_s20, %s105_s29  }
  0x2e   : > { %s3830_s13 = sshll.u32 %s484_s24, 3  ;;  %s493_s12 = scalar_lea.hbm %s7256_s2, %s3831_s14 }
  0x2f   : > { %s488_s9 = scalar_lea.vmem [#allocation4], %s3830_s13  ;;  %p5514_p11 = pnand %p5023_p9, %p114_p13 }
  0x30   : > { %s495_s0 = sshll.u32 %s488_s9, 4  ;;  %s485_s27 = scalar_lea.sflag [#allocation5], %s484_s24  ;;  %s496_s0 = int_to_ptr.vmem [resolvable:$true] %s495_s0 }
  0x31   : > { %p5209_p2 = pneg %p5514_p11  ;;  %s5220_s25 = scalar_lea.vmem %s496_s0, 128 }
  0x32   : > { %p5221_p12 = scmp.ne.s32.totalorder %s496_s0, %s5220_s25  ;;  %s5322_s29 = smov [#allocation4]  }
  0x33   : > { %s5225_s22 = sshll.u32 %s5322_s29, 4  ;;  %s5226_s22 = int_to_ptr.vmem [resolvable:$false] %s5225_s22 }
  0x34   : > { %p5223_p3 = pnand %p5221_p12, %p5209_p2  ;;  %s5227_s11 = scalar_lea.vmem %s5226_s22, 256 }
  0x35   : > { %p5228_p7 = scmp.lt.s32.totalorder %s496_s0, %s5226_s22  ;;  %p5229_p6 = scmp.lt.s32.totalorder %s5227_s11, %s5220_s25 }
  0x36   : > { %p5224_p5 = pneg %p5223_p3 }
  0x37   : > { %p5230_p4 = por %p5229_p6, %p5228_p7 }
  0x39   : > { %p5231_p10 = pnand %p5230_p4, %p5224_p5 }
  0x3b   : > { %5234 = shalt.err (!%p5231_p10)
}
  0x3c   : > { %5017 = dma.hbm_to_vmem [thread:$0]  (!%p5514_p11), %s493_s12, 128, %s496_s0, %s485_s27  }
  0x3d   : > { %504 = sbr.rel (%p5470_p8) target bundleno = 4018 (0xfb2), region = 80 }
  0x42   : > { %s5525_s9 = sand.u32 1, %s5303_s19   ;;  %p7304_p9 = scmp.ne.s32.totalorder %s7295_s28, 0 }
  0x43   : > { %s7281_s13 = sshll.u32 %s5525_s9, 3  ;;  %s507_s14 = scalar_lea.sflag [#allocation5], %s5525_s9 }
  0x44   : > { %s5531_s22 = scalar_lea.vmem [#allocation4], %s7281_s13 }
  0x45   : > { %5286 = dma.done.wait (%p7304_p9), %s507_s14, 128  }
  0x46   : > { %5288 = vsyncadd (%p7304_p9), %s507_s14, 4294967168 }
  0x47   : > { %5290 = dma.done.wait (%p5450_p1), [#allocation8], 128  }
  0x48   : > { %5292 = vsyncadd (%p5450_p1), [#allocation8], 4294967168  ;;  %p573_p8 = scmp.lt.s32.totalorder %s5311_s21, 1  ;;  %v7279_v0 = vmov 0.0   ;;  %vm5324_vm0 = vmmov 0   ;;  %v734_v2 = vld [vmem:[%s7260_s6 + $0x78] sm:$0xff] }
  0x49   : > { %4401 = vmatprep.subr.mxu1 %v7279_v0  ;;  %4433 = vmatprep.mubr.msk.f32.mxu1 %vm5324_vm0, %v7279_v0  ;;  %v733_v4 = vld [vmem:[%s7260_s6 + $0x70] sm:$0xff]  ;;  %v732_v6 = vld [vmem:[%s7260_s6 + $0x68] sm:$0xff]  ;;  %v731_v8 = vld [vmem:[%s7260_s6 + $0x60] sm:$0xff]  ;;  %vm1507_vm1 = vcmask 261120   ;;  %s5329_s24 = smov 8   ;;  %s5330_s28 = smov 16  }
  0x4a   : > { %s5546_s0 = scalar_select %p573_p8, %s5311_s21, 1  ;;  %4402 = vmatpush3.msra.mxu1 %v734_v2  ;;  %v730_v10 = vld [vmem:[%s7260_s6 + $0x58] sm:$0xff]  ;;  %v729_v12 = vld [vmem:[%s7260_s6 + $0x50] sm:$0xff]  ;;  %v728_v14 = vld [vmem:[%s7260_s6 + $0x48] sm:$0xff]  ;;  %vm1452_vm2 = vcmask 64512   ;;  %vm1457_vm3 = vcmask 130048  }
  0x4b   : > { %4403 = vmatprep.subr.mxu1 %v7279_v0  ;;  %v727_v16 = vld [vmem:[%s7260_s6 + $0x40] sm:$0xff]  ;;  %v726_v18 = vld [vmem:[%s7260_s6 + $0x38] sm:$0xff]  ;;  %v725_v20 = vld [vmem:[%s7260_s6 + $0x30] sm:$0xff]  ;;  %s5331_s14 = smov 24   ;;  %vm1462_vm4 = vcmask 195584   ;;  %s7282_s26 = smov 32  }
  0x4c   : > { %s3994_s12 = sshll.u32 %s5546_s0, 7  ;;  %4404 = vmatpush3.msra.mxu1 %v733_v4  ;;  %v724_v22 = vld [vmem:[%s7260_s6 + $0x28] sm:$0xff]  ;;  %v723_v24 = vld [vmem:[%s7260_s6 + $0x20] sm:$0xff]  ;;  %v722_v26 = vld [vmem:[%s7260_s6 + $0x18] sm:$0xff]  ;;  %vm1517_vm5 = vcmask 785408   ;;  %vm1512_vm6 = vcmask 523264  }
  0x4d   : > { %s5552_s25 = scalar_lea.vmem %s7255_s1, %s3994_s12  ;;  %4405 = vmatprep.subr.mxu1 %v7279_v0  ;;  %v721_v28 = vld [vmem:[%s7260_s6 + $0x10] sm:$0xff]  ;;  %v720_v30 = vld [vmem:[%s7260_s6 + $0x8] sm:$0xff]  ;;  %v719_v32 = vld [vmem:[%s7260_s6] sm:$0xff]  ;;  %s7305_s12 = sld [smem:[#allocation19_spill]]  ;;  %vm2479_vm7 = vcmask 785920   ;;  %vm2462_vm8 = vcmask 523520  }
  0x4e   : > { %v5555_v1 = vld [vmem:[%s5552_s25 + $0x78] sm:$0xff]  ;;  %v5561_v3 = vld [vmem:[%s5552_s25 + $0x70] sm:$0xff]  ;;  %v5570_v5 = vld [vmem:[%s5552_s25 + $0x68] sm:$0xff]  ;;  %4406 = vmatpush3.msra.mxu1 %v732_v6  ;;  %s7308_s18 = sld [smem:[#allocation20_spill]]  ;;  %vm2496_vm9 = vcmask 1048320  }
  0x4f   : > { %4363 = vmatprep.subr.mxu0 %v5555_v1  ;;  %v5579_v7 = vld [vmem:[%s5552_s25 + $0x60] sm:$0xff]  ;;  %4407 = vmatprep.subr.mxu1 %v7279_v0  ;;  %v5588_v9 = vld [vmem:[%s5552_s25 + $0x58] sm:$0xff]  ;;  %v5597_v11 = vld [vmem:[%s5552_s25 + $0x50] sm:$0xff]  ;;  %s7313_s17 = sld [smem:[#allocation22_spill]] }
  0x50   : > { %4364 = vmatpush3.msra.mxu0 %v5555_v1  ;;  %4408 = vmatpush3.msra.mxu1 %v731_v8  ;;  %v5606_v13 = vld [vmem:[%s5552_s25 + $0x48] sm:$0xff]  ;;  %v5615_v15 = vld [vmem:[%s5552_s25 + $0x40] sm:$0xff]  ;;  %v5624_v17 = vld [vmem:[%s5552_s25 + $0x38] sm:$0xff] }
  0x51   : > { %4365 = vmatprep.subr.mxu0 %v5561_v3  ;;  %4409 = vmatprep.subr.mxu1 %v7279_v0  ;;  %v5633_v19 = vld [vmem:[%s5552_s25 + $0x30] sm:$0xff]  ;;  %v5642_v21 = vld [vmem:[%s5552_s25 + $0x28] sm:$0xff]  ;;  %v5651_v23 = vld [vmem:[%s5552_s25 + $0x20] sm:$0xff] }
  0x52   : > { %4366 = vmatpush3.msra.mxu0 %v5561_v3  ;;  %4410 = vmatpush3.msra.mxu1 %v730_v10  ;;  %v5660_v25 = vld [vmem:[%s5552_s25 + $0x18] sm:$0xff]  ;;  %v5669_v27 = vld [vmem:[%s5552_s25 + $0x10] sm:$0xff]  ;;  %v5678_v29 = vld [vmem:[%s5552_s25 + $0x8] sm:$0xff] }
  0x53   : > { %4367 = vmatprep.subr.mxu0 %v5570_v5  ;;  %4411 = vmatprep.subr.mxu1 %v7279_v0  ;;  %v5687_v31 = vld [vmem:[%s5552_s25] sm:$0xff]  ;;  %v3859_v35 = vld [vmem:[%s7260_s6 + $0xf8] sm:$0xff]  ;;  %v607_v36 = vld [vmem:[%s7258_s4 + $0x8] sm:$0xff]  ;;  %s5333_s25 = smov 64  }
  0x54   : > { %4368 = vmatpush3.msra.mxu0 %v5570_v5  ;;  %4412 = vmatpush3.msra.mxu1 %v729_v12  ;;  %v5694_v33 = vld [vmem:[%s5531_s22] sm:$0xff]  ;;  %v3858_v37 = vld [vmem:[%s7260_s6 + $0xf0] sm:$0xff]  ;;  %v3855_v40 = vld [vmem:[%s7260_s6 + $0xd8] sm:$0xff]  ;;  %s3836_s22 = sshll.u32 %s5546_s0, 3  ;;  %s7309_s27 = smov %s7308_s18 }
  0x55   : > { %4369 = vmatprep.subr.mxu0 %v5579_v7  ;;  %4413 = vmatprep.subr.mxu1 %v7279_v0  ;;  %v606_v34 = vld [vmem:[%s7258_s4] sm:$0xff]  ;;  %v3857_v38 = vld [vmem:[%s7260_s6 + $0xe8] sm:$0xff]  ;;  %v3854_v41 = vld [vmem:[%s7260_s6 + $0xd0] sm:$0xff] }
  0x56   : > { %4370 = vmatpush3.msra.mxu0 %v5579_v7  ;;  %4414 = vmatpush3.msra.mxu1 %v728_v14  ;;  %v3856_v39 = vld [vmem:[%s7260_s6 + $0xe0] sm:$0xff]  ;;  %v3853_v42 = vld [vmem:[%s7260_s6 + $0xc8] sm:$0xff]  ;;  %v3851_v44 = vld [vmem:[%s7260_s6 + $0xb8] sm:$0xff] }
  0x57   : > { %4371 = vmatprep.subr.mxu0 %v5588_v9  ;;  %4415 = vmatprep.subr.mxu1 %v7279_v0  ;;  %v3852_v43 = vld [vmem:[%s7260_s6 + $0xc0] sm:$0xff]  ;;  %v3850_v45 = vld [vmem:[%s7260_s6 + $0xb0] sm:$0xff]  ;;  %v3849_v46 = vld [vmem:[%s7260_s6 + $0xa8] sm:$0xff] }
  0x58   : > { %4372 = vmatpush3.msra.mxu0 %v5588_v9  ;;  %4416 = vmatpush3.msra.mxu1 %v727_v16  ;;  %v3848_v47 = vld [vmem:[%s7260_s6 + $0xa0] sm:$0xff]  ;;  %v3847_v48 = vld [vmem:[%s7260_s6 + $0x98] sm:$0xff]  ;;  %v3846_v49 = vld [vmem:[%s7260_s6 + $0x90] sm:$0xff] }
  0x59   : > { %4373 = vmatprep.subr.mxu0 %v5597_v11  ;;  %4417 = vmatprep.subr.mxu1 %v7279_v0  ;;  %v608_v50 = vld [vmem:[%s7258_s4 + $0x10] sm:$0xff]  ;;  %v609_v51 = vld [vmem:[%s7258_s4 + $0x18] sm:$0xff]  ;;  %v3845_v52 = vld [vmem:[%s7260_s6 + $0x88] sm:$0xff] }
  0x5a   : > { %4374 = vmatpush3.msra.mxu0 %v5597_v11  ;;  %4418 = vmatpush3.msra.mxu1 %v726_v18  ;;  %v3844_v53 = vld [vmem:[%s7260_s6 + $0x80] sm:$0xff]  ;;  %v3841_v55 = vld [vmem:[%s7258_s4 + $0x28] sm:$0xff]  ;;  %v3880_v56 = vld [vmem:[%s7260_s6 + $0x178] sm:$0xff] }
  0x5b   : > { %4375 = vmatprep.subr.mxu0 %v5606_v13  ;;  %4419 = vmatprep.subr.mxu1 %v7279_v0  ;;  %v3840_v54 = vld [vmem:[%s7258_s4 + $0x20] sm:$0xff]  ;;  %v3879_v57 = vld [vmem:[%s7260_s6 + $0x170] sm:$0xff]  ;;  %v3878_v58 = vld [vmem:[%s7260_s6 + $0x168] sm:$0xff] }
  0x5c   : > { %4376 = vmatpush3.msra.mxu0 %v5606_v13  ;;  %4420 = vmatpush3.msra.mxu1 %v725_v20  ;;  %v3842_v59 = vld [vmem:[%s7258_s4 + $0x30] sm:$0xff]  ;;  %v3843_v60 = vld [vmem:[%s7258_s4 + $0x38] sm:$0xff]  ;;  %v3877_v61 = vld [vmem:[%s7260_s6 + $0x160] sm:$0xff] }
  0x5d   : > { %4377 = vmatprep.subr.mxu0 %v5615_v15  ;;  %4421 = vmatprep.subr.mxu1 %v7279_v0  ;;  %v3876_v62 = vld [vmem:[%s7260_s6 + $0x158] sm:$0xff]  ;;  %v3875_v63 = vld [vmem:[%s7260_s6 + $0x150] sm:$0xff]  ;;  %v3874_v2 = vld [vmem:[%s7260_s6 + $0x148] sm:$0xff] }
  0x5e   : > { %4378 = vmatpush3.msra.mxu0 %v5615_v15  ;;  %4422 = vmatpush3.msra.mxu1 %v724_v22  ;;  %v3873_v4 = vld [vmem:[%s7260_s6 + $0x140] sm:$0xff]  ;;  %v3872_v6 = vld [vmem:[%s7260_s6 + $0x138] sm:$0xff]  ;;  %v3871_v8 = vld [vmem:[%s7260_s6 + $0x130] sm:$0xff] }
  0x5f   : > { %4379 = vmatprep.subr.mxu0 %v5624_v17  ;;  %4423 = vmatprep.subr.mxu1 %v7279_v0  ;;  %v3870_v10 = vld [vmem:[%s7260_s6 + $0x128] sm:$0xff]  ;;  %v3869_v12 = vld [vmem:[%s7260_s6 + $0x120] sm:$0xff]  ;;  %v3868_v14 = vld [vmem:[%s7260_s6 + $0x118] sm:$0xff] }
  0x60   : > { %4380 = vmatpush3.msra.mxu0 %v5624_v17  ;;  %4424 = vmatpush3.msra.mxu1 %v723_v24  ;;  %v3867_v16 = vld [vmem:[%s7260_s6 + $0x110] sm:$0xff]  ;;  %v3866_v18 = vld [vmem:[%s7260_s6 + $0x108] sm:$0xff]  ;;  %v3865_v20 = vld [vmem:[%s7260_s6 + $0x100] sm:$0xff] }
  0x61   : > { %4381 = vmatprep.subr.mxu0 %v5633_v19  ;;  %4425 = vmatprep.subr.mxu1 %v7279_v0  ;;  %v3861_v22 = vld [vmem:[%s7258_s4 + $0x40] sm:$0xff]  ;;  %v3862_v24 = vld [vmem:[%s7258_s4 + $0x48] sm:$0xff] }
  0x62   : > { %4382 = vmatpush3.msra.mxu0 %v5633_v19  ;;  %4426 = vmatpush3.msra.mxu1 %v722_v26  ;;  %v3901_v26 = vld [vmem:[%s7260_s6 + $0x1f8] sm:$0xff] }
  0x63   : > { %4383 = vmatprep.subr.mxu0 %v5642_v21  ;;  %4427 = vmatprep.subr.mxu1 %v7279_v0 }
  0x64   : > { %4384 = vmatpush3.msra.mxu0 %v5642_v21  ;;  %4428 = vmatpush3.msra.mxu1 %v721_v28  ;;  %v3900_v28 = vld [vmem:[%s7260_s6 + $0x1f0] sm:$0xff] }
  0x65   : > { %4385 = vmatprep.subr.mxu0 %v5651_v23  ;;  %4429 = vmatprep.subr.mxu1 %v7279_v0 }
  0x66   : > { %4386 = vmatpush3.msra.mxu0 %v5651_v23  ;;  %4430 = vmatpush3.msra.mxu1 %v720_v30  ;;  %v3863_v30 = vld [vmem:[%s7258_s4 + $0x50] sm:$0xff] }
  0x67   : > { %4387 = vmatprep.subr.mxu0 %v5660_v25  ;;  %4431 = vmatprep.subr.mxu1 %v7279_v0 }
  0x68   : > { %4388 = vmatpush3.msra.mxu0 %v5660_v25  ;;  %4432 = vmatpush3.msra.mxu1 %v719_v32  ;;  %v3864_v32 = vld [vmem:[%s7258_s4 + $0x58] sm:$0xff] }
  0x69   : > { %4389 = vmatprep.subr.mxu0 %v5669_v27  ;;  %4434 = vmatmul.mubr.f32.vlgmr.msra.gmra.mxu1 %v5694_v33 }
  0x6a   : > { %4390 = vmatpush3.msra.mxu0 %v5669_v27  ;;  %4474 = vmatprep.subr.mxu1 %v7279_v0 }
  0x6b   : > { %4391 = vmatprep.subr.mxu0 %v5678_v29  ;;  %4395 = vmatprep.mubr.f32.mxu0 %v606_v34  ;;  %v3899_v34 = vld [vmem:[%s7260_s6 + $0x1e8] sm:$0xff] }
  0x6c   : > { %4392 = vmatpush3.msra.mxu0 %v5678_v29  ;;  %4475 = vmatpush3.msra.mxu1 %v3859_v35  ;;  %v3896_v35 = vld [vmem:[%s7260_s6 + $0x1d0] sm:$0xff] }
  0x6d   : > { %4393 = vmatprep.subr.mxu0 %v5687_v31  ;;  %4476 = vmatprep.subr.mxu1 %v7279_v0 }
  0x6e   : > { %4394 = vmatpush3.msra.mxu0 %v5687_v31  ;;  %4477 = vmatpush3.msra.mxu1 %v3858_v37  ;;  %v5326_v37 = vmov 2  }
  0x6f   : > { %4436 = vmatprep.subr.mxu0 %v5555_v1  ;;  %4396 = vmatmul.mubr.f32.vlgmr.msra.gmra.mxu0 %v607_v36  ;;  %v5325_v36 = vmov 1  }
  0x70   : > { %4437 = vmatpush3.msra.mxu0 %v5555_v1  ;;  %4478 = vmatprep.subr.mxu1 %v7279_v0 }
  0x71   : > { %4438 = vmatprep.subr.mxu0 %v5561_v3  ;;  %4479 = vmatpush3.msra.mxu1 %v3857_v38  ;;  %v3883_v38 = vld [vmem:[%s7258_s4 + $0x68] sm:$0xff] }
  0x72   : > { %4439 = vmatpush3.msra.mxu0 %v5561_v3  ;;  %4480 = vmatprep.subr.mxu1 %v7279_v0 }
  0x73   : > { %4440 = vmatprep.subr.mxu0 %v5570_v5  ;;  %4481 = vmatpush3.msra.mxu1 %v3856_v39  ;;  %v611_v39 = vld [vmem:[%s7259_s5 + $0x8] sm:$0xff] }
  0x74   : > { %4441 = vmatpush3.msra.mxu0 %v5570_v5  ;;  %4482 = vmatprep.subr.mxu1 %v7279_v0 }
  0x75   : > { %4442 = vmatprep.subr.mxu0 %v5579_v7  ;;  %4483 = vmatpush3.msra.mxu1 %v3855_v40  ;;  %v612_v40 = vld [vmem:[%s7259_s5 + $0x10] sm:$0xff] }
  0x76   : > { %4443 = vmatpush3.msra.mxu0 %v5579_v7  ;;  %4484 = vmatprep.subr.mxu1 %v7279_v0 }
  0x77   : > { %4444 = vmatprep.subr.mxu0 %v5588_v9  ;;  %4485 = vmatpush3.msra.mxu1 %v3854_v41  ;;  %v1569_v41 = vld [vmem:[%s7262_s8 + $0x18] sm:$0xff] }
  0x78   : > { %4445 = vmatpush3.msra.mxu0 %v5588_v9  ;;  %4486 = vmatprep.subr.mxu1 %v7279_v0 }
  0x79   : > { %4446 = vmatprep.subr.mxu0 %v5597_v11  ;;  %4487 = vmatpush3.msra.mxu1 %v3853_v42  ;;  %v3922_v42 = vld [vmem:[%s7262_s8 + $0x38] sm:$0xff] }
  0x7a   : > { %4447 = vmatpush3.msra.mxu0 %v5597_v11  ;;  %4488 = vmatprep.subr.mxu1 %v7279_v0 }
  0x7b   : > { %4448 = vmatprep.subr.mxu0 %v5606_v13  ;;  %4489 = vmatpush3.msra.mxu1 %v3852_v43  ;;  %v1568_v43 = vld [vmem:[%s7262_s8 + $0x10] sm:$0xff] }
  0x7c   : > { %4449 = vmatpush3.msra.mxu0 %v5606_v13  ;;  %4490 = vmatprep.subr.mxu1 %v7279_v0 }
  0x7d   : > { %4450 = vmatprep.subr.mxu0 %v5615_v15  ;;  %4491 = vmatpush3.msra.mxu1 %v3851_v44  ;;  %v3921_v44 = vld [vmem:[%s7262_s8 + $0x30] sm:$0xff] }
  0x7e   : > { %4451 = vmatpush3.msra.mxu0 %v5615_v15  ;;  %4492 = vmatprep.subr.mxu1 %v7279_v0 }
  0x7f   : > { %4452 = vmatprep.subr.mxu0 %v5624_v17  ;;  %4493 = vmatpush3.msra.mxu1 %v3850_v45  ;;  %v1567_v45 = vld [vmem:[%s7262_s8 + $0x8] sm:$0xff] }
  0x80   : > { %4453 = vmatpush3.msra.mxu0 %v5624_v17  ;;  %4494 = vmatprep.subr.mxu1 %v7279_v0 }
  0x81   : > { %4454 = vmatprep.subr.mxu0 %v5633_v19  ;;  %4495 = vmatpush3.msra.mxu1 %v3849_v46  ;;  %v5327_v46 = vmov 3  }
  0x82   : > { %4455 = vmatpush3.msra.mxu0 %v5633_v19  ;;  %4496 = vmatprep.subr.mxu1 %v7279_v0 }
  0x83   : > { %4456 = vmatprep.subr.mxu0 %v5642_v21  ;;  %4497 = vmatpush3.msra.mxu1 %v3848_v47  ;;  %v3920_v47 = vld [vmem:[%s7262_s8 + $0x28] sm:$0xff] }
  0x84   : > { %4457 = vmatpush3.msra.mxu0 %v5642_v21  ;;  %4498 = vmatprep.subr.mxu1 %v7279_v0 }
  0x85   : > { %4458 = vmatprep.subr.mxu0 %v5651_v23  ;;  %4499 = vmatpush3.msra.mxu1 %v3847_v48  ;;  %v1566_v48 = vld [vmem:[%s7262_s8] sm:$0xff] }
  0x86   : > { %4459 = vmatpush3.msra.mxu0 %v5651_v23  ;;  %4500 = vmatprep.subr.mxu1 %v7279_v0 }
  0x87   : > { %4460 = vmatprep.subr.mxu0 %v5660_v25  ;;  %4501 = vmatpush3.msra.mxu1 %v3846_v49  ;;  %v3919_v49 = vld [vmem:[%s7262_s8 + $0x20] sm:$0xff] }
  0x88   : > { %4461 = vmatpush3.msra.mxu0 %v5660_v25  ;;  %4398 = vmatprep.mubr.f32.mxu0 %v608_v50  ;;  %v5328_v50 = vmov 0  }
  0x89   : > { %4462 = vmatprep.subr.mxu0 %v5669_v27  ;;  %4502 = vmatprep.subr.mxu1 %v7279_v0 }
  0x8a   : > { %4463 = vmatpush3.msra.mxu0 %v5669_v27  ;;  %4503 = vmatpush3.msra.mxu1 %v3845_v52  ;;  %v3839_v52 = vld [vmem:[%s7261_s7] ss:$0 sm:$0xff] }
  0x8b   : > { %4399 = vmatmul.mubr.f32.gmra.mxu0 %v609_v51  ;;  %4464 = vmatprep.subr.mxu0 %v5678_v29  ;;  %v3942_v51 = vld [vmem:[%s7262_s8 + $0x58] sm:$0xff] }
  0x8c   : > { %4465 = vmatpush3.msra.mxu0 %v5678_v29  ;;  %4504 = vmatprep.subr.mxu1 %v7279_v0 }
  0x8d   : > { %4466 = vmatprep.subr.mxu0 %v5687_v31  ;;  %4505 = vmatpush3.msra.mxu1 %v3844_v53 }
  0x8e   : > { %4506 = vmatprep.mubr.msk.f32.mxu1 %vm5324_vm0, %v7279_v0  ;;  %4467 = vmatpush3.msra.mxu0 %v5687_v31 }
  0x8f   : > { %4468 = vmatprep.mubr.f32.mxu0 %v3840_v54  ;;  %4507 = vmatmul.mubr.f32.vlgmr.msra.gmra.mxu1 %v5694_v33  ;;  %v1534_v54 = vld [vmem:[%s7264_s10] sm:$0xff] }
  0x90   : > { %4547 = vmatprep.subr.mxu1 %v7279_v0  ;;  %4469 = vmatmul.mubr.f32.vlgmr.msra.gmra.mxu0 %v3841_v55 }
  0x91   : > { %4509 = vmatprep.subr.mxu0 %v5555_v1  ;;  %4548 = vmatpush3.msra.mxu1 %v3880_v56 }
  0x92   : > { %4510 = vmatpush3.msra.mxu0 %v5555_v1  ;;  %4549 = vmatprep.subr.mxu1 %v7279_v0 }
  0x93   : > { %4511 = vmatprep.subr.mxu0 %v5561_v3  ;;  %4550 = vmatpush3.msra.mxu1 %v3879_v57 }
  0x94   : > { %4512 = vmatpush3.msra.mxu0 %v5561_v3  ;;  %4551 = vmatprep.subr.mxu1 %v7279_v0 }
  0x95   : > { %4513 = vmatprep.subr.mxu0 %v5570_v5  ;;  %4552 = vmatpush3.msra.mxu1 %v3878_v58  ;;  %v3962_v58 = vld [vmem:[%s7262_s8 + $0x78] sm:$0xff] }
  0x96   : > { %4471 = vmatprep.mubr.f32.mxu0 %v3842_v59  ;;  %4514 = vmatpush3.msra.mxu0 %v5570_v5 }
  0x97   : > { %4553 = vmatprep.subr.mxu1 %v7279_v0  ;;  %4472 = vmatmul.mubr.f32.gmra.mxu0 %v3843_v60 }
  0x98   : > { %4515 = vmatprep.subr.mxu0 %v5579_v7  ;;  %4554 = vmatpush3.msra.mxu1 %v3877_v61 }
  0x99   : > { %4516 = vmatpush3.msra.mxu0 %v5579_v7  ;;  %4555 = vmatprep.subr.mxu1 %v7279_v0 }
  0x9a   : > { %4517 = vmatprep.subr.mxu0 %v5588_v9  ;;  %4556 = vmatpush3.msra.mxu1 %v3876_v62 }
  0x9b   : > { %4518 = vmatpush3.msra.mxu0 %v5588_v9  ;;  %4557 = vmatprep.subr.mxu1 %v7279_v0 }
  0x9c   : > { %4519 = vmatprep.subr.mxu0 %v5597_v11  ;;  %4558 = vmatpush3.msra.mxu1 %v3875_v63  ;;  %v3860_v63 = vld [vmem:[%s7261_s7 + $0x1] ss:$0 sm:$0xff] }
  0x9d   : > { %4520 = vmatpush3.msra.mxu0 %v5597_v11  ;;  %4559 = vmatprep.subr.mxu1 %v7279_v0 }
  0x9e   : > { %4521 = vmatprep.subr.mxu0 %v5606_v13  ;;  %4560 = vmatpush3.msra.mxu1 %v3874_v2 }
  0x9f   : > { %4522 = vmatpush3.msra.mxu0 %v5606_v13  ;;  %4561 = vmatprep.subr.mxu1 %v7279_v0 }
  0xa0   : > { %4523 = vmatprep.subr.mxu0 %v5615_v15  ;;  %4562 = vmatpush3.msra.mxu1 %v3873_v4 }
  0xa1   : > { %4524 = vmatpush3.msra.mxu0 %v5615_v15  ;;  %4563 = vmatprep.subr.mxu1 %v7279_v0 }
  0xa2   : > { %4525 = vmatprep.subr.mxu0 %v5624_v17  ;;  %4564 = vmatpush3.msra.mxu1 %v3872_v6 }
  0xa3   : > { %4526 = vmatpush3.msra.mxu0 %v5624_v17  ;;  %4565 = vmatprep.subr.mxu1 %v7279_v0 }
  0xa4   : > { %4527 = vmatprep.subr.mxu0 %v5633_v19  ;;  %4566 = vmatpush3.msra.mxu1 %v3871_v8  ;;  %v1535_v8 = vld [vmem:[%s7264_s10 + $0x8] sm:$0xff] }
  0xa5   : > { %4528 = vmatpush3.msra.mxu0 %v5633_v19  ;;  %4567 = vmatprep.subr.mxu1 %v7279_v0 }
  0xa6   : > { %4529 = vmatprep.subr.mxu0 %v5642_v21  ;;  %4568 = vmatpush3.msra.mxu1 %v3870_v10 }
  0xa7   : > { %4530 = vmatpush3.msra.mxu0 %v5642_v21  ;;  %4569 = vmatprep.subr.mxu1 %v7279_v0 }
  0xa8   : > { %4531 = vmatprep.subr.mxu0 %v5651_v23  ;;  %4570 = vmatpush3.msra.mxu1 %v3869_v12 }
  0xa9   : > { %4532 = vmatpush3.msra.mxu0 %v5651_v23  ;;  %4571 = vmatprep.subr.mxu1 %v7279_v0 }
  0xaa   : > { %4533 = vmatprep.subr.mxu0 %v5660_v25  ;;  %4572 = vmatpush3.msra.mxu1 %v3868_v14 }
  0xab   : > { %4534 = vmatpush3.msra.mxu0 %v5660_v25  ;;  %4573 = vmatprep.subr.mxu1 %v7279_v0 }
  0xac   : > { %4535 = vmatprep.subr.mxu0 %v5669_v27  ;;  %4574 = vmatpush3.msra.mxu1 %v3867_v16 }
  0xad   : > { %4536 = vmatpush3.msra.mxu0 %v5669_v27  ;;  %4575 = vmatprep.subr.mxu1 %v7279_v0 }
  0xae   : > { %4537 = vmatprep.subr.mxu0 %v5678_v29  ;;  %4576 = vmatpush3.msra.mxu1 %v3866_v18  ;;  %v3941_v18 = vld [vmem:[%s7262_s8 + $0x50] sm:$0xff] }
  0xaf   : > { %4538 = vmatpush3.msra.mxu0 %v5678_v29  ;;  %4577 = vmatprep.subr.mxu1 %v7279_v0 }
  0xb0   : > { %4539 = vmatprep.subr.mxu0 %v5687_v31  ;;  %4578 = vmatpush3.msra.mxu1 %v3865_v20  ;;  %v3961_v20 = vld [vmem:[%s7262_s8 + $0x70] sm:$0xff] }
  0xb1   : > { %4579 = vmatprep.mubr.msk.f32.mxu1 %vm5324_vm0, %v7279_v0  ;;  %4540 = vmatpush3.msra.mxu0 %v5687_v31 }
  0xb2   : > { %4541 = vmatprep.mubr.f32.mxu0 %v3861_v22  ;;  %4580 = vmatmul.mubr.f32.vlgmr.msra.gmra.mxu1 %v5694_v33 }
  0xb3   : > { %4620 = vmatprep.subr.mxu1 %v7279_v0  ;;  %4542 = vmatmul.mubr.f32.vlgmr.msra.gmra.mxu0 %v3862_v24 }
  0xb4   : > { %4582 = vmatprep.subr.mxu0 %v5555_v1  ;;  %4621 = vmatpush3.msra.mxu1 %v3901_v26  ;;  %v3940_v26 = vld [vmem:[%s7262_s8 + $0x48] sm:$0xff] }
  0xb5   : > { %4583 = vmatpush3.msra.mxu0 %v5555_v1  ;;  %4622 = vmatprep.subr.mxu1 %v7279_v0  ;;  %v3898_v1 = vld [vmem:[%s7260_s6 + $0x1e0] sm:$0xff] }
  0xb6   : > { %4584 = vmatprep.subr.mxu0 %v5561_v3  ;;  %4623 = vmatpush3.msra.mxu1 %v3900_v28 }
  0xb7   : > { %4544 = vmatprep.mubr.f32.mxu0 %v3863_v30  ;;  %4585 = vmatpush3.msra.mxu0 %v5561_v3  ;;  %v3897_v3 = vld [vmem:[%s7260_s6 + $0x1d8] sm:$0xff]  ;;  %v3960_v30 = vld [vmem:[%s7262_s8 + $0x68] sm:$0xff] }
  0xb8   : > { %4624 = vmatprep.subr.mxu1 %v7279_v0  ;;  %4545 = vmatmul.mubr.f32.gmra.mxu0 %v3864_v32  ;;  %v3939_v32 = vld [vmem:[%s7262_s8 + $0x40] sm:$0xff] }
  0xb9   : > { %4586 = vmatprep.subr.mxu0 %v5570_v5  ;;  %4625 = vmatpush3.msra.mxu1 %v3899_v34 }
  0xba   : > { %4587 = vmatpush3.msra.mxu0 %v5570_v5  ;;  %4626 = vmatprep.subr.mxu1 %v7279_v0  ;;  %v3895_v5 = vld [vmem:[%s7260_s6 + $0x1c8] sm:$0xff] }
  0xbb   : > { %4588 = vmatprep.subr.mxu0 %v5579_v7  ;;  %4627 = vmatpush3.msra.mxu1 %v3898_v1 }
  0xbc   : > { %4589 = vmatpush3.msra.mxu0 %v5579_v7  ;;  %4628 = vmatprep.subr.mxu1 %v7279_v0  ;;  %v3894_v7 = vld [vmem:[%s7260_s6 + $0x1c0] sm:$0xff] }
  0xbd   : > { %4590 = vmatprep.subr.mxu0 %v5588_v9  ;;  %4629 = vmatpush3.msra.mxu1 %v3897_v3 }
  0xbe   : > { %4591 = vmatpush3.msra.mxu0 %v5588_v9  ;;  %4630 = vmatprep.subr.mxu1 %v7279_v0  ;;  %v3893_v9 = vld [vmem:[%s7260_s6 + $0x1b8] sm:$0xff] }
  0xbf   : > { %4592 = vmatprep.subr.mxu0 %v5597_v11  ;;  %4631 = vmatpush3.msra.mxu1 %v3896_v35  ;;  %v3959_v35 = vld [vmem:[%s7262_s8 + $0x60] sm:$0xff] }
  0xc0   : > { %4593 = vmatpush3.msra.mxu0 %v5597_v11  ;;  %4632 = vmatprep.subr.mxu1 %v7279_v0  ;;  %v3892_v11 = vld [vmem:[%s7260_s6 + $0x1b0] sm:$0xff] }
  0xc1   : > { %4594 = vmatprep.subr.mxu0 %v5606_v13  ;;  %4633 = vmatpush3.msra.mxu1 %v3895_v5 }
  0xc2   : > { %4595 = vmatpush3.msra.mxu0 %v5606_v13  ;;  %4634 = vmatprep.subr.mxu1 %v7279_v0  ;;  %v3891_v13 = vld [vmem:[%s7260_s6 + $0x1a8] sm:$0xff] }
  0xc3   : > { %4596 = vmatprep.subr.mxu0 %v5615_v15  ;;  %4635 = vmatpush3.msra.mxu1 %v3894_v7 }
  0xc4   : > { %4597 = vmatpush3.msra.mxu0 %v5615_v15  ;;  %4636 = vmatprep.subr.mxu1 %v7279_v0  ;;  %v3890_v15 = vld [vmem:[%s7260_s6 + $0x1a0] sm:$0xff] }
  0xc5   : > { %4598 = vmatprep.subr.mxu0 %v5624_v17  ;;  %4637 = vmatpush3.msra.mxu1 %v3893_v9 }
  0xc6   : > { %4599 = vmatpush3.msra.mxu0 %v5624_v17  ;;  %4638 = vmatprep.subr.mxu1 %v7279_v0  ;;  %v3889_v17 = vld [vmem:[%s7260_s6 + $0x198] sm:$0xff] }
  0xc7   : > { %4600 = vmatprep.subr.mxu0 %v5633_v19  ;;  %4639 = vmatpush3.msra.mxu1 %v3892_v11 }
  0xc8   : > { %4601 = vmatpush3.msra.mxu0 %v5633_v19  ;;  %4640 = vmatprep.subr.mxu1 %v7279_v0  ;;  %v6013_v19 = vld [vmem:[%s7259_s5 + $0x18] sm:$0xff] }
  0xc9   : > { %4602 = vmatprep.subr.mxu0 %v5642_v21  ;;  %4641 = vmatpush3.msra.mxu1 %v3891_v13 }
  0xca   : > { %4603 = vmatpush3.msra.mxu0 %v5642_v21  ;;  %4642 = vmatprep.subr.mxu1 %v7279_v0  ;;  %v3888_v21 = vld [vmem:[%s7260_s6 + $0x190] sm:$0xff] }
  0xcb   : > { %4604 = vmatprep.subr.mxu0 %v5651_v23  ;;  %4643 = vmatpush3.msra.mxu1 %v3890_v15 }
  0xcc   : > { %4605 = vmatpush3.msra.mxu0 %v5651_v23  ;;  %4644 = vmatprep.subr.mxu1 %v7279_v0  ;;  %v3887_v23 = vld [vmem:[%s7260_s6 + $0x188] sm:$0xff] }
  0xcd   : > { %5087 = vset.pattern.permute.xlu0 %v5325_v36  ;;  %4606 = vmatprep.subr.mxu0 %v5660_v25 }
  0xce   : > { %4645 = vmatpush3.msra.mxu1 %v3889_v17  ;;  %828 = vperm.xlu0 %5087, %v6013_v19  }
  0xcf   : > { %4607 = vmatpush3.msra.mxu0 %v5660_v25  ;;  %4646 = vmatprep.subr.mxu1 %v7279_v0  ;;  %v3886_v25 = vld [vmem:[%s7260_s6 + $0x180] sm:$0xff] }
  0xd0   : > { %4608 = vmatprep.subr.mxu0 %v5669_v27  ;;  %4647 = vmatpush3.msra.mxu1 %v3888_v21 }
  0xd1   : > { %4609 = vmatpush3.msra.mxu0 %v5669_v27  ;;  %4648 = vmatprep.subr.mxu1 %v7279_v0  ;;  %v3882_v27 = vld [vmem:[%s7258_s4 + $0x60] sm:$0xff] }
  0xd2   : > { %4610 = vmatprep.subr.mxu0 %v5678_v29  ;;  %4649 = vmatpush3.msra.mxu1 %v3887_v23  ;;  %v1536_v23 = vld [vmem:[%s7264_s10 + $0x10] sm:$0xff] }
  0xd3   : > { %5088 = vset.pattern.permute.xlu0 %v5326_v37  ;;  %4611 = vmatpush3.msra.mxu0 %v5678_v29  ;;  %v3884_v29 = vld [vmem:[%s7258_s4 + $0x70] sm:$0xff] }
  0xd4   : > { %4650 = vmatprep.subr.mxu1 %v7279_v0  ;;  %1026 = vperm.xlu0 %5088, %v6013_v19  }
  0xd5   : > { %4612 = vmatprep.subr.mxu0 %v5687_v31  ;;  %4651 = vmatpush3.msra.mxu1 %v3886_v25 }
  0xd6   : > { %4652 = vmatprep.mubr.msk.f32.mxu1 %vm5324_vm0, %v7279_v0  ;;  %4613 = vmatpush3.msra.mxu0 %v5687_v31  ;;  %v3885_v31 = vld [vmem:[%s7258_s4 + $0x78] sm:$0xff] }
  0xd7   : > { %4614 = vmatprep.mubr.f32.mxu0 %v3882_v27  ;;  %4653 = vmatmul.mubr.f32.vlgmr.msra.gmra.mxu1 %v5694_v33  ;;  %v610_v33 = vld [vmem:[%s7259_s5] sm:$0xff] }
  0xd8   : > { %4615 = vmatmul.mubr.f32.vlgmr.msra.gmra.mxu0 %v3883_v38  ;;  %5092 = vset.pattern.permute.xlu0 %v5325_v36 }
  0xd9   : > { %4617 = vmatprep.mubr.f32.mxu0 %v3884_v29  ;;  %820 = vperm.xlu0 %5092, %v611_v39  }
  0xda   : > { %5089 = vset.pattern.permute.xlu1 %v5325_v36  ;;  %4655 = vmatprep.subr.mxu0 %v1569_v41 }
  0xdb   : > { %824 = vperm.xlu1 %5089, %v612_v40   ;;  %4687 = vmatprep.subr.mxu1 %v3922_v42 }
  0xdc   : > { %4618 = vmatmul.mubr.f32.gmra.mxu0 %v3885_v31  ;;  %4688 = vmatpush3.msra.mxu1 %v3922_v42 }
  0xdd   : > { %4656 = vmatpush3.msra.mxu0 %v1569_v41  ;;  %816 = vperm.xlu0 %5092, %v610_v33  }
  0xde   : > { %4657 = vmatprep.subr.mxu0 %v1568_v43  ;;  %4689 = vmatprep.subr.mxu1 %v3921_v44 }
  0xdf   : > { %5090 = vset.pattern.permute.xlu1 %v5327_v46  ;;  %4658 = vmatpush3.msra.mxu0 %v1568_v43 }
  0xe0   : > { %1224 = vperm.xlu1 %5090, %v6013_v19   ;;  %4690 = vmatpush3.msra.mxu1 %v3921_v44 }
  0xe1   : > { %4659 = vmatprep.subr.mxu0 %v1567_v45  ;;  %5096 = vset.pattern.permute.xlu0 %v5326_v37 }
  0xe2   : > { %4691 = vmatprep.subr.mxu1 %v3920_v47  ;;  %1014 = vperm.xlu0 %5096, %v610_v33  }
  0xe3   : > { %4660 = vmatpush3.msra.mxu0 %v1567_v45  ;;  %4692 = vmatpush3.msra.mxu1 %v3920_v47  ;;  %v1537_v45 = vld [vmem:[%s7264_s10 + $0x18] sm:$0xff]  ;;  %v1538_v47 = vld [vmem:[%s7264_s10 + $0x20] sm:$0xff] }
  0xe4   : > { %5091 = vset.pattern.permute.xlu1 %v5326_v37  ;;  %4661 = vmatprep.subr.mxu0 %v1566_v48 }
  0xe5   : > { %1022 = vperm.xlu1 %5091, %v612_v40   ;;  %4693 = vmatprep.subr.mxu1 %v3919_v49 }
  0xe6   : > { %4662 = vmatpush3.msra.mxu0 %v1566_v48  ;;  %5098 = vset.pattern.permute.xlu0 %v5328_v50 }
  0xe7   : > { %4694 = vmatpush3.msra.mxu1 %v3919_v49  ;;  %626 = vperm.xlu0 %5098, %v612_v40  }
  0xe8   : > { %4719 = vmatprep.subr.mxu0 %v3942_v51  ;;  %4751 = vmatprep.subr.mxu1 %v3962_v58 }
  0xe9   : > { %5093 = vset.pattern.permute.xlu1 %v5327_v46 }
  0xea   : > { %1220 = vperm.xlu1 %5093, %v612_v40  }
  0xeb   : > { %5099 = vset.pattern.permute.xlu0 %v5327_v46 }
  0xee   : > { %5094 = vset.pattern.permute.xlu1 %v5326_v37 }
  0xef   : > { %1018 = vperm.xlu1 %5094, %v611_v39  }
  0xf3   : > { %5095 = vset.pattern.permute.xlu1 %v5327_v46 }
  0xf4   : > { %1216 = vperm.xlu1 %5095, %v611_v39  }
  0xf8   : > { %1212 = vperm.xlu1 %5095, %v610_v33  }
  0xfc   : > { %5097 = vset.pattern.permute.xlu1 %v5328_v50 }
  0xfd   : > { %631 = vperm.xlu1 %5097, %v6013_v19   ;;  %v3881_v19 = vld [vmem:[%s7261_s7 + $0x2] ss:$0 sm:$0xff] }
 0x101   : > { %621 = vperm.xlu1 %5097, %v611_v39  }
 0x105   : > { %616 = vperm.xlu1 %5097, %v610_v33   ;;  %v3902_v33 = vld [vmem:[%s7261_s7 + $0x3] ss:$0 sm:$0xff] }
 0x129   : > { %v806_v53 = vpop.f32.mrf.mxu1 }
 0x12a   : > { %v6101_v55 = vadd.f32 %v3839_v52, %v806_v53 }
 0x12b   : > { %v4435_v56 = vpop.f32.mrf.mxu1 }
 0x12c   : > { %v6104_v57 = vmul.f32 %v1534_v54, %v6101_v55  ;;  %v6192_v53 = vmul.f32 %v1538_v47, %v6101_v55  ;;  %v1539_v54 = vld [vmem:[%s7264_s10 + $0x28] sm:$0xff] }
 0x12e   : > { %4663 = vmatprep.mubr.msk.f32.mxu0 %vm1507_vm1, %v6104_v57  ;;  %4695 = vmatprep.mubr.msk.f32.mxu1 %vm1507_vm1, %v6104_v57 }
 0x12f   : > { %v6113_v59 = vpop.f32.mrf.mxu0 }
 0x131   : > { %v6115_v60 = vpop.f32.mrf.mxu0 }
 0x149   : > { %v829_v61 = vpop.permute.xlu0 %828 }
 0x14b   : > { %v6117_v62 = vpop.f32.mrf.mxu0 }
 0x14d   : > { %v6122_v2 = vpop.f32.mrf.mxu0 }
 0x14f   : > { %v6124_v4 = vpop.permute.xlu0 %1026  ;;  %v1004_v6 = vpop.f32.mrf.mxu1 }
 0x150   : > { %v6129_v10 = vadd.f32 %v3860_v63, %v1004_v6  ;;  %v4470_v16 = vpop.f32.mrf.mxu0 }
 0x151   : > { %v4508_v12 = vpop.f32.mrf.mxu1 }
 0x152   : > { %v6132_v14 = vmul.f32 %v1535_v8, %v6129_v10  ;;  %v897_v28 = vpop.f32.mrf.mxu0  ;;  %v6209_v6 = vmul.f32 %v1539_v54, %v6129_v10 }
 0x154   : > { %v821_v22 = vpop.permute.xlu0 %820  ;;  %4664 = vmatmul.mubr.msk.f32.vlgmr.msra.gmra.mxu0 %vm1507_vm1, %v6132_v14  ;;  %4696 = vmatmul.mubr.msk.f32.vlgmr.msra.gmra.mxu1 %vm1507_vm1, %v6132_v14 }
 0x155   : > { %v903_v24 = vadd.f32 %v4470_v16, %v821_v22  ;;  %4720 = vmatpush3.msra.mxu0 %v3942_v51  ;;  %4752 = vmatpush3.msra.mxu1 %v3962_v58  ;;  %v1540_v58 = vld [vmem:[%s7264_s10 + $0x30] sm:$0xff]  ;;  %v1541_v16 = vld [vmem:[%s7264_s10 + $0x38] sm:$0xff] }
 0x156   : > { %4721 = vmatprep.subr.mxu0 %v3941_v18  ;;  %4753 = vmatprep.subr.mxu1 %v3961_v20  ;;  %v825_v7 = vpop.permute.xlu1 %824 }
 0x157   : > { %1410 = vrot.lane.b32.xlu1 %v903_v24, %s5329_s24  ;;  %4722 = vmatpush3.msra.mxu0 %v3941_v18  ;;  %v4473_v1 = vpop.f32.mrf.mxu0  ;;  %v1542_v18 = vld [vmem:[%s7264_s10 + $0x40] sm:$0xff] }
 0x158   : > { %v817_v34 = vpop.permute.xlu0 %816  ;;  %4723 = vmatprep.subr.mxu0 %v3940_v26  ;;  %4754 = vmatpush3.msra.mxu1 %v3961_v20  ;;  %v913_v5 = vadd.f32 %v4473_v1, %v829_v61 }
 0x159   : > { %v898_v3 = vadd.f32 %v897_v28, %v817_v34  ;;  %4724 = vmatpush3.msra.mxu0 %v3940_v26  ;;  %4755 = vmatprep.subr.mxu1 %v3960_v30  ;;  %v907_v9 = vpop.f32.mrf.mxu0  ;;  %v6232_v28 = vmul.f32 %v1542_v18, %v6101_v55 }
 0x15a   : > { %4725 = vmatprep.subr.mxu0 %v3939_v32  ;;  %4756 = vmatpush3.msra.mxu1 %v3960_v30  ;;  %v908_v11 = vadd.f32 %v907_v9, %v825_v7  ;;  %v1543_v30 = vld [vmem:[%s7264_s10 + $0x48] sm:$0xff] }
 0x15b   : > { %1408 = vrot.lane.b32.xlu0 %v898_v3, %s5329_s24  ;;  %4726 = vmatpush3.msra.mxu0 %v3939_v32  ;;  %v1225_v13 = vpop.permute.xlu1 %1224  ;;  %v1544_v32 = vld [vmem:[%s7264_s10 + $0x50] sm:$0xff]  ;;  %v6250_v34 = vmul.f32 %v1543_v30, %v6129_v10  ;;  %v1545_v3 = vld [vmem:[%s7264_s10 + $0x58] sm:$0xff]  ;;  %v1547_v9 = vld [vmem:[%s7264_s10 + $0x68] sm:$0xff] }
 0x15c   : > { %4757 = vmatprep.subr.mxu1 %v3959_v35  ;;  %4783 = vmatprep.subr.mxu0 %v7279_v0 }
 0x15d   : > { %4758 = vmatpush3.msra.mxu1 %v3959_v35  ;;  %v1015_v12 = vpop.permute.xlu0 %1014  ;;  %v1546_v35 = vld [vmem:[%s7264_s10 + $0x60] sm:$0xff] }
 0x15e   : > { %4818 = vmatprep.subr.mxu1 %v7279_v0  ;;  %v6273_v7 = vmul.f32 %v1546_v35, %v6101_v55  ;;  %v6290_v55 = vmul.f32 %v1547_v9, %v6129_v10 }
 0x15f   : > { %1414 = vrot.lane.b32.xlu0 %v913_v5, %s5329_s24 }
 0x160   : > { %v1023_v15 = vpop.permute.xlu1 %1022 }
 0x163   : > { %1412 = vrot.lane.b32.xlu0 %v908_v11, %s5329_s24  ;;  %v1548_v11 = vld [vmem:[%s7264_s10 + $0x70] sm:$0xff]  ;;  %s5334_s24 = smov 96  }
 0x165   : > { %v1221_v17 = vpop.permute.xlu1 %1220 }
 0x16a   : > { %v1019_v36 = vpop.permute.xlu1 %1018 }
 0x16f   : > { %v1217_v51 = vpop.permute.xlu1 %1216 }
 0x172   : > { %v1202_v21 = vpop.f32.mrf.mxu1 }
 0x173   : > { %v6164_v37 = vadd.f32 %v3881_v19, %v1202_v21  ;;  %v4543_v25 = vpop.f32.mrf.mxu0  ;;  %v1213_v20 = vpop.permute.xlu1 %1212  ;;  %v2295_v19 = vld [vmem:[%s7257_s3 + $0x70] sm:$0xff] }
 0x174   : > { %v1101_v27 = vadd.f32 %v4543_v25, %v1019_v36  ;;  %v4581_v38 = vpop.f32.mrf.mxu1  ;;  %v2292_v36 = vld [vmem:[%s7257_s3 + $0x58] sm:$0xff]  ;;  %v2291_v21 = vld [vmem:[%s7257_s3 + $0x50] sm:$0xff] }
 0x175   : > { %v1095_v29 = vpop.f32.mrf.mxu0  ;;  %v6167_v39 = vmul.f32 %v1536_v23, %v6164_v37  ;;  %v6212_v8 = vmul.f32 %v1540_v58, %v6164_v37  ;;  %v6253_v1 = vmul.f32 %v1544_v32, %v6164_v37  ;;  %v2290_v23 = vld [vmem:[%s7257_s3 + $0x48] sm:$0xff]  ;;  %v2288_v25 = vld [vmem:[%s7257_s3 + $0x38] sm:$0xff] }
 0x176   : > { %1426 = vrot.lane.b32.xlu1 %v1101_v27, %s5330_s28  ;;  %v1096_v24 = vadd.f32 %v1095_v29, %v1015_v12  ;;  %v2287_v27 = vld [vmem:[%s7257_s3 + $0x30] sm:$0xff]  ;;  %v2286_v38 = vld [vmem:[%s7257_s3 + $0x28] sm:$0xff]  ;;  %v2285_v29 = vld [vmem:[%s7257_s3 + $0x20] sm:$0xff] }
 0x177   : > { %4666 = vmatprep.mubr.msk.f32.mxu0 %vm1507_vm1, %v6167_v39  ;;  %4698 = vmatprep.mubr.msk.f32.mxu1 %vm1507_vm1, %v6167_v39 }
 0x178   : > { %v4546_v40 = vpop.f32.mrf.mxu0 }
 0x179   : > { %v1111_v41 = vadd.f32 %v4546_v40, %v6124_v4  ;;  %v2283_v40 = vld [vmem:[%s7257_s3 + $0x10] sm:$0xff] }
 0x17a   : > { %v1105_v31 = vpop.f32.mrf.mxu0 }
 0x17b   : > { %v1106_v42 = vadd.f32 %v1105_v31, %v1023_v15  ;;  %1430 = vrot.lane.b32.xlu1 %v1111_v41, %s5330_s28  ;;  %v1549_v15 = vld [vmem:[%s7264_s10 + $0x78] sm:$0xff]  ;;  %v2282_v41 = vld [vmem:[%s7257_s3 + $0x8] sm:$0xff]  ;;  %v2281_v31 = vld [vmem:[%s7257_s3] sm:$0xff] }
 0x17d   : > { %1428 = vrot.lane.b32.xlu0 %v1106_v42, %s5330_s28 }
 0x197   : > { %v1400_v43 = vpop.f32.mrf.mxu1 }
 0x198   : > { %v4616_v44 = vpop.f32.mrf.mxu0  ;;  %v6183_v46 = vadd.f32 %v3902_v33, %v1400_v43  ;;  %v632_v33 = vpop.permute.xlu1 %631 }
 0x199   : > { %v4654_v48 = vpop.f32.mrf.mxu1  ;;  %v1299_v63 = vadd.f32 %v4616_v44, %v1217_v51  ;;  %v627_v44 = vpop.permute.xlu0 %626 }
 0x19a   : > { %v1293_v49 = vpop.f32.mrf.mxu0  ;;  %v6189_v50 = vmul.f32 %v1537_v45, %v6183_v46  ;;  %v6229_v26 = vmul.f32 %v1541_v16, %v6183_v46  ;;  %v6270_v5 = vmul.f32 %v1545_v3, %v6183_v46  ;;  %v6307_v10 = vmul.f32 %v1549_v15, %v6183_v46 }
 0x19b   : > { %v1294_v22 = vadd.f32 %v1293_v49, %v1213_v20  ;;  %v716_v16 = vadd.f32 %v6117_v62, %v632_v33  ;;  %v711_v62 = vadd.f32 %v6122_v2, %v627_v44 }
 0x19c   : > { %v4619_v52 = vpop.f32.mrf.mxu0  ;;  %4667 = vmatmul.mubr.msk.f32.gmra.mxu0 %vm1507_vm1, %v6189_v50  ;;  %4699 = vmatmul.mubr.msk.f32.gmra.mxu1 %vm1507_vm1, %v6189_v50  ;;  %v622_v43 = vpop.permute.xlu1 %621 }
 0x19d   : > { %v1309_v56 = vadd.f32 %v4619_v52, %v1225_v13  ;;  %4669 = vmatprep.mubr.msk.f32.mxu0 %vm1507_vm1, %v6192_v53  ;;  %4701 = vmatprep.mubr.msk.f32.mxu1 %vm1507_vm1, %v6192_v53  ;;  %v6293_v13 = vmul.f32 %v1548_v11, %v6164_v37  ;;  %v2289_v37 = vld [vmem:[%s7257_s3 + $0x40] sm:$0xff]  ;;  %v706_v54 = vadd.f32 %v6113_v59, %v622_v43 }
 0x19e   : > { %v1303_v61 = vpop.f32.mrf.mxu0 }
 0x19f   : > { %v1304_v4 = vadd.f32 %v1303_v61, %v1221_v17  ;;  %1446 = vrot.lane.b32.xlu1 %v1309_v56, %s5331_s14  ;;  %v2296_v17 = vld [vmem:[%s7257_s3 + $0x78] sm:$0xff] }
 0x1a0   : > { %4670 = vmatmul.mubr.msk.f32.gmra.mxu0 %vm1507_vm1, %v6209_v6  ;;  %4702 = vmatmul.mubr.msk.f32.gmra.mxu1 %vm1507_vm1, %v6209_v6  ;;  %v617_v45 = vpop.permute.xlu1 %616 }
 0x1a1   : > { %4672 = vmatprep.mubr.msk.f32.mxu0 %vm1507_vm1, %v6212_v8  ;;  %4704 = vmatprep.mubr.msk.f32.mxu1 %vm1507_vm1, %v6212_v8 }
 0x1a2   : > { %1444 = vrot.lane.b32.xlu0 %v1304_v4, %s5331_s14 }
 0x1a3   : > { %1442 = vrot.lane.b32.xlu1 %v1299_v63, %s5331_s14 }
 0x1a4   : > { %4673 = vmatmul.mubr.msk.f32.gmra.mxu0 %vm1507_vm1, %v6229_v26  ;;  %4705 = vmatmul.mubr.msk.f32.gmra.mxu1 %vm1507_vm1, %v6229_v26 }
 0x1a5   : > { %4675 = vmatprep.mubr.msk.f32.mxu0 %vm1507_vm1, %v6232_v28  ;;  %4707 = vmatprep.mubr.msk.f32.mxu1 %vm1507_vm1, %v6232_v28 }
 0x1a6   : > { %1424 = vrot.lane.b32.xlu0 %v1096_v24, %s5330_s28  ;;  %s6435_s28 = scalar_lea.vmem %s7305_s12, %s3836_s22  ;;  %s7314_s12 = sld [smem:[#allocation24_spill]] }
 0x1a7   : > { %1440 = vrot.lane.b32.xlu1 %v1294_v22, %s5331_s14  ;;  %v2280_v42 = vld [vmem:[%s6435_s28] sm:$0xff]  ;;  %s7315_s22 = sld [smem:[#allocation23_spill]] }
 0x1a8   : > { %4676 = vmatmul.mubr.msk.f32.gmra.mxu0 %vm1507_vm1, %v6250_v34  ;;  %4708 = vmatmul.mubr.msk.f32.gmra.mxu1 %vm1507_vm1, %v6250_v34  ;;  %s7318_s14 = sld [smem:[#allocation25_spill]] }
 0x1a9   : > { %4678 = vmatprep.mubr.msk.f32.mxu0 %vm1507_vm1, %v6253_v1  ;;  %4710 = vmatprep.mubr.msk.f32.mxu1 %vm1507_vm1, %v6253_v1 }
 0x1ac   : > { %4679 = vmatmul.mubr.msk.f32.gmra.mxu0 %vm1507_vm1, %v6270_v5  ;;  %4711 = vmatmul.mubr.msk.f32.gmra.mxu1 %vm1507_vm1, %v6270_v5 }
 0x1ad   : > { %4681 = vmatprep.mubr.msk.f32.mxu0 %vm1507_vm1, %v6273_v7  ;;  %4713 = vmatprep.mubr.msk.f32.mxu1 %vm1507_vm1, %v6273_v7 }
 0x1b0   : > { %4682 = vmatmul.mubr.msk.f32.gmra.mxu0 %vm1507_vm1, %v6290_v55  ;;  %4714 = vmatmul.mubr.msk.f32.gmra.mxu1 %vm1507_vm1, %v6290_v55 }
 0x1b1   : > { %4684 = vmatprep.mubr.msk.f32.mxu0 %vm1507_vm1, %v6293_v13  ;;  %4716 = vmatprep.mubr.msk.f32.mxu1 %vm1507_vm1, %v6293_v13 }
 0x1b4   : > { %4685 = vmatmul.mubr.msk.f32.gmra.mxu0 %vm1507_vm1, %v6307_v10  ;;  %4717 = vmatmul.mubr.msk.f32.gmra.mxu1 %vm1507_vm1, %v6307_v10 }
 0x1b5   : > { %4727 = vmatprep.mubr.msk.f32.mxu0 %vm1507_vm1, %v6104_v57  ;;  %4759 = vmatprep.mubr.msk.f32.mxu1 %vm1507_vm1, %v6104_v57  ;;  %v2294_v57 = vld [vmem:[%s7257_s3 + $0x68] sm:$0xff] }
 0x1b8   : > { %4728 = vmatmul.mubr.msk.f32.vlgmr.msra.gmra.mxu0 %vm1507_vm1, %v6132_v14  ;;  %4760 = vmatmul.mubr.msk.f32.vlgmr.msra.gmra.mxu1 %vm1507_vm1, %v6132_v14  ;;  %v2293_v14 = vld [vmem:[%s7257_s3 + $0x60] sm:$0xff] }
 0x1b9   : > { %4784 = vmatpush3.msra.mxu0 %v2296_v17  ;;  %4730 = vmatprep.mubr.msk.f32.mxu0 %vm1507_vm1, %v6167_v39 }
 0x1ba   : > { %4762 = vmatprep.mubr.msk.f32.mxu1 %vm1507_vm1, %v6167_v39  ;;  %4785 = vmatprep.subr.mxu0 %v7279_v0  ;;  %v2284_v39 = vld [vmem:[%s7257_s3 + $0x18] sm:$0xff] }
 0x1bb   : > { %4786 = vmatpush3.msra.mxu0 %v2295_v19 }
 0x1bc   : > { %4787 = vmatprep.subr.mxu0 %v7279_v0  ;;  %4731 = vmatmul.mubr.msk.f32.gmra.mxu0 %vm1507_vm1, %v6189_v50 }
 0x1bd   : > { %4763 = vmatmul.mubr.msk.f32.gmra.mxu1 %vm1507_vm1, %v6189_v50  ;;  %4788 = vmatpush3.msra.mxu0 %v2294_v57 }
 0x1be   : > { %4733 = vmatprep.mubr.msk.f32.mxu0 %vm1507_vm1, %v6192_v53  ;;  %4765 = vmatprep.mubr.msk.f32.mxu1 %vm1507_vm1, %v6192_v53 }
 0x1bf   : > { %4789 = vmatprep.subr.mxu0 %v7279_v0 }
 0x1c0   : > { %4790 = vmatpush3.msra.mxu0 %v2293_v14 }
 0x1c1   : > { %4791 = vmatprep.subr.mxu0 %v7279_v0  ;;  %4734 = vmatmul.mubr.msk.f32.gmra.mxu0 %vm1507_vm1, %v6209_v6 }
 0x1c2   : > { %4766 = vmatmul.mubr.msk.f32.gmra.mxu1 %vm1507_vm1, %v6209_v6  ;;  %4792 = vmatpush3.msra.mxu0 %v2292_v36  ;;  %v701_v6 = vadd.f32 %v6115_v60, %v617_v45 }
 0x1c3   : > { %4736 = vmatprep.mubr.msk.f32.mxu0 %vm1507_vm1, %v6212_v8  ;;  %4768 = vmatprep.mubr.msk.f32.mxu1 %vm1507_vm1, %v6212_v8 }
 0x1c4   : > { %4793 = vmatprep.subr.mxu0 %v7279_v0 }
 0x1c5   : > { %4794 = vmatpush3.msra.mxu0 %v2291_v21 }
 0x1c6   : > { %4795 = vmatprep.subr.mxu0 %v7279_v0  ;;  %4737 = vmatmul.mubr.msk.f32.gmra.mxu0 %vm1507_vm1, %v6229_v26 }
 0x1c7   : > { %4769 = vmatmul.mubr.msk.f32.gmra.mxu1 %vm1507_vm1, %v6229_v26  ;;  %4796 = vmatpush3.msra.mxu0 %v2290_v23 }
 0x1c8   : > { %4739 = vmatprep.mubr.msk.f32.mxu0 %vm1507_vm1, %v6232_v28  ;;  %4771 = vmatprep.mubr.msk.f32.mxu1 %vm1507_vm1, %v6232_v28 }
 0x1c9   : > { %4797 = vmatprep.subr.mxu0 %v7279_v0  ;;  %v1411_v47 = vpop.permute.xlu1 %1410 }
 0x1ca   : > { %4798 = vmatpush3.msra.mxu0 %v2289_v37  ;;  %v1454_v56 = vsel %vm1452_vm2, %v706_v54, %v1411_v47 }
 0x1cb   : > { %4799 = vmatprep.subr.mxu0 %v7279_v0  ;;  %4740 = vmatmul.mubr.msk.f32.gmra.mxu0 %vm1507_vm1, %v6250_v34 }
 0x1cc   : > { %4772 = vmatmul.mubr.msk.f32.gmra.mxu1 %vm1507_vm1, %v6250_v34  ;;  %4800 = vmatpush3.msra.mxu0 %v2288_v25 }
 0x1cd   : > { %4742 = vmatprep.mubr.msk.f32.mxu0 %vm1507_vm1, %v6253_v1  ;;  %4774 = vmatprep.mubr.msk.f32.mxu1 %vm1507_vm1, %v6253_v1  ;;  %v1409_v46 = vpop.permute.xlu0 %1408 }
 0x1ce   : > { %4801 = vmatprep.subr.mxu0 %v7279_v0  ;;  %v1453_v8 = vsel %vm1452_vm2, %v701_v6, %v1409_v46 }
 0x1cf   : > { %4802 = vmatpush3.msra.mxu0 %v2287_v27 }
 0x1d0   : > { %4803 = vmatprep.subr.mxu0 %v7279_v0  ;;  %4743 = vmatmul.mubr.msk.f32.gmra.mxu0 %vm1507_vm1, %v6270_v5 }
 0x1d1   : > { %4775 = vmatmul.mubr.msk.f32.gmra.mxu1 %vm1507_vm1, %v6270_v5  ;;  %4804 = vmatpush3.msra.mxu0 %v2286_v38  ;;  %v1415_v48 = vpop.permute.xlu0 %1414 }
 0x1d2   : > { %4745 = vmatprep.mubr.msk.f32.mxu0 %vm1507_vm1, %v6273_v7  ;;  %4777 = vmatprep.mubr.msk.f32.mxu1 %vm1507_vm1, %v6273_v7  ;;  %v1456_v60 = vsel %vm1452_vm2, %v716_v16, %v1415_v48 }
 0x1d3   : > { %4805 = vmatprep.subr.mxu0 %v7279_v0 }
 0x1d4   : > { %4806 = vmatpush3.msra.mxu0 %v2285_v29 }
 0x1d5   : > { %4807 = vmatprep.subr.mxu0 %v7279_v0  ;;  %4746 = vmatmul.mubr.msk.f32.gmra.mxu0 %vm1507_vm1, %v6290_v55  ;;  %v1413_v50 = vpop.permute.xlu0 %1412 }
 0x1d6   : > { %4778 = vmatmul.mubr.msk.f32.gmra.mxu1 %vm1507_vm1, %v6290_v55  ;;  %4808 = vmatpush3.msra.mxu0 %v2284_v39  ;;  %v1455_v26 = vsel %vm1452_vm2, %v711_v62, %v1413_v50 }
 0x1d7   : > { %4748 = vmatprep.mubr.msk.f32.mxu0 %vm1507_vm1, %v6293_v13  ;;  %4780 = vmatprep.mubr.msk.f32.mxu1 %vm1507_vm1, %v6293_v13 }
 0x1d8   : > { %4809 = vmatprep.subr.mxu0 %v7279_v0 }
 0x1d9   : > { %4810 = vmatpush3.msra.mxu0 %v2283_v40 }
 0x1da   : > { %4811 = vmatprep.subr.mxu0 %v7279_v0  ;;  %4749 = vmatmul.mubr.msk.f32.gmra.mxu0 %vm1507_vm1, %v6307_v10 }
 0x1db   : > { %4781 = vmatmul.mubr.msk.f32.gmra.mxu1 %vm1507_vm1, %v6307_v10  ;;  %4812 = vmatpush3.msra.mxu0 %v2282_v41 }
 0x1dc   : > { %4813 = vmatprep.subr.mxu0 %v7279_v0  ;;  %4815 = vmatprep.mubr.msk.f32.mxu0 %vm5324_vm0, %v7279_v0 }
 0x1dd   : > { %4814 = vmatpush3.msra.mxu0 %v2281_v31  ;;  %4826 = vmatprep.mubr.msk.f32.mxu1 %vm5324_vm0, %v7279_v0 }
 0x1de   : > { %4816 = vmatmul.mubr.f32.vlgmr.msra.gmra.mxu0 %v2280_v42  ;;  %4829 = vmatprep.subr.mxu0 %v7279_v0 }
 0x1df   : > { %4837 = vmatprep.mubr.msk.f32.mxu0 %vm5324_vm0, %v7279_v0 }
 0x1e8   : > { %v1427_v49 = vpop.permute.xlu1 %1426 }
 0x1e9   : > { %v1459_v58 = vsel %vm1457_vm3, %v1454_v56, %v1427_v49  ;;  %v1525_v56 = vld [vmem:[%s7308_s18 + $0x18] sm:$0xff]  ;;  %s7316_s18 = smov 32  }
 0x1ed   : > { %v1431_v51 = vpop.permute.xlu1 %1430 }
 0x1ee   : > { %v1461_v22 = vsel %vm1457_vm3, %v1456_v60, %v1431_v51 }
 0x1ef   : > { %v1429_v52 = vpop.permute.xlu0 %1428 }
 0x1f0   : > { %v1460_v28 = vsel %vm1457_vm3, %v1455_v26, %v1429_v52 }
 0x211   : > { %v1447_v53 = vpop.permute.xlu1 %1446 }
 0x212   : > { %v1466_v24 = vsel %vm1462_vm4, %v1461_v22, %v1447_v53 }
 0x214   : > { %v1445_v61 = vpop.permute.xlu0 %1444  ;;  %v6497_v2 = vpop.f32.mrf.mxu0 }
 0x215   : > { %v1443_v63 = vpop.permute.xlu1 %1442  ;;  %v6482_v30 = vsel %vm1462_vm4, %v1460_v28, %v1445_v61  ;;  %v6519_v13 = vpop.f32.mrf.mxu1 }
 0x216   : > { %v6458_v4 = vsel %vm1462_vm4, %v1459_v58, %v1443_v63  ;;  %v6499_v32 = vpop.f32.mrf.mxu0 }
 0x217   : > { %1473 = vrot.lane.b32.xlu1 %v6458_v4, %s7282_s26  ;;  %v6525_v17 = vpop.f32.mrf.mxu1 }
 0x218   : > { %v1425_v59 = vpop.permute.xlu0 %1424 }
 0x219   : > { %v1441_v12 = vpop.permute.xlu1 %1440  ;;  %v1458_v18 = vsel %vm1457_vm3, %v1453_v8, %v1425_v59 }
 0x21a   : > { %v6467_v20 = vsel %vm1462_vm4, %v1458_v18, %v1441_v12 }
 0x21b   : > { %1485 = vrot.lane.b32.xlu1 %v6458_v4, %s5333_s25  ;;  %1471 = vrot.lane.b32.xlu0 %v6467_v20, %s7282_s26 }
 0x21f   : > { %1489 = vrot.lane.b32.xlu1 %v1466_v24, %s5333_s25  ;;  %1477 = vrot.lane.b32.xlu0 %v1466_v24, %s7282_s26 }
 0x223   : > { %1501 = vrot.lane.b32.xlu1 %v1466_v24, %s5334_s24  ;;  %1475 = vrot.lane.b32.xlu0 %v6482_v30, %s7282_s26 }
 0x227   : > { %1497 = vrot.lane.b32.xlu1 %v6458_v4, %s5334_s24  ;;  %1487 = vrot.lane.b32.xlu0 %v6482_v30, %s5333_s25 }
 0x22b   : > { %1495 = vrot.lane.b32.xlu1 %v6467_v20, %s5334_s24  ;;  %1499 = vrot.lane.b32.xlu0 %v6482_v30, %s5334_s24 }
 0x22f   : > { %1483 = vrot.lane.b32.xlu0 %v6467_v20, %s5333_s25 }
 0x25c   : > { %v6501_v34 = vpop.f32.mrf.mxu0  ;;  %v6529_v57 = vpop.f32.mrf.mxu1 }
 0x25e   : > { %v6503_v1 = vpop.f32.mrf.mxu0  ;;  %v6535_v21 = vpop.f32.mrf.mxu1 }
 0x260   : > { %v6505_v3 = vpop.f32.mrf.mxu0  ;;  %v6541_v25 = vpop.f32.mrf.mxu1 }
 0x262   : > { %v6507_v35 = vpop.f32.mrf.mxu0  ;;  %v6547_v29 = vpop.f32.mrf.mxu1 }
 0x264   : > { %v6509_v5 = vpop.f32.mrf.mxu0  ;;  %v6551_v40 = vpop.f32.mrf.mxu1 }
 0x266   : > { %v6511_v7 = vpop.f32.mrf.mxu0  ;;  %v6557_v42 = vpop.f32.mrf.mxu1 }
 0x268   : > { %v6513_v9 = vpop.f32.mrf.mxu0  ;;  %v6561_v44 = vpop.f32.mrf.mxu1 }
 0x26a   : > { %v6515_v11 = vpop.f32.mrf.mxu0  ;;  %v6567_v49 = vpop.f32.mrf.mxu1 }
 0x26c   : > { %v6517_v55 = vpop.f32.mrf.mxu0  ;;  %v6577_v58 = vpop.f32.mrf.mxu1 }
 0x26e   : > { %v6521_v15 = vpop.f32.mrf.mxu0  ;;  %v1900_v18 = vpop.f32.mrf.mxu1 }
 0x270   : > { %v6523_v10 = vpop.f32.mrf.mxu0 }
 0x272   : > { %v6527_v19 = vpop.f32.mrf.mxu0 }
 0x274   : > { %v6531_v14 = vpop.f32.mrf.mxu0 }
 0x276   : > { %v6533_v36 = vpop.f32.mrf.mxu0 }
 0x278   : > { %v6537_v23 = vpop.f32.mrf.mxu0 }
 0x279   : > { %7306 = vst [vmem:[#allocation17_spill] sm:$0xff] %v6537_v23 }
 0x27a   : > { %v6539_v37 = vpop.f32.mrf.mxu0 }
 0x27b   : > { %7307 = vst [vmem:[#allocation18_spill] sm:$0xff] %v6539_v37 }
 0x27c   : > { %v6543_v27 = vpop.f32.mrf.mxu0 }
 0x27e   : > { %v6545_v38 = vpop.f32.mrf.mxu0 }
 0x281   : > { %v6549_v39 = vpop.f32.mrf.mxu0 }
 0x283   : > { %v6553_v41 = vpop.f32.mrf.mxu0 }
 0x286   : > { %v6555_v31 = vpop.f32.mrf.mxu0 }
 0x288   : > { %v6559_v33 = vpop.f32.mrf.mxu0 }
 0x289   : > { %v1474_v43 = vpop.permute.xlu1 %1473 }
 0x28a   : > { %v1509_v62 = vsel %vm1507_vm1, %v6458_v4, %v1474_v43  ;;  %v1523_v4 = vld [vmem:[%s7309_s27 + $0x8] sm:$0xff] }
 0x28b   : > { %v6563_v45 = vpop.f32.mrf.mxu0 }
 0x28d   : > { %v1486_v46 = vpop.permute.xlu1 %1485  ;;  %v6565_v47 = vpop.f32.mrf.mxu0 }
 0x28e   : > { %v1472_v48 = vpop.permute.xlu0 %1471 }
 0x290   : > { %v6569_v50 = vpop.f32.mrf.mxu0 }
 0x291   : > { %v1490_v51 = vpop.permute.xlu1 %1489 }
 0x292   : > { %v1478_v52 = vpop.permute.xlu0 %1477  ;;  %v6571_v53 = vpop.f32.mrf.mxu0 }
 0x293   : > { %v1511_v54 = vsel %vm1507_vm1, %v1466_v24, %v1478_v52  ;;  %v1524_v52 = vld [vmem:[%s7309_s27 + $0x10] sm:$0xff] }
 0x294   : > { %v1516_v63 = vsel %vm1512_vm6, %v1511_v54, %v1490_v51  ;;  %v3979_v51 = vld [vmem:[#allocation7] ss:$0 sm:$0xff]  ;;  %v4715_v54 = vpop.f32.mrf.mxu1 }
 0x295   : > { %v1502_v61 = vpop.permute.xlu1 %1501  ;;  %v6580_v6 = vpop.f32.mrf.mxu0 }
 0x296   : > { %v1521_v8 = vsel %vm1517_vm5, %v1516_v63, %v1502_v61  ;;  %v1476_v59 = vpop.permute.xlu0 %1475  ;;  %v1910_v23 = vpop.f32.mrf.mxu1 }
 0x297   : > { %v6583_v12 = vmul.f32 %v1525_v56, %v1521_v8  ;;  %v6585_v16 = vpop.f32.mrf.mxu0  ;;  %v1510_v26 = vsel %vm1507_vm1, %v6482_v30, %v1476_v59  ;;  %v1514_v56 = vsel %vm1512_vm6, %v1509_v62, %v1486_v46  ;;  %v1508_v46 = vsel %vm1507_vm1, %v6467_v20, %v1472_v48 }
 0x299   : > { %4819 = vmatpush3.msra.mxu1 %v6583_v12  ;;  %4830 = vmatpush3.msra.mxu0 %v6583_v12  ;;  %v1498_v24 = vpop.permute.xlu1 %1497 }
 0x29a   : > { %v1488_v60 = vpop.permute.xlu0 %1487  ;;  %4820 = vmatprep.subr.mxu1 %v7279_v0  ;;  %4831 = vmatprep.subr.mxu0 %v7279_v0  ;;  %v6591_v22 = vpop.f32.mrf.mxu0  ;;  %v1519_v30 = vsel %vm1517_vm5, %v1514_v56, %v1498_v24  ;;  %v1522_v24 = vld [vmem:[%s7309_s27] sm:$0xff] }
 0x29b   : > { %v1515_v61 = vsel %vm1512_vm6, %v1510_v26, %v1488_v60  ;;  %v6615_v60 = vmul.f32 %v1523_v4, %v1519_v30 }
 0x29c   : > { %v6597_v28 = vpop.f32.mrf.mxu0 }
 0x29d   : > { %v1496_v26 = vpop.permute.xlu1 %1495 }
 0x29e   : > { %v1500_v63 = vpop.permute.xlu0 %1499  ;;  %v2368_v8 = vpop.f32.mrf.mxu0 }
 0x29f   : > { %v1520_v43 = vsel %vm1517_vm5, %v1515_v61, %v1500_v63  ;;  %v6609_v59 = vadd.f32 %v3979_v51, %v2368_v8  ;;  %v7310_v51 = vmov 0.0  }
 0x2a0   : > { %v6611_v0 = vmul.f32 %v1524_v52, %v1520_v43  ;;  %v4817_v37 = vpop.f32.mrf.mxu0  ;;  %v4718_v52 = vpop.f32.mrf.mxu1 }
 0x2a1   : > { %2534 = vrot.lane.b32.xlu0 %v6609_v59, %s5334_s24 }
 0x2a2   : > { %4821 = vmatpush3.msra.mxu1 %v6611_v0  ;;  %v1484_v62 = vpop.permute.xlu0 %1483  ;;  %4832 = vmatpush3.msra.mxu0 %v6611_v0  ;;  %v1920_v56 = vpop.f32.mrf.mxu1 }
 0x2a3   : > { %v1513_v37 = vsel %vm1512_vm6, %v1508_v46, %v1484_v62  ;;  %4822 = vmatprep.subr.mxu1 %v7310_v51  ;;  %4833 = vmatprep.subr.mxu0 %v7310_v51 }
 0x2a4   : > { %v1518_v20 = vsel %vm1517_vm5, %v1513_v37, %v1496_v26  ;;  %4823 = vmatpush3.msra.mxu1 %v6615_v60  ;;  %4834 = vmatpush3.msra.mxu0 %v6615_v60 }
 0x2a5   : > { %v6629_v48 = vmul.f32 %v1522_v24, %v1518_v20  ;;  %4824 = vmatprep.subr.mxu1 %v7310_v51  ;;  %4835 = vmatprep.subr.mxu0 %v7310_v51 }
 0x2a7   : > { %4825 = vmatpush3.msra.mxu1 %v6629_v48  ;;  %4836 = vmatpush3.msra.mxu0 %v6629_v48 }
 0x2a8   : > { %4827 = vmatmul.mubr.msk.f32.vlgmr.msra.gmra.mxu1 %vm1507_vm1, %v6609_v59  ;;  %4840 = vmatprep.subr.mxu1 %v7310_v51 }
 0x2a9   : > { %4841 = vmatpush3.msra.mxu1 %v4718_v52  ;;  %4875 = vmatprep.subr.mxu0 %v7310_v51 }
 0x2aa   : > { %4842 = vmatprep.subr.mxu1 %v7310_v51  ;;  %4872 = vmatprep.mubr.msk.f32.mxu1 %vm5324_vm0, %v7310_v51 }
 0x2ab   : > { %4843 = vmatpush3.msra.mxu1 %v1920_v56 }
 0x2ac   : > { %4844 = vmatprep.subr.mxu1 %v7310_v51 }
 0x2ad   : > { %4845 = vmatpush3.msra.mxu1 %v4715_v54 }
 0x2ae   : > { %4846 = vmatprep.subr.mxu1 %v7310_v51 }
 0x2af   : > { %4847 = vmatpush3.msra.mxu1 %v1910_v23 }
 0x2b0   : > { %4848 = vmatprep.subr.mxu1 %v7310_v51 }
 0x2b1   : > { %4849 = vmatpush3.msra.mxu1 %v6577_v58 }
 0x2b2   : > { %4850 = vmatprep.subr.mxu1 %v7310_v51 }
 0x2b3   : > { %4851 = vmatpush3.msra.mxu1 %v1900_v18 }
 0x2b4   : > { %4852 = vmatprep.subr.mxu1 %v7310_v51 }
 0x2b5   : > { %4853 = vmatpush3.msra.mxu1 %v6561_v44 }
 0x2b6   : > { %4854 = vmatprep.subr.mxu1 %v7310_v51 }
 0x2b7   : > { %4855 = vmatpush3.msra.mxu1 %v6567_v49 }
 0x2b8   : > { %4856 = vmatprep.subr.mxu1 %v7310_v51 }
 0x2b9   : > { %4857 = vmatpush3.msra.mxu1 %v6551_v40 }
 0x2ba   : > { %4858 = vmatprep.subr.mxu1 %v7310_v51 }
 0x2bb   : > { %4859 = vmatpush3.msra.mxu1 %v6557_v42 }
 0x2bc   : > { %4860 = vmatprep.subr.mxu1 %v7310_v51 }
 0x2bd   : > { %4861 = vmatpush3.msra.mxu1 %v6541_v25 }
 0x2be   : > { %4862 = vmatprep.subr.mxu1 %v7310_v51 }
 0x2bf   : > { %4863 = vmatpush3.msra.mxu1 %v6547_v29 }
 0x2c0   : > { %4864 = vmatprep.subr.mxu1 %v7310_v51 }
 0x2c1   : > { %4865 = vmatpush3.msra.mxu1 %v6529_v57 }
 0x2c2   : > { %4866 = vmatprep.subr.mxu1 %v7310_v51 }
 0x2c3   : > { %4867 = vmatpush3.msra.mxu1 %v6535_v21 }
 0x2c4   : > { %4868 = vmatprep.subr.mxu1 %v7310_v51 }
 0x2c5   : > { %4869 = vmatpush3.msra.mxu1 %v6519_v13 }
 0x2c6   : > { %4870 = vmatprep.subr.mxu1 %v7310_v51 }
 0x2c7   : > { %4871 = vmatpush3.msra.mxu1 %v6525_v17 }
 0x2c8   : > { %4910 = vmatprep.subr.mxu1 %v7310_v51 }
 0x313   : > { %v2535_v23 = vpop.permute.xlu0 %2534 }
 0x314   : > { %4838 = vmatmul.mubr.msk.f32.vlgmr.msra.gmra.mxu0 %vm1507_vm1, %v2535_v23 }
 0x315   : > { %4876 = vmatpush3.msra.mxu0 %v6531_v14  ;;  %4907 = vmatprep.mubr.msk.f32.mxu0 %vm5324_vm0, %v7310_v51 }
 0x316   : > { %4877 = vmatprep.subr.mxu0 %v7310_v51 }
 0x317   : > { %4878 = vmatpush3.msra.mxu0 %v6533_v36 }
 0x318   : > { %4879 = vmatprep.subr.mxu0 %v7310_v51 }
 0x319   : > { %4880 = vmatpush3.msra.mxu0 %v6523_v10 }
 0x31a   : > { %4881 = vmatprep.subr.mxu0 %v7310_v51 }
 0x31b   : > { %4882 = vmatpush3.msra.mxu0 %v6527_v19 }
 0x31c   : > { %4883 = vmatprep.subr.mxu0 %v7310_v51 }
 0x31d   : > { %4884 = vmatpush3.msra.mxu0 %v6517_v55  ;;  %v6692_v55 = vpop.f32.mrf.mxu1 }
 0x31e   : > { %4885 = vmatprep.subr.mxu0 %v7310_v51 }
 0x31f   : > { %4886 = vmatpush3.msra.mxu0 %v6521_v15 }
 0x320   : > { %4887 = vmatprep.subr.mxu0 %v7310_v51 }
 0x321   : > { %4888 = vmatpush3.msra.mxu0 %v6513_v9  ;;  %v6698_v9 = vpop.f32.mrf.mxu1 }
 0x322   : > { %4889 = vmatprep.subr.mxu0 %v7310_v51 }
 0x323   : > { %4890 = vmatpush3.msra.mxu0 %v6515_v11 }
 0x324   : > { %4891 = vmatprep.subr.mxu0 %v7310_v51 }
 0x325   : > { %4892 = vmatpush3.msra.mxu0 %v6509_v5  ;;  %v6704_v5 = vpop.f32.mrf.mxu1 }
 0x326   : > { %4893 = vmatprep.subr.mxu0 %v7310_v51 }
 0x327   : > { %4894 = vmatpush3.msra.mxu0 %v6511_v7 }
 0x328   : > { %4895 = vmatprep.subr.mxu0 %v7310_v51 }
 0x329   : > { %4896 = vmatpush3.msra.mxu0 %v6505_v3  ;;  %v6710_v3 = vpop.f32.mrf.mxu1 }
 0x32a   : > { %4897 = vmatprep.subr.mxu0 %v7310_v51 }
 0x32b   : > { %4898 = vmatpush3.msra.mxu0 %v6507_v35  ;;  %v6712_v35 = vpop.f32.mrf.mxu1 }
 0x32c   : > { %4899 = vmatprep.subr.mxu0 %v7310_v51 }
 0x32d   : > { %4900 = vmatpush3.msra.mxu0 %v6501_v34  ;;  %v6714_v34 = vpop.f32.mrf.mxu1 }
 0x32e   : > { %4901 = vmatprep.subr.mxu0 %v7310_v51 }
 0x32f   : > { %4902 = vmatpush3.msra.mxu0 %v6503_v1  ;;  %v6716_v7 = vpop.f32.mrf.mxu1 }
 0x330   : > { %4903 = vmatprep.subr.mxu0 %v7310_v51 }
 0x331   : > { %4904 = vmatpush3.msra.mxu0 %v6497_v2  ;;  %v6718_v1 = vpop.f32.mrf.mxu1 }
 0x332   : > { %4905 = vmatprep.subr.mxu0 %v7310_v51 }
 0x333   : > { %4906 = vmatpush3.msra.mxu0 %v6499_v32  ;;  %v6720_v11 = vpop.f32.mrf.mxu1 }
 0x334   : > { %4921 = vmatprep.subr.mxu0 %v7310_v51 }
 0x335   : > { %v6722_v13 = vpop.f32.mrf.mxu1 }
 0x337   : > { %v6724_v2 = vpop.f32.mrf.mxu1 }
 0x339   : > { %v6726_v15 = vpop.f32.mrf.mxu1 }
 0x33b   : > { %v6728_v32 = vpop.f32.mrf.mxu1 }
 0x33d   : > { %v6730_v10 = vpop.f32.mrf.mxu1 }
 0x33f   : > { %v6732_v17 = vpop.f32.mrf.mxu1 }
 0x341   : > { %v6734_v19 = vpop.f32.mrf.mxu1 }
 0x368   : > { %v6736_v57 = vpop.f32.mrf.mxu1 }
 0x36a   : > { %v4828_v14 = vpop.f32.mrf.mxu1 }
 0x3d4   : > { %v2604_v36 = vpop.f32.mrf.mxu0 }
 0x3d5   : > { %v2636_v21 = vsel %vm2479_vm7, %v2604_v36, -inf  ;;  %v2620_v25 = vsel %vm2462_vm8, %v2604_v36, -inf  ;;  %v2652_v40 = vsel %vm2496_vm9, %v2604_v36, -inf  ;;  %v2608_v42 = vsel %vm1507_vm1, %v2604_v36, -inf }
 0x3d6   : > { %2637 = vmax.xlane.f32.xlu0 %v2636_v21  ;;  %2621 = vmax.xlane.f32.xlu1 %v2620_v25  ;;  %v4839_v29 = vpop.f32.mrf.mxu0 }
 0x3d7   : > { %v2480_v29 = vsel %vm2479_vm7, %v6736_v57, -inf }
 0x3da   : > { %2653 = vmax.xlane.f32.xlu0 %v2652_v40  ;;  %2609 = vmax.xlane.f32.xlu1 %v2608_v42  ;;  %v2497_v40 = vsel %vm2496_vm9, %v6736_v57, -inf  ;;  %v2450_v42 = vsel %vm1507_vm1, %v6736_v57, -inf }
 0x45f   : > { %v2638_v44 = vpop.xlane.xlu0 %2637  ;;  %v2622_v49 = vpop.xlane.xlu1 %2621 }
 0x460   : > { %v2639_v58 = vsub.f32 %v2604_v36, %v2638_v44  ;;  %v2623_v18 = vsub.f32 %v2604_v36, %v2622_v49 }
 0x462   : > { %v2640_v54 = vmul.f32 1.442695, %v2639_v58  ;;  %v2624_v61 = vmul.f32 1.442695, %v2623_v18 }
 0x463   : > { %v2654_v63 = vpop.xlane.xlu0 %2653  ;;  %v2610_v24 = vpop.xlane.xlu1 %2609 }
 0x464   : > { %5100 = vpow2.f32 %v2640_v54  ;;  %v2655_v8 = vsub.f32 %v2604_v36, %v2654_v63  ;;  %v2611_v62 = vsub.f32 %v2604_v36, %v2610_v24  ;;  %v2463_v36 = vsel %vm2462_vm8, %v6736_v57, -inf }
 0x465   : > { %5102 = vpow2.f32 %v2624_v61 }
 0x466   : > { %v2656_v4 = vmul.f32 1.442695, %v2655_v8  ;;  %v2612_v26 = vmul.f32 1.442695, %v2611_v62 }
 0x468   : > { %5104 = vpow2.f32 %v2656_v4 }
 0x469   : > { %5106 = vpow2.f32 %v2612_v26 }
 0x471   : > { %v5101_v30 = vpop.eup %5100 }
 0x472   : > { %v5103_v43 = vpop.eup %5102  ;;  %2643 = vrot.lane.b32.xlu1 %v5101_v30, %s5333_s25 }
 0x473   : > { %2627 = vrot.lane.b32.xlu0 %v5103_v43, %s5334_s24 }
 0x475   : > { %v5105_v46 = vpop.eup %5104 }
 0x476   : > { %2659 = vrot.lane.b32.xlu1 %v5105_v46, %s7282_s26  ;;  %v5107_v37 = vpop.eup %5106 }
 0x477   : > { %v2614_v20 = vsel %vm1507_vm1, %v5107_v37, 0.0 }
 0x492   : > { %2615 = vadd.xlane.f32.xlu0 %v2614_v20 }
 0x4e4   : > { %v2644_v52 = vpop.permute.xlu1 %2643 }
 0x4e5   : > { %v2628_v56 = vpop.permute.xlu0 %2627  ;;  %v2646_v23 = vsel %vm1507_vm1, %v2644_v52, 0.0 }
 0x4e6   : > { %v2630_v14 = vsel %vm1507_vm1, %v2628_v56, 0.0  ;;  %2647 = vadd.xlane.f32.xlu0 %v2646_v23 }
 0x4e7   : > { %2631 = vadd.xlane.f32.xlu1 %v2630_v14 }
 0x4e8   : > { %v2660_v21 = vpop.permute.xlu1 %2659 }
 0x4e9   : > { %v2662_v25 = vsel %vm1507_vm1, %v2660_v21, 0.0 }
 0x4ea   : > { %2663 = vadd.xlane.f32.xlu0 %v2662_v25 }
 0x4f8   : > { %2828 = vrot.lane.b32.xlu1 %v6609_v59, %s5333_s25 }
 0x500   : > { %3053 = vrot.lane.b32.xlu0 %v6609_v59, %s7282_s26 }
 0x51b   : > { %v2616_v44 = vpop.xlane.xlu0 %2615 }
 0x51c   : > { %2464 = vmax.xlane.f32.xlu1 %v2463_v36  ;;  %5108 = vrcp.f32 %v2616_v44 }
 0x51f   : > { %2481 = vmax.xlane.f32.xlu0 %v2480_v29 }
 0x520   : > { %2498 = vmax.xlane.f32.xlu1 %v2497_v40 }
 0x523   : > { %2451 = vmax.xlane.f32.xlu0 %v2450_v42 }
 0x529   : > { %v5109_v18 = vpop.eup %5108 }
 0x52a   : > { %v2619_v63 = vmul.f32 %v5109_v18, %v5107_v37 }
 0x56f   : > { %v2648_v49 = vpop.xlane.xlu0 %2647 }
 0x570   : > { %5110 = vrcp.f32 %v2648_v49  ;;  %v2632_v59 = vpop.xlane.xlu1 %2631 }
 0x571   : > { %5112 = vrcp.f32 %v2632_v59 }
 0x573   : > { %v2664_v58 = vpop.xlane.xlu0 %2663 }
 0x574   : > { %5114 = vrcp.f32 %v2664_v58 }
 0x57d   : > { %v5111_v54 = vpop.eup %5110 }
 0x57e   : > { %v5113_v61 = vpop.eup %5112  ;;  %v2651_v4 = vmul.f32 %v5111_v54, %v5101_v30  ;;  %v2829_v30 = vpop.permute.xlu1 %2828 }
 0x57f   : > { %v2635_v8 = vmul.f32 %v5113_v61, %v5103_v43  ;;  %v3054_v43 = vpop.permute.xlu0 %3053 }
 0x581   : > { %v5115_v24 = vpop.eup %5114  ;;  %v2668_v62 = vsel %vm1507_vm1, %v2619_v63, %v2635_v8 }
 0x582   : > { %v2667_v26 = vmul.f32 %v5115_v24, %v5105_v46  ;;  %v2669_v20 = vsel %vm1512_vm6, %v2668_v62, %v2651_v4 }
 0x584   : > { %v2670_v52 = vsel %vm1517_vm5, %v2669_v20, %v2667_v26 }
 0x585   : > { %4873 = vmatmul.mubr.f32.vlgmr.msra.gmra.mxu1 %v2670_v52 }
 0x586   : > { %4911 = vmatpush3.msra.mxu1 %v6583_v12  ;;  %4918 = vmatprep.mubr.msk.f32.mxu1 %vm5324_vm0, %v7310_v51 }
 0x587   : > { %4912 = vmatprep.subr.mxu1 %v7310_v51 }
 0x588   : > { %4913 = vmatpush3.msra.mxu1 %v6611_v0 }
 0x589   : > { %4914 = vmatprep.subr.mxu1 %v7310_v51 }
 0x58a   : > { %4915 = vmatpush3.msra.mxu1 %v6615_v60 }
 0x58b   : > { %4916 = vmatprep.subr.mxu1 %v7310_v51 }
 0x58c   : > { %4917 = vmatpush3.msra.mxu1 %v6629_v48 }
 0x58d   : > { %4919 = vmatmul.mubr.msk.f32.vlgmr.msra.gmra.mxu1 %vm1507_vm1, %v2829_v30  ;;  %4956 = vmatprep.subr.mxu1 %v7310_v51 }
 0x58e   : > { %4957 = vmatpush3.msra.mxu1 %v6583_v12  ;;  %4964 = vmatprep.mubr.msk.f32.mxu1 %vm5324_vm0, %v7310_v51 }
 0x58f   : > { %4958 = vmatprep.subr.mxu1 %v7310_v51 }
 0x590   : > { %4959 = vmatpush3.msra.mxu1 %v6611_v0 }
 0x591   : > { %4960 = vmatprep.subr.mxu1 %v7310_v51 }
 0x592   : > { %4961 = vmatpush3.msra.mxu1 %v6615_v60 }
 0x593   : > { %4962 = vmatprep.subr.mxu1 %v7310_v51 }
 0x594   : > { %4963 = vmatpush3.msra.mxu1 %v6629_v48 }
 0x595   : > { %4965 = vmatmul.mubr.msk.f32.vlgmr.msra.gmra.mxu1 %vm1507_vm1, %v3054_v43  ;;  %4967 = vmatprep.subr.mxu1 %v7310_v51 }
 0x596   : > { %4968 = vmatpush3.msra.mxu1 %v6732_v17  ;;  %4999 = vmatprep.mubr.msk.f32.mxu1 %vm5324_vm0, %v7310_v51 }
 0x597   : > { %4969 = vmatprep.subr.mxu1 %v7310_v51 }
 0x598   : > { %4970 = vmatpush3.msra.mxu1 %v6734_v19 }
 0x599   : > { %4971 = vmatprep.subr.mxu1 %v7310_v51 }
 0x59a   : > { %4972 = vmatpush3.msra.mxu1 %v6728_v32 }
 0x59b   : > { %4973 = vmatprep.subr.mxu1 %v7310_v51 }
 0x59c   : > { %4974 = vmatpush3.msra.mxu1 %v6730_v10 }
 0x59d   : > { %4975 = vmatprep.subr.mxu1 %v7310_v51 }
 0x59e   : > { %4976 = vmatpush3.msra.mxu1 %v6724_v2 }
 0x59f   : > { %4977 = vmatprep.subr.mxu1 %v7310_v51 }
 0x5a0   : > { %4978 = vmatpush3.msra.mxu1 %v6726_v15 }
 0x5a1   : > { %4979 = vmatprep.subr.mxu1 %v7310_v51 }
 0x5a2   : > { %4980 = vmatpush3.msra.mxu1 %v6720_v11 }
 0x5a3   : > { %4981 = vmatprep.subr.mxu1 %v7310_v51 }
 0x5a4   : > { %4982 = vmatpush3.msra.mxu1 %v6722_v13 }
 0x5a5   : > { %4983 = vmatprep.subr.mxu1 %v7310_v51 }
 0x5a6   : > { %4984 = vmatpush3.msra.mxu1 %v6716_v7 }
 0x5a7   : > { %4985 = vmatprep.subr.mxu1 %v7310_v51 }
 0x5a8   : > { %4986 = vmatpush3.msra.mxu1 %v6718_v1 }
 0x5a9   : > { %4987 = vmatprep.subr.mxu1 %v7310_v51 }
 0x5aa   : > { %4988 = vmatpush3.msra.mxu1 %v6712_v35  ;;  %v2465_v35 = vpop.xlane.xlu1 %2464 }
 0x5ab   : > { %4989 = vmatprep.subr.mxu1 %v7310_v51  ;;  %v2466_v7 = vsub.f32 %v6736_v57, %v2465_v35 }
 0x5ac   : > { %4990 = vmatpush3.msra.mxu1 %v6714_v34 }
 0x5ad   : > { %4991 = vmatprep.subr.mxu1 %v7310_v51  ;;  %v2467_v32 = vmul.f32 1.442695, %v2466_v7 }
 0x5ae   : > { %4992 = vmatpush3.msra.mxu1 %v6704_v5  ;;  %v2499_v15 = vpop.xlane.xlu1 %2498 }
 0x5af   : > { %4993 = vmatprep.subr.mxu1 %v7310_v51  ;;  %v2500_v19 = vsub.f32 %v6736_v57, %v2499_v15  ;;  %5116 = vpow2.f32 %v2467_v32 }
 0x5b0   : > { %4994 = vmatpush3.msra.mxu1 %v6710_v3 }
 0x5b1   : > { %4995 = vmatprep.subr.mxu1 %v7310_v51  ;;  %v2501_v46 = vmul.f32 1.442695, %v2500_v19 }
 0x5b2   : > { %4996 = vmatpush3.msra.mxu1 %v6692_v55 }
 0x5b3   : > { %4997 = vmatprep.subr.mxu1 %v7310_v51 }
 0x5b4   : > { %4998 = vmatpush3.msra.mxu1 %v6698_v9  ;;  %v2482_v9 = vpop.xlane.xlu0 %2481 }
 0x5b5   : > { %v2483_v13 = vsub.f32 %v6736_v57, %v2482_v9 }
 0x5b7   : > { %v2484_v17 = vmul.f32 1.442695, %v2483_v13 }
 0x5b8   : > { %v2452_v25 = vpop.xlane.xlu0 %2451 }
 0x5b9   : > { %5118 = vpow2.f32 %v2484_v17 }
 0x5ba   : > { %5120 = vpow2.f32 %v2501_v46 }
 0x5bc   : > { %v6840_v37 = vpop.eup %5116 }
 0x5c6   : > { %v6842_v56 = vpop.eup %5118 }
 0x5c7   : > { %v6848_v23 = vpop.eup %5120 }
 0x645   : > { %v6819_v0 = vpop.f32.mrf.mxu1 }
 0x647   : > { %v4874_v12 = vpop.f32.mrf.mxu1 }
 0x64d   : > { %v6821_v60 = vpop.f32.mrf.mxu1 }
 0x64e   : > { %v2930_v48 = vsel %vm2479_vm7, %v6821_v60, -inf  ;;  %v2914_v5 = vsel %vm2462_vm8, %v6821_v60, -inf  ;;  %v2946_v55 = vsel %vm2496_vm9, %v6821_v60, -inf  ;;  %v2902_v14 = vsel %vm1507_vm1, %v6821_v60, -inf }
 0x64f   : > { %2931 = vmax.xlane.f32.xlu1 %v2930_v48  ;;  %2915 = vmax.xlane.f32.xlu0 %v2914_v5  ;;  %v4920_v3 = vpop.f32.mrf.mxu1 }
 0x650   : > { %v2453_v3 = vsub.f32 %v6736_v57, %v2452_v25 }
 0x652   : > { %v2454_v35 = vmul.f32 1.442695, %v2453_v3 }
 0x653   : > { %2947 = vmax.xlane.f32.xlu0 %v2946_v55 }
 0x655   : > { %v6829_v34 = vpop.f32.mrf.mxu1 }
 0x656   : > { %v3155_v1 = vsel %vm2479_vm7, %v6829_v34, -inf  ;;  %v3139_v11 = vsel %vm2462_vm8, %v6829_v34, -inf  ;;  %v3171_v10 = vsel %vm2496_vm9, %v6829_v34, -inf  ;;  %v3127_v21 = vsel %vm1507_vm1, %v6829_v34, -inf }
 0x657   : > { %3156 = vmax.xlane.f32.xlu0 %v3155_v1  ;;  %3140 = vmax.xlane.f32.xlu1 %v3139_v11  ;;  %v4966_v2 = vpop.f32.mrf.mxu1 }
 0x65b   : > { %3172 = vmax.xlane.f32.xlu1 %v3171_v10 }
 0x66c   : > { %2470 = vrot.lane.b32.xlu1 %v6840_v37, %s5334_s24 }
 0x66d   : > { %2487 = vrot.lane.b32.xlu0 %v6842_v56, %s5333_s25 }
 0x671   : > { %2504 = vrot.lane.b32.xlu0 %v6848_v23, %s7282_s26 }
 0x690   : > { %2903 = vmax.xlane.f32.xlu1 %v2902_v14  ;;  %3128 = vmax.xlane.f32.xlu0 %v3127_v21 }
 0x6d8   : > { %v2916_v36 = vpop.xlane.xlu0 %2915  ;;  %v2932_v29 = vpop.xlane.xlu1 %2931 }
 0x6d9   : > { %v2917_v40 = vsub.f32 %v6821_v60, %v2916_v36  ;;  %v2933_v42 = vsub.f32 %v6821_v60, %v2932_v29 }
 0x6db   : > { %v2918_v44 = vmul.f32 1.442695, %v2917_v40  ;;  %v2934_v49 = vmul.f32 1.442695, %v2933_v42 }
 0x6dc   : > { %v2948_v59 = vpop.xlane.xlu0 %2947 }
 0x6dd   : > { %5122 = vpow2.f32 %v2918_v44  ;;  %v2949_v58 = vsub.f32 %v6821_v60, %v2948_v59 }
 0x6de   : > { %5124 = vpow2.f32 %v2934_v49 }
 0x6df   : > { %v2950_v18 = vmul.f32 1.442695, %v2949_v58 }
 0x6e0   : > { %v3157_v54 = vpop.xlane.xlu0 %3156  ;;  %v3141_v61 = vpop.xlane.xlu1 %3140 }
 0x6e1   : > { %5126 = vpow2.f32 %v2950_v18  ;;  %v3142_v63 = vsub.f32 %v6829_v34, %v3141_v61  ;;  %v3158_v8 = vsub.f32 %v6829_v34, %v3157_v54 }
 0x6e3   : > { %v3143_v4 = vmul.f32 1.442695, %v3142_v63  ;;  %v3159_v26 = vmul.f32 1.442695, %v3158_v8 }
 0x6e4   : > { %v3173_v24 = vpop.xlane.xlu1 %3172  ;;  %v2488_v55 = vpop.permute.xlu0 %2487 }
 0x6e5   : > { %v3174_v62 = vsub.f32 %v6829_v34, %v3173_v24  ;;  %5128 = vpow2.f32 %v3143_v4  ;;  %v2490_v15 = vsel %vm1507_vm1, %v2488_v55, 0.0 }
 0x6e7   : > { %v3175_v20 = vmul.f32 1.442695, %v3174_v62 }
 0x6e8   : > { %v2471_v9 = vpop.permute.xlu1 %2470  ;;  %v2505_v7 = vpop.permute.xlu0 %2504 }
 0x6e9   : > { %5130 = vpow2.f32 %v3175_v20  ;;  %v2473_v1 = vsel %vm1507_vm1, %v2471_v9, 0.0  ;;  %v2507_v46 = vsel %vm1507_vm1, %v2505_v7, 0.0 }
 0x6ea   : > { %v6862_v52 = vpop.eup %5122  ;;  %5132 = vpow2.f32 %v3159_v26 }
 0x6eb   : > { %v6864_v30 = vpop.eup %5124  ;;  %2921 = vrot.lane.b32.xlu1 %v6862_v52, %s5334_s24  ;;  %5134 = vpow2.f32 %v2454_v35 }
 0x6ec   : > { %2937 = vrot.lane.b32.xlu0 %v6864_v30, %s5333_s25 }
 0x6ee   : > { %v6870_v43 = vpop.eup %5126 }
 0x6ef   : > { %2953 = vrot.lane.b32.xlu1 %v6870_v43, %s7282_s26 }
 0x6f2   : > { %v6874_v12 = vpop.eup %5128 }
 0x6f3   : > { %3146 = vrot.lane.b32.xlu1 %v6874_v12, %s5334_s24 }
 0x6f6   : > { %v6878_v48 = vpop.eup %5130 }
 0x6f7   : > { %v6880_v5 = vpop.eup %5132  ;;  %3178 = vrot.lane.b32.xlu0 %v6878_v48, %s7282_s26 }
 0x6f8   : > { %3162 = vrot.lane.b32.xlu1 %v6880_v5, %s5333_s25  ;;  %v5135_v11 = vpop.eup %5134 }
 0x6f9   : > { %v2456_v57 = vsel %vm1507_vm1, %v5135_v11, 0.0 }
 0x716   : > { %2474 = vadd.xlane.f32.xlu0 %v2473_v1 }
 0x719   : > { %v3129_v13 = vpop.xlane.xlu0 %3128  ;;  %v2904_v2 = vpop.xlane.xlu1 %2903 }
 0x71a   : > { %v3130_v32 = vsub.f32 %v6829_v34, %v3129_v13  ;;  %v2905_v10 = vsub.f32 %v6821_v60, %v2904_v2  ;;  %2491 = vadd.xlane.f32.xlu0 %v2490_v15 }
 0x71c   : > { %v2906_v17 = vmul.f32 1.442695, %v2905_v10  ;;  %2457 = vadd.xlane.f32.xlu1 %v2456_v57  ;;  %v3131_v19 = vmul.f32 1.442695, %v3130_v32 }
 0x71e   : > { %5136 = vpow2.f32 %v2906_v17 }
 0x71f   : > { %5138 = vpow2.f32 %v3131_v19 }
 0x720   : > { %2508 = vadd.xlane.f32.xlu1 %v2507_v46 }
 0x72b   : > { %v6893_v14 = vpop.eup %5136 }
 0x72c   : > { %v2908_v21 = vsel %vm1507_vm1, %v6893_v14, 0.0  ;;  %v6897_v25 = vpop.eup %5138 }
 0x72d   : > { %2909 = vadd.xlane.f32.xlu0 %v2908_v21  ;;  %v3133_v60 = vsel %vm1507_vm1, %v6897_v25, 0.0 }
 0x731   : > { %3134 = vadd.xlane.f32.xlu0 %v3133_v60 }
 0x75d   : > { %v2922_v34 = vpop.permute.xlu1 %2921 }
 0x75e   : > { %v2938_v36 = vpop.permute.xlu0 %2937  ;;  %v2924_v29 = vsel %vm1507_vm1, %v2922_v34, 0.0 }
 0x75f   : > { %v2940_v40 = vsel %vm1507_vm1, %v2938_v36, 0.0  ;;  %2925 = vadd.xlane.f32.xlu1 %v2924_v29 }
 0x760   : > { %2941 = vadd.xlane.f32.xlu0 %v2940_v40 }
 0x761   : > { %v2954_v42 = vpop.permute.xlu1 %2953 }
 0x762   : > { %v2956_v44 = vsel %vm1507_vm1, %v2954_v42, 0.0 }
 0x763   : > { %2957 = vadd.xlane.f32.xlu1 %v2956_v44  ;;  %v3984_v44 = vld [vmem:[#allocation7 + $0x1] ss:$0 sm:$0xff] }
 0x765   : > { %v3147_v49 = vpop.permute.xlu1 %3146 }
 0x766   : > { %v3149_v59 = vsel %vm1507_vm1, %v3147_v49, 0.0 }
 0x767   : > { %3150 = vadd.xlane.f32.xlu1 %v3149_v59  ;;  %v5180_v59 = vld [vmem:[%s6435_s28] sm:$0xff] }
 0x769   : > { %v3179_v58 = vpop.permute.xlu0 %3178 }
 0x76a   : > { %v3163_v18 = vpop.permute.xlu1 %3162  ;;  %v3181_v54 = vsel %vm1507_vm1, %v3179_v58, 0.0 }
 0x76b   : > { %v3165_v61 = vsel %vm1507_vm1, %v3163_v18, 0.0  ;;  %3182 = vadd.xlane.f32.xlu1 %v3181_v54 }
 0x76c   : > { %3166 = vadd.xlane.f32.xlu0 %v3165_v61 }
 0x79f   : > { %v2475_v63 = vpop.xlane.xlu0 %2474 }
 0x7a0   : > { %5140 = vrcp.f32 %v2475_v63 }
 0x7a3   : > { %v2492_v8 = vpop.xlane.xlu0 %2491 }
 0x7a5   : > { %v2458_v4 = vpop.xlane.xlu1 %2457 }
 0x7a6   : > { %5142 = vrcp.f32 %v2458_v4 }
 0x7a7   : > { %5144 = vrcp.f32 %v2492_v8 }
 0x7a9   : > { %v2509_v24 = vpop.xlane.xlu1 %2508 }
 0x7aa   : > { %5146 = vrcp.f32 %v2509_v24 }
 0x7ad   : > { %v5141_v62 = vpop.eup %5140 }
 0x7ae   : > { %v2478_v35 = vmul.f32 %v5141_v62, %v6840_v37 }
 0x7b3   : > { %v5143_v26 = vpop.eup %5142 }
 0x7b4   : > { %v5145_v20 = vpop.eup %5144  ;;  %v2461_v3 = vmul.f32 %v5143_v26, %v5135_v11 }
 0x7b5   : > { %v2495_v7 = vmul.f32 %v5145_v20, %v6842_v56 }
 0x7b6   : > { %v2513_v55 = vsel %vm1507_vm1, %v2461_v3, %v2478_v35 }
 0x7b7   : > { %v5147_v9 = vpop.eup %5146  ;;  %v2515_v13 = vsel %vm1512_vm6, %v2513_v55, %v2495_v7 }
 0x7b8   : > { %v2512_v1 = vmul.f32 %v5147_v9, %v6848_v23 }
 0x7ba   : > { %v2517_v2 = vsel %vm1517_vm5, %v2515_v13, %v2512_v1 }
 0x7bb   : > { %4908 = vmatmul.mubr.f32.vlgmr.msra.gmra.mxu0 %v2517_v2 }
 0x7bc   : > { %4922 = vmatpush3.msra.mxu0 %v6591_v22  ;;  %4953 = vmatprep.mubr.msk.f32.mxu0 %vm5324_vm0, %v7310_v51 }
 0x7bd   : > { %4923 = vmatprep.subr.mxu0 %v7310_v51 }
 0x7be   : > { %4924 = vmatpush3.msra.mxu0 %v6597_v28 }
 0x7bf   : > { %4925 = vmatprep.subr.mxu0 %v7310_v51 }
 0x7c0   : > { %4926 = vmatpush3.msra.mxu0 %v6580_v6 }
 0x7c1   : > { %4927 = vmatprep.subr.mxu0 %v7310_v51 }
 0x7c2   : > { %4928 = vmatpush3.msra.mxu0 %v6585_v16 }
 0x7c3   : > { %4929 = vmatprep.subr.mxu0 %v7310_v51 }
 0x7c4   : > { %4930 = vmatpush3.msra.mxu0 %v6569_v50 }
 0x7c5   : > { %4931 = vmatprep.subr.mxu0 %v7310_v51 }
 0x7c6   : > { %4932 = vmatpush3.msra.mxu0 %v6571_v53 }
 0x7c7   : > { %4933 = vmatprep.subr.mxu0 %v7310_v51 }
 0x7c8   : > { %4934 = vmatpush3.msra.mxu0 %v6563_v45 }
 0x7c9   : > { %4935 = vmatprep.subr.mxu0 %v7310_v51 }
 0x7ca   : > { %4936 = vmatpush3.msra.mxu0 %v6565_v47 }
 0x7cb   : > { %4937 = vmatprep.subr.mxu0 %v7310_v51 }
 0x7cc   : > { %4938 = vmatpush3.msra.mxu0 %v6555_v31  ;;  %v7311_v31 = vld [vmem:[#allocation17_spill] sm:$0xff] }
 0x7cd   : > { %4939 = vmatprep.subr.mxu0 %v7310_v51 }
 0x7ce   : > { %4940 = vmatpush3.msra.mxu0 %v6559_v33  ;;  %v7312_v33 = vld [vmem:[#allocation18_spill] sm:$0xff] }
 0x7cf   : > { %4941 = vmatprep.subr.mxu0 %v7310_v51 }
 0x7d0   : > { %4942 = vmatpush3.msra.mxu0 %v6549_v39  ;;  %v2910_v39 = vpop.xlane.xlu0 %2909 }
 0x7d1   : > { %4943 = vmatprep.subr.mxu0 %v7310_v51  ;;  %5148 = vrcp.f32 %v2910_v39 }
 0x7d2   : > { %4944 = vmatpush3.msra.mxu0 %v6553_v41 }
 0x7d3   : > { %4945 = vmatprep.subr.mxu0 %v7310_v51 }
 0x7d4   : > { %4946 = vmatpush3.msra.mxu0 %v6543_v27  ;;  %v3135_v45 = vpop.xlane.xlu0 %3134 }
 0x7d5   : > { %4947 = vmatprep.subr.mxu0 %v7310_v51 }
 0x7d6   : > { %4948 = vmatpush3.msra.mxu0 %v6545_v38 }
 0x7d7   : > { %4949 = vmatprep.subr.mxu0 %v7310_v51 }
 0x7d8   : > { %4950 = vmatpush3.msra.mxu0 %v7311_v31 }
 0x7d9   : > { %4951 = vmatprep.subr.mxu0 %v7310_v51 }
 0x7da   : > { %4952 = vmatpush3.msra.mxu0 %v7312_v33 }
 0x7de   : > { %v5149_v38 = vpop.eup %5148 }
 0x7df   : > { %v2913_v28 = vmul.f32 %v5149_v38, %v6893_v14 }
 0x7e8   : > { %v2926_v41 = vpop.xlane.xlu1 %2925 }
 0x7e9   : > { %v2942_v47 = vpop.xlane.xlu0 %2941  ;;  %5150 = vrcp.f32 %v2926_v41 }
 0x7ea   : > { %5152 = vrcp.f32 %v2942_v47  ;;  %v3409_v47 = vld [vmem:[%s7313_s17 + $0xf8] sm:$0xff] }
 0x7eb   : > { %3422 = vmatprep.subr.mxu0 %v3409_v47  ;;  %v3519_v47 = vld [vmem:[%s7314_s12 + $0xa0] sm:$0xff] }
 0x7ec   : > { %v2958_v27 = vpop.xlane.xlu1 %2957 }
 0x7ed   : > { %5154 = vrcp.f32 %v2958_v27  ;;  %v3408_v27 = vld [vmem:[%s7313_s17 + $0xf0] sm:$0xff] }
 0x7f0   : > { %v3151_v50 = vpop.xlane.xlu1 %3150 }
 0x7f1   : > { %5156 = vrcp.f32 %v3151_v50 }
 0x7f2   : > { %5158 = vrcp.f32 %v3135_v45 }
 0x7f4   : > { %v3183_v6 = vpop.xlane.xlu1 %3182 }
 0x7f5   : > { %v3167_v53 = vpop.xlane.xlu0 %3166 }
 0x7f6   : > { %v5151_v16 = vpop.eup %5150  ;;  %5160 = vrcp.f32 %v3167_v53 }
 0x7f7   : > { %v5153_v22 = vpop.eup %5152  ;;  %5162 = vrcp.f32 %v3183_v6  ;;  %v2929_v37 = vmul.f32 %v5151_v16, %v6862_v52 }
 0x7f8   : > { %v2945_v56 = vmul.f32 %v5153_v22, %v6864_v30 }
 0x7f9   : > { %v2962_v23 = vsel %vm1507_vm1, %v2913_v28, %v2929_v37  ;;  %v3407_v28 = vld [vmem:[%s7313_s17 + $0xe8] sm:$0xff]  ;;  %v3406_v37 = vld [vmem:[%s7313_s17 + $0xe0] sm:$0xff] }
 0x7fa   : > { %v5155_v11 = vpop.eup %5154  ;;  %v2963_v32 = vsel %vm1512_vm6, %v2962_v23, %v2945_v56  ;;  %v3405_v56 = vld [vmem:[%s7313_s17 + $0xd8] sm:$0xff]  ;;  %v3404_v23 = vld [vmem:[%s7313_s17 + $0xd0] sm:$0xff] }
 0x7fb   : > { %v2961_v15 = vmul.f32 %v5155_v11, %v6870_v43  ;;  %v3403_v11 = vld [vmem:[%s7313_s17 + $0xc8] sm:$0xff] }
 0x7fd   : > { %v2964_v10 = vsel %vm1517_vm5, %v2963_v32, %v2961_v15  ;;  %v3402_v15 = vld [vmem:[%s7313_s17 + $0xc0] sm:$0xff]  ;;  %v3401_v32 = vld [vmem:[%s7313_s17 + $0xb8] sm:$0xff] }
 0x7fe   : > { %4954 = vmatmul.mubr.f32.vlgmr.msra.gmra.mxu0 %v2964_v10  ;;  %v5157_v57 = vpop.eup %5156  ;;  %v3400_v10 = vld [vmem:[%s7313_s17 + $0xb0] sm:$0xff] }
 0x7ff   : > { %3486 = vmatprep.mubr.f32.mxu0 %v7310_v51  ;;  %v5159_v17 = vpop.eup %5158  ;;  %v3154_v19 = vmul.f32 %v5157_v57, %v6874_v12  ;;  %3423 = vmatpush1.msra.mxu0 %v3408_v27  ;;  %v3399_v57 = vld [vmem:[%s7313_s17 + $0xa8] sm:$0xff] }
 0x800   : > { %v3138_v52 = vmul.f32 %v5159_v17, %v6897_v25  ;;  %3424 = vmatprep.subr.mxu0 %v3407_v28  ;;  %v3398_v17 = vld [vmem:[%s7313_s17 + $0xa0] sm:$0xff] }
 0x801   : > { %3425 = vmatpush1.msra.mxu0 %v3406_v37 }
 0x802   : > { %v3187_v43 = vsel %vm1507_vm1, %v3138_v52, %v3154_v19  ;;  %3426 = vmatprep.subr.mxu0 %v3405_v56  ;;  %v3397_v19 = vld [vmem:[%s7313_s17 + $0x98] sm:$0xff]  ;;  %v3395_v52 = vld [vmem:[%s7313_s17 + $0x88] sm:$0xff] }
 0x803   : > { %v5161_v46 = vpop.eup %5160  ;;  %3427 = vmatpush1.msra.mxu0 %v3404_v23 }
 0x804   : > { %v5163_v30 = vpop.eup %5162  ;;  %v3170_v14 = vmul.f32 %v5161_v46, %v6880_v5  ;;  %3428 = vmatprep.subr.mxu0 %v3403_v11  ;;  %v3396_v46 = vld [vmem:[%s7313_s17 + $0x90] sm:$0xff] }
 0x805   : > { %v3186_v21 = vmul.f32 %v5163_v30, %v6878_v48  ;;  %3429 = vmatpush1.msra.mxu0 %v3402_v15  ;;  %v3394_v30 = vld [vmem:[%s7313_s17 + $0x80] sm:$0xff] }
 0x806   : > { %v3188_v60 = vsel %vm1512_vm6, %v3187_v43, %v3170_v14  ;;  %3430 = vmatprep.subr.mxu0 %v3401_v32  ;;  %v3393_v14 = vld [vmem:[%s7313_s17 + $0x78] sm:$0xff]  ;;  %v3391_v43 = vld [vmem:[%s7313_s17 + $0x68] sm:$0xff] }
 0x807   : > { %v3189_v34 = vsel %vm1517_vm5, %v3188_v60, %v3186_v21  ;;  %3431 = vmatpush1.msra.mxu0 %v3400_v10  ;;  %v3392_v21 = vld [vmem:[%s7313_s17 + $0x70] sm:$0xff]  ;;  %v3390_v60 = vld [vmem:[%s7313_s17 + $0x60] sm:$0xff] }
 0x808   : > { %5000 = vmatmul.mubr.f32.vlgmr.msra.gmra.mxu1 %v3189_v34  ;;  %3432 = vmatprep.subr.mxu0 %v3399_v57  ;;  %v3389_v34 = vld [vmem:[%s7313_s17 + $0x58] sm:$0xff] }
 0x809   : > { %3433 = vmatpush1.msra.mxu0 %v3398_v17 }
 0x80a   : > { %3434 = vmatprep.subr.mxu0 %v3397_v19 }
 0x80b   : > { %3435 = vmatpush1.msra.mxu0 %v3396_v46 }
 0x80c   : > { %3436 = vmatprep.subr.mxu0 %v3395_v52 }
 0x80d   : > { %3437 = vmatpush1.msra.mxu0 %v3394_v30  ;;  %v3985_v30 = vld [vmem:[#allocation7 + $0x2] ss:$0 sm:$0xff] }
 0x80e   : > { %3438 = vmatprep.subr.mxu0 %v3393_v14 }
 0x80f   : > { %3439 = vmatpush1.msra.mxu0 %v3392_v21 }
 0x810   : > { %3440 = vmatprep.subr.mxu0 %v3391_v43  ;;  %v3986_v43 = vld [vmem:[#allocation7 + $0x3] ss:$0 sm:$0xff] }
 0x811   : > { %3441 = vmatpush1.msra.mxu0 %v3390_v60 }
 0x812   : > { %3442 = vmatprep.subr.mxu0 %v3389_v34 }
 0x87b   : > { %v2824_v51 = vpop.f32.mrf.mxu0 }
 0x87c   : > { %v2825_v40 = vadd.f32 %v2824_v51, %v6819_v0  ;;  %v3388_v51 = vld [vmem:[%s7313_s17 + $0x50] sm:$0xff] }
 0x87d   : > { %v4909_v36 = vpop.f32.mrf.mxu0  ;;  %3443 = vmatpush1.msra.mxu0 %v3388_v51 }
 0x87e   : > { %v3387_v36 = vld [vmem:[%s7313_s17 + $0x48] sm:$0xff] }
 0x87f   : > { %3444 = vmatprep.subr.mxu0 %v3387_v36  ;;  %v3501_v36 = vld [vmem:[%s7314_s12 + $0x10] sm:$0xff] }
 0x8be   : > { %v3048_v29 = vpop.f32.mrf.mxu0 }
 0x8bf   : > { %v3052_v25 = vadd.f32 %v3048_v29, %v2825_v40  ;;  %v3386_v29 = vld [vmem:[%s7313_s17 + $0x40] sm:$0xff]  ;;  %v3384_v40 = vld [vmem:[%s7313_s17 + $0x30] sm:$0xff] }
 0x8c0   : > { %v4955_v12 = vpop.f32.mrf.mxu0  ;;  %3445 = vmatpush1.msra.mxu0 %v3386_v29  ;;  %v3516_v29 = vld [vmem:[%s7314_s12 + $0x88] sm:$0xff] }
 0x8c1   : > { %v3385_v12 = vld [vmem:[%s7313_s17 + $0x38] sm:$0xff] }
 0x8c2   : > { %3446 = vmatprep.subr.mxu0 %v3385_v12  ;;  %v3500_v12 = vld [vmem:[%s7314_s12 + $0x8] sm:$0xff] }
 0x8c3   : > { %3447 = vmatpush1.msra.mxu0 %v3384_v40  ;;  %v3515_v40 = vld [vmem:[%s7314_s12 + $0x80] sm:$0xff] }
 0x8c8   : > { %v3273_v42 = vpop.f32.mrf.mxu1 }
 0x8c9   : > { %v3277_v5 = vadd.f32 %v3273_v42, %v3052_v25  ;;  %v3383_v25 = vld [vmem:[%s7313_s17 + $0x28] sm:$0xff]  ;;  %v3382_v42 = vld [vmem:[%s7313_s17 + $0x20] sm:$0xff] }
 0x8ca   : > { %v5001_v49 = vpop.f32.mrf.mxu1  ;;  %3448 = vmatprep.subr.mxu0 %v3383_v25  ;;  %v3499_v25 = vld [vmem:[%s7314_s12] sm:$0xff] }
 0x8cb   : > { %v3283_v48 = vadd.f32 %v3984_v44, %v3277_v5  ;;  %v3381_v44 = vld [vmem:[%s7313_s17 + $0x18] sm:$0xff]  ;;  %v3380_v5 = vld [vmem:[%s7313_s17 + $0x10] sm:$0xff]  ;;  %3449 = vmatpush1.msra.mxu0 %v3382_v42  ;;  %v3379_v49 = vld [vmem:[%s7313_s17 + $0x8] sm:$0xff]  ;;  %v3412_v42 = vlaneseq }
 0x8cc   : > { %3450 = vmatprep.subr.mxu0 %v3381_v44 }
 0x8cd   : > { %v3289_v58 = vadd.f32 %v5180_v59, %v3283_v48  ;;  %v3378_v48 = vld [vmem:[%s7313_s17] sm:$0xff]  ;;  %3451 = vmatpush1.msra.mxu0 %v3380_v5  ;;  %v3530_v59 = vld [vmem:[%s7314_s12 + $0xf8] sm:$0xff]  ;;  %v3413_v44 = vshrl.u32 %v3412_v42, 7 }
 0x8ce   : > { %3452 = vmatprep.subr.mxu0 %v3379_v49  ;;  %4328 = vmatprep.subr.mxu1 %v3530_v59  ;;  %v3410_v49 = vld [vmem:[%s7315_s22] sm:$0x3]  ;;  %s5335_s22 = smov [#allocation9]  }
 0x8cf   : > { %3325 = vrot.lane.b32.xlu1 %v3289_v58, %s5333_s25  ;;  %3305 = vrot.lane.b32.xlu0 %v3289_v58, %s5334_s24  ;;  %v3290_v4 = vsel %vm1507_vm1, %v3289_v58, 0.0  ;;  %v3414_v5 = vsub.s32 0, %v3413_v44 }
 0x8d0   : > { %3453 = vmatpush1.msra.mxu0 %v3378_v48  ;;  %v3418_v48 = vsub.s32 1, %v3413_v44 }
 0x8d1   : > { %v3415_v59 = vrot.slane %v3410_v49, %v3414_v5 }
 0x8d3   : > { %3345 = vrot.lane.b32.xlu1 %v3289_v58, %s7282_s26 }
 0x941   : > { %v3326_v18 = vpop.permute.xlu1 %3325  ;;  %v3306_v54 = vpop.permute.xlu0 %3305 }
 0x942   : > { %v3328_v61 = vsel %vm1507_vm1, %v3326_v18, 0.0  ;;  %v3308_v0 = vsel %vm1507_vm1, %v3306_v54, 0.0  ;;  %v3529_v18 = vld [vmem:[%s7314_s12 + $0xf0] sm:$0xff] }
 0x943   : > { %3329 = vadd.xlane.f32.xlu1 %v3328_v61  ;;  %3309 = vadd.xlane.f32.xlu0 %v3308_v0  ;;  %v3513_v54 = vld [vmem:[%s7314_s12 + $0x70] sm:$0xff]  ;;  %v3528_v61 = vld [vmem:[%s7314_s12 + $0xe8] sm:$0xff] }
 0x944   : > { %v3512_v0 = vld [vmem:[%s7314_s12 + $0x68] sm:$0xff] }
 0x945   : > { %v3346_v63 = vpop.permute.xlu1 %3345 }
 0x946   : > { %v3348_v8 = vsel %vm1507_vm1, %v3346_v63, 0.0  ;;  %v3527_v63 = vld [vmem:[%s7314_s12 + $0xe0] sm:$0xff] }
 0x947   : > { %3349 = vadd.xlane.f32.xlu0 %v3348_v8  ;;  %v3511_v8 = vld [vmem:[%s7314_s12 + $0x60] sm:$0xff] }
 0x94b   : > { %3291 = vadd.xlane.f32.xlu0 %v3290_v4  ;;  %v3526_v4 = vld [vmem:[%s7314_s12 + $0xd8] sm:$0xff] }
 0x9cc   : > { %v3330_v24 = vpop.xlane.xlu1 %3329  ;;  %v3310_v62 = vpop.xlane.xlu0 %3309 }
 0x9cd   : > { %v3331_v26 = vmul.f32 0.03125, %v3330_v24  ;;  %v3311_v20 = vmul.f32 0.03125, %v3310_v62  ;;  %v3510_v24 = vld [vmem:[%s7314_s12 + $0x58] sm:$0xff]  ;;  %v3525_v62 = vld [vmem:[%s7314_s12 + $0xd0] sm:$0xff] }
 0x9cf   : > { %v6970_v3 = vsub.f32 %v3289_v58, %v3331_v26  ;;  %v6972_v35 = vsub.f32 %v3289_v58, %v3311_v20  ;;  %v3509_v26 = vld [vmem:[%s7314_s12 + $0x50] sm:$0xff]  ;;  %v3524_v20 = vld [vmem:[%s7314_s12 + $0xc8] sm:$0xff] }
 0x9d0   : > { %v3350_v55 = vpop.xlane.xlu0 %3349 }
 0x9d1   : > { %v3351_v9 = vmul.f32 0.03125, %v3350_v55  ;;  %v3313_v7 = vmul.f32 %v6972_v35, %v6972_v35  ;;  %v3333_v1 = vmul.f32 %v6970_v3, %v6970_v3  ;;  %v3508_v55 = vld [vmem:[%s7314_s12 + $0x48] sm:$0xff] }
 0x9d3   : > { %v6978_v13 = vsub.f32 %v3289_v58, %v3351_v9  ;;  %3315 = vrot.lane.b32.xlu1 %v3313_v7, %s5334_s24  ;;  %3335 = vrot.lane.b32.xlu0 %v3333_v1, %s5333_s25  ;;  %v3523_v9 = vld [vmem:[%s7314_s12 + $0xc0] sm:$0xff]  ;;  %v3522_v1 = vld [vmem:[%s7314_s12 + $0xb8] sm:$0xff] }
 0x9d4   : > { %v3292_v31 = vpop.xlane.xlu0 %3291  ;;  %v3507_v7 = vld [vmem:[%s7314_s12 + $0x40] sm:$0xff] }
 0x9d5   : > { %v3353_v2 = vmul.f32 %v6978_v13, %v6978_v13  ;;  %v3294_v33 = vmul.f32 0.03125, %v3292_v31  ;;  %v3521_v31 = vld [vmem:[%s7314_s12 + $0xb0] sm:$0xff] }
 0x9d7   : > { %3355 = vrot.lane.b32.xlu1 %v3353_v2, %s7282_s26  ;;  %v6985_v39 = vsub.f32 %v3289_v58, %v3294_v33  ;;  %v3514_v58 = vld [vmem:[%s7314_s12 + $0x78] sm:$0xff]  ;;  %v3505_v33 = vld [vmem:[%s7314_s12 + $0x30] sm:$0xff]  ;;  %s3695_s26 = scalar_lea.sflag [#allocation6], %s5525_s9 }
 0x9d8   : > { %4329 = vmatpush3.msra.mxu1 %v3514_v58  ;;  %v3506_v2 = vld [vmem:[%s7314_s12 + $0x38] sm:$0xff]  ;;  %v3419_v58 = vrot.slane %v3410_v49, %v3418_v48 }
 0x9d9   : > { %v3296_v45 = vmul.f32 %v6985_v39, %v6985_v39  ;;  %4330 = vmatprep.subr.mxu1 %v3529_v18 }
 0x9da   : > { %4331 = vmatpush3.msra.mxu1 %v3513_v54 }
 0x9db   : > { %v3297_v41 = vsel %vm1507_vm1, %v3296_v45, 0.0  ;;  %4332 = vmatprep.subr.mxu1 %v3528_v61  ;;  %v3520_v45 = vld [vmem:[%s7314_s12 + $0xa8] sm:$0xff] }
 0x9dc   : > { %4333 = vmatpush3.msra.mxu1 %v3512_v0 }
 0x9dd   : > { %4334 = vmatprep.subr.mxu1 %v3527_v63 }
 0x9de   : > { %4335 = vmatpush3.msra.mxu1 %v3511_v8 }
 0x9df   : > { %4336 = vmatprep.subr.mxu1 %v3526_v4 }
 0x9e0   : > { %4337 = vmatpush3.msra.mxu1 %v3510_v24 }
 0x9e1   : > { %4338 = vmatprep.subr.mxu1 %v3525_v62 }
 0x9e2   : > { %4339 = vmatpush3.msra.mxu1 %v3509_v26  ;;  %v3987_v26 = vld [vmem:[#allocation7 + $0x6] ss:$0 sm:$0xff] }
 0x9e3   : > { %4340 = vmatprep.subr.mxu1 %v3524_v20 }
 0x9e4   : > { %4341 = vmatpush3.msra.mxu1 %v3508_v55 }
 0x9e5   : > { %4342 = vmatprep.subr.mxu1 %v3523_v9 }
 0x9e6   : > { %4343 = vmatpush3.msra.mxu1 %v3507_v7 }
 0x9e7   : > { %4344 = vmatprep.subr.mxu1 %v3522_v1 }
 0x9e8   : > { %4345 = vmatpush3.msra.mxu1 %v3506_v2 }
 0x9e9   : > { %4346 = vmatprep.subr.mxu1 %v3521_v31 }
 0x9ea   : > { %4347 = vmatpush3.msra.mxu1 %v3505_v33 }
 0x9eb   : > { %4348 = vmatprep.subr.mxu1 %v3520_v45 }
 0x9fb   : > { %3298 = vadd.xlane.f32.xlu1 %v3297_v41  ;;  %v3504_v41 = vld [vmem:[%s7314_s12 + $0x28] sm:$0xff] }
 0x9fc   : > { %4349 = vmatpush3.msra.mxu1 %v3504_v41 }
 0x9fd   : > { %4350 = vmatprep.subr.mxu1 %v3519_v47 }
 0xa45   : > { %v3316_v50 = vpop.permute.xlu1 %3315  ;;  %v3336_v53 = vpop.permute.xlu0 %3335 }
 0xa46   : > { %v3318_v38 = vsel %vm1507_vm1, %v3316_v50, 0.0  ;;  %v3338_v22 = vsel %vm1507_vm1, %v3336_v53, 0.0 }
 0xa47   : > { %3319 = vadd.xlane.f32.xlu0 %v3318_v38 }
 0xa49   : > { %v3356_v6 = vpop.permute.xlu1 %3355 }
 0xa4a   : > { %v3358_v16 = vsel %vm1507_vm1, %v3356_v6, 0.0 }
 0xa4b   : > { %3359 = vadd.xlane.f32.xlu1 %v3358_v16  ;;  %3339 = vadd.xlane.f32.xlu0 %v3338_v22 }
 0xa84   : > { %v3299_v27 = vpop.xlane.xlu1 %3298 }
 0xa85   : > { %v3300_v50 = vmul.f32 0.03125, %v3299_v27 }
 0xa87   : > { %v3301_v6 = vadd.f32 1e-05, %v3300_v50 }
 0xad0   : > { %v3320_v38 = vpop.xlane.xlu0 %3319 }
 0xad1   : > { %v3321_v53 = vmul.f32 0.03125, %v3320_v38 }
 0xad3   : > { %v3322_v16 = vadd.f32 1e-05, %v3321_v53 }
 0xad4   : > { %v3360_v22 = vpop.xlane.xlu1 %3359  ;;  %v3340_v28 = vpop.xlane.xlu0 %3339 }
 0xad5   : > { %5164 = vrsqrt.f32 %v3322_v16  ;;  %v3361_v37 = vmul.f32 0.03125, %v3360_v22  ;;  %v3341_v56 = vmul.f32 0.03125, %v3340_v28 }
 0xad6   : > { %5166 = vrsqrt.f32 %v3301_v6 }
 0xad7   : > { %v3362_v23 = vadd.f32 1e-05, %v3361_v37  ;;  %v3342_v11 = vadd.f32 1e-05, %v3341_v56 }
 0xad9   : > { %5168 = vrsqrt.f32 %v3362_v23 }
 0xada   : > { %5170 = vrsqrt.f32 %v3342_v11 }
 0xae2   : > { %v5165_v15 = vpop.eup %5164 }
 0xae3   : > { %v5167_v32 = vpop.eup %5166  ;;  %v3324_v10 = vmul.f32 %v5165_v15, %v6972_v35  ;;  %v3503_v35 = vld [vmem:[%s7314_s12 + $0x20] sm:$0xff] }
 0xae4   : > { %v3303_v19 = vmul.f32 %v5167_v32, %v6985_v39  ;;  %4351 = vmatpush3.msra.mxu1 %v3503_v35  ;;  %v3517_v39 = vld [vmem:[%s7314_s12 + $0x90] sm:$0xff] }
 0xae6   : > { %v5169_v57 = vpop.eup %5168  ;;  %v3365_v14 = vsel %vm1507_vm1, %v3303_v19, %v3324_v10 }
 0xae7   : > { %v5171_v17 = vpop.eup %5170  ;;  %v3364_v46 = vmul.f32 %v5169_v57, %v6978_v13  ;;  %v3502_v13 = vld [vmem:[%s7314_s12 + $0x18] sm:$0xff] }
 0xae8   : > { %v3344_v52 = vmul.f32 %v5171_v17, %v6970_v3  ;;  %v3518_v3 = vld [vmem:[%s7314_s12 + $0x98] sm:$0xff] }
 0xae9   : > { %4352 = vmatprep.subr.mxu1 %v3518_v3 }
 0xaea   : > { %v3366_v21 = vsel %vm1512_vm6, %v3365_v14, %v3344_v52  ;;  %4353 = vmatpush3.msra.mxu1 %v3502_v13 }
 0xaeb   : > { %v3367_v60 = vsel %vm1517_vm5, %v3366_v21, %v3364_v46  ;;  %4354 = vmatprep.subr.mxu1 %v3517_v39 }
 0xaec   : > { %v3372_v34 = vmul.f32 %v3985_v30, %v3367_v60  ;;  %4355 = vmatpush3.msra.mxu1 %v3501_v36 }
 0xaed   : > { %4356 = vmatprep.subr.mxu1 %v3516_v29 }
 0xaee   : > { %v3377_v51 = vadd.f32 %v3986_v43, %v3372_v34  ;;  %4357 = vmatpush3.msra.mxu1 %v3500_v12 }
 0xaef   : > { %4358 = vmatprep.subr.mxu1 %v3515_v40 }
 0xaf0   : > { %3487 = vmatmul.mubr.f32.vlgmr.msra.gmra.mxu0 %v3377_v51  ;;  %4359 = vmatpush3.msra.mxu1 %v3499_v25 }
 0xbb0   : > { %v3488_v18 = vpop.f32.mrf.mxu0 }
 0xbb1   : > { %v3489_v54 = vadd.f32 %v3488_v18, %v3415_v59 }
 0xbb2   : > { %v3490_v61 = vpop.f32.mrf.mxu0 }
 0xbb3   : > { %v3491_v0 = vadd.f32 %v3490_v61, %v3419_v58  ;;  %v3495_v63 = vmul.f32 0.05, %v3489_v54  ;;  %vm3493_vm10 = vcmp.ge.f32.partialorder %v3489_v54, 0.0 }
 0xbb5   : > { %v3496_v8 = vmul.f32 0.05, %v3491_v0  ;;  %vm3494_vm11 = vcmp.ge.f32.partialorder %v3491_v0, 0.0  ;;  %v3497_v24 = vsel %vm3493_vm10, %v3489_v54, %v3495_v63  ;;  %v3988_v54 = vld [vmem:[#allocation7 + $0x4] ss:$0 sm:$0xff] }
 0xbb7   : > { %v3498_v4 = vsel %vm3494_vm11, %v3491_v0, %v3496_v8  ;;  %v3989_v0 = vld [vmem:[#allocation7 + $0x5] ss:$0 sm:$0xff] }
 0xbb8   : > { %3599 = vmatprep.mubr.f32.mxu1 %v3498_v4 }
 0xbb9   : > { %3600 = vmatmul.mubr.f32.vlgmr.msra.gmra.mxu1 %v3497_v24 }
 0xc79   : > { %v4360_v62 = vpop.f32.mrf.mxu1 }
 0xc7b   : > { %v4361_v20 = vpop.f32.mrf.mxu1 }
 0xc7c   : > { %v4362_v55 = vadd.f32 %v4361_v20, %v4360_v62 }
 0xc7e   : > { %v3602_v9 = vadd.f32 %v4362_v55, %v3987_v26 }
 0xc80   : > { %v3605_v7 = vadd.f32 %v3602_v9, %v3377_v51 }
 0xc82   : > { %3640 = vrot.lane.b32.xlu1 %v3605_v7, %s5333_s25  ;;  %3620 = vrot.lane.b32.xlu0 %v3605_v7, %s5334_s24  ;;  %v3606_v1 = vsel %vm1507_vm1, %v3605_v7, 0.0 }
 0xca1   : > { %3607 = vadd.xlane.f32.xlu0 %v3606_v1 }
 0xcf4   : > { %v3621_v2 = vpop.permute.xlu0 %3620  ;;  %v3641_v33 = vpop.permute.xlu1 %3640 }
 0xcf5   : > { %v3623_v31 = vsel %vm1507_vm1, %v3621_v2, 0.0  ;;  %v3643_v45 = vsel %vm1507_vm1, %v3641_v33, 0.0 }
 0xcf6   : > { %3624 = vadd.xlane.f32.xlu1 %v3623_v31 }
 0xcfa   : > { %3644 = vadd.xlane.f32.xlu1 %v3643_v45 }
 0xd0b   : > { %3660 = vrot.lane.b32.xlu1 %v3605_v7, %s7316_s18 }
 0xd2a   : > { %v3608_v41 = vpop.xlane.xlu0 %3607 }
 0xd2b   : > { %v3609_v47 = vmul.f32 0.03125, %v3608_v41 }
 0xd2d   : > { %v3610_v27 = vsub.f32 %v3605_v7, %v3609_v47 }
 0xd2f   : > { %v3611_v50 = vmul.f32 %v3610_v27, %v3610_v27 }
 0xd31   : > { %v3612_v38 = vsel %vm1507_vm1, %v3611_v50, 0.0 }
 0xd32   : > { %3613 = vadd.xlane.f32.xlu1 %v3612_v38 }
 0xd7f   : > { %v3625_v53 = vpop.xlane.xlu1 %3624 }
 0xd80   : > { %v3626_v6 = vmul.f32 0.03125, %v3625_v53 }
 0xd82   : > { %v3627_v16 = vsub.f32 %v3605_v7, %v3626_v6 }
 0xd83   : > { %v3645_v22 = vpop.xlane.xlu1 %3644 }
 0xd84   : > { %v3628_v28 = vmul.f32 %v3627_v16, %v3627_v16  ;;  %v3646_v37 = vmul.f32 0.03125, %v3645_v22 }
 0xd86   : > { %v3647_v56 = vsub.f32 %v3605_v7, %v3646_v37  ;;  %3630 = vrot.lane.b32.xlu1 %v3628_v28, %s5334_s24  ;;  %s7317_s24 = sshll.u32 %s5525_s9, 3 }
 0xd87   : > { %v3661_v11 = vpop.permute.xlu1 %3660  ;;  %s572_s13 = scalar_lea.vmem [#allocation9], %s7317_s24 }
 0xd88   : > { %v3648_v23 = vmul.f32 %v3647_v56, %v3647_v56  ;;  %v3663_v57 = vsel %vm1507_vm1, %v3661_v11, 0.0  ;;  %s3709_s29 = sshll.u32 %s572_s13, 4  ;;  %s3710_s29 = int_to_ptr.vmem [resolvable:$true] %s3709_s29 }
 0xd89   : > { %s5235_s28 = scalar_lea.vmem %s3710_s29, 128 }
 0xd8a   : > { %3650 = vrot.lane.b32.xlu0 %v3648_v23, %s5333_s25  ;;  %s3991_s25 = sshll.u32 %s5311_s21, 7  ;;  %p5236_p1 = scmp.ne.s32.totalorder %s3710_s29, %s5235_s28 }
 0xd8b   : > { %s3707_s30 = scalar_lea.hbm %s7318_s14, %s3991_s25 }
 0xd8c   : > { %p5237_p13 = pnand %p5236_p1, %p5502_p0 }
 0xd8e   : > { %p5238_p11 = pneg %p5237_p13 }
 0xdbb   : > { %v3614_v15 = vpop.xlane.xlu1 %3613 }
 0xdbc   : > { %v3615_v17 = vmul.f32 0.03125, %v3614_v15 }
 0xdbe   : > { %v3616_v46 = vadd.f32 1e-05, %v3615_v17 }
 0xdc0   : > { %5172 = vrsqrt.f32 %v3616_v46 }
 0xdcd   : > { %v5173_v51 = vpop.eup %5172 }
 0xdce   : > { %v3618_v3 = vmul.f32 %v5173_v51, %v3610_v27 }
 0xdf8   : > { %v3631_v32 = vpop.permute.xlu1 %3630 }
 0xdf9   : > { %v3633_v10 = vsel %vm1507_vm1, %v3631_v32, 0.0 }
 0xdfa   : > { %3634 = vadd.xlane.f32.xlu0 %v3633_v10 }
 0xdfc   : > { %v3651_v19 = vpop.permute.xlu0 %3650 }
 0xdfd   : > { %v3653_v36 = vsel %vm1507_vm1, %v3651_v19, 0.0 }
 0xdfe   : > { %3664 = vadd.xlane.f32.xlu0 %v3663_v57 }
 0xe83   : > { %v3635_v52 = vpop.xlane.xlu0 %3634 }
 0xe84   : > { %v3636_v30 = vmul.f32 0.03125, %v3635_v52 }
 0xe86   : > { %v3637_v14 = vadd.f32 1e-05, %v3636_v30 }
 0xe87   : > { %v3665_v21 = vpop.xlane.xlu0 %3664 }
 0xe88   : > { %5174 = vrsqrt.f32 %v3637_v14  ;;  %v3666_v43 = vmul.f32 0.03125, %v3665_v21 }
 0xe8a   : > { %v3667_v60 = vsub.f32 %v3605_v7, %v3666_v43 }
 0xe8c   : > { %v3668_v34 = vmul.f32 %v3667_v60, %v3667_v60 }
 0xe8e   : > { %3670 = vrot.lane.b32.xlu1 %v3668_v34, %s7316_s18  ;;  %s5239_s18 = sshll.u32 %s5335_s22, 4  ;;  %s5240_s18 = int_to_ptr.vmem [resolvable:$false] %s5239_s18 }
 0xe8f   : > { %s5241_s21 = scalar_lea.vmem %s5240_s18, 256  ;;  %p5242_p2 = scmp.lt.s32.totalorder %s3710_s29, %s5240_s18 }
 0xe90   : > { %p5243_p12 = scmp.lt.s32.totalorder %s5241_s21, %s5235_s28 }
 0xe92   : > { %p5244_p3 = por %p5243_p12, %p5242_p2 }
 0xe94   : > { %p5245_p5 = pnand %p5244_p3, %p5238_p11 }
 0xe95   : > { %v5175_v35 = vpop.eup %5174 }
 0xe96   : > { %v3639_v13 = vmul.f32 %v5175_v35, %v3627_v16 }
 0xe98   : > { %v3680_v39 = vsel %vm1507_vm1, %v3618_v3, %v3639_v13 }
 0xeb2   : > { %3654 = vadd.xlane.f32.xlu1 %v3653_v36 }
 0xf00   : > { %v3671_v29 = vpop.permute.xlu1 %3670 }
 0xf01   : > { %v3673_v12 = vsel %vm1507_vm1, %v3671_v29, 0.0 }
 0xf02   : > { %3674 = vadd.xlane.f32.xlu1 %v3673_v12 }
 0xf3b   : > { %v3655_v40 = vpop.xlane.xlu1 %3654 }
 0xf3c   : > { %v3656_v25 = vmul.f32 0.03125, %v3655_v40 }
 0xf3e   : > { %v3657_v42 = vadd.f32 1e-05, %v3656_v25 }
 0xf40   : > { %5176 = vrsqrt.f32 %v3657_v42 }
 0xf4d   : > { %v5177_v48 = vpop.eup %5176 }
 0xf4e   : > { %v3659_v59 = vmul.f32 %v5177_v48, %v3647_v56 }
 0xf50   : > { %v3681_v61 = vsel %vm1512_vm6, %v3680_v39, %v3659_v59 }
 0xf8b   : > { %v3675_v44 = vpop.xlane.xlu1 %3674 }
 0xf8c   : > { %v3676_v5 = vmul.f32 0.03125, %v3675_v44 }
 0xf8e   : > { %v3677_v49 = vadd.f32 1e-05, %v3676_v5 }
 0xf90   : > { %5178 = vrsqrt.f32 %v3677_v49 }
 0xf9d   : > { %v5179_v58 = vpop.eup %5178 }
 0xf9e   : > { %v3679_v18 = vmul.f32 %v5179_v58, %v3667_v60 }
 0xfa0   : > { %v3682_v63 = vsel %vm1517_vm5, %v3681_v61, %v3679_v18 }
 0xfa1   : > { %v3687_v8 = vmul.f32 %v3988_v54, %v3682_v63 }
 0xfa3   : > { %v3692_v4 = vadd.f32 %v3989_v0, %v3687_v8 }
 0xfa5   : > { %3693 = vst [vmem:[%s572_s13] sm:$0xff] %v3692_v4 }
 0xfa6   : > { %5248 = shalt.err (!%p5245_p5)
}
 0xfa7   : > { %s5249_s24 = scalar_lea.hbm %s3707_s30, 128  ;;  %s5253_s13 = scalar_lea.hbm %s7318_s14, 256 }
 0xfa8   : > { %p5250_p7 = scmp.ne.s32.totalorder %s3707_s30, %s5249_s24  ;;  %p5254_p10 = scmp.lt.s32.totalorder %s3707_s30, %s7318_s14 }
 0xfa9   : > { %p5255_p9 = scmp.lt.s32.totalorder %s5253_s13, %s5249_s24 }
 0xfaa   : > { %p5251_p6 = pnand %p5250_p7, %p5502_p0 }
 0xfab   : > { %p5256_p8 = por %p5255_p9, %p5254_p10 }
 0xfac   : > { %p5252_p4 = pneg %p5251_p6 }
 0xfae   : > { %p5257_p1 = pnand %p5256_p8, %p5252_p4 }
 0xfb0   : > { %5260 = shalt.err (!%p5257_p1)
}
 0xfb1   : > { %5008 = dma.vmem_to_hbm [thread:$0]  (%p5502_p0), %s3710_s29, 128, %s3707_s30, %s3695_s26  }
 0xfb2 PF: > { %s7319_s28 = sld [smem:[#allocation13_spill]]  ;;  %p7322_p11 = scmp.ge.s32.totalorder %s5319_s23, 2 }
 0xfb3   : > { %s7320_s22 = sld [smem:[#allocation15_spill]] }
 0xfb8   : > { %s3721_s18 = sand.u32 1, %s7319_s28  }
 0xfb9   : > { %p7321_p13 = scmp.ne.s32.totalorder %s7320_s22, 0  ;;  %s3722_s21 = scalar_lea.sflag [#allocation6], %s3721_s18 }
 0xfbb   : > { %p5019_p2 = pnand %p7322_p11, %p7321_p13 }
 0xfbd   : > { %p5020_p12 = pneg %p5019_p2 }
 0xfbf   : > { %5294 = dma.done.wait (%p5020_p12), %s3722_s21, 128  }
 0xfc0   : > { %5296 = vsyncadd (%p5020_p12), %s3722_s21, 4294967168  ;;  %s32_s23 = sadd.s32 1, %s5319_s23   ;;  %s7323_s21 = sld [smem:[#allocation14_spill]] }
 0xfc1   : > { %p29_p3 = scmp.ge.s32.totalorder %s32_s23, 4   ;;  %s7324_s22 = sld [smem:[#allocation16_spill]] }
 0xfc2   : > { %s7325_s18 = smov %s5303_s19  ;;  %s7326_s19 = smov %s5307_s20 }
 0xfc3   : > { %s7327_s20 = smov %s5508_s16  ;;  %31 = sbr.rel (!%p29_p3) target bundleno = 15 (0xf), region = 154 }
 0xfc8   :  { %3727 = vsyncpa [#allocation5], 1 }
 0xfc9   :  { %3729 = vsyncpa [#allocation5 + $0x1], 1 }
 0xfca   :  { %3730 = vsyncpa [#allocation8], 1 }
 0xfcb   :  { %3731 = vsyncpa [#allocation6], 1 }
 0xfcc   :  { %3733 = vsyncpa [#allocation6 + $0x1], 1 }

// kernel: tpu_custom_call.1
= control target key start
LH: loop header
LB: loop body
LE: loop exit
PB: predicated region body
PF: predicated region fallthrough
CT: control target
= control target key end

     0   :  { %s7254_s0 = inlined_call_operand.vmem [shape: f32[2,8,128], index: 0, kind: input, shape index: {}]   ;;  %s7255_s1 = inlined_call_operand.vmem [shape: f32[2,128,8], index: 1, kind: input, shape index: {}]   ;;  %s7256_s2 = inlined_call_operand.hbm [shape: f32[2,8,128], index: 2, kind: input, shape index: {}]   ;;  %s7257_s3 = inlined_call_operand.vmem [shape: f32[128,128], index: 3, kind: input, shape index: {}]   ;;  %s7258_s4 = inlined_call_operand.vmem [shape: f32[4,32,128], index: 4, kind: input, shape index: {}]   ;;  %s7259_s5 = inlined_call_operand.vmem [shape: f32[32,4], index: 5, kind: input, shape index: {}]   ;;  %s7260_s6 = inlined_call_operand.vmem [shape: f32[4,128,32], index: 6, kind: input, shape index: {}]   ;;  %s7261_s7 = inlined_call_operand.vmem [shape: f32[4,32], index: 7, kind: input, shape index: {}]   ;;  %s7262_s8 = inlined_call_operand.vmem [shape: f32[4,32,128], index: 8, kind: input, shape index: {}]   ;;  %s7263_s9 = inlined_call_operand.vmem [shape: f32[32,128], index: 9, kind: input, shape index: {}]   ;;  %s7264_s10 = inlined_call_operand.vmem [shape: f32[128,32], index: 10, kind: input, shape index: {}]   ;;  %s7265_s11 = inlined_call_operand.hbm [shape: f32[7,128], index: 11, kind: input, shape index: {}]   ;;  %s7266_s12 = inlined_call_operand.vmem [shape: f32[128,256], index: 12, kind: input, shape index: {}]   ;;  %s7267_s13 = inlined_call_operand.vmem [shape: f32[1,256], index: 13, kind: input, shape index: {}]   ;;  %s7268_s14 = inlined_call_operand.vmem [shape: f32[256,128], index: 14, kind: input, shape index: {}]   ;;  %s7269_s15 = inlined_call_operand.hbm [shape: f32[2,8,128], index: 15, kind: output, shape index: {}]  }
   0x1   :  { %7284 = sst [smem:[#allocation19_spill]] %s7254_s0 }
   0x2   :  { %7285 = sst [smem:[#allocation20_spill]] %s7263_s9 }
   0x3   :  { %7286 = sst [smem:[#allocation21_spill]] %s7265_s11 }
   0x4   :  { %7287 = sst [smem:[#allocation22_spill]] %s7266_s12 }
   0x5   :  { %7288 = sst [smem:[#allocation23_spill]] %s7267_s13 }
   0x6   :  { %7289 = sst [smem:[#allocation24_spill]] %s7268_s14 }
   0x7   :  { %7290 = sst [smem:[#allocation25_spill]] %s7269_s15 }
   0x8   :  { %20 = vsyncpa [#allocation5], 0 }
   0x9   :  { %22 = vsyncpa [#allocation5 + $0x1], 0 }
   0xa   :  { %23 = vsyncpa [#allocation8], 0 }
   0xb   :  { %24 = vsyncpa [#allocation6], 0 }
   0xc   :  { %26 = vsyncpa [#allocation6 + $0x1], 0  ;;  %s5416_s18 = smov 0   ;;  %s5418_s19 = smov 0  }
   0xd   :  { %s5420_s20 = smov 0   ;;  %s5422_s21 = smov 0  }
   0xe   :  { %s5424_s22 = smov 0   ;;  %s5426_s23 = smov 0  }
   0xf LB: > { %7291 = sst [smem:[#allocation13_spill]] %s5299_s18  ;;  %s3825_s24 = sadd.s32 4294967295, %s5319_s23   ;;  %s5319_s23 = sphi %s5426_s23, %s32_s23   ;;  %s5315_s22 = sphi %s5424_s22, %s7324_s22   ;;  %s5311_s21 = sphi %s5422_s21, %s7323_s21   ;;  %s5307_s20 = sphi %s5420_s20, %s7327_s20   ;;  %s5303_s19 = sphi %s5418_s19, %s7326_s19   ;;  %s5299_s18 = sphi %s5416_s18, %s7325_s18  }
  0x10   : > { %7292 = sst [smem:[#allocation14_spill]] %s5315_s22  ;;  %s3826_s25 = sadd.s32 4294967294, %s5319_s23  }
  0x11   : > { %p118_p0 = scmp.ne.s32.totalorder %s5303_s19, %s5299_s18  ;;  %p5450_p1 = scmp.eq.s32.totalorder %s3825_s24, 0 }
  0x12   : > { %p5454_p2 = scmp.eq.s32.totalorder %s3825_s24, 1  ;;  %p402_p3 = scmp.eq.s32.totalorder %s3826_s25, 1 }
  0x13   : > { %p5460_p4 = por %p5450_p1, %p118_p0  ;;  %p3827_p5 = scmp.ge.s32.totalorder %s5319_s23, 1 }
  0x14   : > { %p5465_p6 = por %p402_p3, %p118_p0  ;;  %p409_p7 = scmp.lt.s32.totalorder %s5319_s23, 3 }
  0x15   : > { %s7295_s28 = scalar_select %p5460_p4, 1, 0 }
  0x16   : > { %s7296_s29 = scalar_select %p5465_p6, 1, 0 }
  0x17   : > { %p5470_p8 = pnand %p3827_p5, %p409_p7  ;;  %s5321_s16 = smov [#allocation7]  }
  0x18   : > { %7297 = sst [smem:[#allocation15_spill]] %s7296_s29  ;;  %s446_s17 = sshll.u32 %s5321_s16, 4  ;;  %s447_s17 = int_to_ptr.vmem [resolvable:$true] %s446_s17 }
  0x19   : > { %p5010_p10 = pneg %p5470_p8  ;;  %s44_s25 = sadd.s32 1, %s5315_s22 }
  0x1a   : > { %s105_s29 = sadd.s32 1, %s5307_s20  ;;  %p46_p12 = scmp.ge.s32.totalorder %s44_s25, 2 }
  0x1b   : > { %p5479_p11 = pnand %p5010_p10, %p5450_p1  ;;  %s5192_s18 = scalar_lea.vmem %s447_s17, 128 }
  0x1c   : > { %p5193_p0 = scmp.ne.s32.totalorder %s447_s17, %s5192_s18  ;;  %p5200_p7 = scmp.lt.s32.totalorder %s447_s17, %s447_s17 }
  0x1d   : > { %p5183_p13 = pneg %p5479_p11  ;;  %p5201_p6 = scmp.lt.s32.totalorder %s5192_s18, %s5192_s18 }
  0x1f   : > { %p5195_p3 = pnand %p5193_p0, %p5183_p13  ;;  %p5202_p9 = por %p5201_p6, %p5200_p7 }
  0x21   : > { %p5196_p5 = pneg %p5195_p3 }
  0x23   : > { %p5203_p4 = pnand %p5202_p9, %p5196_p5 }
  0x25   : > { %5206 = shalt.err (!%p5203_p4)
}
  0x26   : > { %s7300_s11 = sld [smem:[#allocation21_spill]]  ;;  %s7329_s25 = smov (%p46_p12, %s44_s25), 0 }
  0x27   : > { %7301 = sst [smem:[#allocation16_spill]] %s7329_s25  ;;  %p112_p6 = scmp.ne.s32.totalorder %s5307_s20, %s5303_s19 }
  0x28   : > { %p113_p4 = scmp.eq.s32.totalorder %s5319_s23, 0  ;;  %s102_s18 = ssub.s32 %s5315_s22, %s7329_s25 }
  0x29   : > { %p5023_p9 = scmp.lt.s32.totalorder %s5319_s23, 2  ;;  %p103_p10 = scmp.eq.s32.totalorder %s102_s18, 0 }
  0x2a   : > { %p114_p13 = por %p113_p4, %p112_p6  ;;  %p5502_p0 = por %p5454_p2, %p112_p6 }
  0x2b   : > { %s484_s24 = sand.u32 1, %s5307_s20   ;;  %s3831_s14 = sshll.u32 %s5315_s22, 7 }
  0x2c   : > { %5013 = dma.hbm_to_vmem [thread:$0]  (!%p5479_p11), %s7300_s11, 128, %s447_s17, [#allocation8]  }
  0x2d   : > { %s5508_s16 = scalar_select %p103_p10, %s5307_s20, %s105_s29  }
  0x2e   : > { %s3830_s13 = sshll.u32 %s484_s24, 3  ;;  %s493_s12 = scalar_lea.hbm %s7256_s2, %s3831_s14 }
  0x2f   : > { %s488_s9 = scalar_lea.vmem [#allocation4], %s3830_s13  ;;  %p5514_p11 = pnand %p5023_p9, %p114_p13 }
  0x30   : > { %s495_s0 = sshll.u32 %s488_s9, 4  ;;  %s485_s27 = scalar_lea.sflag [#allocation5], %s484_s24  ;;  %s496_s0 = int_to_ptr.vmem [resolvable:$true] %s495_s0 }
  0x31   : > { %p5209_p2 = pneg %p5514_p11  ;;  %s5220_s25 = scalar_lea.vmem %s496_s0, 128 }
  0x32   : > { %p5221_p12 = scmp.ne.s32.totalorder %s496_s0, %s5220_s25  ;;  %s5322_s29 = smov [#allocation4]  }
  0x33   : > { %s5225_s22 = sshll.u32 %s5322_s29, 4  ;;  %s5226_s22 = int_to_ptr.vmem [resolvable:$false] %s5225_s22 }
  0x34   : > { %p5223_p3 = pnand %p5221_p12, %p5209_p2  ;;  %s5227_s11 = scalar_lea.vmem %s5226_s22, 256 }
  0x35   : > { %p5228_p7 = scmp.lt.s32.totalorder %s496_s0, %s5226_s22  ;;  %p5229_p6 = scmp.lt.s32.totalorder %s5227_s11, %s5220_s25 }
  0x36   : > { %p5224_p5 = pneg %p5223_p3 }
  0x37   : > { %p5230_p4 = por %p5229_p6, %p5228_p7 }
  0x39   : > { %p5231_p10 = pnand %p5230_p4, %p5224_p5 }
  0x3b   : > { %5234 = shalt.err (!%p5231_p10)
}
  0x3c   : > { %5017 = dma.hbm_to_vmem [thread:$0]  (!%p5514_p11), %s493_s12, 128, %s496_s0, %s485_s27  }
  0x3d   : > { %504 = sbr.rel (%p5470_p8) target bundleno = 4018 (0xfb2), region = 80 }
  0x42   : > { %s5525_s9 = sand.u32 1, %s5303_s19   ;;  %p7304_p9 = scmp.ne.s32.totalorder %s7295_s28, 0 }
  0x43   : > { %s7281_s13 = sshll.u32 %s5525_s9, 3  ;;  %s507_s14 = scalar_lea.sflag [#allocation5], %s5525_s9 }
  0x44   : > { %s5531_s22 = scalar_lea.vmem [#allocation4], %s7281_s13 }
  0x45   : > { %5286 = dma.done.wait (%p7304_p9), %s507_s14, 128  }
  0x46   : > { %5288 = vsyncadd (%p7304_p9), %s507_s14, 4294967168 }
  0x47   : > { %5290 = dma.done.wait (%p5450_p1), [#allocation8], 128  }
  0x48   : > { %5292 = vsyncadd (%p5450_p1), [#allocation8], 4294967168  ;;  %p573_p8 = scmp.lt.s32.totalorder %s5311_s21, 1  ;;  %v7279_v0 = vmov 0.0   ;;  %vm5324_vm0 = vmmov 0   ;;  %v734_v2 = vld [vmem:[%s7260_s6 + $0x78] sm:$0xff] }
  0x49   : > { %4401 = vmatprep.subr.mxu1 %v7279_v0  ;;  %4433 = vmatprep.mubr.msk.f32.mxu1 %vm5324_vm0, %v7279_v0  ;;  %v733_v4 = vld [vmem:[%s7260_s6 + $0x70] sm:$0xff]  ;;  %v732_v6 = vld [vmem:[%s7260_s6 + $0x68] sm:$0xff]  ;;  %v731_v8 = vld [vmem:[%s7260_s6 + $0x60] sm:$0xff]  ;;  %vm1507_vm1 = vcmask 261120   ;;  %s5329_s24 = smov 8   ;;  %s5330_s28 = smov 16  }
  0x4a   : > { %s5546_s0 = scalar_select %p573_p8, %s5311_s21, 1  ;;  %4402 = vmatpush3.msra.mxu1 %v734_v2  ;;  %v730_v10 = vld [vmem:[%s7260_s6 + $0x58] sm:$0xff]  ;;  %v729_v12 = vld [vmem:[%s7260_s6 + $0x50] sm:$0xff]  ;;  %v728_v14 = vld [vmem:[%s7260_s6 + $0x48] sm:$0xff]  ;;  %vm1452_vm2 = vcmask 64512   ;;  %vm1457_vm3 = vcmask 130048  }
  0x4b   : > { %4403 = vmatprep.subr.mxu1 %v7279_v0  ;;  %v727_v16 = vld [vmem:[%s7260_s6 + $0x40] sm:$0xff]  ;;  %v726_v18 = vld [vmem:[%s7260_s6 + $0x38] sm:$0xff]  ;;  %v725_v20 = vld [vmem:[%s7260_s6 + $0x30] sm:$0xff]  ;;  %s5331_s14 = smov 24   ;;  %vm1462_vm4 = vcmask 195584   ;;  %s7282_s26 = smov 32  }
  0x4c   : > { %s3994_s12 = sshll.u32 %s5546_s0, 7  ;;  %4404 = vmatpush3.msra.mxu1 %v733_v4  ;;  %v724_v22 = vld [vmem:[%s7260_s6 + $0x28] sm:$0xff]  ;;  %v723_v24 = vld [vmem:[%s7260_s6 + $0x20] sm:$0xff]  ;;  %v722_v26 = vld [vmem:[%s7260_s6 + $0x18] sm:$0xff]  ;;  %vm1517_vm5 = vcmask 785408   ;;  %vm1512_vm6 = vcmask 523264  }
  0x4d   : > { %s5552_s25 = scalar_lea.vmem %s7255_s1, %s3994_s12  ;;  %4405 = vmatprep.subr.mxu1 %v7279_v0  ;;  %v721_v28 = vld [vmem:[%s7260_s6 + $0x10] sm:$0xff]  ;;  %v720_v30 = vld [vmem:[%s7260_s6 + $0x8] sm:$0xff]  ;;  %v719_v32 = vld [vmem:[%s7260_s6] sm:$0xff]  ;;  %s7305_s12 = sld [smem:[#allocation19_spill]]  ;;  %vm2479_vm7 = vcmask 785920   ;;  %vm2462_vm8 = vcmask 523520  }
  0x4e   : > { %v5555_v1 = vld [vmem:[%s5552_s25 + $0x78] sm:$0xff]  ;;  %v5561_v3 = vld [vmem:[%s5552_s25 + $0x70] sm:$0xff]  ;;  %v5570_v5 = vld [vmem:[%s5552_s25 + $0x68] sm:$0xff]  ;;  %4406 = vmatpush3.msra.mxu1 %v732_v6  ;;  %s7308_s18 = sld [smem:[#allocation20_spill]]  ;;  %vm2496_vm9 = vcmask 1048320  }
  0x4f   : > { %4363 = vmatprep.subr.mxu0 %v5555_v1  ;;  %v5579_v7 = vld [vmem:[%s5552_s25 + $0x60] sm:$0xff]  ;;  %4407 = vmatprep.subr.mxu1 %v7279_v0  ;;  %v5588_v9 = vld [vmem:[%s5552_s25 + $0x58] sm:$0xff]  ;;  %v5597_v11 = vld [vmem:[%s5552_s25 + $0x50] sm:$0xff]  ;;  %s7313_s17 = sld [smem:[#allocation22_spill]] }
  0x50   : > { %4364 = vmatpush3.msra.mxu0 %v5555_v1  ;;  %4408 = vmatpush3.msra.mxu1 %v731_v8  ;;  %v5606_v13 = vld [vmem:[%s5552_s25 + $0x48] sm:$0xff]  ;;  %v5615_v15 = vld [vmem:[%s5552_s25 + $0x40] sm:$0xff]  ;;  %v5624_v17 = vld [vmem:[%s5552_s25 + $0x38] sm:$0xff] }
  0x51   : > { %4365 = vmatprep.subr.mxu0 %v5561_v3  ;;  %4409 = vmatprep.subr.mxu1 %v7279_v0  ;;  %v5633_v19 = vld [vmem:[%s5552_s25 + $0x30] sm:$0xff]  ;;  %v5642_v21 = vld [vmem:[%s5552_s25 + $0x28] sm:$0xff]  ;;  %v5651_v23 = vld [vmem:[%s5552_s25 + $0x20] sm:$0xff] }
  0x52   : > { %4366 = vmatpush3.msra.mxu0 %v5561_v3  ;;  %4410 = vmatpush3.msra.mxu1 %v730_v10  ;;  %v5660_v25 = vld [vmem:[%s5552_s25 + $0x18] sm:$0xff]  ;;  %v5669_v27 = vld [vmem:[%s5552_s25 + $0x10] sm:$0xff]  ;;  %v5678_v29 = vld [vmem:[%s5552_s25 + $0x8] sm:$0xff] }
  0x53   : > { %4367 = vmatprep.subr.mxu0 %v5570_v5  ;;  %4411 = vmatprep.subr.mxu1 %v7279_v0  ;;  %v5687_v31 = vld [vmem:[%s5552_s25] sm:$0xff]  ;;  %v3859_v35 = vld [vmem:[%s7260_s6 + $0xf8] sm:$0xff]  ;;  %v607_v36 = vld [vmem:[%s7258_s4 + $0x8] sm:$0xff]  ;;  %s5333_s25 = smov 64  }
  0x54   : > { %4368 = vmatpush3.msra.mxu0 %v5570_v5  ;;  %4412 = vmatpush3.msra.mxu1 %v729_v12  ;;  %v5694_v33 = vld [vmem:[%s5531_s22] sm:$0xff]  ;;  %v3858_v37 = vld [vmem:[%s7260_s6 + $0xf0] sm:$0xff]  ;;  %v3855_v40 = vld [vmem:[%s7260_s6 + $0xd8] sm:$0xff]  ;;  %s3836_s22 = sshll.u32 %s5546_s0, 3  ;;  %s7309_s27 = smov %s7308_s18 }
  0x55   : > { %4369 = vmatprep.subr.mxu0 %v5579_v7  ;;  %4413 = vmatprep.subr.mxu1 %v7279_v0  ;;  %v606_v34 = vld [vmem:[%s7258_s4] sm:$0xff]  ;;  %v3857_v38 = vld [vmem:[%s7260_s6 + $0xe8] sm:$0xff]  ;;  %v3854_v41 = vld [vmem:[%s7260_s6 + $0xd0] sm:$0xff] }
  0x56   : > { %4370 = vmatpush3.msra.mxu0 %v5579_v7  ;;  %4414 = vmatpush3.msra.mxu1 %v728_v14  ;;  %v3856_v39 = vld [vmem:[%s7260_s6 + $0xe0] sm:$0xff]  ;;  %v3853_v42 = vld [vmem:[%s7260_s6 + $0xc8] sm:$0xff]  ;;  %v3851_v44 = vld [vmem:[%s7260_s6 + $0xb8] sm:$0xff] }
  0x57   : > { %4371 = vmatprep.subr.mxu0 %v5588_v9  ;;  %4415 = vmatprep.subr.mxu1 %v7279_v0  ;;  %v3852_v43 = vld [vmem:[%s7260_s6 + $0xc0] sm:$0xff]  ;;  %v3850_v45 = vld [vmem:[%s7260_s6 + $0xb0] sm:$0xff]  ;;  %v3849_v46 = vld [vmem:[%s7260_s6 + $0xa8] sm:$0xff] }
  0x58   : > { %4372 = vmatpush3.msra.mxu0 %v5588_v9  ;;  %4416 = vmatpush3.msra.mxu1 %v727_v16  ;;  %v3848_v47 = vld [vmem:[%s7260_s6 + $0xa0] sm:$0xff]  ;;  %v3847_v48 = vld [vmem:[%s7260_s6 + $0x98] sm:$0xff]  ;;  %v3846_v49 = vld [vmem:[%s7260_s6 + $0x90] sm:$0xff] }
  0x59   : > { %4373 = vmatprep.subr.mxu0 %v5597_v11  ;;  %4417 = vmatprep.subr.mxu1 %v7279_v0  ;;  %v608_v50 = vld [vmem:[%s7258_s4 + $0x10] sm:$0xff]  ;;  %v609_v51 = vld [vmem:[%s7258_s4 + $0x18] sm:$0xff]  ;;  %v3845_v52 = vld [vmem:[%s7260_s6 + $0x88] sm:$0xff] }
  0x5a   : > { %4374 = vmatpush3.msra.mxu0 %v5597_v11  ;;  %4418 = vmatpush3.msra.mxu1 %v726_v18  ;;  %v3844_v53 = vld [vmem:[%s7260_s6 + $0x80] sm:$0xff]  ;;  %v3841_v55 = vld [vmem:[%s7258_s4 + $0x28] sm:$0xff]  ;;  %v3880_v56 = vld [vmem:[%s7260_s6 + $0x178] sm:$0xff] }
  0x5b   : > { %4375 = vmatprep.subr.mxu0 %v5606_v13  ;;  %4419 = vmatprep.subr.mxu1 %v7279_v0  ;;  %v3840_v54 = vld [vmem:[%s7258_s4 + $0x20] sm:$0xff]  ;;  %v3879_v57 = vld [vmem:[%s7260_s6 + $0x170] sm:$0xff]  ;;  %v3878_v58 = vld [vmem:[%s7260_s6 + $0x168] sm:$0xff] }
  0x5c   : > { %4376 = vmatpush3.msra.mxu0 %v5606_v13  ;;  %4420 = vmatpush3.msra.mxu1 %v725_v20  ;;  %v3842_v59 = vld [vmem:[%s7258_s4 + $0x30] sm:$0xff]  ;;  %v3843_v60 = vld [vmem:[%s7258_s4 + $0x38] sm:$0xff]  ;;  %v3877_v61 = vld [vmem:[%s7260_s6 + $0x160] sm:$0xff] }
  0x5d   : > { %4377 = vmatprep.subr.mxu0 %v5615_v15  ;;  %4421 = vmatprep.subr.mxu1 %v7279_v0  ;;  %v3876_v62 = vld [vmem:[%s7260_s6 + $0x158] sm:$0xff]  ;;  %v3875_v63 = vld [vmem:[%s7260_s6 + $0x150] sm:$0xff]  ;;  %v3874_v2 = vld [vmem:[%s7260_s6 + $0x148] sm:$0xff] }
  0x5e   : > { %4378 = vmatpush3.msra.mxu0 %v5615_v15  ;;  %4422 = vmatpush3.msra.mxu1 %v724_v22  ;;  %v3873_v4 = vld [vmem:[%s7260_s6 + $0x140] sm:$0xff]  ;;  %v3872_v6 = vld [vmem:[%s7260_s6 + $0x138] sm:$0xff]  ;;  %v3871_v8 = vld [vmem:[%s7260_s6 + $0x130] sm:$0xff] }
  0x5f   : > { %4379 = vmatprep.subr.mxu0 %v5624_v17  ;;  %4423 = vmatprep.subr.mxu1 %v7279_v0  ;;  %v3870_v10 = vld [vmem:[%s7260_s6 + $0x128] sm:$0xff]  ;;  %v3869_v12 = vld [vmem:[%s7260_s6 + $0x120] sm:$0xff]  ;;  %v3868_v14 = vld [vmem:[%s7260_s6 + $0x118] sm:$0xff] }
  0x60   : > { %4380 = vmatpush3.msra.mxu0 %v5624_v17  ;;  %4424 = vmatpush3.msra.mxu1 %v723_v24  ;;  %v3867_v16 = vld [vmem:[%s7260_s6 + $0x110] sm:$0xff]  ;;  %v3866_v18 = vld [vmem:[%s7260_s6 + $0x108] sm:$0xff]  ;;  %v3865_v20 = vld [vmem:[%s7260_s6 + $0x100] sm:$0xff] }
  0x61   : > { %4381 = vmatprep.subr.mxu0 %v5633_v19  ;;  %4425 = vmatprep.subr.mxu1 %v7279_v0  ;;  %v3861_v22 = vld [vmem:[%s7258_s4 + $0x40] sm:$0xff]  ;;  %v3862_v24 = vld [vmem:[%s7258_s4 + $0x48] sm:$0xff] }
  0x62   : > { %4382 = vmatpush3.msra.mxu0 %v5633_v19  ;;  %4426 = vmatpush3.msra.mxu1 %v722_v26  ;;  %v3901_v26 = vld [vmem:[%s7260_s6 + $0x1f8] sm:$0xff] }
  0x63   : > { %4383 = vmatprep.subr.mxu0 %v5642_v21  ;;  %4427 = vmatprep.subr.mxu1 %v7279_v0 }
  0x64   : > { %4384 = vmatpush3.msra.mxu0 %v5642_v21  ;;  %4428 = vmatpush3.msra.mxu1 %v721_v28  ;;  %v3900_v28 = vld [vmem:[%s7260_s6 + $0x1f0] sm:$0xff] }
  0x65   : > { %4385 = vmatprep.subr.mxu0 %v5651_v23  ;;  %4429 = vmatprep.subr.mxu1 %v7279_v0 }
  0x66   : > { %4386 = vmatpush3.msra.mxu0 %v5651_v23  ;;  %4430 = vmatpush3.msra.mxu1 %v720_v30  ;;  %v3863_v30 = vld [vmem:[%s7258_s4 + $0x50] sm:$0xff] }
  0x67   : > { %4387 = vmatprep.subr.mxu0 %v5660_v25  ;;  %4431 = vmatprep.subr.mxu1 %v7279_v0 }
  0x68   : > { %4388 = vmatpush3.msra.mxu0 %v5660_v25  ;;  %4432 = vmatpush3.msra.mxu1 %v719_v32  ;;  %v3864_v32 = vld [vmem:[%s7258_s4 + $0x58] sm:$0xff] }
  0x69   : > { %4389 = vmatprep.subr.mxu0 %v5669_v27  ;;  %4434 = vmatmul.mubr.f32.vlgmr.msra.gmra.mxu1 %v5694_v33 }
  0x6a   : > { %4390 = vmatpush3.msra.mxu0 %v5669_v27  ;;  %4474 = vmatprep.subr.mxu1 %v7279_v0 }
  0x6b   : > { %4391 = vmatprep.subr.mxu0 %v5678_v29  ;;  %4395 = vmatprep.mubr.f32.mxu0 %v606_v34  ;;  %v3899_v34 = vld [vmem:[%s7260_s6 + $0x1e8] sm:$0xff] }
  0x6c   : > { %4392 = vmatpush3.msra.mxu0 %v5678_v29  ;;  %4475 = vmatpush3.msra.mxu1 %v3859_v35  ;;  %v3896_v35 = vld [vmem:[%s7260_s6 + $0x1d0] sm:$0xff] }
  0x6d   : > { %4393 = vmatprep.subr.mxu0 %v5687_v31  ;;  %4476 = vmatprep.subr.mxu1 %v7279_v0 }
  0x6e   : > { %4394 = vmatpush3.msra.mxu0 %v5687_v31  ;;  %4477 = vmatpush3.msra.mxu1 %v3858_v37  ;;  %v5326_v37 = vmov 2  }
  0x6f   : > { %4436 = vmatprep.subr.mxu0 %v5555_v1  ;;  %4396 = vmatmul.mubr.f32.vlgmr.msra.gmra.mxu0 %v607_v36  ;;  %v5325_v36 = vmov 1  }
  0x70   : > { %4437 = vmatpush3.msra.mxu0 %v5555_v1  ;;  %4478 = vmatprep.subr.mxu1 %v7279_v0 }
  0x71   : > { %4438 = vmatprep.subr.mxu0 %v5561_v3  ;;  %4479 = vmatpush3.msra.mxu1 %v3857_v38  ;;  %v3883_v38 = vld [vmem:[%s7258_s4 + $0x68] sm:$0xff] }
  0x72   : > { %4439 = vmatpush3.msra.mxu0 %v5561_v3  ;;  %4480 = vmatprep.subr.mxu1 %v7279_v0 }
  0x73   : > { %4440 = vmatprep.subr.mxu0 %v5570_v5  ;;  %4481 = vmatpush3.msra.mxu1 %v3856_v39  ;;  %v611_v39 = vld [vmem:[%s7259_s5 + $0x8] sm:$0xff] }
  0x74   : > { %4441 = vmatpush3.msra.mxu0 %v5570_v5  ;;  %4482 = vmatprep.subr.mxu1 %v7279_v0 }
  0x75   : > { %4442 = vmatprep.subr.mxu0 %v5579_v7  ;;  %4483 = vmatpush3.msra.mxu1 %v3855_v40  ;;  %v612_v40 = vld [vmem:[%s7259_s5 + $0x10] sm:$0xff] }
  0x76   : > { %4443 = vmatpush3.msra.mxu0 %v5579_v7  ;;  %4484 = vmatprep.subr.mxu1 %v7279_v0 }
  0x77   : > { %4444 = vmatprep.subr.mxu0 %v5588_v9  ;;  %4485 = vmatpush3.msra.mxu1 %v3854_v41  ;;  %v1569_v41 = vld [vmem:[%s7262_s8 + $0x18] sm:$0xff] }
  0x78   : > { %4445 = vmatpush3.msra.mxu0 %v5588_v9  ;;  %4486 = vmatprep.subr.mxu1 %v7279_v0 }
  0x79   : > { %4446 = vmatprep.subr.mxu0 %v5597_v11  ;;  %4487 = vmatpush3.msra.mxu1 %v3853_v42  ;;  %v3922_v42 = vld [vmem:[%s7262_s8 + $0x38] sm:$0xff] }
  0x7a   : > { %4447 = vmatpush3.msra.mxu0 %v5597_v11  ;;  %4488 = vmatprep.subr.mxu1 %v7279_v0 }
  0x7b   : > { %4448 = vmatprep.subr.mxu0 %v5606_v13  ;;  %4489 = vmatpush3.msra.mxu1 %v3852_v43  ;;  %v1568_v43 = vld [vmem:[%s7262_s8 + $0x10] sm:$0xff] }
  0x7c   : > { %4449 = vmatpush3.msra.mxu0 %v5606_v13  ;;  %4490 = vmatprep.subr.mxu1 %v7279_v0 }
  0x7d   : > { %4450 = vmatprep.subr.mxu0 %v5615_v15  ;;  %4491 = vmatpush3.msra.mxu1 %v3851_v44  ;;  %v3921_v44 = vld [vmem:[%s7262_s8 + $0x30] sm:$0xff] }
  0x7e   : > { %4451 = vmatpush3.msra.mxu0 %v5615_v15  ;;  %4492 = vmatprep.subr.mxu1 %v7279_v0 }
  0x7f   : > { %4452 = vmatprep.subr.mxu0 %v5624_v17  ;;  %4493 = vmatpush3.msra.mxu1 %v3850_v45  ;;  %v1567_v45 = vld [vmem:[%s7262_s8 + $0x8] sm:$0xff] }
  0x80   : > { %4453 = vmatpush3.msra.mxu0 %v5624_v17  ;;  %4494 = vmatprep.subr.mxu1 %v7279_v0 }
  0x81   : > { %4454 = vmatprep.subr.mxu0 %v5633_v19  ;;  %4495 = vmatpush3.msra.mxu1 %v3849_v46  ;;  %v5327_v46 = vmov 3  }
  0x82   : > { %4455 = vmatpush3.msra.mxu0 %v5633_v19  ;;  %4496 = vmatprep.subr.mxu1 %v7279_v0 }
  0x83   : > { %4456 = vmatprep.subr.mxu0 %v5642_v21  ;;  %4497 = vmatpush3.msra.mxu1 %v3848_v47  ;;  %v3920_v47 = vld [vmem:[%s7262_s8 + $0x28] sm:$0xff] }
  0x84   : > { %4457 = vmatpush3.msra.mxu0 %v5642_v21  ;;  %4498 = vmatprep.subr.mxu1 %v7279_v0 }
  0x85   : > { %4458 = vmatprep.subr.mxu0 %v5651_v23  ;;  %4499 = vmatpush3.msra.mxu1 %v3847_v48  ;;  %v1566_v48 = vld [vmem:[%s7262_s8] sm:$0xff] }
  0x86   : > { %4459 = vmatpush3.msra.mxu0 %v5651_v23  ;;  %4500 = vmatprep.subr.mxu1 %v7279_v0 }
  0x87   : > { %4460 = vmatprep.subr.mxu0 %v5660_v25  ;;  %4501 = vmatpush3.msra.mxu1 %v3846_v49  ;;  %v3919_v49 = vld [vmem:[%s7262_s8 + $0x20] sm:$0xff] }
  0x88   : > { %4461 = vmatpush3.msra.mxu0 %v5660_v25  ;;  %4398 = vmatprep.mubr.f32.mxu0 %v608_v50  ;;  %v5328_v50 = vmov 0  }
  0x89   : > { %4462 = vmatprep.subr.mxu0 %v5669_v27  ;;  %4502 = vmatprep.subr.mxu1 %v7279_v0 }
  0x8a   : > { %4463 = vmatpush3.msra.mxu0 %v5669_v27  ;;  %4503 = vmatpush3.msra.mxu1 %v3845_v52  ;;  %v3839_v52 = vld [vmem:[%s7261_s7] ss:$0 sm:$0xff] }
  0x8b   : > { %4399 = vmatmul.mubr.f32.gmra.mxu0 %v609_v51  ;;  %4464 = vmatprep.subr.mxu0 %v5678_v29  ;;  %v3942_v51 = vld [vmem:[%s7262_s8 + $0x58] sm:$0xff] }
  0x8c   : > { %4465 = vmatpush3.msra.mxu0 %v5678_v29  ;;  %4504 = vmatprep.subr.mxu1 %v7279_v0 }
  0x8d   : > { %4466 = vmatprep.subr.mxu0 %v5687_v31  ;;  %4505 = vmatpush3.msra.mxu1 %v3844_v53 }
  0x8e   : > { %4506 = vmatprep.mubr.msk.f32.mxu1 %vm5324_vm0, %v7279_v0  ;;  %4467 = vmatpush3.msra.mxu0 %v5687_v31 }
  0x8f   : > { %4468 = vmatprep.mubr.f32.mxu0 %v3840_v54  ;;  %4507 = vmatmul.mubr.f32.vlgmr.msra.gmra.mxu1 %v5694_v33  ;;  %v1534_v54 = vld [vmem:[%s7264_s10] sm:$0xff] }
  0x90   : > { %4547 = vmatprep.subr.mxu1 %v7279_v0  ;;  %4469 = vmatmul.mubr.f32.vlgmr.msra.gmra.mxu0 %v3841_v55 }
  0x91   : > { %4509 = vmatprep.subr.mxu0 %v5555_v1  ;;  %4548 = vmatpush3.msra.mxu1 %v3880_v56 }
  0x92   : > { %4510 = vmatpush3.msra.mxu0 %v5555_v1  ;;  %4549 = vmatprep.subr.mxu1 %v7279_v0 }
  0x93   : > { %4511 = vmatprep.subr.mxu0 %v5561_v3  ;;  %4550 = vmatpush3.msra.mxu1 %v3879_v57 }
  0x94   : > { %4512 = vmatpush3.msra.mxu0 %v5561_v3  ;;  %4551 = vmatprep.subr.mxu1 %v7279_v0 }
  0x95   : > { %4513 = vmatprep.subr.mxu0 %v5570_v5  ;;  %4552 = vmatpush3.msra.mxu1 %v3878_v58  ;;  %v3962_v58 = vld [vmem:[%s7262_s8 + $0x78] sm:$0xff] }
  0x96   : > { %4471 = vmatprep.mubr.f32.mxu0 %v3842_v59  ;;  %4514 = vmatpush3.msra.mxu0 %v5570_v5 }
  0x97   : > { %4553 = vmatprep.subr.mxu1 %v7279_v0  ;;  %4472 = vmatmul.mubr.f32.gmra.mxu0 %v3843_v60 }
  0x98   : > { %4515 = vmatprep.subr.mxu0 %v5579_v7  ;;  %4554 = vmatpush3.msra.mxu1 %v3877_v61 }
  0x99   : > { %4516 = vmatpush3.msra.mxu0 %v5579_v7  ;;  %4555 = vmatprep.subr.mxu1 %v7279_v0 }
  0x9a   : > { %4517 = vmatprep.subr.mxu0 %v5588_v9  ;;  %4556 = vmatpush3.msra.mxu1 %v3876_v62 }
  0x9b   : > { %4518 = vmatpush3.msra.mxu0 %v5588_v9  ;;  %4557 = vmatprep.subr.mxu1 %v7279_v0 }
  0x9c   : > { %4519 = vmatprep.subr.mxu0 %v5597_v11  ;;  %4558 = vmatpush3.msra.mxu1 %v3875_v63  ;;  %v3860_v63 = vld [vmem:[%s7261_s7 + $0x1] ss:$0 sm:$0xff] }
  0x9d   : > { %4520 = vmatpush3.msra.mxu0 %v5597_v11  ;;  %4559 = vmatprep.subr.mxu1 %v7279_v0 }
  0x9e   : > { %4521 = vmatprep.subr.mxu0 %v5606_v13  ;;  %4560 = vmatpush3.msra.mxu1 %v3874_v2 }
  0x9f   : > { %4522 = vmatpush3.msra.mxu0 %v5606_v13  ;;  %4561 = vmatprep.subr.mxu1 %v7279_v0 }
  0xa0   : > { %4523 = vmatprep.subr.mxu0 %v5615_v15  ;;  %4562 = vmatpush3.msra.mxu1 %v3873_v4 }
  0xa1   : > { %4524 = vmatpush3.msra.mxu0 %v5615_v15  ;;  %4563 = vmatprep.subr.mxu1 %v7279_v0 }
  0xa2   : > { %4525 = vmatprep.subr.mxu0 %v5624_v17  ;;  %4564 = vmatpush3.msra.mxu1 %v3872_v6 }
  0xa3   : > { %4526 = vmatpush3.msra.mxu0 %v5624_v17  ;;  %4565 = vmatprep.subr.mxu1 %v7279_v0 }
  0xa4   : > { %4527 = vmatprep.subr.mxu0 %v5633_v19  ;;  %4566 = vmatpush3.msra.mxu1 %v3871_v8  ;;  %v1535_v8 = vld [vmem:[%s7264_s10 + $0x8] sm:$0xff] }
  0xa5   : > { %4528 = vmatpush3.msra.mxu0 %v5633_v19  ;;  %4567 = vmatprep.subr.mxu1 %v7279_v0 }
  0xa6   : > { %4529 = vmatprep.subr.mxu0 %v5642_v21  ;;  %4568 = vmatpush3.msra.mxu1 %v3870_v10 }
  0xa7   : > { %4530 = vmatpush3.msra.mxu0 %v5642_v21  ;;  %4569 = vmatprep.subr.mxu1 %v7279_v0 }
  0xa8   : > { %4531 = vmatprep.subr.mxu0 %v5651_v23  ;;  %4570 = vmatpush3.msra.mxu1 %v3869_v12 }
  0xa9   : > { %4532 = vmatpush3.msra.mxu0 %v5651_v23  ;;  %4571 = vmatprep.subr.mxu1 %v7279_v0 }
  0xaa   : > { %4533 = vmatprep.subr.mxu0 %v5660_v25  ;;  %4572 = vmatpush3.msra.mxu1 %v3868_v14 }
  0xab   : > { %4534 = vmatpush3.msra.mxu0 %v5660_v25  ;;  %4573 = vmatprep.subr.mxu1 %v7279_v0 }
  0xac   : > { %4535 = vmatprep.subr.mxu0 %v5669_v27  ;;  %4574 = vmatpush3.msra.mxu1 %v3867_v16 }
  0xad   : > { %4536 = vmatpush3.msra.mxu0 %v5669_v27  ;;  %4575 = vmatprep.subr.mxu1 %v7279_v0 }
  0xae   : > { %4537 = vmatprep.subr.mxu0 %v5678_v29  ;;  %4576 = vmatpush3.msra.mxu1 %v3866_v18  ;;  %v3941_v18 = vld [vmem:[%s7262_s8 + $0x50] sm:$0xff] }
  0xaf   : > { %4538 = vmatpush3.msra.mxu0 %v5678_v29  ;;  %4577 = vmatprep.subr.mxu1 %v7279_v0 }
  0xb0   : > { %4539 = vmatprep.subr.mxu0 %v5687_v31  ;;  %4578 = vmatpush3.msra.mxu1 %v3865_v20  ;;  %v3961_v20 = vld [vmem:[%s7262_s8 + $0x70] sm:$0xff] }
  0xb1   : > { %4579 = vmatprep.mubr.msk.f32.mxu1 %vm5324_vm0, %v7279_v0  ;;  %4540 = vmatpush3.msra.mxu0 %v5687_v31 }
  0xb2   : > { %4541 = vmatprep.mubr.f32.mxu0 %v3861_v22  ;;  %4580 = vmatmul.mubr.f32.vlgmr.msra.gmra.mxu1 %v5694_v33 }
  0xb3   : > { %4620 = vmatprep.subr.mxu1 %v7279_v0  ;;  %4542 = vmatmul.mubr.f32.vlgmr.msra.gmra.mxu0 %v3862_v24 }
  0xb4   : > { %4582 = vmatprep.subr.mxu0 %v5555_v1  ;;  %4621 = vmatpush3.msra.mxu1 %v3901_v26  ;;  %v3940_v26 = vld [vmem:[%s7262_s8 + $0x48] sm:$0xff] }
  0xb5   : > { %4583 = vmatpush3.msra.mxu0 %v5555_v1  ;;  %4622 = vmatprep.subr.mxu1 %v7279_v0  ;;  %v3898_v1 = vld [vmem:[%s7260_s6 + $0x1e0] sm:$0xff] }
  0xb6   : > { %4584 = vmatprep.subr.mxu0 %v5561_v3  ;;  %4623 = vmatpush3.msra.mxu1 %v3900_v28 }
  0xb7   : > { %4544 = vmatprep.mubr.f32.mxu0 %v3863_v30  ;;  %4585 = vmatpush3.msra.mxu0 %v5561_v3  ;;  %v3897_v3 = vld [vmem:[%s7260_s6 + $0x1d8] sm:$0xff]  ;;  %v3960_v30 = vld [vmem:[%s7262_s8 + $0x68] sm:$0xff] }
  0xb8   : > { %4624 = vmatprep.subr.mxu1 %v7279_v0  ;;  %4545 = vmatmul.mubr.f32.gmra.mxu0 %v3864_v32  ;;  %v3939_v32 = vld [vmem:[%s7262_s8 + $0x40] sm:$0xff] }
  0xb9   : > { %4586 = vmatprep.subr.mxu0 %v5570_v5  ;;  %4625 = vmatpush3.msra.mxu1 %v3899_v34 }
  0xba   : > { %4587 = vmatpush3.msra.mxu0 %v5570_v5  ;;  %4626 = vmatprep.subr.mxu1 %v7279_v0  ;;  %v3895_v5 = vld [vmem:[%s7260_s6 + $0x1c8] sm:$0xff] }
  0xbb   : > { %4588 = vmatprep.subr.mxu0 %v5579_v7  ;;  %4627 = vmatpush3.msra.mxu1 %v3898_v1 }
  0xbc   : > { %4589 = vmatpush3.msra.mxu0 %v5579_v7  ;;  %4628 = vmatprep.subr.mxu1 %v7279_v0  ;;  %v3894_v7 = vld [vmem:[%s7260_s6 + $0x1c0] sm:$0xff] }
  0xbd   : > { %4590 = vmatprep.subr.mxu0 %v5588_v9  ;;  %4629 = vmatpush3.msra.mxu1 %v3897_v3 }
  0xbe   : > { %4591 = vmatpush3.msra.mxu0 %v5588_v9  ;;  %4630 = vmatprep.subr.mxu1 %v7279_v0  ;;  %v3893_v9 = vld [vmem:[%s7260_s6 + $0x1b8] sm:$0xff] }
  0xbf   : > { %4592 = vmatprep.subr.mxu0 %v5597_v11  ;;  %4631 = vmatpush3.msra.mxu1 %v3896_v35  ;;  %v3959_v35 = vld [vmem:[%s7262_s8 + $0x60] sm:$0xff] }
  0xc0   : > { %4593 = vmatpush3.msra.mxu0 %v5597_v11  ;;  %4632 = vmatprep.subr.mxu1 %v7279_v0  ;;  %v3892_v11 = vld [vmem:[%s7260_s6 + $0x1b0] sm:$0xff] }
  0xc1   : > { %4594 = vmatprep.subr.mxu0 %v5606_v13  ;;  %4633 = vmatpush3.msra.mxu1 %v3895_v5 }
  0xc2   : > { %4595 = vmatpush3.msra.mxu0 %v5606_v13  ;;  %4634 = vmatprep.subr.mxu1 %v7279_v0  ;;  %v3891_v13 = vld [vmem:[%s7260_s6 + $0x1a8] sm:$0xff] }
  0xc3   : > { %4596 = vmatprep.subr.mxu0 %v5615_v15  ;;  %4635 = vmatpush3.msra.mxu1 %v3894_v7 }
  0xc4   : > { %4597 = vmatpush3.msra.mxu0 %v5615_v15  ;;  %4636 = vmatprep.subr.mxu1 %v7279_v0  ;;  %v3890_v15 = vld [vmem:[%s7260_s6 + $0x1a0] sm:$0xff] }
  0xc5   : > { %4598 = vmatprep.subr.mxu0 %v5624_v17  ;;  %4637 = vmatpush3.msra.mxu1 %v3893_v9 }
  0xc6   : > { %4599 = vmatpush3.msra.mxu0 %v5624_v17  ;;  %4638 = vmatprep.subr.mxu1 %v7279_v0  ;;  %v3889_v17 = vld [vmem:[%s7260_s6 + $0x198] sm:$0xff] }
  0xc7   : > { %4600 = vmatprep.subr.mxu0 %v5633_v19  ;;  %4639 = vmatpush3.msra.mxu1 %v3892_v11 }
  0xc8   : > { %4601 = vmatpush3.msra.mxu0 %v5633_v19  ;;  %4640 = vmatprep.subr.mxu1 %v7279_v0  ;;  %v6013_v19 = vld [vmem:[%s7259_s5 + $0x18] sm:$0xff] }
  0xc9   : > { %4602 = vmatprep.subr.mxu0 %v5642_v21  ;;  %4641 = vmatpush3.msra.mxu1 %v3891_v13 }
  0xca   : > { %4603 = vmatpush3.msra.mxu0 %v5642_v21  ;;  %4642 = vmatprep.subr.mxu1 %v7279_v0  ;;  %v3888_v21 = vld [vmem:[%s7260_s6 + $0x190] sm:$0xff] }
  0xcb   : > { %4604 = vmatprep.subr.mxu0 %v5651_v23  ;;  %4643 = vmatpush3.msra.mxu1 %v3890_v15 }
  0xcc   : > { %4605 = vmatpush3.msra.mxu0 %v5651_v23  ;;  %4644 = vmatprep.subr.mxu1 %v7279_v0  ;;  %v3887_v23 = vld [vmem:[%s7260_s6 + $0x188] sm:$0xff] }
  0xcd   : > { %5087 = vset.pattern.permute.xlu0 %v5325_v36  ;;  %4606 = vmatprep.subr.mxu0 %v5660_v25 }
  0xce   : > { %4645 = vmatpush3.msra.mxu1 %v3889_v17  ;;  %828 = vperm.xlu0 %5087, %v6013_v19  }
  0xcf   : > { %4607 = vmatpush3.msra.mxu0 %v5660_v25  ;;  %4646 = vmatprep.subr.mxu1 %v7279_v0  ;;  %v3886_v25 = vld [vmem:[%s7260_s6 + $0x180] sm:$0xff] }
  0xd0   : > { %4608 = vmatprep.subr.mxu0 %v5669_v27  ;;  %4647 = vmatpush3.msra.mxu1 %v3888_v21 }
  0xd1   : > { %4609 = vmatpush3.msra.mxu0 %v5669_v27  ;;  %4648 = vmatprep.subr.mxu1 %v7279_v0  ;;  %v3882_v27 = vld [vmem:[%s7258_s4 + $0x60] sm:$0xff] }
  0xd2   : > { %4610 = vmatprep.subr.mxu0 %v5678_v29  ;;  %4649 = vmatpush3.msra.mxu1 %v3887_v23  ;;  %v1536_v23 = vld [vmem:[%s7264_s10 + $0x10] sm:$0xff] }
  0xd3   : > { %5088 = vset.pattern.permute.xlu0 %v5326_v37  ;;  %4611 = vmatpush3.msra.mxu0 %v5678_v29  ;;  %v3884_v29 = vld [vmem:[%s7258_s4 + $0x70] sm:$0xff] }
  0xd4   : > { %4650 = vmatprep.subr.mxu1 %v7279_v0  ;;  %1026 = vperm.xlu0 %5088, %v6013_v19  }
  0xd5   : > { %4612 = vmatprep.subr.mxu0 %v5687_v31  ;;  %4651 = vmatpush3.msra.mxu1 %v3886_v25 }
  0xd6   : > { %4652 = vmatprep.mubr.msk.f32.mxu1 %vm5324_vm0, %v7279_v0  ;;  %4613 = vmatpush3.msra.mxu0 %v5687_v31  ;;  %v3885_v31 = vld [vmem:[%s7258_s4 + $0x78] sm:$0xff] }
  0xd7   : > { %4614 = vmatprep.mubr.f32.mxu0 %v3882_v27  ;;  %4653 = vmatmul.mubr.f32.vlgmr.msra.gmra.mxu1 %v5694_v33  ;;  %v610_v33 = vld [vmem:[%s7259_s5] sm:$0xff] }
  0xd8   : > { %4615 = vmatmul.mubr.f32.vlgmr.msra.gmra.mxu0 %v3883_v38  ;;  %5092 = vset.pattern.permute.xlu0 %v5325_v36 }
  0xd9   : > { %4617 = vmatprep.mubr.f32.mxu0 %v3884_v29  ;;  %820 = vperm.xlu0 %5092, %v611_v39  }
  0xda   : > { %5089 = vset.pattern.permute.xlu1 %v5325_v36  ;;  %4655 = vmatprep.subr.mxu0 %v1569_v41 }
  0xdb   : > { %824 = vperm.xlu1 %5089, %v612_v40   ;;  %4687 = vmatprep.subr.mxu1 %v3922_v42 }
  0xdc   : > { %4618 = vmatmul.mubr.f32.gmra.mxu0 %v3885_v31  ;;  %4688 = vmatpush3.msra.mxu1 %v3922_v42 }
  0xdd   : > { %4656 = vmatpush3.msra.mxu0 %v1569_v41  ;;  %816 = vperm.xlu0 %5092, %v610_v33  }
  0xde   : > { %4657 = vmatprep.subr.mxu0 %v1568_v43  ;;  %4689 = vmatprep.subr.mxu1 %v3921_v44 }
  0xdf   : > { %5090 = vset.pattern.permute.xlu1 %v5327_v46  ;;  %4658 = vmatpush3.msra.mxu0 %v1568_v43 }
  0xe0   : > { %1224 = vperm.xlu1 %5090, %v6013_v19   ;;  %4690 = vmatpush3.msra.mxu1 %v3921_v44 }
  0xe1   : > { %4659 = vmatprep.subr.mxu0 %v1567_v45  ;;  %5096 = vset.pattern.permute.xlu0 %v5326_v37 }
  0xe2   : > { %4691 = vmatprep.subr.mxu1 %v3920_v47  ;;  %1014 = vperm.xlu0 %5096, %v610_v33  }
  0xe3   : > { %4660 = vmatpush3.msra.mxu0 %v1567_v45  ;;  %4692 = vmatpush3.msra.mxu1 %v3920_v47  ;;  %v1537_v45 = vld [vmem:[%s7264_s10 + $0x18] sm:$0xff]  ;;  %v1538_v47 = vld [vmem:[%s7264_s10 + $0x20] sm:$0xff] }
  0xe4   : > { %5091 = vset.pattern.permute.xlu1 %v5326_v37  ;;  %4661 = vmatprep.subr.mxu0 %v1566_v48 }
  0xe5   : > { %1022 = vperm.xlu1 %5091, %v612_v40   ;;  %4693 = vmatprep.subr.mxu1 %v3919_v49 }
  0xe6   : > { %4662 = vmatpush3.msra.mxu0 %v1566_v48  ;;  %5098 = vset.pattern.permute.xlu0 %v5328_v50 }
  0xe7   : > { %4694 = vmatpush3.msra.mxu1 %v3919_v49  ;;  %626 = vperm.xlu0 %5098, %v612_v40  }
  0xe8   : > { %4719 = vmatprep.subr.mxu0 %v3942_v51  ;;  %4751 = vmatprep.subr.mxu1 %v3962_v58 }
  0xe9   : > { %5093 = vset.pattern.permute.xlu1 %v5327_v46 }
  0xea   : > { %1220 = vperm.xlu1 %5093, %v612_v40  }
  0xeb   : > { %5099 = vset.pattern.permute.xlu0 %v5327_v46 }
  0xee   : > { %5094 = vset.pattern.permute.xlu1 %v5326_v37 }
  0xef   : > { %1018 = vperm.xlu1 %5094, %v611_v39  }
  0xf3   : > { %5095 = vset.pattern.permute.xlu1 %v5327_v46 }
  0xf4   : > { %1216 = vperm.xlu1 %5095, %v611_v39  }
  0xf8   : > { %1212 = vperm.xlu1 %5095, %v610_v33  }
  0xfc   : > { %5097 = vset.pattern.permute.xlu1 %v5328_v50 }
  0xfd   : > { %631 = vperm.xlu1 %5097, %v6013_v19   ;;  %v3881_v19 = vld [vmem:[%s7261_s7 + $0x2] ss:$0 sm:$0xff] }
 0x101   : > { %621 = vperm.xlu1 %5097, %v611_v39  }
 0x105   : > { %616 = vperm.xlu1 %5097, %v610_v33   ;;  %v3902_v33 = vld [vmem:[%s7261_s7 + $0x3] ss:$0 sm:$0xff] }
 0x129   : > { %v806_v53 = vpop.f32.mrf.mxu1 }
 0x12a   : > { %v6101_v55 = vadd.f32 %v3839_v52, %v806_v53 }
 0x12b   : > { %v4435_v56 = vpop.f32.mrf.mxu1 }
 0x12c   : > { %v6104_v57 = vmul.f32 %v1534_v54, %v6101_v55  ;;  %v6192_v53 = vmul.f32 %v1538_v47, %v6101_v55  ;;  %v1539_v54 = vld [vmem:[%s7264_s10 + $0x28] sm:$0xff] }
 0x12e   : > { %4663 = vmatprep.mubr.msk.f32.mxu0 %vm1507_vm1, %v6104_v57  ;;  %4695 = vmatprep.mubr.msk.f32.mxu1 %vm1507_vm1, %v6104_v57 }
 0x12f   : > { %v6113_v59 = vpop.f32.mrf.mxu0 }
 0x131   : > { %v6115_v60 = vpop.f32.mrf.mxu0 }
 0x149   : > { %v829_v61 = vpop.permute.xlu0 %828 }
 0x14b   : > { %v6117_v62 = vpop.f32.mrf.mxu0 }
 0x14d   : > { %v6122_v2 = vpop.f32.mrf.mxu0 }
 0x14f   : > { %v6124_v4 = vpop.permute.xlu0 %1026  ;;  %v1004_v6 = vpop.f32.mrf.mxu1 }
 0x150   : > { %v6129_v10 = vadd.f32 %v3860_v63, %v1004_v6  ;;  %v4470_v16 = vpop.f32.mrf.mxu0 }
 0x151   : > { %v4508_v12 = vpop.f32.mrf.mxu1 }
 0x152   : > { %v6132_v14 = vmul.f32 %v1535_v8, %v6129_v10  ;;  %v897_v28 = vpop.f32.mrf.mxu0  ;;  %v6209_v6 = vmul.f32 %v1539_v54, %v6129_v10 }
 0x154   : > { %v821_v22 = vpop.permute.xlu0 %820  ;;  %4664 = vmatmul.mubr.msk.f32.vlgmr.msra.gmra.mxu0 %vm1507_vm1, %v6132_v14  ;;  %4696 = vmatmul.mubr.msk.f32.vlgmr.msra.gmra.mxu1 %vm1507_vm1, %v6132_v14 }
 0x155   : > { %v903_v24 = vadd.f32 %v4470_v16, %v821_v22  ;;  %4720 = vmatpush3.msra.mxu0 %v3942_v51  ;;  %4752 = vmatpush3.msra.mxu1 %v3962_v58  ;;  %v1540_v58 = vld [vmem:[%s7264_s10 + $0x30] sm:$0xff]  ;;  %v1541_v16 = vld [vmem:[%s7264_s10 + $0x38] sm:$0xff] }
 0x156   : > { %4721 = vmatprep.subr.mxu0 %v3941_v18  ;;  %4753 = vmatprep.subr.mxu1 %v3961_v20  ;;  %v825_v7 = vpop.permute.xlu1 %824 }
 0x157   : > { %1410 = vrot.lane.b32.xlu1 %v903_v24, %s5329_s24  ;;  %4722 = vmatpush3.msra.mxu0 %v3941_v18  ;;  %v4473_v1 = vpop.f32.mrf.mxu0  ;;  %v1542_v18 = vld [vmem:[%s7264_s10 + $0x40] sm:$0xff] }
 0x158   : > { %v817_v34 = vpop.permute.xlu0 %816  ;;  %4723 = vmatprep.subr.mxu0 %v3940_v26  ;;  %4754 = vmatpush3.msra.mxu1 %v3961_v20  ;;  %v913_v5 = vadd.f32 %v4473_v1, %v829_v61 }
 0x159   : > { %v898_v3 = vadd.f32 %v897_v28, %v817_v34  ;;  %4724 = vmatpush3.msra.mxu0 %v3940_v26  ;;  %4755 = vmatprep.subr.mxu1 %v3960_v30  ;;  %v907_v9 = vpop.f32.mrf.mxu0  ;;  %v6232_v28 = vmul.f32 %v1542_v18, %v6101_v55 }
 0x15a   : > { %4725 = vmatprep.subr.mxu0 %v3939_v32  ;;  %4756 = vmatpush3.msra.mxu1 %v3960_v30  ;;  %v908_v11 = vadd.f32 %v907_v9, %v825_v7  ;;  %v1543_v30 = vld [vmem:[%s7264_s10 + $0x48] sm:$0xff] }
 0x15b   : > { %1408 = vrot.lane.b32.xlu0 %v898_v3, %s5329_s24  ;;  %4726 = vmatpush3.msra.mxu0 %v3939_v32  ;;  %v1225_v13 = vpop.permute.xlu1 %1224  ;;  %v1544_v32 = vld [vmem:[%s7264_s10 + $0x50] sm:$0xff]  ;;  %v6250_v34 = vmul.f32 %v1543_v30, %v6129_v10  ;;  %v1545_v3 = vld [vmem:[%s7264_s10 + $0x58] sm:$0xff]  ;;  %v1547_v9 = vld [vmem:[%s7264_s10 + $0x68] sm:$0xff] }
 0x15c   : > { %4757 = vmatprep.subr.mxu1 %v3959_v35  ;;  %4783 = vmatprep.subr.mxu0 %v7279_v0 }
 0x15d   : > { %4758 = vmatpush3.msra.mxu1 %v3959_v35  ;;  %v1015_v12 = vpop.permute.xlu0 %1014  ;;  %v1546_v35 = vld [vmem:[%s7264_s10 + $0x60] sm:$0xff] }
 0x15e   : > { %4818 = vmatprep.subr.mxu1 %v7279_v0  ;;  %v6273_v7 = vmul.f32 %v1546_v35, %v6101_v55  ;;  %v6290_v55 = vmul.f32 %v1547_v9, %v6129_v10 }
 0x15f   : > { %1414 = vrot.lane.b32.xlu0 %v913_v5, %s5329_s24 }
 0x160   : > { %v1023_v15 = vpop.permute.xlu1 %1022 }
 0x163   : > { %1412 = vrot.lane.b32.xlu0 %v908_v11, %s5329_s24  ;;  %v1548_v11 = vld [vmem:[%s7264_s10 + $0x70] sm:$0xff]  ;;  %s5334_s24 = smov 96  }
 0x165   : > { %v1221_v17 = vpop.permute.xlu1 %1220 }
 0x16a   : > { %v1019_v36 = vpop.permute.xlu1 %1018 }
 0x16f   : > { %v1217_v51 = vpop.permute.xlu1 %1216 }
 0x172   : > { %v1202_v21 = vpop.f32.mrf.mxu1 }
 0x173   : > { %v6164_v37 = vadd.f32 %v3881_v19, %v1202_v21  ;;  %v4543_v25 = vpop.f32.mrf.mxu0  ;;  %v1213_v20 = vpop.permute.xlu1 %1212  ;;  %v2295_v19 = vld [vmem:[%s7257_s3 + $0x70] sm:$0xff] }
 0x174   : > { %v1101_v27 = vadd.f32 %v4543_v25, %v1019_v36  ;;  %v4581_v38 = vpop.f32.mrf.mxu1  ;;  %v2292_v36 = vld [vmem:[%s7257_s3 + $0x58] sm:$0xff]  ;;  %v2291_v21 = vld [vmem:[%s7257_s3 + $0x50] sm:$0xff] }
 0x175   : > { %v1095_v29 = vpop.f32.mrf.mxu0  ;;  %v6167_v39 = vmul.f32 %v1536_v23, %v6164_v37  ;;  %v6212_v8 = vmul.f32 %v1540_v58, %v6164_v37  ;;  %v6253_v1 = vmul.f32 %v1544_v32, %v6164_v37  ;;  %v2290_v23 = vld [vmem:[%s7257_s3 + $0x48] sm:$0xff]  ;;  %v2288_v25 = vld [vmem:[%s7257_s3 + $0x38] sm:$0xff] }
 0x176   : > { %1426 = vrot.lane.b32.xlu1 %v1101_v27, %s5330_s28  ;;  %v1096_v24 = vadd.f32 %v1095_v29, %v1015_v12  ;;  %v2287_v27 = vld [vmem:[%s7257_s3 + $0x30] sm:$0xff]  ;;  %v2286_v38 = vld [vmem:[%s7257_s3 + $0x28] sm:$0xff]  ;;  %v2285_v29 = vld [vmem:[%s7257_s3 + $0x20] sm:$0xff] }
 0x177   : > { %4666 = vmatprep.mubr.msk.f32.mxu0 %vm1507_vm1, %v6167_v39  ;;  %4698 = vmatprep.mubr.msk.f32.mxu1 %vm1507_vm1, %v6167_v39 }
 0x178   : > { %v4546_v40 = vpop.f32.mrf.mxu0 }
 0x179   : > { %v1111_v41 = vadd.f32 %v4546_v40, %v6124_v4  ;;  %v2283_v40 = vld [vmem:[%s7257_s3 + $0x10] sm:$0xff] }
 0x17a   : > { %v1105_v31 = vpop.f32.mrf.mxu0 }
 0x17b   : > { %v1106_v42 = vadd.f32 %v1105_v31, %v1023_v15  ;;  %1430 = vrot.lane.b32.xlu1 %v1111_v41, %s5330_s28  ;;  %v1549_v15 = vld [vmem:[%s7264_s10 + $0x78] sm:$0xff]  ;;  %v2282_v41 = vld [vmem:[%s7257_s3 + $0x8] sm:$0xff]  ;;  %v2281_v31 = vld [vmem:[%s7257_s3] sm:$0xff] }
 0x17d   : > { %1428 = vrot.lane.b32.xlu0 %v1106_v42, %s5330_s28 }
 0x197   : > { %v1400_v43 = vpop.f32.mrf.mxu1 }
 0x198   : > { %v4616_v44 = vpop.f32.mrf.mxu0  ;;  %v6183_v46 = vadd.f32 %v3902_v33, %v1400_v43  ;;  %v632_v33 = vpop.permute.xlu1 %631 }
 0x199   : > { %v4654_v48 = vpop.f32.mrf.mxu1  ;;  %v1299_v63 = vadd.f32 %v4616_v44, %v1217_v51  ;;  %v627_v44 = vpop.permute.xlu0 %626 }
 0x19a   : > { %v1293_v49 = vpop.f32.mrf.mxu0  ;;  %v6189_v50 = vmul.f32 %v1537_v45, %v6183_v46  ;;  %v6229_v26 = vmul.f32 %v1541_v16, %v6183_v46  ;;  %v6270_v5 = vmul.f32 %v1545_v3, %v6183_v46  ;;  %v6307_v10 = vmul.f32 %v1549_v15, %v6183_v46 }
 0x19b   : > { %v1294_v22 = vadd.f32 %v1293_v49, %v1213_v20  ;;  %v716_v16 = vadd.f32 %v6117_v62, %v632_v33  ;;  %v711_v62 = vadd.f32 %v6122_v2, %v627_v44 }
 0x19c   : > { %v4619_v52 = vpop.f32.mrf.mxu0  ;;  %4667 = vmatmul.mubr.msk.f32.gmra.mxu0 %vm1507_vm1, %v6189_v50  ;;  %4699 = vmatmul.mubr.msk.f32.gmra.mxu1 %vm1507_vm1, %v6189_v50  ;;  %v622_v43 = vpop.permute.xlu1 %621 }
 0x19d   : > { %v1309_v56 = vadd.f32 %v4619_v52, %v1225_v13  ;;  %4669 = vmatprep.mubr.msk.f32.mxu0 %vm1507_vm1, %v6192_v53  ;;  %4701 = vmatprep.mubr.msk.f32.mxu1 %vm1507_vm1, %v6192_v53  ;;  %v6293_v13 = vmul.f32 %v1548_v11, %v6164_v37  ;;  %v2289_v37 = vld [vmem:[%s7257_s3 + $0x40] sm:$0xff]  ;;  %v706_v54 = vadd.f32 %v6113_v59, %v622_v43 }
 0x19e   : > { %v1303_v61 = vpop.f32.mrf.mxu0 }
 0x19f   : > { %v1304_v4 = vadd.f32 %v1303_v61, %v1221_v17  ;;  %1446 = vrot.lane.b32.xlu1 %v1309_v56, %s5331_s14  ;;  %v2296_v17 = vld [vmem:[%s7257_s3 + $0x78] sm:$0xff] }
 0x1a0   : > { %4670 = vmatmul.mubr.msk.f32.gmra.mxu0 %vm1507_vm1, %v6209_v6  ;;  %4702 = vmatmul.mubr.msk.f32.gmra.mxu1 %vm1507_vm1, %v6209_v6  ;;  %v617_v45 = vpop.permute.xlu1 %616 }
 0x1a1   : > { %4672 = vmatprep.mubr.msk.f32.mxu0 %vm1507_vm1, %v6212_v8  ;;  %4704 = vmatprep.mubr.msk.f32.mxu1 %vm1507_vm1, %v6212_v8 }
 0x1a2   : > { %1444 = vrot.lane.b32.xlu0 %v1304_v4, %s5331_s14 }
 0x1a3   : > { %1442 = vrot.lane.b32.xlu1 %v1299_v63, %s5331_s14 }
 0x1a4   : > { %4673 = vmatmul.mubr.msk.f32.gmra.mxu0 %vm1507_vm1, %v6229_v26  ;;  %4705 = vmatmul.mubr.msk.f32.gmra.mxu1 %vm1507_vm1, %v6229_v26 }
 0x1a5   : > { %4675 = vmatprep.mubr.msk.f32.mxu0 %vm1507_vm1, %v6232_v28  ;;  %4707 = vmatprep.mubr.msk.f32.mxu1 %vm1507_vm1, %v6232_v28 }
 0x1a6   : > { %1424 = vrot.lane.b32.xlu0 %v1096_v24, %s5330_s28  ;;  %s6435_s28 = scalar_lea.vmem %s7305_s12, %s3836_s22  ;;  %s7314_s12 = sld [smem:[#allocation24_spill]] }
 0x1a7   : > { %1440 = vrot.lane.b32.xlu1 %v1294_v22, %s5331_s14  ;;  %v2280_v42 = vld [vmem:[%s6435_s28] sm:$0xff]  ;;  %s7315_s22 = sld [smem:[#allocation23_spill]] }
 0x1a8   : > { %4676 = vmatmul.mubr.msk.f32.gmra.mxu0 %vm1507_vm1, %v6250_v34  ;;  %4708 = vmatmul.mubr.msk.f32.gmra.mxu1 %vm1507_vm1, %v6250_v34  ;;  %s7318_s14 = sld [smem:[#allocation25_spill]] }
 0x1a9   : > { %4678 = vmatprep.mubr.msk.f32.mxu0 %vm1507_vm1, %v6253_v1  ;;  %4710 = vmatprep.mubr.msk.f32.mxu1 %vm1507_vm1, %v6253_v1 }
 0x1ac   : > { %4679 = vmatmul.mubr.msk.f32.gmra.mxu0 %vm1507_vm1, %v6270_v5  ;;  %4711 = vmatmul.mubr.msk.f32.gmra.mxu1 %vm1507_vm1, %v6270_v5 }
 0x1ad   : > { %4681 = vmatprep.mubr.msk.f32.mxu0 %vm1507_vm1, %v6273_v7  ;;  %4713 = vmatprep.mubr.msk.f32.mxu1 %vm1507_vm1, %v6273_v7 }
 0x1b0   : > { %4682 = vmatmul.mubr.msk.f32.gmra.mxu0 %vm1507_vm1, %v6290_v55  ;;  %4714 = vmatmul.mubr.msk.f32.gmra.mxu1 %vm1507_vm1, %v6290_v55 }
 0x1b1   : > { %4684 = vmatprep.mubr.msk.f32.mxu0 %vm1507_vm1, %v6293_v13  ;;  %4716 = vmatprep.mubr.msk.f32.mxu1 %vm1507_vm1, %v6293_v13 }
 0x1b4   : > { %4685 = vmatmul.mubr.msk.f32.gmra.mxu0 %vm1507_vm1, %v6307_v10  ;;  %4717 = vmatmul.mubr.msk.f32.gmra.mxu1 %vm1507_vm1, %v6307_v10 }
 0x1b5   : > { %4727 = vmatprep.mubr.msk.f32.mxu0 %vm1507_vm1, %v6104_v57  ;;  %4759 = vmatprep.mubr.msk.f32.mxu1 %vm1507_vm1, %v6104_v57  ;;  %v2294_v57 = vld [vmem:[%s7257_s3 + $0x68] sm:$0xff] }
 0x1b8   : > { %4728 = vmatmul.mubr.msk.f32.vlgmr.msra.gmra.mxu0 %vm1507_vm1, %v6132_v14  ;;  %4760 = vmatmul.mubr.msk.f32.vlgmr.msra.gmra.mxu1 %vm1507_vm1, %v6132_v14  ;;  %v2293_v14 = vld [vmem:[%s7257_s3 + $0x60] sm:$0xff] }
 0x1b9   : > { %4784 = vmatpush3.msra.mxu0 %v2296_v17  ;;  %4730 = vmatprep.mubr.msk.f32.mxu0 %vm1507_vm1, %v6167_v39 }
 0x1ba   : > { %4762 = vmatprep.mubr.msk.f32.mxu1 %vm1507_vm1, %v6167_v39  ;;  %4785 = vmatprep.subr.mxu0 %v7279_v0  ;;  %v2284_v39 = vld [vmem:[%s7257_s3 + $0x18] sm:$0xff] }
 0x1bb   : > { %4786 = vmatpush3.msra.mxu0 %v2295_v19 }
 0x1bc   : > { %4787 = vmatprep.subr.mxu0 %v7279_v0  ;;  %4731 = vmatmul.mubr.msk.f32.gmra.mxu0 %vm1507_vm1, %v6189_v50 }
 0x1bd   : > { %4763 = vmatmul.mubr.msk.f32.gmra.mxu1 %vm1507_vm1, %v6189_v50  ;;  %4788 = vmatpush3.msra.mxu0 %v2294_v57 }
 0x1be   : > { %4733 = vmatprep.mubr.msk.f32.mxu0 %vm1507_vm1, %v6192_v53  ;;  %4765 = vmatprep.mubr.msk.f32.mxu1 %vm1507_vm1, %v6192_v53 }
 0x1bf   : > { %4789 = vmatprep.subr.mxu0 %v7279_v0 }
 0x1c0   : > { %4790 = vmatpush3.msra.mxu0 %v2293_v14 }
 0x1c1   : > { %4791 = vmatprep.subr.mxu0 %v7279_v0  ;;  %4734 = vmatmul.mubr.msk.f32.gmra.mxu0 %vm1507_vm1, %v6209_v6 }
 0x1c2   : > { %4766 = vmatmul.mubr.msk.f32.gmra.mxu1 %vm1507_vm1, %v6209_v6  ;;  %4792 = vmatpush3.msra.mxu0 %v2292_v36  ;;  %v701_v6 = vadd.f32 %v6115_v60, %v617_v45 }
 0x1c3   : > { %4736 = vmatprep.mubr.msk.f32.mxu0 %vm1507_vm1, %v6212_v8  ;;  %4768 = vmatprep.mubr.msk.f32.mxu1 %vm1507_vm1, %v6212_v8 }
 0x1c4   : > { %4793 = vmatprep.subr.mxu0 %v7279_v0 }
 0x1c5   : > { %4794 = vmatpush3.msra.mxu0 %v2291_v21 }
 0x1c6   : > { %4795 = vmatprep.subr.mxu0 %v7279_v0  ;;  %4737 = vmatmul.mubr.msk.f32.gmra.mxu0 %vm1507_vm1, %v6229_v26 }
 0x1c7   : > { %4769 = vmatmul.mubr.msk.f32.gmra.mxu1 %vm1507_vm1, %v6229_v26  ;;  %4796 = vmatpush3.msra.mxu0 %v2290_v23 }
 0x1c8   : > { %4739 = vmatprep.mubr.msk.f32.mxu0 %vm1507_vm1, %v6232_v28  ;;  %4771 = vmatprep.mubr.msk.f32.mxu1 %vm1507_vm1, %v6232_v28 }
 0x1c9   : > { %4797 = vmatprep.subr.mxu0 %v7279_v0  ;;  %v1411_v47 = vpop.permute.xlu1 %1410 }
 0x1ca   : > { %4798 = vmatpush3.msra.mxu0 %v2289_v37  ;;  %v1454_v56 = vsel %vm1452_vm2, %v706_v54, %v1411_v47 }
 0x1cb   : > { %4799 = vmatprep.subr.mxu0 %v7279_v0  ;;  %4740 = vmatmul.mubr.msk.f32.gmra.mxu0 %vm1507_vm1, %v6250_v34 }
 0x1cc   : > { %4772 = vmatmul.mubr.msk.f32.gmra.mxu1 %vm1507_vm1, %v6250_v34  ;;  %4800 = vmatpush3.msra.mxu0 %v2288_v25 }
 0x1cd   : > { %4742 = vmatprep.mubr.msk.f32.mxu0 %vm1507_vm1, %v6253_v1  ;;  %4774 = vmatprep.mubr.msk.f32.mxu1 %vm1507_vm1, %v6253_v1  ;;  %v1409_v46 = vpop.permute.xlu0 %1408 }
 0x1ce   : > { %4801 = vmatprep.subr.mxu0 %v7279_v0  ;;  %v1453_v8 = vsel %vm1452_vm2, %v701_v6, %v1409_v46 }
 0x1cf   : > { %4802 = vmatpush3.msra.mxu0 %v2287_v27 }
 0x1d0   : > { %4803 = vmatprep.subr.mxu0 %v7279_v0  ;;  %4743 = vmatmul.mubr.msk.f32.gmra.mxu0 %vm1507_vm1, %v6270_v5 }
 0x1d1   : > { %4775 = vmatmul.mubr.msk.f32.gmra.mxu1 %vm1507_vm1, %v6270_v5  ;;  %4804 = vmatpush3.msra.mxu0 %v2286_v38  ;;  %v1415_v48 = vpop.permute.xlu0 %1414 }
 0x1d2   : > { %4745 = vmatprep.mubr.msk.f32.mxu0 %vm1507_vm1, %v6273_v7  ;;  %4777 = vmatprep.mubr.msk.f32.mxu1 %vm1507_vm1, %v6273_v7  ;;  %v1456_v60 = vsel %vm1452_vm2, %v716_v16, %v1415_v48 }
 0x1d3   : > { %4805 = vmatprep.subr.mxu0 %v7279_v0 }
 0x1d4   : > { %4806 = vmatpush3.msra.mxu0 %v2285_v29 }
 0x1d5   : > { %4807 = vmatprep.subr.mxu0 %v7279_v0  ;;  %4746 = vmatmul.mubr.msk.f32.gmra.mxu0 %vm1507_vm1, %v6290_v55  ;;  %v1413_v50 = vpop.permute.xlu0 %1412 }
 0x1d6   : > { %4778 = vmatmul.mubr.msk.f32.gmra.mxu1 %vm1507_vm1, %v6290_v55  ;;  %4808 = vmatpush3.msra.mxu0 %v2284_v39  ;;  %v1455_v26 = vsel %vm1452_vm2, %v711_v62, %v1413_v50 }
 0x1d7   : > { %4748 = vmatprep.mubr.msk.f32.mxu0 %vm1507_vm1, %v6293_v13  ;;  %4780 = vmatprep.mubr.msk.f32.mxu1 %vm1507_vm1, %v6293_v13 }
 0x1d8   : > { %4809 = vmatprep.subr.mxu0 %v7279_v0 }
 0x1d9   : > { %4810 = vmatpush3.msra.mxu0 %v2283_v40 }
 0x1da   : > { %4811 = vmatprep.subr.mxu0 %v7279_v0  ;;  %4749 = vmatmul.mubr.msk.f32.gmra.mxu0 %vm1507_vm1, %v6307_v10 }
 0x1db   : > { %4781 = vmatmul.mubr.msk.f32.gmra.mxu1 %vm1507_vm1, %v6307_v10  ;;  %4812 = vmatpush3.msra.mxu0 %v2282_v41 }
 0x1dc   : > { %4813 = vmatprep.subr.mxu0 %v7279_v0  ;;  %4815 = vmatprep.mubr.msk.f32.mxu0 %vm5324_vm0, %v7279_v0 }
 0x1dd   : > { %4814 = vmatpush3.msra.mxu0 %v2281_v31  ;;  %4826 = vmatprep.mubr.msk.f32.mxu1 %vm5324_vm0, %v7279_v0 }
 0x1de   : > { %4816 = vmatmul.mubr.f32.vlgmr.msra.gmra.mxu0 %v2280_v42  ;;  %4829 = vmatprep.subr.mxu0 %v7279_v0 }
 0x1df   : > { %4837 = vmatprep.mubr.msk.f32.mxu0 %vm5324_vm0, %v7279_v0 }
 0x1e8   : > { %v1427_v49 = vpop.permute.xlu1 %1426 }
 0x1e9   : > { %v1459_v58 = vsel %vm1457_vm3, %v1454_v56, %v1427_v49  ;;  %v1525_v56 = vld [vmem:[%s7308_s18 + $0x18] sm:$0xff]  ;;  %s7316_s18 = smov 32  }
 0x1ed   : > { %v1431_v51 = vpop.permute.xlu1 %1430 }
 0x1ee   : > { %v1461_v22 = vsel %vm1457_vm3, %v1456_v60, %v1431_v51 }
 0x1ef   : > { %v1429_v52 = vpop.permute.xlu0 %1428 }
 0x1f0   : > { %v1460_v28 = vsel %vm1457_vm3, %v1455_v26, %v1429_v52 }
 0x211   : > { %v1447_v53 = vpop.permute.xlu1 %1446 }
 0x212   : > { %v1466_v24 = vsel %vm1462_vm4, %v1461_v22, %v1447_v53 }
 0x214   : > { %v1445_v61 = vpop.permute.xlu0 %1444  ;;  %v6497_v2 = vpop.f32.mrf.mxu0 }
 0x215   : > { %v1443_v63 = vpop.permute.xlu1 %1442  ;;  %v6482_v30 = vsel %vm1462_vm4, %v1460_v28, %v1445_v61  ;;  %v6519_v13 = vpop.f32.mrf.mxu1 }
 0x216   : > { %v6458_v4 = vsel %vm1462_vm4, %v1459_v58, %v1443_v63  ;;  %v6499_v32 = vpop.f32.mrf.mxu0 }
 0x217   : > { %1473 = vrot.lane.b32.xlu1 %v6458_v4, %s7282_s26  ;;  %v6525_v17 = vpop.f32.mrf.mxu1 }
 0x218   : > { %v1425_v59 = vpop.permute.xlu0 %1424 }
 0x219   : > { %v1441_v12 = vpop.permute.xlu1 %1440  ;;  %v1458_v18 = vsel %vm1457_vm3, %v1453_v8, %v1425_v59 }
 0x21a   : > { %v6467_v20 = vsel %vm1462_vm4, %v1458_v18, %v1441_v12 }
 0x21b   : > { %1485 = vrot.lane.b32.xlu1 %v6458_v4, %s5333_s25  ;;  %1471 = vrot.lane.b32.xlu0 %v6467_v20, %s7282_s26 }
 0x21f   : > { %1489 = vrot.lane.b32.xlu1 %v1466_v24, %s5333_s25  ;;  %1477 = vrot.lane.b32.xlu0 %v1466_v24, %s7282_s26 }
 0x223   : > { %1501 = vrot.lane.b32.xlu1 %v1466_v24, %s5334_s24  ;;  %1475 = vrot.lane.b32.xlu0 %v6482_v30, %s7282_s26 }
 0x227   : > { %1497 = vrot.lane.b32.xlu1 %v6458_v4, %s5334_s24  ;;  %1487 = vrot.lane.b32.xlu0 %v6482_v30, %s5333_s25 }
 0x22b   : > { %1495 = vrot.lane.b32.xlu1 %v6467_v20, %s5334_s24  ;;  %1499 = vrot.lane.b32.xlu0 %v6482_v30, %s5334_s24 }
 0x22f   : > { %1483 = vrot.lane.b32.xlu0 %v6467_v20, %s5333_s25 }
 0x25c   : > { %v6501_v34 = vpop.f32.mrf.mxu0  ;;  %v6529_v57 = vpop.f32.mrf.mxu1 }
 0x25e   : > { %v6503_v1 = vpop.f32.mrf.mxu0  ;;  %v6535_v21 = vpop.f32.mrf.mxu1 }
 0x260   : > { %v6505_v3 = vpop.f32.mrf.mxu0  ;;  %v6541_v25 = vpop.f32.mrf.mxu1 }
 0x262   : > { %v6507_v35 = vpop.f32.mrf.mxu0  ;;  %v6547_v29 = vpop.f32.mrf.mxu1 }
 0x264   : > { %v6509_v5 = vpop.f32.mrf.mxu0  ;;  %v6551_v40 = vpop.f32.mrf.mxu1 }
 0x266   : > { %v6511_v7 = vpop.f32.mrf.mxu0  ;;  %v6557_v42 = vpop.f32.mrf.mxu1 }
 0x268   : > { %v6513_v9 = vpop.f32.mrf.mxu0  ;;  %v6561_v44 = vpop.f32.mrf.mxu1 }
 0x26a   : > { %v6515_v11 = vpop.f32.mrf.mxu0  ;;  %v6567_v49 = vpop.f32.mrf.mxu1 }
 0x26c   : > { %v6517_v55 = vpop.f32.mrf.mxu0  ;;  %v6577_v58 = vpop.f32.mrf.mxu1 }
 0x26e   : > { %v6521_v15 = vpop.f32.mrf.mxu0  ;;  %v1900_v18 = vpop.f32.mrf.mxu1 }
 0x270   : > { %v6523_v10 = vpop.f32.mrf.mxu0 }
 0x272   : > { %v6527_v19 = vpop.f32.mrf.mxu0 }
 0x274   : > { %v6531_v14 = vpop.f32.mrf.mxu0 }
 0x276   : > { %v6533_v36 = vpop.f32.mrf.mxu0 }
 0x278   : > { %v6537_v23 = vpop.f32.mrf.mxu0 }
 0x279   : > { %7306 = vst [vmem:[#allocation17_spill] sm:$0xff] %v6537_v23 }
 0x27a   : > { %v6539_v37 = vpop.f32.mrf.mxu0 }
 0x27b   : > { %7307 = vst [vmem:[#allocation18_spill] sm:$0xff] %v6539_v37 }
 0x27c   : > { %v6543_v27 = vpop.f32.mrf.mxu0 }
 0x27e   : > { %v6545_v38 = vpop.f32.mrf.mxu0 }
 0x281   : > { %v6549_v39 = vpop.f32.mrf.mxu0 }
 0x283   : > { %v6553_v41 = vpop.f32.mrf.mxu0 }
 0x286   : > { %v6555_v31 = vpop.f32.mrf.mxu0 }
 0x288   : > { %v6559_v33 = vpop.f32.mrf.mxu0 }
 0x289   : > { %v1474_v43 = vpop.permute.xlu1 %1473 }
 0x28a   : > { %v1509_v62 = vsel %vm1507_vm1, %v6458_v4, %v1474_v43  ;;  %v1523_v4 = vld [vmem:[%s7309_s27 + $0x8] sm:$0xff] }
 0x28b   : > { %v6563_v45 = vpop.f32.mrf.mxu0 }
 0x28d   : > { %v1486_v46 = vpop.permute.xlu1 %1485  ;;  %v6565_v47 = vpop.f32.mrf.mxu0 }
 0x28e   : > { %v1472_v48 = vpop.permute.xlu0 %1471 }
 0x290   : > { %v6569_v50 = vpop.f32.mrf.mxu0 }
 0x291   : > { %v1490_v51 = vpop.permute.xlu1 %1489 }
 0x292   : > { %v1478_v52 = vpop.permute.xlu0 %1477  ;;  %v6571_v53 = vpop.f32.mrf.mxu0 }
 0x293   : > { %v1511_v54 = vsel %vm1507_vm1, %v1466_v24, %v1478_v52  ;;  %v1524_v52 = vld [vmem:[%s7309_s27 + $0x10] sm:$0xff] }
 0x294   : > { %v1516_v63 = vsel %vm1512_vm6, %v1511_v54, %v1490_v51  ;;  %v3979_v51 = vld [vmem:[#allocation7] ss:$0 sm:$0xff]  ;;  %v4715_v54 = vpop.f32.mrf.mxu1 }
 0x295   : > { %v1502_v61 = vpop.permute.xlu1 %1501  ;;  %v6580_v6 = vpop.f32.mrf.mxu0 }
 0x296   : > { %v1521_v8 = vsel %vm1517_vm5, %v1516_v63, %v1502_v61  ;;  %v1476_v59 = vpop.permute.xlu0 %1475  ;;  %v1910_v23 = vpop.f32.mrf.mxu1 }
 0x297   : > { %v6583_v12 = vmul.f32 %v1525_v56, %v1521_v8  ;;  %v6585_v16 = vpop.f32.mrf.mxu0  ;;  %v1510_v26 = vsel %vm1507_vm1, %v6482_v30, %v1476_v59  ;;  %v1514_v56 = vsel %vm1512_vm6, %v1509_v62, %v1486_v46  ;;  %v1508_v46 = vsel %vm1507_vm1, %v6467_v20, %v1472_v48 }
 0x299   : > { %4819 = vmatpush3.msra.mxu1 %v6583_v12  ;;  %4830 = vmatpush3.msra.mxu0 %v6583_v12  ;;  %v1498_v24 = vpop.permute.xlu1 %1497 }
 0x29a   : > { %v1488_v60 = vpop.permute.xlu0 %1487  ;;  %4820 = vmatprep.subr.mxu1 %v7279_v0  ;;  %4831 = vmatprep.subr.mxu0 %v7279_v0  ;;  %v6591_v22 = vpop.f32.mrf.mxu0  ;;  %v1519_v30 = vsel %vm1517_vm5, %v1514_v56, %v1498_v24  ;;  %v1522_v24 = vld [vmem:[%s7309_s27] sm:$0xff] }
 0x29b   : > { %v1515_v61 = vsel %vm1512_vm6, %v1510_v26, %v1488_v60  ;;  %v6615_v60 = vmul.f32 %v1523_v4, %v1519_v30 }
 0x29c   : > { %v6597_v28 = vpop.f32.mrf.mxu0 }
 0x29d   : > { %v1496_v26 = vpop.permute.xlu1 %1495 }
 0x29e   : > { %v1500_v63 = vpop.permute.xlu0 %1499  ;;  %v2368_v8 = vpop.f32.mrf.mxu0 }
 0x29f   : > { %v1520_v43 = vsel %vm1517_vm5, %v1515_v61, %v1500_v63  ;;  %v6609_v59 = vadd.f32 %v3979_v51, %v2368_v8  ;;  %v7310_v51 = vmov 0.0  }
 0x2a0   : > { %v6611_v0 = vmul.f32 %v1524_v52, %v1520_v43  ;;  %v4817_v37 = vpop.f32.mrf.mxu0  ;;  %v4718_v52 = vpop.f32.mrf.mxu1 }
 0x2a1   : > { %2534 = vrot.lane.b32.xlu0 %v6609_v59, %s5334_s24 }
 0x2a2   : > { %4821 = vmatpush3.msra.mxu1 %v6611_v0  ;;  %v1484_v62 = vpop.permute.xlu0 %1483  ;;  %4832 = vmatpush3.msra.mxu0 %v6611_v0  ;;  %v1920_v56 = vpop.f32.mrf.mxu1 }
 0x2a3   : > { %v1513_v37 = vsel %vm1512_vm6, %v1508_v46, %v1484_v62  ;;  %4822 = vmatprep.subr.mxu1 %v7310_v51  ;;  %4833 = vmatprep.subr.mxu0 %v7310_v51 }
 0x2a4   : > { %v1518_v20 = vsel %vm1517_vm5, %v1513_v37, %v1496_v26  ;;  %4823 = vmatpush3.msra.mxu1 %v6615_v60  ;;  %4834 = vmatpush3.msra.mxu0 %v6615_v60 }
 0x2a5   : > { %v6629_v48 = vmul.f32 %v1522_v24, %v1518_v20  ;;  %4824 = vmatprep.subr.mxu1 %v7310_v51  ;;  %4835 = vmatprep.subr.mxu0 %v7310_v51 }
 0x2a7   : > { %4825 = vmatpush3.msra.mxu1 %v6629_v48  ;;  %4836 = vmatpush3.msra.mxu0 %v6629_v48 }
 0x2a8   : > { %4827 = vmatmul.mubr.msk.f32.vlgmr.msra.gmra.mxu1 %vm1507_vm1, %v6609_v59  ;;  %4840 = vmatprep.subr.mxu1 %v7310_v51 }
 0x2a9   : > { %4841 = vmatpush3.msra.mxu1 %v4718_v52  ;;  %4875 = vmatprep.subr.mxu0 %v7310_v51 }
 0x2aa   : > { %4842 = vmatprep.subr.mxu1 %v7310_v51  ;;  %4872 = vmatprep.mubr.msk.f32.mxu1 %vm5324_vm0, %v7310_v51 }
 0x2ab   : > { %4843 = vmatpush3.msra.mxu1 %v1920_v56 }
 0x2ac   : > { %4844 = vmatprep.subr.mxu1 %v7310_v51 }
 0x2ad   : > { %4845 = vmatpush3.msra.mxu1 %v4715_v54 }
 0x2ae   : > { %4846 = vmatprep.subr.mxu1 %v7310_v51 }
 0x2af   : > { %4847 = vmatpush3.msra.mxu1 %v1910_v23 }
 0x2b0   : > { %4848 = vmatprep.subr.mxu1 %v7310_v51 }
 0x2b1   : > { %4849 = vmatpush3.msra.mxu1 %v6577_v58 }
 0x2b2   : > { %4850 = vmatprep.subr.mxu1 %v7310_v51 }
 0x2b3   : > { %4851 = vmatpush3.msra.mxu1 %v1900_v18 }
 0x2b4   : > { %4852 = vmatprep.subr.mxu1 %v7310_v51 }
 0x2b5   : > { %4853 = vmatpush3.msra.mxu1 %v6561_v44 }
 0x2b6   : > { %4854 = vmatprep.subr.mxu1 %v7310_v51 }
 0x2b7   : > { %4855 = vmatpush3.msra.mxu1 %v6567_v49 }
 0x2b8   : > { %4856 = vmatprep.subr.mxu1 %v7310_v51 }
 0x2b9   : > { %4857 = vmatpush3.msra.mxu1 %v6551_v40 }
 0x2ba   : > { %4858 = vmatprep.subr.mxu1 %v7310_v51 }
 0x2bb   : > { %4859 = vmatpush3.msra.mxu1 %v6557_v42 }
 0x2bc   : > { %4860 = vmatprep.subr.mxu1 %v7310_v51 }
 0x2bd   : > { %4861 = vmatpush3.msra.mxu1 %v6541_v25 }
 0x2be   : > { %4862 = vmatprep.subr.mxu1 %v7310_v51 }
 0x2bf   : > { %4863 = vmatpush3.msra.mxu1 %v6547_v29 }
 0x2c0   : > { %4864 = vmatprep.subr.mxu1 %v7310_v51 }
 0x2c1   : > { %4865 = vmatpush3.msra.mxu1 %v6529_v57 }
 0x2c2   : > { %4866 = vmatprep.subr.mxu1 %v7310_v51 }
 0x2c3   : > { %4867 = vmatpush3.msra.mxu1 %v6535_v21 }
 0x2c4   : > { %4868 = vmatprep.subr.mxu1 %v7310_v51 }
 0x2c5   : > { %4869 = vmatpush3.msra.mxu1 %v6519_v13 }
 0x2c6   : > { %4870 = vmatprep.subr.mxu1 %v7310_v51 }
 0x2c7   : > { %4871 = vmatpush3.msra.mxu1 %v6525_v17 }
 0x2c8   : > { %4910 = vmatprep.subr.mxu1 %v7310_v51 }
 0x313   : > { %v2535_v23 = vpop.permute.xlu0 %2534 }
 0x314   : > { %4838 = vmatmul.mubr.msk.f32.vlgmr.msra.gmra.mxu0 %vm1507_vm1, %v2535_v23 }
 0x315   : > { %4876 = vmatpush3.msra.mxu0 %v6531_v14  ;;  %4907 = vmatprep.mubr.msk.f32.mxu0 %vm5324_vm0, %v7310_v51 }
 0x316   : > { %4877 = vmatprep.subr.mxu0 %v7310_v51 }
 0x317   : > { %4878 = vmatpush3.msra.mxu0 %v6533_v36 }
 0x318   : > { %4879 = vmatprep.subr.mxu0 %v7310_v51 }
 0x319   : > { %4880 = vmatpush3.msra.mxu0 %v6523_v10 }
 0x31a   : > { %4881 = vmatprep.subr.mxu0 %v7310_v51 }
 0x31b   : > { %4882 = vmatpush3.msra.mxu0 %v6527_v19 }
 0x31c   : > { %4883 = vmatprep.subr.mxu0 %v7310_v51 }
 0x31d   : > { %4884 = vmatpush3.msra.mxu0 %v6517_v55  ;;  %v6692_v55 = vpop.f32.mrf.mxu1 }
 0x31e   : > { %4885 = vmatprep.subr.mxu0 %v7310_v51 }
 0x31f   : > { %4886 = vmatpush3.msra.mxu0 %v6521_v15 }
 0x320   : > { %4887 = vmatprep.subr.mxu0 %v7310_v51 }
 0x321   : > { %4888 = vmatpush3.msra.mxu0 %v6513_v9  ;;  %v6698_v9 = vpop.f32.mrf.mxu1 }
 0x322   : > { %4889 = vmatprep.subr.mxu0 %v7310_v51 }
 0x323   : > { %4890 = vmatpush3.msra.mxu0 %v6515_v11 }
 0x324   : > { %4891 = vmatprep.subr.mxu0 %v7310_v51 }
 0x325   : > { %4892 = vmatpush3.msra.mxu0 %v6509_v5  ;;  %v6704_v5 = vpop.f32.mrf.mxu1 }
 0x326   : > { %4893 = vmatprep.subr.mxu0 %v7310_v51 }
 0x327   : > { %4894 = vmatpush3.msra.mxu0 %v6511_v7 }
 0x328   : > { %4895 = vmatprep.subr.mxu0 %v7310_v51 }
 0x329   : > { %4896 = vmatpush3.msra.mxu0 %v6505_v3  ;;  %v6710_v3 = vpop.f32.mrf.mxu1 }
 0x32a   : > { %4897 = vmatprep.subr.mxu0 %v7310_v51 }
 0x32b   : > { %4898 = vmatpush3.msra.mxu0 %v6507_v35  ;;  %v6712_v35 = vpop.f32.mrf.mxu1 }
 0x32c   : > { %4899 = vmatprep.subr.mxu0 %v7310_v51 }
 0x32d   : > { %4900 = vmatpush3.msra.mxu0 %v6501_v34  ;;  %v6714_v34 = vpop.f32.mrf.mxu1 }
 0x32e   : > { %4901 = vmatprep.subr.mxu0 %v7310_v51 }
 0x32f   : > { %4902 = vmatpush3.msra.mxu0 %v6503_v1  ;;  %v6716_v7 = vpop.f32.mrf.mxu1 }
 0x330   : > { %4903 = vmatprep.subr.mxu0 %v7310_v51 }
 0x331   : > { %4904 = vmatpush3.msra.mxu0 %v6497_v2  ;;  %v6718_v1 = vpop.f32.mrf.mxu1 }
 0x332   : > { %4905 = vmatprep.subr.mxu0 %v7310_v51 }
 0x333   : > { %4906 = vmatpush3.msra.mxu0 %v6499_v32  ;;  %v6720_v11 = vpop.f32.mrf.mxu1 }
 0x334   : > { %4921 = vmatprep.subr.mxu0 %v7310_v51 }
 0x335   : > { %v6722_v13 = vpop.f32.mrf.mxu1 }
 0x337   : > { %v6724_v2 = vpop.f32.mrf.mxu1 }
 0x339   : > { %v6726_v15 = vpop.f32.mrf.mxu1 }
 0x33b   : > { %v6728_v32 = vpop.f32.mrf.mxu1 }
 0x33d   : > { %v6730_v10 = vpop.f32.mrf.mxu1 }
 0x33f   : > { %v6732_v17 = vpop.f32.mrf.mxu1 }
 0x341   : > { %v6734_v19 = vpop.f32.mrf.mxu1 }
 0x368   : > { %v6736_v57 = vpop.f32.mrf.mxu1 }
 0x36a   : > { %v4828_v14 = vpop.f32.mrf.mxu1 }
 0x3d4   : > { %v2604_v36 = vpop.f32.mrf.mxu0 }
 0x3d5   : > { %v2636_v21 = vsel %vm2479_vm7, %v2604_v36, -inf  ;;  %v2620_v25 = vsel %vm2462_vm8, %v2604_v36, -inf  ;;  %v2652_v40 = vsel %vm2496_vm9, %v2604_v36, -inf  ;;  %v2608_v42 = vsel %vm1507_vm1, %v2604_v36, -inf }
 0x3d6   : > { %2637 = vmax.xlane.f32.xlu0 %v2636_v21  ;;  %2621 = vmax.xlane.f32.xlu1 %v2620_v25  ;;  %v4839_v29 = vpop.f32.mrf.mxu0 }
 0x3d7   : > { %v2480_v29 = vsel %vm2479_vm7, %v6736_v57, -inf }
 0x3da   : > { %2653 = vmax.xlane.f32.xlu0 %v2652_v40  ;;  %2609 = vmax.xlane.f32.xlu1 %v2608_v42  ;;  %v2497_v40 = vsel %vm2496_vm9, %v6736_v57, -inf  ;;  %v2450_v42 = vsel %vm1507_vm1, %v6736_v57, -inf }
 0x45f   : > { %v2638_v44 = vpop.xlane.xlu0 %2637  ;;  %v2622_v49 = vpop.xlane.xlu1 %2621 }
 0x460   : > { %v2639_v58 = vsub.f32 %v2604_v36, %v2638_v44  ;;  %v2623_v18 = vsub.f32 %v2604_v36, %v2622_v49 }
 0x462   : > { %v2640_v54 = vmul.f32 1.442695, %v2639_v58  ;;  %v2624_v61 = vmul.f32 1.442695, %v2623_v18 }
 0x463   : > { %v2654_v63 = vpop.xlane.xlu0 %2653  ;;  %v2610_v24 = vpop.xlane.xlu1 %2609 }
 0x464   : > { %5100 = vpow2.f32 %v2640_v54  ;;  %v2655_v8 = vsub.f32 %v2604_v36, %v2654_v63  ;;  %v2611_v62 = vsub.f32 %v2604_v36, %v2610_v24  ;;  %v2463_v36 = vsel %vm2462_vm8, %v6736_v57, -inf }
 0x465   : > { %5102 = vpow2.f32 %v2624_v61 }
 0x466   : > { %v2656_v4 = vmul.f32 1.442695, %v2655_v8  ;;  %v2612_v26 = vmul.f32 1.442695, %v2611_v62 }
 0x468   : > { %5104 = vpow2.f32 %v2656_v4 }
 0x469   : > { %5106 = vpow2.f32 %v2612_v26 }
 0x471   : > { %v5101_v30 = vpop.eup %5100 }
 0x472   : > { %v5103_v43 = vpop.eup %5102  ;;  %2643 = vrot.lane.b32.xlu1 %v5101_v30, %s5333_s25 }
 0x473   : > { %2627 = vrot.lane.b32.xlu0 %v5103_v43, %s5334_s24 }
 0x475   : > { %v5105_v46 = vpop.eup %5104 }
 0x476   : > { %2659 = vrot.lane.b32.xlu1 %v5105_v46, %s7282_s26  ;;  %v5107_v37 = vpop.eup %5106 }
 0x477   : > { %v2614_v20 = vsel %vm1507_vm1, %v5107_v37, 0.0 }
 0x492   : > { %2615 = vadd.xlane.f32.xlu0 %v2614_v20 }
 0x4e4   : > { %v2644_v52 = vpop.permute.xlu1 %2643 }
 0x4e5   : > { %v2628_v56 = vpop.permute.xlu0 %2627  ;;  %v2646_v23 = vsel %vm1507_vm1, %v2644_v52, 0.0 }
 0x4e6   : > { %v2630_v14 = vsel %vm1507_vm1, %v2628_v56, 0.0  ;;  %2647 = vadd.xlane.f32.xlu0 %v2646_v23 }
 0x4e7   : > { %2631 = vadd.xlane.f32.xlu1 %v2630_v14 }
 0x4e8   : > { %v2660_v21 = vpop.permute.xlu1 %2659 }
 0x4e9   : > { %v2662_v25 = vsel %vm1507_vm1, %v2660_v21, 0.0 }
 0x4ea   : > { %2663 = vadd.xlane.f32.xlu0 %v2662_v25 }
 0x4f8   : > { %2828 = vrot.lane.b32.xlu1 %v6609_v59, %s5333_s25 }
 0x500   : > { %3053 = vrot.lane.b32.xlu0 %v6609_v59, %s7282_s26 }
 0x51b   : > { %v2616_v44 = vpop.xlane.xlu0 %2615 }
 0x51c   : > { %2464 = vmax.xlane.f32.xlu1 %v2463_v36  ;;  %5108 = vrcp.f32 %v2616_v44 }
 0x51f   : > { %2481 = vmax.xlane.f32.xlu0 %v2480_v29 }
 0x520   : > { %2498 = vmax.xlane.f32.xlu1 %v2497_v40 }
 0x523   : > { %2451 = vmax.xlane.f32.xlu0 %v2450_v42 }
 0x529   : > { %v5109_v18 = vpop.eup %5108 }
 0x52a   : > { %v2619_v63 = vmul.f32 %v5109_v18, %v5107_v37 }
 0x56f   : > { %v2648_v49 = vpop.xlane.xlu0 %2647 }
 0x570   : > { %5110 = vrcp.f32 %v2648_v49  ;;  %v2632_v59 = vpop.xlane.xlu1 %2631 }
 0x571   : > { %5112 = vrcp.f32 %v2632_v59 }
 0x573   : > { %v2664_v58 = vpop.xlane.xlu0 %2663 }
 0x574   : > { %5114 = vrcp.f32 %v2664_v58 }
 0x57d   : > { %v5111_v54 = vpop.eup %5110 }
 0x57e   : > { %v5113_v61 = vpop.eup %5112  ;;  %v2651_v4 = vmul.f32 %v5111_v54, %v5101_v30  ;;  %v2829_v30 = vpop.permute.xlu1 %2828 }
 0x57f   : > { %v2635_v8 = vmul.f32 %v5113_v61, %v5103_v43  ;;  %v3054_v43 = vpop.permute.xlu0 %3053 }
 0x581   : > { %v5115_v24 = vpop.eup %5114  ;;  %v2668_v62 = vsel %vm1507_vm1, %v2619_v63, %v2635_v8 }
 0x582   : > { %v2667_v26 = vmul.f32 %v5115_v24, %v5105_v46  ;;  %v2669_v20 = vsel %vm1512_vm6, %v2668_v62, %v2651_v4 }
 0x584   : > { %v2670_v52 = vsel %vm1517_vm5, %v2669_v20, %v2667_v26 }
 0x585   : > { %4873 = vmatmul.mubr.f32.vlgmr.msra.gmra.mxu1 %v2670_v52 }
 0x586   : > { %4911 = vmatpush3.msra.mxu1 %v6583_v12  ;;  %4918 = vmatprep.mubr.msk.f32.mxu1 %vm5324_vm0, %v7310_v51 }
 0x587   : > { %4912 = vmatprep.subr.mxu1 %v7310_v51 }
 0x588   : > { %4913 = vmatpush3.msra.mxu1 %v6611_v0 }
 0x589   : > { %4914 = vmatprep.subr.mxu1 %v7310_v51 }
 0x58a   : > { %4915 = vmatpush3.msra.mxu1 %v6615_v60 }
 0x58b   : > { %4916 = vmatprep.subr.mxu1 %v7310_v51 }
 0x58c   : > { %4917 = vmatpush3.msra.mxu1 %v6629_v48 }
 0x58d   : > { %4919 = vmatmul.mubr.msk.f32.vlgmr.msra.gmra.mxu1 %vm1507_vm1, %v2829_v30  ;;  %4956 = vmatprep.subr.mxu1 %v7310_v51 }
 0x58e   : > { %4957 = vmatpush3.msra.mxu1 %v6583_v12  ;;  %4964 = vmatprep.mubr.msk.f32.mxu1 %vm5324_vm0, %v7310_v51 }
 0x58f   : > { %4958 = vmatprep.subr.mxu1 %v7310_v51 }
 0x590   : > { %4959 = vmatpush3.msra.mxu1 %v6611_v0 }
 0x591   : > { %4960 = vmatprep.subr.mxu1 %v7310_v51 }
 0x592   : > { %4961 = vmatpush3.msra.mxu1 %v6615_v60 }
 0x593   : > { %4962 = vmatprep.subr.mxu1 %v7310_v51 }
 0x594   : > { %4963 = vmatpush3.msra.mxu1 %v6629_v48 }
 0x595   : > { %4965 = vmatmul.mubr.msk.f32.vlgmr.msra.gmra.mxu1 %vm1507_vm1, %v3054_v43  ;;  %4967 = vmatprep.subr.mxu1 %v7310_v51 }
 0x596   : > { %4968 = vmatpush3.msra.mxu1 %v6732_v17  ;;  %4999 = vmatprep.mubr.msk.f32.mxu1 %vm5324_vm0, %v7310_v51 }
 0x597   : > { %4969 = vmatprep.subr.mxu1 %v7310_v51 }
 0x598   : > { %4970 = vmatpush3.msra.mxu1 %v6734_v19 }
 0x599   : > { %4971 = vmatprep.subr.mxu1 %v7310_v51 }
 0x59a   : > { %4972 = vmatpush3.msra.mxu1 %v6728_v32 }
 0x59b   : > { %4973 = vmatprep.subr.mxu1 %v7310_v51 }
 0x59c   : > { %4974 = vmatpush3.msra.mxu1 %v6730_v10 }
 0x59d   : > { %4975 = vmatprep.subr.mxu1 %v7310_v51 }
 0x59e   : > { %4976 = vmatpush3.msra.mxu1 %v6724_v2 }
 0x59f   : > { %4977 = vmatprep.subr.mxu1 %v7310_v51 }
 0x5a0   : > { %4978 = vmatpush3.msra.mxu1 %v6726_v15 }
 0x5a1   : > { %4979 = vmatprep.subr.mxu1 %v7310_v51 }
 0x5a2   : > { %4980 = vmatpush3.msra.mxu1 %v6720_v11 }
 0x5a3   : > { %4981 = vmatprep.subr.mxu1 %v7310_v51 }
 0x5a4   : > { %4982 = vmatpush3.msra.mxu1 %v6722_v13 }
 0x5a5   : > { %4983 = vmatprep.subr.mxu1 %v7310_v51 }
 0x5a6   : > { %4984 = vmatpush3.msra.mxu1 %v6716_v7 }
 0x5a7   : > { %4985 = vmatprep.subr.mxu1 %v7310_v51 }
 0x5a8   : > { %4986 = vmatpush3.msra.mxu1 %v6718_v1 }
 0x5a9   : > { %4987 = vmatprep.subr.mxu1 %v7310_v51 }
 0x5aa   : > { %4988 = vmatpush3.msra.mxu1 %v6712_v35  ;;  %v2465_v35 = vpop.xlane.xlu1 %2464 }
 0x5ab   : > { %4989 = vmatprep.subr.mxu1 %v7310_v51  ;;  %v2466_v7 = vsub.f32 %v6736_v57, %v2465_v35 }
 0x5ac   : > { %4990 = vmatpush3.msra.mxu1 %v6714_v34 }
 0x5ad   : > { %4991 = vmatprep.subr.mxu1 %v7310_v51  ;;  %v2467_v32 = vmul.f32 1.442695, %v2466_v7 }
 0x5ae   : > { %4992 = vmatpush3.msra.mxu1 %v6704_v5  ;;  %v2499_v15 = vpop.xlane.xlu1 %2498 }
 0x5af   : > { %4993 = vmatprep.subr.mxu1 %v7310_v51  ;;  %v2500_v19 = vsub.f32 %v6736_v57, %v2499_v15  ;;  %5116 = vpow2.f32 %v2467_v32 }
 0x5b0   : > { %4994 = vmatpush3.msra.mxu1 %v6710_v3 }
 0x5b1   : > { %4995 = vmatprep.subr.mxu1 %v7310_v51  ;;  %v2501_v46 = vmul.f32 1.442695, %v2500_v19 }
 0x5b2   : > { %4996 = vmatpush3.msra.mxu1 %v6692_v55 }
 0x5b3   : > { %4997 = vmatprep.subr.mxu1 %v7310_v51 }
 0x5b4   : > { %4998 = vmatpush3.msra.mxu1 %v6698_v9  ;;  %v2482_v9 = vpop.xlane.xlu0 %2481 }
 0x5b5   : > { %v2483_v13 = vsub.f32 %v6736_v57, %v2482_v9 }
 0x5b7   : > { %v2484_v17 = vmul.f32 1.442695, %v2483_v13 }
 0x5b8   : > { %v2452_v25 = vpop.xlane.xlu0 %2451 }
 0x5b9   : > { %5118 = vpow2.f32 %v2484_v17 }
 0x5ba   : > { %5120 = vpow2.f32 %v2501_v46 }
 0x5bc   : > { %v6840_v37 = vpop.eup %5116 }
 0x5c6   : > { %v6842_v56 = vpop.eup %5118 }
 0x5c7   : > { %v6848_v23 = vpop.eup %5120 }
 0x645   : > { %v6819_v0 = vpop.f32.mrf.mxu1 }
 0x647   : > { %v4874_v12 = vpop.f32.mrf.mxu1 }
 0x64d   : > { %v6821_v60 = vpop.f32.mrf.mxu1 }
 0x64e   : > { %v2930_v48 = vsel %vm2479_vm7, %v6821_v60, -inf  ;;  %v2914_v5 = vsel %vm2462_vm8, %v6821_v60, -inf  ;;  %v2946_v55 = vsel %vm2496_vm9, %v6821_v60, -inf  ;;  %v2902_v14 = vsel %vm1507_vm1, %v6821_v60, -inf }
 0x64f   : > { %2931 = vmax.xlane.f32.xlu1 %v2930_v48  ;;  %2915 = vmax.xlane.f32.xlu0 %v2914_v5  ;;  %v4920_v3 = vpop.f32.mrf.mxu1 }
 0x650   : > { %v2453_v3 = vsub.f32 %v6736_v57, %v2452_v25 }
 0x652   : > { %v2454_v35 = vmul.f32 1.442695, %v2453_v3 }
 0x653   : > { %2947 = vmax.xlane.f32.xlu0 %v2946_v55 }
 0x655   : > { %v6829_v34 = vpop.f32.mrf.mxu1 }
 0x656   : > { %v3155_v1 = vsel %vm2479_vm7, %v6829_v34, -inf  ;;  %v3139_v11 = vsel %vm2462_vm8, %v6829_v34, -inf  ;;  %v3171_v10 = vsel %vm2496_vm9, %v6829_v34, -inf  ;;  %v3127_v21 = vsel %vm1507_vm1, %v6829_v34, -inf }
 0x657   : > { %3156 = vmax.xlane.f32.xlu0 %v3155_v1  ;;  %3140 = vmax.xlane.f32.xlu1 %v3139_v11  ;;  %v4966_v2 = vpop.f32.mrf.mxu1 }
 0x65b   : > { %3172 = vmax.xlane.f32.xlu1 %v3171_v10 }
 0x66c   : > { %2470 = vrot.lane.b32.xlu1 %v6840_v37, %s5334_s24 }
 0x66d   : > { %2487 = vrot.lane.b32.xlu0 %v6842_v56, %s5333_s25 }
 0x671   : > { %2504 = vrot.lane.b32.xlu0 %v6848_v23, %s7282_s26 }
 0x690   : > { %2903 = vmax.xlane.f32.xlu1 %v2902_v14  ;;  %3128 = vmax.xlane.f32.xlu0 %v3127_v21 }
 0x6d8   : > { %v2916_v36 = vpop.xlane.xlu0 %2915  ;;  %v2932_v29 = vpop.xlane.xlu1 %2931 }
 0x6d9   : > { %v2917_v40 = vsub.f32 %v6821_v60, %v2916_v36  ;;  %v2933_v42 = vsub.f32 %v6821_v60, %v2932_v29 }
 0x6db   : > { %v2918_v44 = vmul.f32 1.442695, %v2917_v40  ;;  %v2934_v49 = vmul.f32 1.442695, %v2933_v42 }
 0x6dc   : > { %v2948_v59 = vpop.xlane.xlu0 %2947 }
 0x6dd   : > { %5122 = vpow2.f32 %v2918_v44  ;;  %v2949_v58 = vsub.f32 %v6821_v60, %v2948_v59 }
 0x6de   : > { %5124 = vpow2.f32 %v2934_v49 }
 0x6df   : > { %v2950_v18 = vmul.f32 1.442695, %v2949_v58 }
 0x6e0   : > { %v3157_v54 = vpop.xlane.xlu0 %3156  ;;  %v3141_v61 = vpop.xlane.xlu1 %3140 }
 0x6e1   : > { %5126 = vpow2.f32 %v2950_v18  ;;  %v3142_v63 = vsub.f32 %v6829_v34, %v3141_v61  ;;  %v3158_v8 = vsub.f32 %v6829_v34, %v3157_v54 }
 0x6e3   : > { %v3143_v4 = vmul.f32 1.442695, %v3142_v63  ;;  %v3159_v26 = vmul.f32 1.442695, %v3158_v8 }
 0x6e4   : > { %v3173_v24 = vpop.xlane.xlu1 %3172  ;;  %v2488_v55 = vpop.permute.xlu0 %2487 }
 0x6e5   : > { %v3174_v62 = vsub.f32 %v6829_v34, %v3173_v24  ;;  %5128 = vpow2.f32 %v3143_v4  ;;  %v2490_v15 = vsel %vm1507_vm1, %v2488_v55, 0.0 }
 0x6e7   : > { %v3175_v20 = vmul.f32 1.442695, %v3174_v62 }
 0x6e8   : > { %v2471_v9 = vpop.permute.xlu1 %2470  ;;  %v2505_v7 = vpop.permute.xlu0 %2504 }
 0x6e9   : > { %5130 = vpow2.f32 %v3175_v20  ;;  %v2473_v1 = vsel %vm1507_vm1, %v2471_v9, 0.0  ;;  %v2507_v46 = vsel %vm1507_vm1, %v2505_v7, 0.0 }
 0x6ea   : > { %v6862_v52 = vpop.eup %5122  ;;  %5132 = vpow2.f32 %v3159_v26 }
 0x6eb   : > { %v6864_v30 = vpop.eup %5124  ;;  %2921 = vrot.lane.b32.xlu1 %v6862_v52, %s5334_s24  ;;  %5134 = vpow2.f32 %v2454_v35 }
 0x6ec   : > { %2937 = vrot.lane.b32.xlu0 %v6864_v30, %s5333_s25 }
 0x6ee   : > { %v6870_v43 = vpop.eup %5126 }
 0x6ef   : > { %2953 = vrot.lane.b32.xlu1 %v6870_v43, %s7282_s26 }
 0x6f2   : > { %v6874_v12 = vpop.eup %5128 }
 0x6f3   : > { %3146 = vrot.lane.b32.xlu1 %v6874_v12, %s5334_s24 }
 0x6f6   : > { %v6878_v48 = vpop.eup %5130 }
 0x6f7   : > { %v6880_v5 = vpop.eup %5132  ;;  %3178 = vrot.lane.b32.xlu0 %v6878_v48, %s7282_s26 }
 0x6f8   : > { %3162 = vrot.lane.b32.xlu1 %v6880_v5, %s5333_s25  ;;  %v5135_v11 = vpop.eup %5134 }
 0x6f9   : > { %v2456_v57 = vsel %vm1507_vm1, %v5135_v11, 0.0 }
 0x716   : > { %2474 = vadd.xlane.f32.xlu0 %v2473_v1 }
 0x719   : > { %v3129_v13 = vpop.xlane.xlu0 %3128  ;;  %v2904_v2 = vpop.xlane.xlu1 %2903 }
 0x71a   : > { %v3130_v32 = vsub.f32 %v6829_v34, %v3129_v13  ;;  %v2905_v10 = vsub.f32 %v6821_v60, %v2904_v2  ;;  %2491 = vadd.xlane.f32.xlu0 %v2490_v15 }
 0x71c   : > { %v2906_v17 = vmul.f32 1.442695, %v2905_v10  ;;  %2457 = vadd.xlane.f32.xlu1 %v2456_v57  ;;  %v3131_v19 = vmul.f32 1.442695, %v3130_v32 }
 0x71e   : > { %5136 = vpow2.f32 %v2906_v17 }
 0x71f   : > { %5138 = vpow2.f32 %v3131_v19 }
 0x720   : > { %2508 = vadd.xlane.f32.xlu1 %v2507_v46 }
 0x72b   : > { %v6893_v14 = vpop.eup %5136 }
 0x72c   : > { %v2908_v21 = vsel %vm1507_vm1, %v6893_v14, 0.0  ;;  %v6897_v25 = vpop.eup %5138 }
 0x72d   : > { %2909 = vadd.xlane.f32.xlu0 %v2908_v21  ;;  %v3133_v60 = vsel %vm1507_vm1, %v6897_v25, 0.0 }
 0x731   : > { %3134 = vadd.xlane.f32.xlu0 %v3133_v60 }
 0x75d   : > { %v2922_v34 = vpop.permute.xlu1 %2921 }
 0x75e   : > { %v2938_v36 = vpop.permute.xlu0 %2937  ;;  %v2924_v29 = vsel %vm1507_vm1, %v2922_v34, 0.0 }
 0x75f   : > { %v2940_v40 = vsel %vm1507_vm1, %v2938_v36, 0.0  ;;  %2925 = vadd.xlane.f32.xlu1 %v2924_v29 }
 0x760   : > { %2941 = vadd.xlane.f32.xlu0 %v2940_v40 }
 0x761   : > { %v2954_v42 = vpop.permute.xlu1 %2953 }
 0x762   : > { %v2956_v44 = vsel %vm1507_vm1, %v2954_v42, 0.0 }
 0x763   : > { %2957 = vadd.xlane.f32.xlu1 %v2956_v44  ;;  %v3984_v44 = vld [vmem:[#allocation7 + $0x1] ss:$0 sm:$0xff] }
 0x765   : > { %v3147_v49 = vpop.permute.xlu1 %3146 }
 0x766   : > { %v3149_v59 = vsel %vm1507_vm1, %v3147_v49, 0.0 }
 0x767   : > { %3150 = vadd.xlane.f32.xlu1 %v3149_v59  ;;  %v5180_v59 = vld [vmem:[%s6435_s28] sm:$0xff] }
 0x769   : > { %v3179_v58 = vpop.permute.xlu0 %3178 }
 0x76a   : > { %v3163_v18 = vpop.permute.xlu1 %3162  ;;  %v3181_v54 = vsel %vm1507_vm1, %v3179_v58, 0.0 }
 0x76b   : > { %v3165_v61 = vsel %vm1507_vm1, %v3163_v18, 0.0  ;;  %3182 = vadd.xlane.f32.xlu1 %v3181_v54 }
 0x76c   : > { %3166 = vadd.xlane.f32.xlu0 %v3165_v61 }
 0x79f   : > { %v2475_v63 = vpop.xlane.xlu0 %2474 }
 0x7a0   : > { %5140 = vrcp.f32 %v2475_v63 }
 0x7a3   : > { %v2492_v8 = vpop.xlane.xlu0 %2491 }
 0x7a5   : > { %v2458_v4 = vpop.xlane.xlu1 %2457 }
 0x7a6   : > { %5142 = vrcp.f32 %v2458_v4 }
 0x7a7   : > { %5144 = vrcp.f32 %v2492_v8 }
 0x7a9   : > { %v2509_v24 = vpop.xlane.xlu1 %2508 }
 0x7aa   : > { %5146 = vrcp.f32 %v2509_v24 }
 0x7ad   : > { %v5141_v62 = vpop.eup %5140 }
 0x7ae   : > { %v2478_v35 = vmul.f32 %v5141_v62, %v6840_v37 }
 0x7b3   : > { %v5143_v26 = vpop.eup %5142 }
 0x7b4   : > { %v5145_v20 = vpop.eup %5144  ;;  %v2461_v3 = vmul.f32 %v5143_v26, %v5135_v11 }
 0x7b5   : > { %v2495_v7 = vmul.f32 %v5145_v20, %v6842_v56 }
 0x7b6   : > { %v2513_v55 = vsel %vm1507_vm1, %v2461_v3, %v2478_v35 }
 0x7b7   : > { %v5147_v9 = vpop.eup %5146  ;;  %v2515_v13 = vsel %vm1512_vm6, %v2513_v55, %v2495_v7 }
 0x7b8   : > { %v2512_v1 = vmul.f32 %v5147_v9, %v6848_v23 }
 0x7ba   : > { %v2517_v2 = vsel %vm1517_vm5, %v2515_v13, %v2512_v1 }
 0x7bb   : > { %4908 = vmatmul.mubr.f32.vlgmr.msra.gmra.mxu0 %v2517_v2 }
 0x7bc   : > { %4922 = vmatpush3.msra.mxu0 %v6591_v22  ;;  %4953 = vmatprep.mubr.msk.f32.mxu0 %vm5324_vm0, %v7310_v51 }
 0x7bd   : > { %4923 = vmatprep.subr.mxu0 %v7310_v51 }
 0x7be   : > { %4924 = vmatpush3.msra.mxu0 %v6597_v28 }
 0x7bf   : > { %4925 = vmatprep.subr.mxu0 %v7310_v51 }
 0x7c0   : > { %4926 = vmatpush3.msra.mxu0 %v6580_v6 }
 0x7c1   : > { %4927 = vmatprep.subr.mxu0 %v7310_v51 }
 0x7c2   : > { %4928 = vmatpush3.msra.mxu0 %v6585_v16 }
 0x7c3   : > { %4929 = vmatprep.subr.mxu0 %v7310_v51 }
 0x7c4   : > { %4930 = vmatpush3.msra.mxu0 %v6569_v50 }
 0x7c5   : > { %4931 = vmatprep.subr.mxu0 %v7310_v51 }
 0x7c6   : > { %4932 = vmatpush3.msra.mxu0 %v6571_v53 }
 0x7c7   : > { %4933 = vmatprep.subr.mxu0 %v7310_v51 }
 0x7c8   : > { %4934 = vmatpush3.msra.mxu0 %v6563_v45 }
 0x7c9   : > { %4935 = vmatprep.subr.mxu0 %v7310_v51 }
 0x7ca   : > { %4936 = vmatpush3.msra.mxu0 %v6565_v47 }
 0x7cb   : > { %4937 = vmatprep.subr.mxu0 %v7310_v51 }
 0x7cc   : > { %4938 = vmatpush3.msra.mxu0 %v6555_v31  ;;  %v7311_v31 = vld [vmem:[#allocation17_spill] sm:$0xff] }
 0x7cd   : > { %4939 = vmatprep.subr.mxu0 %v7310_v51 }
 0x7ce   : > { %4940 = vmatpush3.msra.mxu0 %v6559_v33  ;;  %v7312_v33 = vld [vmem:[#allocation18_spill] sm:$0xff] }
 0x7cf   : > { %4941 = vmatprep.subr.mxu0 %v7310_v51 }
 0x7d0   : > { %4942 = vmatpush3.msra.mxu0 %v6549_v39  ;;  %v2910_v39 = vpop.xlane.xlu0 %2909 }
 0x7d1   : > { %4943 = vmatprep.subr.mxu0 %v7310_v51  ;;  %5148 = vrcp.f32 %v2910_v39 }
 0x7d2   : > { %4944 = vmatpush3.msra.mxu0 %v6553_v41 }
 0x7d3   : > { %4945 = vmatprep.subr.mxu0 %v7310_v51 }
 0x7d4   : > { %4946 = vmatpush3.msra.mxu0 %v6543_v27  ;;  %v3135_v45 = vpop.xlane.xlu0 %3134 }
 0x7d5   : > { %4947 = vmatprep.subr.mxu0 %v7310_v51 }
 0x7d6   : > { %4948 = vmatpush3.msra.mxu0 %v6545_v38 }
 0x7d7   : > { %4949 = vmatprep.subr.mxu0 %v7310_v51 }
 0x7d8   : > { %4950 = vmatpush3.msra.mxu0 %v7311_v31 }
 0x7d9   : > { %4951 = vmatprep.subr.mxu0 %v7310_v51 }
 0x7da   : > { %4952 = vmatpush3.msra.mxu0 %v7312_v33 }
 0x7de   : > { %v5149_v38 = vpop.eup %5148 }
 0x7df   : > { %v2913_v28 = vmul.f32 %v5149_v38, %v6893_v14 }
 0x7e8   : > { %v2926_v41 = vpop.xlane.xlu1 %2925 }
 0x7e9   : > { %v2942_v47 = vpop.xlane.xlu0 %2941  ;;  %5150 = vrcp.f32 %v2926_v41 }
 0x7ea   : > { %5152 = vrcp.f32 %v2942_v47  ;;  %v3409_v47 = vld [vmem:[%s7313_s17 + $0xf8] sm:$0xff] }
 0x7eb   : > { %3422 = vmatprep.subr.mxu0 %v3409_v47  ;;  %v3519_v47 = vld [vmem:[%s7314_s12 + $0xa0] sm:$0xff] }
 0x7ec   : > { %v2958_v27 = vpop.xlane.xlu1 %2957 }
 0x7ed   : > { %5154 = vrcp.f32 %v2958_v27  ;;  %v3408_v27 = vld [vmem:[%s7313_s17 + $0xf0] sm:$0xff] }
 0x7f0   : > { %v3151_v50 = vpop.xlane.xlu1 %3150 }
 0x7f1   : > { %5156 = vrcp.f32 %v3151_v50 }
 0x7f2   : > { %5158 = vrcp.f32 %v3135_v45 }
 0x7f4   : > { %v3183_v6 = vpop.xlane.xlu1 %3182 }
 0x7f5   : > { %v3167_v53 = vpop.xlane.xlu0 %3166 }
 0x7f6   : > { %v5151_v16 = vpop.eup %5150  ;;  %5160 = vrcp.f32 %v3167_v53 }
 0x7f7   : > { %v5153_v22 = vpop.eup %5152  ;;  %5162 = vrcp.f32 %v3183_v6  ;;  %v2929_v37 = vmul.f32 %v5151_v16, %v6862_v52 }
 0x7f8   : > { %v2945_v56 = vmul.f32 %v5153_v22, %v6864_v30 }
 0x7f9   : > { %v2962_v23 = vsel %vm1507_vm1, %v2913_v28, %v2929_v37  ;;  %v3407_v28 = vld [vmem:[%s7313_s17 + $0xe8] sm:$0xff]  ;;  %v3406_v37 = vld [vmem:[%s7313_s17 + $0xe0] sm:$0xff] }
 0x7fa   : > { %v5155_v11 = vpop.eup %5154  ;;  %v2963_v32 = vsel %vm1512_vm6, %v2962_v23, %v2945_v56  ;;  %v3405_v56 = vld [vmem:[%s7313_s17 + $0xd8] sm:$0xff]  ;;  %v3404_v23 = vld [vmem:[%s7313_s17 + $0xd0] sm:$0xff] }
 0x7fb   : > { %v2961_v15 = vmul.f32 %v5155_v11, %v6870_v43  ;;  %v3403_v11 = vld [vmem:[%s7313_s17 + $0xc8] sm:$0xff] }
 0x7fd   : > { %v2964_v10 = vsel %vm1517_vm5, %v2963_v32, %v2961_v15  ;;  %v3402_v15 = vld [vmem:[%s7313_s17 + $0xc0] sm:$0xff]  ;;  %v3401_v32 = vld [vmem:[%s7313_s17 + $0xb8] sm:$0xff] }
 0x7fe   : > { %4954 = vmatmul.mubr.f32.vlgmr.msra.gmra.mxu0 %v2964_v10  ;;  %v5157_v57 = vpop.eup %5156  ;;  %v3400_v10 = vld [vmem:[%s7313_s17 + $0xb0] sm:$0xff] }
 0x7ff   : > { %3486 = vmatprep.mubr.f32.mxu0 %v7310_v51  ;;  %v5159_v17 = vpop.eup %5158  ;;  %v3154_v19 = vmul.f32 %v5157_v57, %v6874_v12  ;;  %3423 = vmatpush1.msra.mxu0 %v3408_v27  ;;  %v3399_v57 = vld [vmem:[%s7313_s17 + $0xa8] sm:$0xff] }
 0x800   : > { %v3138_v52 = vmul.f32 %v5159_v17, %v6897_v25  ;;  %3424 = vmatprep.subr.mxu0 %v3407_v28  ;;  %v3398_v17 = vld [vmem:[%s7313_s17 + $0xa0] sm:$0xff] }
 0x801   : > { %3425 = vmatpush1.msra.mxu0 %v3406_v37 }
 0x802   : > { %v3187_v43 = vsel %vm1507_vm1, %v3138_v52, %v3154_v19  ;;  %3426 = vmatprep.subr.mxu0 %v3405_v56  ;;  %v3397_v19 = vld [vmem:[%s7313_s17 + $0x98] sm:$0xff]  ;;  %v3395_v52 = vld [vmem:[%s7313_s17 + $0x88] sm:$0xff] }
 0x803   : > { %v5161_v46 = vpop.eup %5160  ;;  %3427 = vmatpush1.msra.mxu0 %v3404_v23 }
 0x804   : > { %v5163_v30 = vpop.eup %5162  ;;  %v3170_v14 = vmul.f32 %v5161_v46, %v6880_v5  ;;  %3428 = vmatprep.subr.mxu0 %v3403_v11  ;;  %v3396_v46 = vld [vmem:[%s7313_s17 + $0x90] sm:$0xff] }
 0x805   : > { %v3186_v21 = vmul.f32 %v5163_v30, %v6878_v48  ;;  %3429 = vmatpush1.msra.mxu0 %v3402_v15  ;;  %v3394_v30 = vld [vmem:[%s7313_s17 + $0x80] sm:$0xff] }
 0x806   : > { %v3188_v60 = vsel %vm1512_vm6, %v3187_v43, %v3170_v14  ;;  %3430 = vmatprep.subr.mxu0 %v3401_v32  ;;  %v3393_v14 = vld [vmem:[%s7313_s17 + $0x78] sm:$0xff]  ;;  %v3391_v43 = vld [vmem:[%s7313_s17 + $0x68] sm:$0xff] }
 0x807   : > { %v3189_v34 = vsel %vm1517_vm5, %v3188_v60, %v3186_v21  ;;  %3431 = vmatpush1.msra.mxu0 %v3400_v10  ;;  %v3392_v21 = vld [vmem:[%s7313_s17 + $0x70] sm:$0xff]  ;;  %v3390_v60 = vld [vmem:[%s7313_s17 + $0x60] sm:$0xff] }
 0x808   : > { %5000 = vmatmul.mubr.f32.vlgmr.msra.gmra.mxu1 %v3189_v34  ;;  %3432 = vmatprep.subr.mxu0 %v3399_v57  ;;  %v3389_v34 = vld [vmem:[%s7313_s17 + $0x58] sm:$0xff] }
 0x809   : > { %3433 = vmatpush1.msra.mxu0 %v3398_v17 }
 0x80a   : > { %3434 = vmatprep.subr.mxu0 %v3397_v19 }
 0x80b   : > { %3435 = vmatpush1.msra.mxu0 %v3396_v46 }
 0x80c   : > { %3436 = vmatprep.subr.mxu0 %v3395_v52 }
 0x80d   : > { %3437 = vmatpush1.msra.mxu0 %v3394_v30  ;;  %v3985_v30 = vld [vmem:[#allocation7 + $0x2] ss:$0 sm:$0xff] }
 0x80e   : > { %3438 = vmatprep.subr.mxu0 %v3393_v14 }
 0x80f   : > { %3439 = vmatpush1.msra.mxu0 %v3392_v21 }
 0x810   : > { %3440 = vmatprep.subr.mxu0 %v3391_v43  ;;  %v3986_v43 = vld [vmem:[#allocation7 + $0x3] ss:$0 sm:$0xff] }
 0x811   : > { %3441 = vmatpush1.msra.mxu0 %v3390_v60 }
 0x812   : > { %3442 = vmatprep.subr.mxu0 %v3389_v34 }
 0x87b   : > { %v2824_v51 = vpop.f32.mrf.mxu0 }
 0x87c   : > { %v2825_v40 = vadd.f32 %v2824_v51, %v6819_v0  ;;  %v3388_v51 = vld [vmem:[%s7313_s17 + $0x50] sm:$0xff] }
 0x87d   : > { %v4909_v36 = vpop.f32.mrf.mxu0  ;;  %3443 = vmatpush1.msra.mxu0 %v3388_v51 }
 0x87e   : > { %v3387_v36 = vld [vmem:[%s7313_s17 + $0x48] sm:$0xff] }
 0x87f   : > { %3444 = vmatprep.subr.mxu0 %v3387_v36  ;;  %v3501_v36 = vld [vmem:[%s7314_s12 + $0x10] sm:$0xff] }
 0x8be   : > { %v3048_v29 = vpop.f32.mrf.mxu0 }
 0x8bf   : > { %v3052_v25 = vadd.f32 %v3048_v29, %v2825_v40  ;;  %v3386_v29 = vld [vmem:[%s7313_s17 + $0x40] sm:$0xff]  ;;  %v3384_v40 = vld [vmem:[%s7313_s17 + $0x30] sm:$0xff] }
 0x8c0   : > { %v4955_v12 = vpop.f32.mrf.mxu0  ;;  %3445 = vmatpush1.msra.mxu0 %v3386_v29  ;;  %v3516_v29 = vld [vmem:[%s7314_s12 + $0x88] sm:$0xff] }
 0x8c1   : > { %v3385_v12 = vld [vmem:[%s7313_s17 + $0x38] sm:$0xff] }
 0x8c2   : > { %3446 = vmatprep.subr.mxu0 %v3385_v12  ;;  %v3500_v12 = vld [vmem:[%s7314_s12 + $0x8] sm:$0xff] }
 0x8c3   : > { %3447 = vmatpush1.msra.mxu0 %v3384_v40  ;;  %v3515_v40 = vld [vmem:[%s7314_s12 + $0x80] sm:$0xff] }
 0x8c8   : > { %v3273_v42 = vpop.f32.mrf.mxu1 }
 0x8c9   : > { %v3277_v5 = vadd.f32 %v3273_v42, %v3052_v25  ;;  %v3383_v25 = vld [vmem:[%s7313_s17 + $0x28] sm:$0xff]  ;;  %v3382_v42 = vld [vmem:[%s7313_s17 + $0x20] sm:$0xff] }
 0x8ca   : > { %v5001_v49 = vpop.f32.mrf.mxu1  ;;  %3448 = vmatprep.subr.mxu0 %v3383_v25  ;;  %v3499_v25 = vld [vmem:[%s7314_s12] sm:$0xff] }
 0x8cb   : > { %v3283_v48 = vadd.f32 %v3984_v44, %v3277_v5  ;;  %v3381_v44 = vld [vmem:[%s7313_s17 + $0x18] sm:$0xff]  ;;  %v3380_v5 = vld [vmem:[%s7313_s17 + $0x10] sm:$0xff]  ;;  %3449 = vmatpush1.msra.mxu0 %v3382_v42  ;;  %v3379_v49 = vld [vmem:[%s7313_s17 + $0x8] sm:$0xff]  ;;  %v3412_v42 = vlaneseq }
 0x8cc   : > { %3450 = vmatprep.subr.mxu0 %v3381_v44 }
 0x8cd   : > { %v3289_v58 = vadd.f32 %v5180_v59, %v3283_v48  ;;  %v3378_v48 = vld [vmem:[%s7313_s17] sm:$0xff]  ;;  %3451 = vmatpush1.msra.mxu0 %v3380_v5  ;;  %v3530_v59 = vld [vmem:[%s7314_s12 + $0xf8] sm:$0xff]  ;;  %v3413_v44 = vshrl.u32 %v3412_v42, 7 }
 0x8ce   : > { %3452 = vmatprep.subr.mxu0 %v3379_v49  ;;  %4328 = vmatprep.subr.mxu1 %v3530_v59  ;;  %v3410_v49 = vld [vmem:[%s7315_s22] sm:$0x3]  ;;  %s5335_s22 = smov [#allocation9]  }
 0x8cf   : > { %3325 = vrot.lane.b32.xlu1 %v3289_v58, %s5333_s25  ;;  %3305 = vrot.lane.b32.xlu0 %v3289_v58, %s5334_s24  ;;  %v3290_v4 = vsel %vm1507_vm1, %v3289_v58, 0.0  ;;  %v3414_v5 = vsub.s32 0, %v3413_v44 }
 0x8d0   : > { %3453 = vmatpush1.msra.mxu0 %v3378_v48  ;;  %v3418_v48 = vsub.s32 1, %v3413_v44 }
 0x8d1   : > { %v3415_v59 = vrot.slane %v3410_v49, %v3414_v5 }
 0x8d3   : > { %3345 = vrot.lane.b32.xlu1 %v3289_v58, %s7282_s26 }
 0x941   : > { %v3326_v18 = vpop.permute.xlu1 %3325  ;;  %v3306_v54 = vpop.permute.xlu0 %3305 }
 0x942   : > { %v3328_v61 = vsel %vm1507_vm1, %v3326_v18, 0.0  ;;  %v3308_v0 = vsel %vm1507_vm1, %v3306_v54, 0.0  ;;  %v3529_v18 = vld [vmem:[%s7314_s12 + $0xf0] sm:$0xff] }
 0x943   : > { %3329 = vadd.xlane.f32.xlu1 %v3328_v61  ;;  %3309 = vadd.xlane.f32.xlu0 %v3308_v0  ;;  %v3513_v54 = vld [vmem:[%s7314_s12 + $0x70] sm:$0xff]  ;;  %v3528_v61 = vld [vmem:[%s7314_s12 + $0xe8] sm:$0xff] }
 0x944   : > { %v3512_v0 = vld [vmem:[%s7314_s12 + $0x68] sm:$0xff] }
 0x945   : > { %v3346_v63 = vpop.permute.xlu1 %3345 }
 0x946   : > { %v3348_v8 = vsel %vm1507_vm1, %v3346_v63, 0.0  ;;  %v3527_v63 = vld [vmem:[%s7314_s12 + $0xe0] sm:$0xff] }
 0x947   : > { %3349 = vadd.xlane.f32.xlu0 %v3348_v8  ;;  %v3511_v8 = vld [vmem:[%s7314_s12 + $0x60] sm:$0xff] }
 0x94b   : > { %3291 = vadd.xlane.f32.xlu0 %v3290_v4  ;;  %v3526_v4 = vld [vmem:[%s7314_s12 + $0xd8] sm:$0xff] }
 0x9cc   : > { %v3330_v24 = vpop.xlane.xlu1 %3329  ;;  %v3310_v62 = vpop.xlane.xlu0 %3309 }
 0x9cd   : > { %v3331_v26 = vmul.f32 0.03125, %v3330_v24  ;;  %v3311_v20 = vmul.f32 0.03125, %v3310_v62  ;;  %v3510_v24 = vld [vmem:[%s7314_s12 + $0x58] sm:$0xff]  ;;  %v3525_v62 = vld [vmem:[%s7314_s12 + $0xd0] sm:$0xff] }
 0x9cf   : > { %v6970_v3 = vsub.f32 %v3289_v58, %v3331_v26  ;;  %v6972_v35 = vsub.f32 %v3289_v58, %v3311_v20  ;;  %v3509_v26 = vld [vmem:[%s7314_s12 + $0x50] sm:$0xff]  ;;  %v3524_v20 = vld [vmem:[%s7314_s12 + $0xc8] sm:$0xff] }
 0x9d0   : > { %v3350_v55 = vpop.xlane.xlu0 %3349 }
 0x9d1   : > { %v3351_v9 = vmul.f32 0.03125, %v3350_v55  ;;  %v3313_v7 = vmul.f32 %v6972_v35, %v6972_v35  ;;  %v3333_v1 = vmul.f32 %v6970_v3, %v6970_v3  ;;  %v3508_v55 = vld [vmem:[%s7314_s12 + $0x48] sm:$0xff] }
 0x9d3   : > { %v6978_v13 = vsub.f32 %v3289_v58, %v3351_v9  ;;  %3315 = vrot.lane.b32.xlu1 %v3313_v7, %s5334_s24  ;;  %3335 = vrot.lane.b32.xlu0 %v3333_v1, %s5333_s25  ;;  %v3523_v9 = vld [vmem:[%s7314_s12 + $0xc0] sm:$0xff]  ;;  %v3522_v1 = vld [vmem:[%s7314_s12 + $0xb8] sm:$0xff] }
 0x9d4   : > { %v3292_v31 = vpop.xlane.xlu0 %3291  ;;  %v3507_v7 = vld [vmem:[%s7314_s12 + $0x40] sm:$0xff] }
 0x9d5   : > { %v3353_v2 = vmul.f32 %v6978_v13, %v6978_v13  ;;  %v3294_v33 = vmul.f32 0.03125, %v3292_v31  ;;  %v3521_v31 = vld [vmem:[%s7314_s12 + $0xb0] sm:$0xff] }
 0x9d7   : > { %3355 = vrot.lane.b32.xlu1 %v3353_v2, %s7282_s26  ;;  %v6985_v39 = vsub.f32 %v3289_v58, %v3294_v33  ;;  %v3514_v58 = vld [vmem:[%s7314_s12 + $0x78] sm:$0xff]  ;;  %v3505_v33 = vld [vmem:[%s7314_s12 + $0x30] sm:$0xff]  ;;  %s3695_s26 = scalar_lea.sflag [#allocation6], %s5525_s9 }
 0x9d8   : > { %4329 = vmatpush3.msra.mxu1 %v3514_v58  ;;  %v3506_v2 = vld [vmem:[%s7314_s12 + $0x38] sm:$0xff]  ;;  %v3419_v58 = vrot.slane %v3410_v49, %v3418_v48 }
 0x9d9   : > { %v3296_v45 = vmul.f32 %v6985_v39, %v6985_v39  ;;  %4330 = vmatprep.subr.mxu1 %v3529_v18 }
 0x9da   : > { %4331 = vmatpush3.msra.mxu1 %v3513_v54 }
 0x9db   : > { %v3297_v41 = vsel %vm1507_vm1, %v3296_v45, 0.0  ;;  %4332 = vmatprep.subr.mxu1 %v3528_v61  ;;  %v3520_v45 = vld [vmem:[%s7314_s12 + $0xa8] sm:$0xff] }
 0x9dc   : > { %4333 = vmatpush3.msra.mxu1 %v3512_v0 }
 0x9dd   : > { %4334 = vmatprep.subr.mxu1 %v3527_v63 }
 0x9de   : > { %4335 = vmatpush3.msra.mxu1 %v3511_v8 }
 0x9df   : > { %4336 = vmatprep.subr.mxu1 %v3526_v4 }
 0x9e0   : > { %4337 = vmatpush3.msra.mxu1 %v3510_v24 }
 0x9e1   : > { %4338 = vmatprep.subr.mxu1 %v3525_v62 }
 0x9e2   : > { %4339 = vmatpush3.msra.mxu1 %v3509_v26  ;;  %v3987_v26 = vld [vmem:[#allocation7 + $0x6] ss:$0 sm:$0xff] }
 0x9e3   : > { %4340 = vmatprep.subr.mxu1 %v3524_v20 }
 0x9e4   : > { %4341 = vmatpush3.msra.mxu1 %v3508_v55 }
 0x9e5   : > { %4342 = vmatprep.subr.mxu1 %v3523_v9 }
 0x9e6   : > { %4343 = vmatpush3.msra.mxu1 %v3507_v7 }
 0x9e7   : > { %4344 = vmatprep.subr.mxu1 %v3522_v1 }
 0x9e8   : > { %4345 = vmatpush3.msra.mxu1 %v3506_v2 }
 0x9e9   : > { %4346 = vmatprep.subr.mxu1 %v3521_v31 }
 0x9ea   : > { %4347 = vmatpush3.msra.mxu1 %v3505_v33 }
 0x9eb   : > { %4348 = vmatprep.subr.mxu1 %v3520_v45 }
 0x9fb   : > { %3298 = vadd.xlane.f32.xlu1 %v3297_v41  ;;  %v3504_v41 = vld [vmem:[%s7314_s12 + $0x28] sm:$0xff] }
 0x9fc   : > { %4349 = vmatpush3.msra.mxu1 %v3504_v41 }
 0x9fd   : > { %4350 = vmatprep.subr.mxu1 %v3519_v47 }
 0xa45   : > { %v3316_v50 = vpop.permute.xlu1 %3315  ;;  %v3336_v53 = vpop.permute.xlu0 %3335 }
 0xa46   : > { %v3318_v38 = vsel %vm1507_vm1, %v3316_v50, 0.0  ;;  %v3338_v22 = vsel %vm1507_vm1, %v3336_v53, 0.0 }
 0xa47   : > { %3319 = vadd.xlane.f32.xlu0 %v3318_v38 }
 0xa49   : > { %v3356_v6 = vpop.permute.xlu1 %3355 }
 0xa4a   : > { %v3358_v16 = vsel %vm1507_vm1, %v3356_v6, 0.0 }
 0xa4b   : > { %3359 = vadd.xlane.f32.xlu1 %v3358_v16  ;;  %3339 = vadd.xlane.f32.xlu0 %v3338_v22 }
 0xa84   : > { %v3299_v27 = vpop.xlane.xlu1 %3298 }
 0xa85   : > { %v3300_v50 = vmul.f32 0.03125, %v3299_v27 }
 0xa87   : > { %v3301_v6 = vadd.f32 1e-05, %v3300_v50 }
 0xad0   : > { %v3320_v38 = vpop.xlane.xlu0 %3319 }
 0xad1   : > { %v3321_v53 = vmul.f32 0.03125, %v3320_v38 }
 0xad3   : > { %v3322_v16 = vadd.f32 1e-05, %v3321_v53 }
 0xad4   : > { %v3360_v22 = vpop.xlane.xlu1 %3359  ;;  %v3340_v28 = vpop.xlane.xlu0 %3339 }
 0xad5   : > { %5164 = vrsqrt.f32 %v3322_v16  ;;  %v3361_v37 = vmul.f32 0.03125, %v3360_v22  ;;  %v3341_v56 = vmul.f32 0.03125, %v3340_v28 }
 0xad6   : > { %5166 = vrsqrt.f32 %v3301_v6 }
 0xad7   : > { %v3362_v23 = vadd.f32 1e-05, %v3361_v37  ;;  %v3342_v11 = vadd.f32 1e-05, %v3341_v56 }
 0xad9   : > { %5168 = vrsqrt.f32 %v3362_v23 }
 0xada   : > { %5170 = vrsqrt.f32 %v3342_v11 }
 0xae2   : > { %v5165_v15 = vpop.eup %5164 }
 0xae3   : > { %v5167_v32 = vpop.eup %5166  ;;  %v3324_v10 = vmul.f32 %v5165_v15, %v6972_v35  ;;  %v3503_v35 = vld [vmem:[%s7314_s12 + $0x20] sm:$0xff] }
 0xae4   : > { %v3303_v19 = vmul.f32 %v5167_v32, %v6985_v39  ;;  %4351 = vmatpush3.msra.mxu1 %v3503_v35  ;;  %v3517_v39 = vld [vmem:[%s7314_s12 + $0x90] sm:$0xff] }
 0xae6   : > { %v5169_v57 = vpop.eup %5168  ;;  %v3365_v14 = vsel %vm1507_vm1, %v3303_v19, %v3324_v10 }
 0xae7   : > { %v5171_v17 = vpop.eup %5170  ;;  %v3364_v46 = vmul.f32 %v5169_v57, %v6978_v13  ;;  %v3502_v13 = vld [vmem:[%s7314_s12 + $0x18] sm:$0xff] }
 0xae8   : > { %v3344_v52 = vmul.f32 %v5171_v17, %v6970_v3  ;;  %v3518_v3 = vld [vmem:[%s7314_s12 + $0x98] sm:$0xff] }
 0xae9   : > { %4352 = vmatprep.subr.mxu1 %v3518_v3 }
 0xaea   : > { %v3366_v21 = vsel %vm1512_vm6, %v3365_v14, %v3344_v52  ;;  %4353 = vmatpush3.msra.mxu1 %v3502_v13 }
 0xaeb   : > { %v3367_v60 = vsel %vm1517_vm5, %v3366_v21, %v3364_v46  ;;  %4354 = vmatprep.subr.mxu1 %v3517_v39 }
 0xaec   : > { %v3372_v34 = vmul.f32 %v3985_v30, %v3367_v60  ;;  %4355 = vmatpush3.msra.mxu1 %v3501_v36 }
 0xaed   : > { %4356 = vmatprep.subr.mxu1 %v3516_v29 }
 0xaee   : > { %v3377_v51 = vadd.f32 %v3986_v43, %v3372_v34  ;;  %4357 = vmatpush3.msra.mxu1 %v3500_v12 }
 0xaef   : > { %4358 = vmatprep.subr.mxu1 %v3515_v40 }
 0xaf0   : > { %3487 = vmatmul.mubr.f32.vlgmr.msra.gmra.mxu0 %v3377_v51  ;;  %4359 = vmatpush3.msra.mxu1 %v3499_v25 }
 0xbb0   : > { %v3488_v18 = vpop.f32.mrf.mxu0 }
 0xbb1   : > { %v3489_v54 = vadd.f32 %v3488_v18, %v3415_v59 }
 0xbb2   : > { %v3490_v61 = vpop.f32.mrf.mxu0 }
 0xbb3   : > { %v3491_v0 = vadd.f32 %v3490_v61, %v3419_v58  ;;  %v3495_v63 = vmul.f32 0.05, %v3489_v54  ;;  %vm3493_vm10 = vcmp.ge.f32.partialorder %v3489_v54, 0.0 }
 0xbb5   : > { %v3496_v8 = vmul.f32 0.05, %v3491_v0  ;;  %vm3494_vm11 = vcmp.ge.f32.partialorder %v3491_v0, 0.0  ;;  %v3497_v24 = vsel %vm3493_vm10, %v3489_v54, %v3495_v63  ;;  %v3988_v54 = vld [vmem:[#allocation7 + $0x4] ss:$0 sm:$0xff] }
 0xbb7   : > { %v3498_v4 = vsel %vm3494_vm11, %v3491_v0, %v3496_v8  ;;  %v3989_v0 = vld [vmem:[#allocation7 + $0x5] ss:$0 sm:$0xff] }
 0xbb8   : > { %3599 = vmatprep.mubr.f32.mxu1 %v3498_v4 }
 0xbb9   : > { %3600 = vmatmul.mubr.f32.vlgmr.msra.gmra.mxu1 %v3497_v24 }
 0xc79   : > { %v4360_v62 = vpop.f32.mrf.mxu1 }
 0xc7b   : > { %v4361_v20 = vpop.f32.mrf.mxu1 }
 0xc7c   : > { %v4362_v55 = vadd.f32 %v4361_v20, %v4360_v62 }
 0xc7e   : > { %v3602_v9 = vadd.f32 %v4362_v55, %v3987_v26 }
 0xc80   : > { %v3605_v7 = vadd.f32 %v3602_v9, %v3377_v51 }
 0xc82   : > { %3640 = vrot.lane.b32.xlu1 %v3605_v7, %s5333_s25  ;;  %3620 = vrot.lane.b32.xlu0 %v3605_v7, %s5334_s24  ;;  %v3606_v1 = vsel %vm1507_vm1, %v3605_v7, 0.0 }
 0xca1   : > { %3607 = vadd.xlane.f32.xlu0 %v3606_v1 }
 0xcf4   : > { %v3621_v2 = vpop.permute.xlu0 %3620  ;;  %v3641_v33 = vpop.permute.xlu1 %3640 }
 0xcf5   : > { %v3623_v31 = vsel %vm1507_vm1, %v3621_v2, 0.0  ;;  %v3643_v45 = vsel %vm1507_vm1, %v3641_v33, 0.0 }
 0xcf6   : > { %3624 = vadd.xlane.f32.xlu1 %v3623_v31 }
 0xcfa   : > { %3644 = vadd.xlane.f32.xlu1 %v3643_v45 }
 0xd0b   : > { %3660 = vrot.lane.b32.xlu1 %v3605_v7, %s7316_s18 }
 0xd2a   : > { %v3608_v41 = vpop.xlane.xlu0 %3607 }
 0xd2b   : > { %v3609_v47 = vmul.f32 0.03125, %v3608_v41 }
 0xd2d   : > { %v3610_v27 = vsub.f32 %v3605_v7, %v3609_v47 }
 0xd2f   : > { %v3611_v50 = vmul.f32 %v3610_v27, %v3610_v27 }
 0xd31   : > { %v3612_v38 = vsel %vm1507_vm1, %v3611_v50, 0.0 }
 0xd32   : > { %3613 = vadd.xlane.f32.xlu1 %v3612_v38 }
 0xd7f   : > { %v3625_v53 = vpop.xlane.xlu1 %3624 }
 0xd80   : > { %v3626_v6 = vmul.f32 0.03125, %v3625_v53 }
 0xd82   : > { %v3627_v16 = vsub.f32 %v3605_v7, %v3626_v6 }
 0xd83   : > { %v3645_v22 = vpop.xlane.xlu1 %3644 }
 0xd84   : > { %v3628_v28 = vmul.f32 %v3627_v16, %v3627_v16  ;;  %v3646_v37 = vmul.f32 0.03125, %v3645_v22 }
 0xd86   : > { %v3647_v56 = vsub.f32 %v3605_v7, %v3646_v37  ;;  %3630 = vrot.lane.b32.xlu1 %v3628_v28, %s5334_s24  ;;  %s7317_s24 = sshll.u32 %s5525_s9, 3 }
 0xd87   : > { %v3661_v11 = vpop.permute.xlu1 %3660  ;;  %s572_s13 = scalar_lea.vmem [#allocation9], %s7317_s24 }
 0xd88   : > { %v3648_v23 = vmul.f32 %v3647_v56, %v3647_v56  ;;  %v3663_v57 = vsel %vm1507_vm1, %v3661_v11, 0.0  ;;  %s3709_s29 = sshll.u32 %s572_s13, 4  ;;  %s3710_s29 = int_to_ptr.vmem [resolvable:$true] %s3709_s29 }
 0xd89   : > { %s5235_s28 = scalar_lea.vmem %s3710_s29, 128 }
 0xd8a   : > { %3650 = vrot.lane.b32.xlu0 %v3648_v23, %s5333_s25  ;;  %s3991_s25 = sshll.u32 %s5311_s21, 7  ;;  %p5236_p1 = scmp.ne.s32.totalorder %s3710_s29, %s5235_s28 }
 0xd8b   : > { %s3707_s30 = scalar_lea.hbm %s7318_s14, %s3991_s25 }
 0xd8c   : > { %p5237_p13 = pnand %p5236_p1, %p5502_p0 }
 0xd8e   : > { %p5238_p11 = pneg %p5237_p13 }
 0xdbb   : > { %v3614_v15 = vpop.xlane.xlu1 %3613 }
 0xdbc   : > { %v3615_v17 = vmul.f32 0.03125, %v3614_v15 }
 0xdbe   : > { %v3616_v46 = vadd.f32 1e-05, %v3615_v17 }
 0xdc0   : > { %5172 = vrsqrt.f32 %v3616_v46 }
 0xdcd   : > { %v5173_v51 = vpop.eup %5172 }
 0xdce   : > { %v3618_v3 = vmul.f32 %v5173_v51, %v3610_v27 }
 0xdf8   : > { %v3631_v32 = vpop.permute.xlu1 %3630 }
 0xdf9   : > { %v3633_v10 = vsel %vm1507_vm1, %v3631_v32, 0.0 }
 0xdfa   : > { %3634 = vadd.xlane.f32.xlu0 %v3633_v10 }
 0xdfc   : > { %v3651_v19 = vpop.permute.xlu0 %3650 }
 0xdfd   : > { %v3653_v36 = vsel %vm1507_vm1, %v3651_v19, 0.0 }
 0xdfe   : > { %3664 = vadd.xlane.f32.xlu0 %v3663_v57 }
 0xe83   : > { %v3635_v52 = vpop.xlane.xlu0 %3634 }
 0xe84   : > { %v3636_v30 = vmul.f32 0.03125, %v3635_v52 }
 0xe86   : > { %v3637_v14 = vadd.f32 1e-05, %v3636_v30 }
 0xe87   : > { %v3665_v21 = vpop.xlane.xlu0 %3664 }
 0xe88   : > { %5174 = vrsqrt.f32 %v3637_v14  ;;  %v3666_v43 = vmul.f32 0.03125, %v3665_v21 }
 0xe8a   : > { %v3667_v60 = vsub.f32 %v3605_v7, %v3666_v43 }
 0xe8c   : > { %v3668_v34 = vmul.f32 %v3667_v60, %v3667_v60 }
 0xe8e   : > { %3670 = vrot.lane.b32.xlu1 %v3668_v34, %s7316_s18  ;;  %s5239_s18 = sshll.u32 %s5335_s22, 4  ;;  %s5240_s18 = int_to_ptr.vmem [resolvable:$false] %s5239_s18 }
 0xe8f   : > { %s5241_s21 = scalar_lea.vmem %s5240_s18, 256  ;;  %p5242_p2 = scmp.lt.s32.totalorder %s3710_s29, %s5240_s18 }
 0xe90   : > { %p5243_p12 = scmp.lt.s32.totalorder %s5241_s21, %s5235_s28 }
 0xe92   : > { %p5244_p3 = por %p5243_p12, %p5242_p2 }
 0xe94   : > { %p5245_p5 = pnand %p5244_p3, %p5238_p11 }
 0xe95   : > { %v5175_v35 = vpop.eup %5174 }
 0xe96   : > { %v3639_v13 = vmul.f32 %v5175_v35, %v3627_v16 }
 0xe98   : > { %v3680_v39 = vsel %vm1507_vm1, %v3618_v3, %v3639_v13 }
 0xeb2   : > { %3654 = vadd.xlane.f32.xlu1 %v3653_v36 }
 0xf00   : > { %v3671_v29 = vpop.permute.xlu1 %3670 }
 0xf01   : > { %v3673_v12 = vsel %vm1507_vm1, %v3671_v29, 0.0 }
 0xf02   : > { %3674 = vadd.xlane.f32.xlu1 %v3673_v12 }
 0xf3b   : > { %v3655_v40 = vpop.xlane.xlu1 %3654 }
 0xf3c   : > { %v3656_v25 = vmul.f32 0.03125, %v3655_v40 }
 0xf3e   : > { %v3657_v42 = vadd.f32 1e-05, %v3656_v25 }
 0xf40   : > { %5176 = vrsqrt.f32 %v3657_v42 }
 0xf4d   : > { %v5177_v48 = vpop.eup %5176 }
 0xf4e   : > { %v3659_v59 = vmul.f32 %v5177_v48, %v3647_v56 }
 0xf50   : > { %v3681_v61 = vsel %vm1512_vm6, %v3680_v39, %v3659_v59 }
 0xf8b   : > { %v3675_v44 = vpop.xlane.xlu1 %3674 }
 0xf8c   : > { %v3676_v5 = vmul.f32 0.03125, %v3675_v44 }
 0xf8e   : > { %v3677_v49 = vadd.f32 1e-05, %v3676_v5 }
 0xf90   : > { %5178 = vrsqrt.f32 %v3677_v49 }
 0xf9d   : > { %v5179_v58 = vpop.eup %5178 }
 0xf9e   : > { %v3679_v18 = vmul.f32 %v5179_v58, %v3667_v60 }
 0xfa0   : > { %v3682_v63 = vsel %vm1517_vm5, %v3681_v61, %v3679_v18 }
 0xfa1   : > { %v3687_v8 = vmul.f32 %v3988_v54, %v3682_v63 }
 0xfa3   : > { %v3692_v4 = vadd.f32 %v3989_v0, %v3687_v8 }
 0xfa5   : > { %3693 = vst [vmem:[%s572_s13] sm:$0xff] %v3692_v4 }
 0xfa6   : > { %5248 = shalt.err (!%p5245_p5)
}
 0xfa7   : > { %s5249_s24 = scalar_lea.hbm %s3707_s30, 128  ;;  %s5253_s13 = scalar_lea.hbm %s7318_s14, 256 }
 0xfa8   : > { %p5250_p7 = scmp.ne.s32.totalorder %s3707_s30, %s5249_s24  ;;  %p5254_p10 = scmp.lt.s32.totalorder %s3707_s30, %s7318_s14 }
 0xfa9   : > { %p5255_p9 = scmp.lt.s32.totalorder %s5253_s13, %s5249_s24 }
 0xfaa   : > { %p5251_p6 = pnand %p5250_p7, %p5502_p0 }
 0xfab   : > { %p5256_p8 = por %p5255_p9, %p5254_p10 }
 0xfac   : > { %p5252_p4 = pneg %p5251_p6 }
 0xfae   : > { %p5257_p1 = pnand %p5256_p8, %p5252_p4 }
 0xfb0   : > { %5260 = shalt.err (!%p5257_p1)
}
 0xfb1   : > { %5008 = dma.vmem_to_hbm [thread:$0]  (%p5502_p0), %s3710_s29, 128, %s3707_s30, %s3695_s26  }
 0xfb2 PF: > { %s7319_s28 = sld [smem:[#allocation13_spill]]  ;;  %p7322_p11 = scmp.ge.s32.totalorder %s5319_s23, 2 }
 0xfb3   : > { %s7320_s22 = sld [smem:[#allocation15_spill]] }
 0xfb8   : > { %s3721_s18 = sand.u32 1, %s7319_s28  }
 0xfb9   : > { %p7321_p13 = scmp.ne.s32.totalorder %s7320_s22, 0  ;;  %s3722_s21 = scalar_lea.sflag [#allocation6], %s3721_s18 }
 0xfbb   : > { %p5019_p2 = pnand %p7322_p11, %p7321_p13 }
 0xfbd   : > { %p5020_p12 = pneg %p5019_p2 }
 0xfbf   : > { %5294 = dma.done.wait (%p5020_p12), %s3722_s21, 128  }
 0xfc0   : > { %5296 = vsyncadd (%p5020_p12), %s3722_s21, 4294967168  ;;  %s32_s23 = sadd.s32 1, %s5319_s23   ;;  %s7323_s21 = sld [smem:[#allocation14_spill]] }
 0xfc1   : > { %p29_p3 = scmp.ge.s32.totalorder %s32_s23, 4   ;;  %s7324_s22 = sld [smem:[#allocation16_spill]] }
 0xfc2   : > { %s7325_s18 = smov %s5303_s19  ;;  %s7326_s19 = smov %s5307_s20 }
 0xfc3   : > { %s7327_s20 = smov %s5508_s16  ;;  %31 = sbr.rel (!%p29_p3) target bundleno = 15 (0xf), region = 154 }
 0xfc8   :  { %3727 = vsyncpa [#allocation5], 1 }
 0xfc9   :  { %3729 = vsyncpa [#allocation5 + $0x1], 1 }
 0xfca   :  { %3730 = vsyncpa [#allocation8], 1 }
 0xfcb   :  { %3731 = vsyncpa [#allocation6], 1 }
 0xfcc   :  { %3733 = vsyncpa [#allocation6 + $0x1], 1 }

</bundles_post_ra>
